<compile_context>
chip_gen: v5e
topology: v5e:2x2
jax: 0.10.0
libtpu: 0.0.40
codegen_flags: <defaults>
</compile_context>

<pallas_src>
import functools

import jax
import jax.numpy as jnp
from jax.experimental import pallas as pl
from jax.experimental.pallas import tpu as pltpu


# ---------------------------------------------------------------------------
# Tunables (review-driven).
# ---------------------------------------------------------------------------
_MAX_SLAB_EDGE_TILE = 8192            # 4096-8192 amortizes the ~0.35us step overhead
_SLAB_VMEM_BUDGET = 8 * 1024 * 1024   # 2 inputs x 2 pipeline buffers per step (fits v5e 16 MiB default)
_FUSED_VMEM_BUDGET = 4 * 1024 * 1024  # one-hot + gathered in-kernel temporaries per step
_FUSED_MAX_NODES = 256                # one-hot MXU gather only pays off for small node tables
_FUSED_MAX_DPAD = 512                 # keep resident tables / gathered tiles small


def _round_up(n, m):
    return ((n + m - 1) // m) * m


def _next_pow2(n):
    return 1 if n <= 1 else 1 << (n - 1).bit_length()


# ---------------------------------------------------------------------------
# Kernel 1: pre-gathered, lane-packed feature slabs  ->  sigmoid(dot) per edge.
# ---------------------------------------------------------------------------
def _slab_kernel(xs_ref, xt_ref, out_ref, *, d, pack):
    # xs_ref / xt_ref: (rows_tile, d*pack) with `pack` edges per 128-lane row.
    prod = (xs_ref[...] * xt_ref[...]).astype(jnp.float32)
    if pack > 1:
        # Constant block-selector: sel[l, g] = 1 iff lane l belongs to group g.
        # Group-reduce on the (otherwise idle) MXU instead of jnp.sum(axis=-1).
        lane = jax.lax.broadcasted_iota(jnp.int32, (d * pack, pack), 0)
        grp = jax.lax.broadcasted_iota(jnp.int32, (d * pack, pack), 1)
        sel = ((lane >= grp * d) & (lane < (grp + 1) * d)).astype(jnp.float32)
        s = jnp.dot(prod, sel, preferred_element_type=jnp.float32)   # (rows, pack)
    else:
        s = jnp.sum(prod, axis=-1, keepdims=True)                    # (rows, 1)
    out_ref[...] = jax.nn.sigmoid(s)


@functools.partial(jax.jit, static_argnames=("rows_tile", "d", "pack"))
def _slab_pallas(xs, xt, rows_tile, d, pack):
    rows, width = xs.shape
    grid = (rows // rows_tile,)
    edges = rows * pack
    kernel = functools.partial(_slab_kernel, d=d, pack=pack)
    return pl.pallas_call(
        kernel,
        grid_spec=pltpu.PrefetchScalarGridSpec(
            num_scalar_prefetch=0,
            grid=grid,
            in_specs=[
                pl.BlockSpec((rows_tile, width), lambda i: (i, 0)),
                pl.BlockSpec((rows_tile, width), lambda i: (i, 0)),
            ],
            out_specs=pl.BlockSpec((rows_tile, pack), lambda i: (i, 0)),
        ),
        out_shape=jax.ShapeDtypeStruct((rows, pack), jnp.float32),
        compiler_params=pltpu.CompilerParams(
            dimension_semantics=("parallel",)),  # v7x: shard edge tiles over 2 TCs
        cost_estimate=pl.CostEstimate(
            flops=2 * edges * d,
            transcendentals=edges,
            bytes_accessed=2 * rows * width * 4 + rows * pack * 4),
    )(xs, xt)


# ---------------------------------------------------------------------------
# Kernel 2: fused gather — VMEM-resident node tables + streamed edge indices.
# ---------------------------------------------------------------------------
def _fused_gather_kernel(src_ref, tgt_ref, xs_tab_ref, xt_tab_ref, out_ref):
    # src_ref / tgt_ref: (e_tile, 1) int32 edge indices (VMEM, vector form so the
    # one-hot compare is VPU work; no SMEM scalar loop).
    # xs_tab_ref / xt_tab_ref: full (n_pad, d_pad) node tables, resident in VMEM.
    e = src_ref.shape[0]
    n_s = xs_tab_ref.shape[0]
    n_t = xt_tab_ref.shape[0]
    src = src_ref[...]
    tgt = tgt_ref[...]
    oh_s = (jax.lax.broadcasted_iota(jnp.int32, (e, n_s), 1) == src)
    oh_t = (jax.lax.broadcasted_iota(jnp.int32, (e, n_t), 1) == tgt)
    # One-hot @ table: MXU row gather (exactly one 1.0 per row -> selects a row).
    xs = jnp.dot(oh_s.astype(jnp.float32), xs_tab_ref[...].astype(jnp.float32),
                 preferred_element_type=jnp.float32)                  # (e, d_pad)
    xt = jnp.dot(oh_t.astype(jnp.float32), xt_tab_ref[...].astype(jnp.float32),
                 preferred_element_type=jnp.float32)
    s = jnp.sum(xs * xt, axis=-1, keepdims=True)                      # (e, 1)
    out_ref[...] = jax.nn.sigmoid(s)


@functools.partial(jax.jit, static_argnames=("e_tile",))
def _fused_pallas(src2d, tgt2d, xs_tab, xt_tab, e_tile):
    padded_e = src2d.shape[0]
    n_s, d_pad = xs_tab.shape
    n_t, _ = xt_tab.shape
    grid = (padded_e // e_tile,)
    return pl.pallas_call(
        _fused_gather_kernel,
        grid_spec=pltpu.PrefetchScalarGridSpec(
            num_scalar_prefetch=0,
            grid=grid,
            in_specs=[
                pl.BlockSpec((e_tile, 1), lambda i: (i, 0)),
                pl.BlockSpec((e_tile, 1), lambda i: (i, 0)),
                # Constant block index -> tables are DMAed once and stay resident.
                pl.BlockSpec((n_s, d_pad), lambda i: (0, 0)),
                pl.BlockSpec((n_t, d_pad), lambda i: (0, 0)),
            ],
            out_specs=pl.BlockSpec((e_tile, 1), lambda i: (i, 0)),
        ),
        out_shape=jax.ShapeDtypeStruct((padded_e, 1), jnp.float32),
        compiler_params=pltpu.CompilerParams(
            dimension_semantics=("parallel",)),
        cost_estimate=pl.CostEstimate(
            flops=2 * padded_e * (n_s + n_t + 1) * d_pad,
            transcendentals=padded_e,
            bytes_accessed=(3 * padded_e * 4 + (n_s + n_t) * d_pad * 4)),
    )(src2d, tgt2d, xs_tab, xt_tab)


# ---------------------------------------------------------------------------
# Wrappers.
# ---------------------------------------------------------------------------
def _pad_indices(idx, padded_e):
    pad = padded_e - idx.shape[0]
    if pad:
        idx = jnp.concatenate([idx, jnp.zeros((pad,), jnp.int32)])  # row 0 is valid
    return idx


def _decode_slab(x_source, x_target, src_idx, tgt_idx, num_edges):
    d = x_source.shape[1]
    # Pack `pack` edges into each 128-lane vreg row when D divides 128.
    pack = (128 // d) if (d < 128 and 128 % d == 0) else 1
    align = 8 * pack                       # keep rows_tile a sublane multiple
    # Big tiles amortize per-step overhead; clamp so 2 inputs x 2 pipeline
    # buffers stay within every generation's default scoped-VMEM limit.
    bytes_per_edge = 2 * 2 * d * 4
    e_tile = min(_MAX_SLAB_EDGE_TILE,
                 max(align, (_SLAB_VMEM_BUDGET // bytes_per_edge) // align * align))
    e_tile = min(e_tile, _round_up(num_edges, align))
    # Bucket the grid length to powers of two -> bounded number of compiles.
    n_tiles = _next_pow2(pl.cdiv(num_edges, e_tile))
    padded_e = n_tiles * e_tile
    src_p = _pad_indices(src_idx, padded_e)
    tgt_p = _pad_indices(tgt_idx, padded_e)

    # Wrapper-side row gather (general fallback for large node tables).
    # TODO(synk): pl.ANY + pltpu.make_async_copy DMA-ring gather for huge
    # tables with wide rows, to avoid materializing these slabs in HBM.
    xs = jnp.take(x_source, src_p, axis=0).astype(jnp.float32)
    xt = jnp.take(x_target, tgt_p, axis=0).astype(jnp.float32)
    if pack > 1:
        # Row-major contiguous -> free reshape: 4 edges per dense 128-lane row.
        xs = xs.reshape(padded_e // pack, d * pack)
        xt = xt.reshape(padded_e // pack, d * pack)

    out = _slab_pallas(xs, xt, e_tile // pack, d, pack)
    # (rows, pack) -> (padded_E,) is a layout-free reshape; trim the padding.
    return out.reshape(-1)[:num_edges]


def _decode_fused(x_source, x_target, src_idx, tgt_idx, num_edges):
    n_s, d = x_source.shape
    n_t = x_target.shape[0]
    d_pad = _round_up(d, 128)
    ns_pad = _round_up(n_s, 8)
    nt_pad = _round_up(n_t, 8)
    # Zero-pad tables to native (8,128) tiles; padded rows/lanes contribute 0.
    xs_tab = jnp.zeros((ns_pad, d_pad), jnp.float32).at[:n_s, :d].set(
        x_source.astype(jnp.float32))
    xt_tab = jnp.zeros((nt_pad, d_pad), jnp.float32).at[:n_t, :d].set(
        x_target.astype(jnp.float32))

    # Edge tile: large enough to amortize per-step overhead, small enough that
    # the in-kernel one-hot / gathered temporaries stay within a few MiB.
    bytes_per_edge = 4 * (ns_pad + nt_pad + 3 * d_pad)
    e_tile = max(8, min(4096, (_FUSED_VMEM_BUDGET // bytes_per_edge) // 8 * 8))
    e_tile = min(e_tile, _round_up(num_edges, 8))
    n_tiles = _next_pow2(pl.cdiv(num_edges, e_tile))
    padded_e = n_tiles * e_tile
    src2d = _pad_indices(src_idx, padded_e).reshape(padded_e, 1)
    tgt2d = _pad_indices(tgt_idx, padded_e).reshape(padded_e, 1)

    out = _fused_pallas(src2d, tgt2d, xs_tab, xt_tab, e_tile)
    return out.reshape(-1)[:num_edges]


def inner_product_decode(x_source, x_target, edge_index, *, force_path=None):
    """sigmoid(<x_source[src_i], x_target[tgt_i]>) for every edge of one type."""
    src_idx = jnp.asarray(edge_index[0], dtype=jnp.int32)
    tgt_idx = jnp.asarray(edge_index[1], dtype=jnp.int32)
    num_edges = int(src_idx.shape[0])
    if num_edges == 0:                      # skip zero-size pallas_call launches
        return jnp.zeros((0,), dtype=jnp.float32)

    n_s, d = x_source.shape
    n_t, d_t = x_target.shape
    assert d == d_t, (d, d_t)

    fused_ok = (max(_round_up(n_s, 8), _round_up(n_t, 8)) <= _FUSED_MAX_NODES
                and _round_up(d, 128) <= _FUSED_MAX_DPAD)
    path = force_path if force_path is not None else ("fused" if fused_ok else "slab")
    if path == "fused":
        return _decode_fused(x_source, x_target, src_idx, tgt_idx, num_edges)
    if path == "slab":
        return _decode_slab(x_source, x_target, src_idx, tgt_idx, num_edges)
    raise ValueError(f"unknown path {path!r}")


class InnerProductDecoder:
    """JAX/Pallas port of the PyTorch InnerProductDecoder (no parameters)."""

    def __init__(self, supervision_types):
        self.supervision_types = supervision_types

    def __call__(self, x: dict, edge_label_index: dict) -> dict:
        # TODO(synk): batch all edge types that share a feature dim into one
        # pallas_call (concatenate padded edge ranges) to amortize the per-call
        # launch overhead for tiny types.
        pred_dict = {}
        for edge_type in self.supervision_types:   # static metadata loop (glue)
            edge_index = edge_label_index[edge_type]
            source_type, _, target_type = edge_type
            pred_dict[edge_type] = inner_product_decode(
                x[source_type], x[target_type], edge_index)
        return pred_dict


def _reference(x, edge_label_index, supervision_types):
    out = {}
    for et in supervision_types:
        s, _, t = et
        ei = edge_label_index[et]
        ns = x[s][ei[0]]
        nt = x[t][ei[1]]
        out[et] = jax.nn.sigmoid(jnp.sum(ns * nt, axis=1))
    return out


if __name__ == "__main__":
    key = jax.random.PRNGKey(0)
    keys = jax.random.split(key, 12)
    D = 32
    n_user, n_item = 12, 10

    # Test features are rounded to bf16-representable f32 values so the exact
    # f32 reference matches the kernels tightly no matter how the MXU
    # decomposes f32 matmuls (one-hot gather / block-selector reduce) into
    # passes.  Arbitrary f32 inputs are still handled; only the last few
    # mantissa bits of the MXU reduce could then differ.
    def bf16_snapped_normal(k, shape):
        v = jax.random.normal(k, shape, dtype=jnp.float32)
        return v.astype(jnp.bfloat16).astype(jnp.float32)

    x = {
        "user": bf16_snapped_normal(keys[0], (n_user, D)),
        "item": bf16_snapped_normal(keys[1], (n_item, D)),
    }

    supervision_types = [
        ("user", "rates", "item"),      # 1000 edges
        ("user", "follows", "user"),    # 16 edges (tiny tile)
        ("item", "rev_rates", "user"),  # 0 edges: skipped pallas_call
    ]
    n_rates, n_follows = 1000, 16
    edge_label_index = {
        ("user", "rates", "item"): jnp.stack([
            jax.random.randint(keys[2], (n_rates,), 0, n_user, dtype=jnp.int32),
            jax.random.randint(keys[3], (n_rates,), 0, n_item, dtype=jnp.int32),
        ]),
        ("user", "follows", "user"): jnp.stack([
            jax.random.randint(keys[4], (n_follows,), 0, n_user, dtype=jnp.int32),
            jax.random.randint(keys[5], (n_follows,), 0, n_user, dtype=jnp.int32),
        ]),
        ("item", "rev_rates", "user"): jnp.zeros((2, 0), dtype=jnp.int32),
    }

    decoder = InnerProductDecoder(supervision_types)
    preds = decoder(x, edge_label_index)     # small tables -> fused-gather path
    preds = jax.tree_util.tree_map(jax.block_until_ready, preds)

    ref = _reference(x, edge_label_index, supervision_types)
    expected_counts = {
        ("user", "rates", "item"): n_rates,
        ("user", "follows", "user"): n_follows,
        ("item", "rev_rates", "user"): 0,
    }
    for et in supervision_types:
        assert preds[et].shape == (expected_counts[et],), preds[et].shape
        assert preds[et].dtype == jnp.float32
        assert jnp.allclose(preds[et], ref[et], atol=1e-4, rtol=1e-4), et

    # Also exercise the general slab path (wrapper gather + lane packing, D=32).
    et = ("user", "rates", "item")
    pred_slab = jax.block_until_ready(inner_product_decode(
        x["user"], x["item"], edge_label_index[et], force_path="slab"))
    assert pred_slab.shape == (n_rates,)
    assert jnp.allclose(pred_slab, ref[et], atol=1e-4, rtol=1e-4)

    # And the pack==1 / plain-sum branch (feature dim already 128 lanes wide).
    xa = bf16_snapped_normal(keys[6], (9, 128))
    xb = bf16_snapped_normal(keys[7], (7, 128))
    ei128 = jnp.stack([
        jax.random.randint(keys[8], (37,), 0, 9, dtype=jnp.int32),
        jax.random.randint(keys[9], (37,), 0, 7, dtype=jnp.int32),
    ])
    ref128 = jax.nn.sigmoid(jnp.sum(xa[ei128[0]] * xb[ei128[1]], axis=1))
    for path in ("fused", "slab"):
        p = jax.block_until_ready(
            inner_product_decode(xa, xb, ei128, force_path=path))
        assert p.shape == (37,)
        assert jnp.allclose(p, ref128, atol=1e-4, rtol=1e-4), path

    print("KERNEL_OK")
</pallas_src>

<mosaic_0001>
module attributes {stable_mosaic.version = 11 : i64} {
  func.func @_fused_gather_kernel(%arg0: i32, %arg1: memref<1000x1xi32, #tpu.memory_space<vmem>>, %arg2: memref<1000x1xi32, #tpu.memory_space<vmem>>, %arg3: memref<16x128xf32, #tpu.memory_space<vmem>>, %arg4: memref<16x128xf32, #tpu.memory_space<vmem>>, %arg5: memref<1000x1xf32, #tpu.memory_space<vmem>>) attributes {dimension_semantics = [#tpu.dimension_semantics<parallel>], iteration_bounds = array<i64: 1>, scalar_prefetch = 0 : i64, scratch_operands = 0 : i64, tpu.core_type = #tpu.core_type<tc>, window_params = [{transform_indices = @transform_0, window_bounds = array<i64: 1000, 1>}, {transform_indices = @transform_1, window_bounds = array<i64: 1000, 1>}, {pipeline_mode = #tpu.pipeline_mode<synchronous>, transform_indices = @transform_2, window_bounds = array<i64: 16, 128>}, {pipeline_mode = #tpu.pipeline_mode<synchronous>, transform_indices = @transform_3, window_bounds = array<i64: 16, 128>}, {transform_indices = @transform_4, window_bounds = array<i64: 1000, 1>}]} {
    %c0 = arith.constant 0 : index
    %c0_0 = arith.constant 0 : index
    %0 = vector.load %arg1[%c0, %c0_0] : memref<1000x1xi32, #tpu.memory_space<vmem>>, vector<1000x1xi32>
    %c0_1 = arith.constant 0 : index
    %c0_2 = arith.constant 0 : index
    %1 = vector.load %arg2[%c0_1, %c0_2] : memref<1000x1xi32, #tpu.memory_space<vmem>>, vector<1000x1xi32>
    %2 = tpu.iota {dimensions = array<i32: 1>} : vector<1000x16xi32>
    %3 = vector.broadcast %0 : vector<1000x1xi32> to vector<1000x16xi32>
    %4 = arith.cmpi eq, %2, %3 : vector<1000x16xi32>
    %5 = tpu.iota {dimensions = array<i32: 1>} : vector<1000x16xi32>
    %6 = vector.broadcast %1 : vector<1000x1xi32> to vector<1000x16xi32>
    %7 = arith.cmpi eq, %5, %6 : vector<1000x16xi32>
    %8 = arith.extui %4 : vector<1000x16xi1> to vector<1000x16xi32>
    %9 = arith.sitofp %8 : vector<1000x16xi32> to vector<1000x16xf32>
    %c0_3 = arith.constant 0 : index
    %c0_4 = arith.constant 0 : index
    %10 = vector.load %arg3[%c0_3, %c0_4] : memref<16x128xf32, #tpu.memory_space<vmem>>, vector<16x128xf32>
    %cst = arith.constant dense<0.000000e+00> : vector<1000x128xf32>
    %11 = tpu.matmul %9, %10, %cst {dimension_numbers = #tpu.dot_dimension_numbers<[1], [0], [0], [1], [0, 0, 1, 1], [], []>} : vector<1000x16xf32>, vector<16x128xf32>, vector<1000x128xf32> -> vector<1000x128xf32>
    %12 = arith.extui %7 : vector<1000x16xi1> to vector<1000x16xi32>
    %13 = arith.sitofp %12 : vector<1000x16xi32> to vector<1000x16xf32>
    %c0_5 = arith.constant 0 : index
    %c0_6 = arith.constant 0 : index
    %14 = vector.load %arg4[%c0_5, %c0_6] : memref<16x128xf32, #tpu.memory_space<vmem>>, vector<16x128xf32>
    %cst_7 = arith.constant dense<0.000000e+00> : vector<1000x128xf32>
    %15 = tpu.matmul %13, %14, %cst_7 {dimension_numbers = #tpu.dot_dimension_numbers<[1], [0], [0], [1], [0, 0, 1, 1], [], []>} : vector<1000x16xf32>, vector<16x128xf32>, vector<1000x128xf32> -> vector<1000x128xf32>
    %16 = arith.mulf %11, %15 : vector<1000x128xf32>
    %cst_8 = arith.constant dense<0.000000e+00> : vector<1000xf32>
    %17 = vector.multi_reduction <add>, %16, %cst_8 [1] : vector<1000x128xf32> to vector<1000xf32>
    %18 = vector.shape_cast %17 : vector<1000xf32> to vector<1000x1xf32>
    %19 = arith.negf %18 : vector<1000x1xf32>
    %20 = math.exp %19 : vector<1000x1xf32>
    %cst_9 = arith.constant 1.000000e+00 : f32
    %21 = vector.broadcast %cst_9 : f32 to vector<1000x1xf32>
    %22 = arith.addf %21, %20 : vector<1000x1xf32>
    %23 = arith.divf %21, %22 : vector<1000x1xf32>
    %c0_10 = arith.constant 0 : index
    %c0_11 = arith.constant 0 : index
    %24 = vector.load %arg5[%c0_10, %c0_11] : memref<1000x1xf32, #tpu.memory_space<vmem>>, vector<1000x1xf32>
    tpu.vector_store %arg5[%c0_10, %c0_11], %23 {strides = array<i32>} : memref<1000x1xf32, #tpu.memory_space<vmem>>, vector<1000x1xf32>,
    return
  }
  func.func @transform_0(%arg0: i32) -> (i32, i32) {
    %c0_i32 = arith.constant 0 : i32
    %c0_i32_0 = arith.constant 0 : i32
    return %arg0, %c0_i32 : i32, i32
  }
  func.func @transform_1(%arg0: i32) -> (i32, i32) {
    %c0_i32 = arith.constant 0 : i32
    %c0_i32_0 = arith.constant 0 : i32
    return %arg0, %c0_i32 : i32, i32
  }
  func.func @transform_2(%arg0: i32) -> (i32, i32) {
    %c0_i32 = arith.constant 0 : i32
    %c0_i32_0 = arith.constant 0 : i32
    %c0_i32_1 = arith.constant 0 : i32
    return %c0_i32, %c0_i32_0 : i32, i32
  }
  func.func @transform_3(%arg0: i32) -> (i32, i32) {
    %c0_i32 = arith.constant 0 : i32
    %c0_i32_0 = arith.constant 0 : i32
    %c0_i32_1 = arith.constant 0 : i32
    return %c0_i32, %c0_i32_0 : i32, i32
  }
  func.func @transform_4(%arg0: i32) -> (i32, i32) {
    %c0_i32 = arith.constant 0 : i32
    %c0_i32_0 = arith.constant 0 : i32
    return %arg0, %c0_i32 : i32, i32
  }
}

</mosaic_0001>

<bundles_post_ra>
// kernel: _fused_pallas.1
= control target key start
LH: loop header
LB: loop body
LE: loop exit
PB: predicated region body
PF: predicated region fallthrough
CT: control target
= control target key end

     0   :  { %v7322_v0 = vmov 0   ;;  %v267_v48 = vlaneseq  ;;  %vm1521_vm0 = vcmask 130048   ;;  %v12464_v56 = vmov 0.0   ;;  %s12459_s0 = inlined_call_operand.vmem [shape: s32[1000,1], index: 0, kind: input, shape index: {}]   ;;  %s12460_s2 = inlined_call_operand.vmem [shape: f32[16,128], index: 2, kind: input, shape index: {}]   ;;  %s12461_s1 = inlined_call_operand.vmem [shape: s32[1000,1], index: 1, kind: input, shape index: {}]   ;;  %s12462_s3 = inlined_call_operand.vmem [shape: f32[16,128], index: 3, kind: input, shape index: {}]   ;;  %s12463_s4 = inlined_call_operand.vmem [shape: f32[1000,1], index: 4, kind: output, shape index: {}]  }
   0x1   :  { %6821 = vset.pattern.permute.xlu2 %v7322_v0  ;;  %6820 = vset.pattern.permute.xlu1 %v7322_v0  ;;  %v21_v1 = vld [vmem:[%s12459_s0 + $0x20] sm:$0xff]  ;;  %v19_v2 = vld [vmem:[%s12459_s0 + $0x10] sm:$0xff]  ;;  %v22_v4 = vld [vmem:[%s12459_s0 + $0x28] sm:$0xff] }
   0x2   :  { %v17_v3 = vld [vmem:[%s12459_s0] sm:$0xff]  ;;  %6819 = vset.pattern.permute.xlu0 %v7322_v0  ;;  %282 = vperm.xlu2 %6821, %v21_v1   ;;  %v20_v5 = vld [vmem:[%s12459_s0 + $0x18] sm:$0xff]  ;;  %v18_v6 = vld [vmem:[%s12459_s0 + $0x8] sm:$0xff]  ;;  %v7496_v52 = vand.u32 127, %v267_v48 }
   0x3   :  { %276 = vperm.xlu1 %6820, %v19_v2   ;;  %270 = vperm.xlu0 %6819, %v17_v3   ;;  %v25_v7 = vld [vmem:[%s12459_s0 + $0x40] sm:$0xff]  ;;  %v24_v8 = vld [vmem:[%s12459_s0 + $0x38] sm:$0xff]  ;;  %v23_v9 = vld [vmem:[%s12459_s0 + $0x30] sm:$0xff] }
   0x4   :  { %v28_v10 = vld [vmem:[%s12459_s0 + $0x58] sm:$0xff]  ;;  %v27_v11 = vld [vmem:[%s12459_s0 + $0x50] sm:$0xff]  ;;  %v26_v12 = vld [vmem:[%s12459_s0 + $0x48] sm:$0xff] }
   0x5   :  { %v31_v13 = vld [vmem:[%s12459_s0 + $0x70] sm:$0xff]  ;;  %v30_v14 = vld [vmem:[%s12459_s0 + $0x68] sm:$0xff]  ;;  %v29_v15 = vld [vmem:[%s12459_s0 + $0x60] sm:$0xff] }
   0x6   :  { %v34_v16 = vld [vmem:[%s12459_s0 + $0x88] sm:$0xff]  ;;  %v33_v17 = vld [vmem:[%s12459_s0 + $0x80] sm:$0xff]  ;;  %v32_v18 = vld [vmem:[%s12459_s0 + $0x78] sm:$0xff] }
   0x7   :  { %v37_v19 = vld [vmem:[%s12459_s0 + $0xa0] sm:$0xff]  ;;  %v36_v20 = vld [vmem:[%s12459_s0 + $0x98] sm:$0xff]  ;;  %v35_v21 = vld [vmem:[%s12459_s0 + $0x90] sm:$0xff] }
   0x8   :  { %v40_v22 = vld [vmem:[%s12459_s0 + $0xb8] sm:$0xff]  ;;  %v39_v23 = vld [vmem:[%s12459_s0 + $0xb0] sm:$0xff]  ;;  %v38_v24 = vld [vmem:[%s12459_s0 + $0xa8] sm:$0xff] }
   0x9   :  { %v43_v25 = vld [vmem:[%s12459_s0 + $0xd0] sm:$0xff]  ;;  %v42_v26 = vld [vmem:[%s12459_s0 + $0xc8] sm:$0xff]  ;;  %v41_v27 = vld [vmem:[%s12459_s0 + $0xc0] sm:$0xff] }
   0xa   :  { %285 = vperm.xlu2 %6821, %v22_v4   ;;  %v46_v28 = vld [vmem:[%s12459_s0 + $0xe8] sm:$0xff]  ;;  %v45_v29 = vld [vmem:[%s12459_s0 + $0xe0] sm:$0xff]  ;;  %v44_v30 = vld [vmem:[%s12459_s0 + $0xd8] sm:$0xff] }
   0xb   :  { %279 = vperm.xlu1 %6820, %v20_v5   ;;  %273 = vperm.xlu0 %6819, %v18_v6   ;;  %v49_v31 = vld [vmem:[%s12459_s0 + $0x100] sm:$0xff]  ;;  %v48_v32 = vld [vmem:[%s12459_s0 + $0xf8] sm:$0xff]  ;;  %v47_v33 = vld [vmem:[%s12459_s0 + $0xf0] sm:$0xff] }
   0xc   :  { %v1520_v34 = vld [vmem:[%s12460_s2 + $0x8] sm:$0xff]  ;;  %v1519_v35 = vld [vmem:[%s12460_s2] sm:$0xff]  ;;  %v52_v36 = vld [vmem:[%s12459_s0 + $0x118] sm:$0xff] }
   0xd   :  { %1911 = vmatpush.msra.mxu0 %v1520_v34  ;;  %6813 = vmatpush.msra.mxu2 %v1520_v34  ;;  %v51_v37 = vld [vmem:[%s12459_s0 + $0x110] sm:$0xff]  ;;  %v50_v38 = vld [vmem:[%s12459_s0 + $0x108] sm:$0xff]  ;;  %v53_v42 = vld [vmem:[%s12459_s0 + $0x120] sm:$0xff] }
   0xe   :  { %v55_v40 = vld [vmem:[%s12459_s0 + $0x130] sm:$0xff]  ;;  %v54_v41 = vld [vmem:[%s12459_s0 + $0x128] sm:$0xff]  ;;  %v57_v45 = vld [vmem:[%s12459_s0 + $0x140] sm:$0xff] }
   0xf   :  { %1912 = vmatpush.msra.mxu0 %v1519_v35  ;;  %6814 = vmatpush.msra.mxu2 %v1519_v35  ;;  %v58_v44 = vld [vmem:[%s12459_s0 + $0x148] sm:$0xff]  ;;  %v56_v46 = vld [vmem:[%s12459_s0 + $0x138] sm:$0xff]  ;;  %v61_v49 = vld [vmem:[%s12459_s0 + $0x160] sm:$0xff] }
  0x10   :  { %v60_v50 = vld [vmem:[%s12459_s0 + $0x158] sm:$0xff]  ;;  %v59_v51 = vld [vmem:[%s12459_s0 + $0x150] sm:$0xff]  ;;  %v62_v60 = vld [vmem:[%s12459_s0 + $0x168] sm:$0xff] }
  0x11   :  { %v64_v58 = vld [vmem:[%s12459_s0 + $0x178] sm:$0xff]  ;;  %v63_v59 = vld [vmem:[%s12459_s0 + $0x170] sm:$0xff]  ;;  %v66_v2 = vld [vmem:[%s12459_s0 + $0x188] sm:$0xff] }
  0x12   :  { %294 = vperm.xlu2 %6821, %v25_v7   ;;  %v67_v1 = vld [vmem:[%s12459_s0 + $0x190] sm:$0xff]  ;;  %v65_v3 = vld [vmem:[%s12459_s0 + $0x180] sm:$0xff] }
  0x13   :  { %291 = vperm.xlu1 %6820, %v24_v8   ;;  %288 = vperm.xlu0 %6819, %v23_v9   ;;  %v70_v8 = vld [vmem:[%s12459_s0 + $0x1a8] sm:$0xff]  ;;  %v69_v9 = vld [vmem:[%s12459_s0 + $0x1a0] sm:$0xff] }
  0x1a   :  { %303 = vperm.xlu2 %6821, %v28_v10   ;;  %v68_v10 = vld [vmem:[%s12459_s0 + $0x198] sm:$0xff] }
  0x1b   :  { %300 = vperm.xlu1 %6820, %v27_v11   ;;  %297 = vperm.xlu0 %6819, %v26_v12  }
  0x22   :  { %312 = vperm.xlu2 %6821, %v31_v13  }
  0x23   :  { %309 = vperm.xlu1 %6820, %v30_v14   ;;  %306 = vperm.xlu0 %6819, %v29_v15   ;;  %v73_v15 = vld [vmem:[%s12459_s0 + $0x1c0] sm:$0xff] }
  0x2a   :  { %321 = vperm.xlu2 %6821, %v34_v16   ;;  %v72_v16 = vld [vmem:[%s12459_s0 + $0x1b8] sm:$0xff] }
  0x2b   :  { %318 = vperm.xlu1 %6820, %v33_v17   ;;  %315 = vperm.xlu0 %6819, %v32_v18   ;;  %v71_v17 = vld [vmem:[%s12459_s0 + $0x1b0] sm:$0xff] }
  0x32   :  { %330 = vperm.xlu2 %6821, %v37_v19  }
  0x33   :  { %327 = vperm.xlu1 %6820, %v36_v20   ;;  %324 = vperm.xlu0 %6819, %v35_v21  }
  0x3a   :  { %339 = vperm.xlu2 %6821, %v40_v22   ;;  %v76_v22 = vld [vmem:[%s12459_s0 + $0x1d8] sm:$0xff] }
  0x3b   :  { %336 = vperm.xlu1 %6820, %v39_v23   ;;  %333 = vperm.xlu0 %6819, %v38_v24   ;;  %v75_v23 = vld [vmem:[%s12459_s0 + $0x1d0] sm:$0xff]  ;;  %v74_v24 = vld [vmem:[%s12459_s0 + $0x1c8] sm:$0xff] }
  0x42   :  { %348 = vperm.xlu2 %6821, %v43_v25  }
  0x43   :  { %345 = vperm.xlu1 %6820, %v42_v26   ;;  %342 = vperm.xlu0 %6819, %v41_v27  }
  0x4a   :  { %357 = vperm.xlu2 %6821, %v46_v28  }
  0x4b   :  { %354 = vperm.xlu1 %6820, %v45_v29   ;;  %351 = vperm.xlu0 %6819, %v44_v30   ;;  %v79_v29 = vld [vmem:[%s12459_s0 + $0x1f0] sm:$0xff]  ;;  %v78_v30 = vld [vmem:[%s12459_s0 + $0x1e8] sm:$0xff] }
  0x52   :  { %366 = vperm.xlu2 %6821, %v49_v31   ;;  %v77_v31 = vld [vmem:[%s12459_s0 + $0x1e0] sm:$0xff] }
  0x53   :  { %363 = vperm.xlu1 %6820, %v48_v32   ;;  %360 = vperm.xlu0 %6819, %v47_v33  }
  0x5a   :  { %375 = vperm.xlu2 %6821, %v52_v36   ;;  %v82_v36 = vld [vmem:[%s12459_s0 + $0x208] sm:$0xff] }
  0x5b   :  { %372 = vperm.xlu1 %6820, %v51_v37   ;;  %369 = vperm.xlu0 %6819, %v50_v38   ;;  %v81_v37 = vld [vmem:[%s12459_s0 + $0x200] sm:$0xff]  ;;  %v80_v38 = vld [vmem:[%s12459_s0 + $0x1f8] sm:$0xff] }
  0x5c   :  { %v7463_v39 = vpop.permute.xlu2 %282 }
  0x5d   :  { %vm648_vm5 = vcmp.eq.s32.totalorder %v7496_v52, %v7463_v39 }
  0x5e   :  { %v6192_v21 = vsel %vm648_vm5, 1.0, %v12464_v56 }
  0x62   :  { %384 = vperm.xlu2 %6821, %v55_v40  }
  0x63   :  { %381 = vperm.xlu1 %6820, %v54_v41   ;;  %378 = vperm.xlu0 %6819, %v53_v42  }
  0x64   :  { %v7474_v43 = vpop.permute.xlu2 %285 }
  0x65   :  { %vm649_vm6 = vcmp.eq.s32.totalorder %v7496_v52, %v7474_v43  ;;  %v85_v43 = vld [vmem:[%s12459_s0 + $0x220] sm:$0xff] }
  0x66   :  { %v6193_v28 = vsel %vm649_vm6, 1.0, %v12464_v56 }
  0x6a   :  { %393 = vperm.xlu2 %6821, %v58_v44   ;;  %v84_v44 = vld [vmem:[%s12459_s0 + $0x218] sm:$0xff] }
  0x6b   :  { %390 = vperm.xlu1 %6820, %v57_v45   ;;  %387 = vperm.xlu0 %6819, %v56_v46   ;;  %v83_v45 = vld [vmem:[%s12459_s0 + $0x210] sm:$0xff] }
  0x6c   :  { %v7485_v47 = vpop.permute.xlu2 %294 }
  0x6d   :  { %vm652_vm9 = vcmp.eq.s32.totalorder %v7496_v52, %v7485_v47  ;;  %v86_v47 = vld [vmem:[%s12459_s0 + $0x228] sm:$0xff] }
  0x72   :  { %402 = vperm.xlu2 %6821, %v61_v49  }
  0x73   :  { %399 = vperm.xlu1 %6820, %v60_v50   ;;  %396 = vperm.xlu0 %6819, %v59_v51   ;;  %v6196_v50 = vsel %vm652_vm9, 1.0, %v12464_v56  ;;  %v88_v51 = vld [vmem:[%s12459_s0 + $0x238] sm:$0xff] }
  0x74   :  { %v7498_v53 = vpop.permute.xlu2 %303 }
  0x75   :  { %v277_v54 = vpop.permute.xlu1 %276  ;;  %v271_v55 = vpop.permute.xlu0 %270  ;;  %vm655_vm12 = vcmp.eq.s32.totalorder %v7496_v52, %v7498_v53  ;;  %v95_v53 = vld [vmem:[%s12459_s0 + $0x270] sm:$0xff] }
  0x76   :  { %vm644_vm1 = vcmp.eq.s32.totalorder %v7496_v52, %v271_v55  ;;  %vm646_vm3 = vcmp.eq.s32.totalorder %v7496_v52, %v277_v54  ;;  %v87_v54 = vld [vmem:[%s12459_s0 + $0x230] sm:$0xff] }
  0x77   :  { %v6188_v57 = vsel %vm644_vm1, 1.0, %v12464_v56  ;;  %v6190_v7 = vsel %vm646_vm3, 1.0, %v12464_v56 }
  0x78   :  { %6313 = vmatmul.msk.f32.vlgmr.msra.gmra.mxu0 %vm1521_vm0, %v6188_v57 }
  0x7a   :  { %411 = vperm.xlu2 %6821, %v64_v58  }
  0x7b   :  { %408 = vperm.xlu1 %6820, %v63_v59   ;;  %405 = vperm.xlu0 %6819, %v62_v60   ;;  %v91_v60 = vld [vmem:[%s12459_s0 + $0x250] sm:$0xff] }
  0x7c   :  { %v7512_v61 = vpop.permute.xlu2 %312 }
  0x7d   :  { %v280_v62 = vpop.permute.xlu1 %279  ;;  %v274_v63 = vpop.permute.xlu0 %273  ;;  %vm658_vm15 = vcmp.eq.s32.totalorder %v7496_v52, %v7512_v61  ;;  %v104_v61 = vld [vmem:[%s12459_s0 + $0x2b8] sm:$0xff] }
  0x7e   :  { %vm645_vm2 = vcmp.eq.s32.totalorder %v7496_v52, %v274_v63  ;;  %vm647_vm4 = vcmp.eq.s32.totalorder %v7496_v52, %v280_v62  ;;  %v90_v62 = vld [vmem:[%s12459_s0 + $0x248] sm:$0xff]  ;;  %v89_v63 = vld [vmem:[%s12459_s0 + $0x240] sm:$0xff] }
  0x7f   :  { %v6189_v0 = vsel %vm645_vm2, 1.0, %v12464_v56  ;;  %v6191_v14 = vsel %vm647_vm4, 1.0, %v12464_v56 }
  0x80   :  { %6314 = vmatmul.msk.f32.gmra.mxu0 %vm1521_vm0, %v6189_v0 }
  0x82   :  { %420 = vperm.xlu2 %6821, %v67_v1  }
  0x83   :  { %417 = vperm.xlu1 %6820, %v66_v2   ;;  %414 = vperm.xlu0 %6819, %v65_v3  }
  0x84   :  { %v7527_v4 = vpop.permute.xlu2 %321 }
  0x85   :  { %v7529_v5 = vpop.permute.xlu1 %291  ;;  %v289_v6 = vpop.permute.xlu0 %288  ;;  %vm661_vm3 = vcmp.eq.s32.totalorder %v7496_v52, %v7527_v4  ;;  %v114_v4 = vld [vmem:[%s12459_s0 + $0x308] sm:$0xff] }
  0x86   :  { %vm650_vm7 = vcmp.eq.s32.totalorder %v7496_v52, %v289_v6  ;;  %vm651_vm8 = vcmp.eq.s32.totalorder %v7496_v52, %v7529_v5  ;;  %v94_v5 = vld [vmem:[%s12459_s0 + $0x268] sm:$0xff]  ;;  %v93_v6 = vld [vmem:[%s12459_s0 + $0x260] sm:$0xff] }
  0x87   :  { %v6194_v35 = vsel %vm650_vm7, 1.0, %v12464_v56  ;;  %v6195_v42 = vsel %vm651_vm8, 1.0, %v12464_v56 }
  0x88   :  { %6315 = vmatmul.msk.f32.gmra.mxu0 %vm1521_vm0, %v6190_v7  ;;  %v92_v7 = vld [vmem:[%s12459_s0 + $0x258] sm:$0xff] }
  0x8a   :  { %429 = vperm.xlu2 %6821, %v70_v8  }
  0x8b   :  { %426 = vperm.xlu1 %6820, %v69_v9   ;;  %423 = vperm.xlu0 %6819, %v68_v10  }
  0x8c   :  { %v7543_v11 = vpop.permute.xlu2 %330 }
  0x8d   :  { %v7545_v12 = vpop.permute.xlu1 %300  ;;  %v7547_v13 = vpop.permute.xlu0 %297  ;;  %vm664_vm6 = vcmp.eq.s32.totalorder %v7496_v52, %v7543_v11  ;;  %v123_v11 = vld [vmem:[%s12459_s0 + $0x350] sm:$0xff] }
  0x8e   :  { %vm653_vm10 = vcmp.eq.s32.totalorder %v7496_v52, %v7547_v13  ;;  %vm654_vm11 = vcmp.eq.s32.totalorder %v7496_v52, %v7545_v12  ;;  %v6199_v12 = vsel %vm655_vm12, 1.0, %v12464_v56  ;;  %v97_v13 = vld [vmem:[%s12459_s0 + $0x280] sm:$0xff] }
  0x8f   :  { %v6197_v59 = vsel %vm653_vm10, 1.0, %v12464_v56  ;;  %v6198_v3 = vsel %vm654_vm11, 1.0, %v12464_v56 }
  0x90   :  { %6316 = vmatmul.msk.f32.gmra.mxu0 %vm1521_vm0, %v6191_v14  ;;  %v96_v14 = vld [vmem:[%s12459_s0 + $0x278] sm:$0xff] }
  0x92   :  { %438 = vperm.xlu2 %6821, %v73_v15  }
  0x93   :  { %435 = vperm.xlu1 %6820, %v72_v16   ;;  %432 = vperm.xlu0 %6819, %v71_v17  }
  0x94   :  { %v7562_v18 = vpop.permute.xlu2 %339 }
  0x95   :  { %v7564_v19 = vpop.permute.xlu1 %309  ;;  %v7566_v20 = vpop.permute.xlu0 %306  ;;  %vm667_vm11 = vcmp.eq.s32.totalorder %v7496_v52, %v7562_v18  ;;  %v132_v18 = vld [vmem:[%s12459_s0 + $0x398] sm:$0xff] }
  0x96   :  { %vm656_vm13 = vcmp.eq.s32.totalorder %v7496_v52, %v7566_v20  ;;  %v98_v20 = vld [vmem:[%s12459_s0 + $0x288] sm:$0xff]  ;;  %vm657_vm14 = vcmp.eq.s32.totalorder %v7496_v52, %v7564_v19  ;;  %v101_v19 = vld [vmem:[%s12459_s0 + $0x2a0] sm:$0xff] }
  0x98   :  { %6317 = vmatmul.msk.f32.gmra.mxu0 %vm1521_vm0, %v6192_v21  ;;  %v6200_v21 = vsel %vm656_vm13, 1.0, %v12464_v56 }
  0x9a   :  { %447 = vperm.xlu2 %6821, %v76_v22   ;;  %v100_v22 = vld [vmem:[%s12459_s0 + $0x298] sm:$0xff] }
  0x9b   :  { %444 = vperm.xlu1 %6820, %v75_v23   ;;  %441 = vperm.xlu0 %6819, %v74_v24   ;;  %v99_v23 = vld [vmem:[%s12459_s0 + $0x290] sm:$0xff] }
  0x9c   :  { %v7581_v25 = vpop.permute.xlu2 %348 }
  0x9d   :  { %v7583_v26 = vpop.permute.xlu1 %318  ;;  %v7585_v27 = vpop.permute.xlu0 %315 }
  0x9e   :  { %vm659_vm1 = vcmp.eq.s32.totalorder %v7496_v52, %v7585_v27  ;;  %v107_v27 = vld [vmem:[%s12459_s0 + $0x2d0] sm:$0xff]  ;;  %vm660_vm2 = vcmp.eq.s32.totalorder %v7496_v52, %v7583_v26 }
  0x9f   :  { %v111_v26 = vld [vmem:[%s12459_s0 + $0x2f0] sm:$0xff] }
  0xa0   :  { %6318 = vmatmul.msk.f32.gmra.mxu0 %vm1521_vm0, %v6193_v28 }
  0xa2   :  { %456 = vperm.xlu2 %6821, %v79_v29  }
  0xa3   :  { %453 = vperm.xlu1 %6820, %v78_v30   ;;  %450 = vperm.xlu0 %6819, %v77_v31   ;;  %v6201_v30 = vsel %vm657_vm14, 1.0, %v12464_v56  ;;  %v103_v31 = vld [vmem:[%s12459_s0 + $0x2b0] sm:$0xff] }
  0xa4   :  { %v7599_v32 = vpop.permute.xlu2 %357 }
  0xa5   :  { %v7601_v33 = vpop.permute.xlu1 %327  ;;  %v7603_v34 = vpop.permute.xlu0 %324 }
  0xa6   :  { %vm662_vm4 = vcmp.eq.s32.totalorder %v7496_v52, %v7603_v34  ;;  %v117_v34 = vld [vmem:[%s12459_s0 + $0x320] sm:$0xff]  ;;  %vm663_vm5 = vcmp.eq.s32.totalorder %v7496_v52, %v7601_v33  ;;  %v120_v33 = vld [vmem:[%s12459_s0 + $0x338] sm:$0xff] }
  0xa8   :  { %6319 = vmatmul.msk.f32.gmra.mxu0 %vm1521_vm0, %v6194_v35  ;;  %v102_v35 = vld [vmem:[%s12459_s0 + $0x2a8] sm:$0xff] }
  0xaa   :  { %465 = vperm.xlu2 %6821, %v82_v36  }
  0xab   :  { %462 = vperm.xlu1 %6820, %v81_v37   ;;  %459 = vperm.xlu0 %6819, %v80_v38  }
  0xac   :  { %v7618_v39 = vpop.permute.xlu2 %366 }
  0xad   :  { %v7620_v40 = vpop.permute.xlu1 %336  ;;  %v7622_v41 = vpop.permute.xlu0 %333 }
  0xae   :  { %vm665_vm7 = vcmp.eq.s32.totalorder %v7496_v52, %v7622_v41  ;;  %v126_v41 = vld [vmem:[%s12459_s0 + $0x368] sm:$0xff]  ;;  %vm666_vm9 = vcmp.eq.s32.totalorder %v7496_v52, %v7620_v40  ;;  %v129_v40 = vld [vmem:[%s12459_s0 + $0x380] sm:$0xff] }
  0xb0   :  { %6320 = vmatmul.msk.f32.gmra.mxu0 %vm1521_vm0, %v6195_v42  ;;  %v6202_v42 = vsel %vm658_vm15, 1.0, %v12464_v56 }
  0xb2   :  { %474 = vperm.xlu2 %6821, %v85_v43   ;;  %v106_v43 = vld [vmem:[%s12459_s0 + $0x2c8] sm:$0xff] }
  0xb3   :  { %471 = vperm.xlu1 %6820, %v84_v44   ;;  %468 = vperm.xlu0 %6819, %v83_v45   ;;  %v105_v44 = vld [vmem:[%s12459_s0 + $0x2c0] sm:$0xff] }
  0xb4   :  { %v7637_v46 = vpop.permute.xlu2 %375 }
  0xb5   :  { %v7639_v48 = vpop.permute.xlu1 %345  ;;  %v7641_v49 = vpop.permute.xlu0 %342 }
  0xb6   :  { %vm668_vm13 = vcmp.eq.s32.totalorder %v7496_v52, %v7641_v49  ;;  %v135_v49 = vld [vmem:[%s12459_s0 + $0x3b0] sm:$0xff]  ;;  %vm669_vm15 = vcmp.eq.s32.totalorder %v7496_v52, %v7639_v48  ;;  %v138_v48 = vld [vmem:[%s12459_s0 + $0x3c8] sm:$0xff] }
  0xb8   :  { %6321 = vmatmul.msk.f32.gmra.mxu0 %vm1521_vm0, %v6196_v50 }
  0xba   :  { %483 = vperm.xlu2 %6821, %v88_v51  }
  0xbb   :  { %480 = vperm.xlu1 %6820, %v87_v54   ;;  %477 = vperm.xlu0 %6819, %v86_v47   ;;  %v6203_v54 = vsel %vm659_vm1, 1.0, %v12464_v56  ;;  %v109_v47 = vld [vmem:[%s12459_s0 + $0x2e0] sm:$0xff] }
  0xbc   :  { %v7656_v55 = vpop.permute.xlu2 %384 }
  0xbd   :  { %v7658_v57 = vpop.permute.xlu1 %354  ;;  %v7660_v58 = vpop.permute.xlu0 %351 }
  0xc0   :  { %6322 = vmatmul.msk.f32.gmra.mxu0 %vm1521_vm0, %v6197_v59  ;;  %v108_v59 = vld [vmem:[%s12459_s0 + $0x2d8] sm:$0xff] }
  0xc2   :  { %492 = vperm.xlu2 %6821, %v91_v60  }
  0xc3   :  { %489 = vperm.xlu1 %6820, %v90_v62   ;;  %486 = vperm.xlu0 %6819, %v89_v63  }
  0xc4   :  { %v7675_v0 = vpop.permute.xlu2 %393 }
  0xc5   :  { %v7677_v1 = vpop.permute.xlu1 %363  ;;  %v7679_v2 = vpop.permute.xlu0 %360 }
  0xc8   :  { %6323 = vmatmul.msk.f32.gmra.mxu0 %vm1521_vm0, %v6198_v3 }
  0xca   :  { %501 = vperm.xlu2 %6821, %v94_v5   ;;  %v6204_v5 = vsel %vm660_vm2, 1.0, %v12464_v56  ;;  %vm670_vm2 = vcmp.eq.s32.totalorder %v7496_v52, %v7581_v25 }
  0xcb   :  { %498 = vperm.xlu1 %6820, %v93_v6   ;;  %495 = vperm.xlu0 %6819, %v92_v7   ;;  %v112_v6 = vld [vmem:[%s12459_s0 + $0x2f8] sm:$0xff]  ;;  %v110_v7 = vld [vmem:[%s12459_s0 + $0x2e8] sm:$0xff] }
  0xcc   :  { %v7694_v8 = vpop.permute.xlu2 %402 }
  0xcd   :  { %v7696_v9 = vpop.permute.xlu1 %372  ;;  %v7698_v10 = vpop.permute.xlu0 %369 }
  0xd0   :  { %6324 = vmatmul.msk.f32.gmra.mxu0 %vm1521_vm0, %v6199_v12 }
  0xd2   :  { %510 = vperm.xlu2 %6821, %v97_v13  }
  0xd3   :  { %507 = vperm.xlu1 %6820, %v96_v14   ;;  %504 = vperm.xlu0 %6819, %v95_v53  }
  0xd4   :  { %v7713_v15 = vpop.permute.xlu2 %411 }
  0xd5   :  { %v7715_v16 = vpop.permute.xlu1 %381  ;;  %v7717_v17 = vpop.permute.xlu0 %378 }
  0xd8   :  { %6325 = vmatmul.msk.f32.gmra.mxu0 %vm1521_vm0, %v6200_v21  ;;  %v6205_v21 = vsel %vm661_vm3, 1.0, %v12464_v56 }
  0xda   :  { %519 = vperm.xlu2 %6821, %v100_v22   ;;  %v115_v22 = vld [vmem:[%s12459_s0 + $0x310] sm:$0xff] }
  0xdb   :  { %516 = vperm.xlu1 %6820, %v99_v23   ;;  %513 = vperm.xlu0 %6819, %v98_v20   ;;  %v113_v23 = vld [vmem:[%s12459_s0 + $0x300] sm:$0xff] }
  0xdc   :  { %v7732_v24 = vpop.permute.xlu2 %420 }
  0xdd   :  { %v7734_v28 = vpop.permute.xlu1 %390  ;;  %v7736_v29 = vpop.permute.xlu0 %387 }
  0xe0   :  { %6326 = vmatmul.msk.f32.gmra.mxu0 %vm1521_vm0, %v6201_v30 }
  0xe2   :  { %528 = vperm.xlu2 %6821, %v103_v31  }
  0xe3   :  { %525 = vperm.xlu1 %6820, %v102_v35   ;;  %522 = vperm.xlu0 %6819, %v101_v19   ;;  %v6206_v19 = vsel %vm662_vm4, 1.0, %v12464_v56  ;;  %vm671_vm4 = vcmp.eq.s32.totalorder %v7496_v52, %v7660_v58 }
  0xe4   :  { %v7751_v36 = vpop.permute.xlu2 %429 }
  0xe5   :  { %v7753_v37 = vpop.permute.xlu1 %399  ;;  %v7755_v38 = vpop.permute.xlu0 %396 }
  0xe8   :  { %6327 = vmatmul.msk.f32.gmra.mxu0 %vm1521_vm0, %v6202_v42  ;;  %v118_v42 = vld [vmem:[%s12459_s0 + $0x328] sm:$0xff] }
  0xea   :  { %537 = vperm.xlu2 %6821, %v106_v43   ;;  %v116_v43 = vld [vmem:[%s12459_s0 + $0x318] sm:$0xff] }
  0xeb   :  { %534 = vperm.xlu1 %6820, %v105_v44   ;;  %531 = vperm.xlu0 %6819, %v104_v61  }
  0xec   :  { %v7770_v45 = vpop.permute.xlu2 %438 }
  0xed   :  { %v7772_v50 = vpop.permute.xlu1 %408  ;;  %v7774_v51 = vpop.permute.xlu0 %405 }
  0xf0   :  { %6328 = vmatmul.msk.f32.gmra.mxu0 %vm1521_vm0, %v6203_v54 }
  0xf2   :  { %546 = vperm.xlu2 %6821, %v109_v47  }
  0xf3   :  { %543 = vperm.xlu1 %6820, %v108_v59   ;;  %540 = vperm.xlu0 %6819, %v107_v27   ;;  %v6207_v59 = vsel %vm663_vm5, 1.0, %v12464_v56  ;;  %v121_v27 = vld [vmem:[%s12459_s0 + $0x340] sm:$0xff] }
  0xf4   :  { %v7789_v60 = vpop.permute.xlu2 %447 }
  0xf5   :  { %v7791_v62 = vpop.permute.xlu1 %417  ;;  %v7793_v63 = vpop.f32.mrf.mxu0 }
  0xf6   :  { %12474 = vst [vmem:[#allocation2_spill] sm:$0xff] %v7793_v63  ;;  %v7795_v3 = vpop.permute.xlu0 %414 }
  0xf8   :  { %6329 = vmatmul.msk.f32.gmra.mxu0 %vm1521_vm0, %v6204_v5  ;;  %v119_v5 = vld [vmem:[%s12459_s0 + $0x330] sm:$0xff] }
  0xfa   :  { %555 = vperm.xlu2 %6821, %v112_v6  }
  0xfb   :  { %552 = vperm.xlu1 %6820, %v111_v26   ;;  %549 = vperm.xlu0 %6819, %v110_v7  }
  0xfc   :  { %v7810_v12 = vpop.permute.xlu2 %456 }
  0xfd   :  { %12475 = vst [vmem:[#allocation3_spill] sm:$0xff] %v7810_v12  ;;  %v7812_v13 = vpop.permute.xlu1 %426  ;;  %v7814_v14 = vpop.f32.mrf.mxu0 }
  0xfe   :  { %12476 = vst [vmem:[#allocation4_spill] sm:$0xff] %v7814_v14  ;;  %v7816_v53 = vpop.permute.xlu0 %423 }
 0x100   :  { %6330 = vmatmul.msk.f32.gmra.mxu0 %vm1521_vm0, %v6205_v21 }
 0x102   :  { %564 = vperm.xlu2 %6821, %v115_v22   ;;  %v6208_v22 = vsel %vm664_vm6, 1.0, %v12464_v56  ;;  %vm672_vm6 = vcmp.eq.s32.totalorder %v7496_v52, %v7658_v57  ;;  %v147_v57 = vld [vmem:[%s12461_s1 + $0x28] sm:$0xff] }
 0x103   :  { %561 = vperm.xlu1 %6820, %v114_v4   ;;  %558 = vperm.xlu0 %6819, %v113_v23   ;;  %v124_v4 = vld [vmem:[%s12459_s0 + $0x358] sm:$0xff]  ;;  %v122_v23 = vld [vmem:[%s12459_s0 + $0x348] sm:$0xff] }
 0x104   :  { %v7831_v20 = vpop.permute.xlu2 %465 }
 0x105   :  { %v7833_v30 = vpop.permute.xlu1 %435  ;;  %v7835_v31 = vpop.f32.mrf.mxu0  ;;  %vm709_vm12 = vcmp.eq.s32.totalorder %v7496_v52, %v7831_v20  ;;  %v131_v20 = vld [vmem:[%s12459_s0 + $0x390] sm:$0xff] }
 0x106   :  { %12477 = vst [vmem:[#allocation5_spill] sm:$0xff] %v7835_v31  ;;  %v7837_v35 = vpop.permute.xlu0 %432 }
 0x108   :  { %6331 = vmatmul.msk.f32.gmra.mxu0 %vm1521_vm0, %v6206_v19 }
 0x10a   :  { %573 = vperm.xlu2 %6821, %v118_v42  }
 0x10b   :  { %570 = vperm.xlu1 %6820, %v117_v34   ;;  %567 = vperm.xlu0 %6819, %v116_v43  }
 0x10c   :  { %v7852_v44 = vpop.permute.xlu2 %474 }
 0x10d   :  { %v7854_v61 = vpop.permute.xlu1 %444  ;;  %v7856_v54 = vpop.f32.mrf.mxu0  ;;  %vm712_vm3 = vcmp.eq.s32.totalorder %v7496_v52, %v7852_v44  ;;  %v141_v44 = vld [vmem:[%s12459_s0 + $0x3e0] sm:$0xff] }
 0x10e   :  { %12478 = vst [vmem:[#allocation6_spill] sm:$0xff] %v7856_v54  ;;  %v7858_v47 = vpop.permute.xlu0 %441 }
 0x110   :  { %6332 = vmatmul.msk.f32.gmra.mxu0 %vm1521_vm0, %v6207_v59  ;;  %v6209_v59 = vsel %vm665_vm7, 1.0, %v12464_v56 }
 0x112   :  { %582 = vperm.xlu2 %6821, %v121_v27   ;;  %v127_v27 = vld [vmem:[%s12459_s0 + $0x370] sm:$0xff] }
 0x113   :  { %579 = vperm.xlu1 %6820, %v120_v33   ;;  %576 = vperm.xlu0 %6819, %v119_v5   ;;  %v125_v5 = vld [vmem:[%s12459_s0 + $0x360] sm:$0xff] }
 0x114   :  { %v7873_v6 = vpop.permute.xlu2 %483 }
 0x115   :  { %v7875_v26 = vpop.permute.xlu1 %453  ;;  %v7877_v7 = vpop.f32.mrf.mxu0 }
 0x116   :  { %12479 = vst [vmem:[#allocation7_spill] sm:$0xff] %v7875_v26  ;;  %v7879_v21 = vpop.permute.xlu0 %450 }
 0x117   :  { %12480 = vst [vmem:[#allocation8_spill] sm:$0xff] %v7877_v7 }
 0x118   :  { %6333 = vmatmul.msk.f32.gmra.mxu0 %vm1521_vm0, %v6208_v22 }
 0x11a   :  { %591 = vperm.xlu2 %6821, %v124_v4  }
 0x11b   :  { %588 = vperm.xlu1 %6820, %v123_v11   ;;  %585 = vperm.xlu0 %6819, %v122_v23  }
 0x11c   :  { %v7894_v19 = vpop.permute.xlu2 %492 }
 0x11d   :  { %v463_v42 = vpop.permute.xlu1 %462  ;;  %v7896_v34 = vpop.f32.mrf.mxu0 }
 0x11e   :  { %12481 = vst [vmem:[#allocation9_spill] sm:$0xff] %v7896_v34  ;;  %v460_v43 = vpop.permute.xlu0 %459  ;;  %vm708_vm10 = vcmp.eq.s32.totalorder %v7496_v52, %v463_v42  ;;  %v128_v42 = vld [vmem:[%s12459_s0 + $0x378] sm:$0xff] }
 0x11f   :  { %vm707_vm8 = vcmp.eq.s32.totalorder %v7496_v52, %v460_v43  ;;  %v6210_v43 = vsel %vm666_vm9, 1.0, %v12464_v56  ;;  %vm715_vm9 = vcmp.eq.s32.totalorder %v7496_v52, %v7873_v6  ;;  %v149_v6 = vld [vmem:[%s12461_s1 + $0x38] sm:$0xff] }
 0x120   :  { %6334 = vmatmul.msk.f32.gmra.mxu0 %vm1521_vm0, %v6209_v59  ;;  %v6251_v33 = vsel %vm707_vm8, 1.0, %v12464_v56  ;;  %v130_v59 = vld [vmem:[%s12459_s0 + $0x388] sm:$0xff]  ;;  %vm673_vm8 = vcmp.eq.s32.totalorder %v7496_v52, %v7599_v32  ;;  %v150_v32 = vld [vmem:[%s12461_s1 + $0x40] sm:$0xff] }
 0x121   :  { %6376 = vmatmul.msk.f32.vlgmr.msra.gmra.mxu2 %vm1521_vm0, %v6251_v33 }
 0x122   :  { %600 = vperm.xlu2 %6821, %v127_v27   ;;  %v6252_v27 = vsel %vm708_vm10, 1.0, %v12464_v56  ;;  %vm674_vm10 = vcmp.eq.s32.totalorder %v7496_v52, %v7679_v2  ;;  %v153_v2 = vld [vmem:[%s12461_s1 + $0x58] sm:$0xff] }
 0x123   :  { %597 = vperm.xlu1 %6820, %v126_v41   ;;  %594 = vperm.xlu0 %6819, %v125_v5  }
 0x124   :  { %v7914_v22 = vpop.permute.xlu2 %501 }
 0x125   :  { %v472_v4 = vpop.permute.xlu1 %471  ;;  %v7917_v23 = vpop.f32.mrf.mxu0 }
 0x126   :  { %v469_v11 = vpop.permute.xlu0 %468  ;;  %12482 = vst [vmem:[#allocation10_spill] sm:$0xff] %v7917_v23  ;;  %v12484_v23 = vmov 0.0   ;;  %vm711_vm1 = vcmp.eq.s32.totalorder %v7496_v52, %v472_v4  ;;  %v137_v4 = vld [vmem:[%s12459_s0 + $0x3c0] sm:$0xff] }
 0x127   :  { %vm710_vm14 = vcmp.eq.s32.totalorder %v7496_v52, %v469_v11  ;;  %v6212_v34 = vsel %vm668_vm13, 1.0, %v12484_v23  ;;  %v134_v11 = vld [vmem:[%s12459_s0 + $0x3a8] sm:$0xff]  ;;  %v6213_v7 = vsel %vm669_vm15, 1.0, %v12484_v23  ;;  %v6214_v31 = vsel %vm670_vm2, 1.0, %v12484_v23 }
 0x128   :  { %6335 = vmatmul.msk.f32.gmra.mxu0 %vm1521_vm0, %v6210_v43  ;;  %v6211_v43 = vsel %vm667_vm11, 1.0, %v12464_v56  ;;  %v6256_v25 = vsel %vm712_vm3, 1.0, %v12484_v23  ;;  %v6217_v14 = vsel %vm673_vm8, 1.0, %v12484_v23  ;;  %v6218_v12 = vsel %vm674_vm10, 1.0, %v12484_v23 }
 0x129   :  { %6377 = vmatmul.msk.f32.gmra.mxu2 %vm1521_vm0, %v6252_v27  ;;  %v6253_v27 = vsel %vm709_vm12, 1.0, %v12464_v56  ;;  %vm675_vm12 = vcmp.eq.s32.totalorder %v7496_v52, %v7677_v1  ;;  %vm718_vm15 = vcmp.eq.s32.totalorder %v7496_v52, %v7894_v19  ;;  %v159_v19 = vld [vmem:[%s12461_s1 + $0x88] sm:$0xff]  ;;  %vm678_vm3 = vcmp.eq.s32.totalorder %v7496_v52, %v7696_v9  ;;  %v166_v9 = vld [vmem:[%s12461_s1 + $0xc0] sm:$0xff] }
 0x12a   :  { %609 = vperm.xlu2 %6821, %v130_v59   ;;  %v133_v59 = vld [vmem:[%s12459_s0 + $0x3a0] sm:$0xff]  ;;  %v6219_v26 = vsel %vm675_vm12, 1.0, %v12484_v23 }
 0x12b   :  { %606 = vperm.xlu1 %6820, %v129_v40   ;;  %603 = vperm.xlu0 %6819, %v128_v42  }
 0x12c   :  { %v7934_v33 = vpop.permute.xlu2 %510 }
 0x12d   :  { %v7938_v41 = vpop.permute.xlu1 %480  ;;  %v7954_v40 = vpop.f32.mrf.mxu0  ;;  %vm724_vm12 = vcmp.eq.s32.totalorder %v7496_v52, %v7934_v33 }
 0x12e   :  { %v7940_v5 = vpop.permute.xlu0 %477  ;;  %12483 = vst [vmem:[#allocation11_spill] sm:$0xff] %v7954_v40  ;;  %vm714_vm7 = vcmp.eq.s32.totalorder %v7496_v52, %v7938_v41  ;;  %v146_v41 = vld [vmem:[%s12461_s1 + $0x20] sm:$0xff]  ;;  %v6268_v33 = vsel %vm724_vm12, 1.0, %v12484_v23 }
 0x12f   :  { %vm713_vm5 = vcmp.eq.s32.totalorder %v7496_v52, %v7940_v5  ;;  %v144_v5 = vld [vmem:[%s12461_s1 + $0x10] sm:$0xff] }
 0x130   :  { %6336 = vmatmul.msk.f32.gmra.mxu0 %vm1521_vm0, %v6211_v43  ;;  %v6257_v58 = vsel %vm713_vm5, 1.0, %v12484_v23  ;;  %vm679_vm5 = vcmp.eq.s32.totalorder %v7496_v52, %v7637_v46  ;;  %v168_v46 = vld [vmem:[%s12461_s1 + $0xd0] sm:$0xff] }
 0x131   :  { %6378 = vmatmul.msk.f32.gmra.mxu2 %vm1521_vm0, %v6253_v27  ;;  %v136_v27 = vld [vmem:[%s12459_s0 + $0x3b8] sm:$0xff] }
 0x132   :  { %618 = vperm.xlu2 %6821, %v133_v59   ;;  %v6254_v59 = vsel %vm710_vm14, 1.0, %v12484_v23  ;;  %vm676_vm14 = vcmp.eq.s32.totalorder %v7496_v52, %v7618_v39  ;;  %v6262_v39 = vsel %vm718_vm15, 1.0, %v12484_v23 }
 0x133   :  { %615 = vperm.xlu1 %6820, %v132_v18   ;;  %612 = vperm.xlu0 %6819, %v131_v20  }
 0x134   :  { %v7959_v42 = vpop.permute.xlu2 %519 }
 0x135   :  { %v7962_v43 = vpop.permute.xlu1 %489  ;;  %v7979_v18 = vpop.f32.mrf.mxu0 }
 0x136   :  { %v7964_v56 = vpop.permute.xlu0 %486  ;;  %12485 = vst [vmem:[#allocation12_spill] sm:$0xff] %v7979_v18  ;;  %vm717_vm13 = vcmp.eq.s32.totalorder %v7496_v52, %v7962_v43  ;;  %v156_v43 = vld [vmem:[%s12461_s1 + $0x70] sm:$0xff] }
 0x137   :  { %vm716_vm11 = vcmp.eq.s32.totalorder %v7496_v52, %v7964_v56  ;;  %v152_v56 = vld [vmem:[%s12461_s1 + $0x50] sm:$0xff]  ;;  %v6261_v1 = vsel %vm717_vm13, 1.0, %v12484_v23 }
 0x138   :  { %6337 = vmatmul.msk.f32.gmra.mxu0 %vm1521_vm0, %v6212_v34 }
 0x139   :  { %6379 = vmatmul.msk.f32.gmra.mxu2 %vm1521_vm0, %v6254_v59  ;;  %v6255_v59 = vsel %vm711_vm1, 1.0, %v12484_v23  ;;  %vm677_vm1 = vcmp.eq.s32.totalorder %v7496_v52, %v7698_v10  ;;  %v162_v10 = vld [vmem:[%s12461_s1 + $0xa0] sm:$0xff] }
 0x13a   :  { %627 = vperm.xlu2 %6821, %v136_v27   ;;  %v139_v27 = vld [vmem:[%s12459_s0 + $0x3d0] sm:$0xff] }
 0x13b   :  { %624 = vperm.xlu1 %6820, %v135_v49   ;;  %621 = vperm.xlu0 %6819, %v134_v11  }
 0x13c   :  { %v7983_v34 = vpop.permute.xlu2 %528 }
 0x13d   :  { %v7986_v20 = vpop.permute.xlu1 %498  ;;  %vm730_vm12 = vcmp.eq.s32.totalorder %v7496_v52, %v7983_v34  ;;  %v195_v34 = vld [vmem:[%s12461_s1 + $0x1a8] sm:$0xff] }
 0x13e   :  { %v7988_v40 = vpop.permute.xlu0 %495 }
 0x13f   :  { %vm719_vm2 = vcmp.eq.s32.totalorder %v7496_v52, %v7988_v40  ;;  %v161_v40 = vld [vmem:[%s12461_s1 + $0x98] sm:$0xff] }
 0x140   :  { %6338 = vmatmul.msk.f32.gmra.mxu0 %vm1521_vm0, %v6213_v7  ;;  %v8009_v7 = vpop.f32.mrf.mxu0 }
 0x141   :  { %6380 = vmatmul.msk.f32.gmra.mxu2 %vm1521_vm0, %v6255_v59  ;;  %12486 = vst [vmem:[#allocation13_spill] sm:$0xff] %v8009_v7  ;;  %v140_v59 = vld [vmem:[%s12459_s0 + $0x3d8] sm:$0xff]  ;;  %v6215_v7 = vsel %vm671_vm4, 1.0, %v12484_v23  ;;  %vm720_vm4 = vcmp.eq.s32.totalorder %v7496_v52, %v7986_v20 }
 0x142   :  { %636 = vperm.xlu2 %6821, %v139_v27   ;;  %v142_v27 = vld [vmem:[%s12461_s1] sm:$0xff]  ;;  %v6264_v20 = vsel %vm720_vm4, 1.0, %v12484_v23  ;;  %vm727_vm4 = vcmp.eq.s32.totalorder %v7496_v52, %v7959_v42 }
 0x143   :  { %633 = vperm.xlu1 %6820, %v138_v48   ;;  %630 = vperm.xlu0 %6819, %v137_v4   ;;  %v186_v42 = vld [vmem:[%s12461_s1 + $0x160] sm:$0xff] }
 0x144   :  { %v8005_v49 = vpop.permute.xlu2 %537 }
 0x145   :  { %v8011_v11 = vpop.permute.xlu1 %507 }
 0x146   :  { %v8013_v18 = vpop.permute.xlu0 %504  ;;  %vm723_vm10 = vcmp.eq.s32.totalorder %v7496_v52, %v8011_v11  ;;  %v174_v11 = vld [vmem:[%s12461_s1 + $0x100] sm:$0xff] }
 0x147   :  { %vm722_vm8 = vcmp.eq.s32.totalorder %v7496_v52, %v8013_v18  ;;  %v171_v18 = vld [vmem:[%s12461_s1 + $0xe8] sm:$0xff] }
 0x148   :  { %6339 = vmatmul.msk.f32.gmra.mxu0 %vm1521_vm0, %v6214_v31  ;;  %v8039_v54 = vpop.f32.mrf.mxu0 }
 0x149   :  { %6381 = vmatmul.msk.f32.gmra.mxu2 %vm1521_vm0, %v6256_v25  ;;  %12487 = vst [vmem:[#allocation14_spill] sm:$0xff] %v8039_v54  ;;  %v143_v25 = vld [vmem:[%s12461_s1 + $0x8] sm:$0xff]  ;;  %v6216_v54 = vsel %vm672_vm6, 1.0, %v12484_v23  ;;  %vm721_vm6 = vcmp.eq.s32.totalorder %v7496_v52, %v7914_v22 }
 0x14a   :  { %770 = vperm.xlu2 %6821, %v142_v27   ;;  %v145_v27 = vld [vmem:[%s12461_s1 + $0x18] sm:$0xff]  ;;  %v167_v22 = vld [vmem:[%s12461_s1 + $0xc8] sm:$0xff] }
 0x14b   :  { %642 = vperm.xlu1 %6820, %v141_v44   ;;  %639 = vperm.xlu0 %6819, %v140_v59  }
 0x14c   :  { %v8030_v48 = vpop.permute.xlu2 %546 }
 0x14d   :  { %v8034_v31 = vpop.permute.xlu1 %516 }
 0x14e   :  { %v8036_v4 = vpop.permute.xlu0 %513 }
 0x14f   :  { %vm725_vm15 = vcmp.eq.s32.totalorder %v7496_v52, %v8036_v4  ;;  %v179_v4 = vld [vmem:[%s12461_s1 + $0x128] sm:$0xff] }
 0x150   :  { %6340 = vmatmul.msk.f32.gmra.mxu0 %vm1521_vm0, %v6215_v7 }
 0x151   :  { %6382 = vmatmul.msk.f32.gmra.mxu2 %vm1521_vm0, %v6257_v58  ;;  %v6258_v58 = vsel %vm714_vm7, 1.0, %v12484_v23  ;;  %vm680_vm7 = vcmp.eq.s32.totalorder %v7496_v52, %v7717_v17  ;;  %v6266_v17 = vsel %vm722_vm8, 1.0, %v12484_v23  ;;  %vm687_vm8 = vcmp.eq.s32.totalorder %v7496_v52, %v7753_v37 }
 0x152   :  { %779 = vperm.xlu2 %6821, %v145_v27   ;;  %v148_v27 = vld [vmem:[%s12461_s1 + $0x30] sm:$0xff] }
 0x153   :  { %776 = vperm.xlu1 %6820, %v144_v5   ;;  %773 = vperm.xlu0 %6819, %v143_v25   ;;  %v8075_v5 = vpop.f32.mrf.mxu0 }
 0x154   :  { %v8055_v44 = vpop.permute.xlu2 %555  ;;  %12488 = vst [vmem:[#allocation15_spill] sm:$0xff] %v8075_v5 }
 0x155   :  { %v8059_v7 = vpop.permute.xlu1 %525 }
 0x156   :  { %v8061_v59 = vpop.permute.xlu0 %522 }
 0x158   :  { %6341 = vmatmul.msk.f32.gmra.mxu0 %vm1521_vm0, %v6216_v54 }
 0x159   :  { %6383 = vmatmul.msk.f32.gmra.mxu2 %vm1521_vm0, %v6258_v58  ;;  %v6259_v58 = vsel %vm715_vm9, 1.0, %v12484_v23  ;;  %vm681_vm9 = vcmp.eq.s32.totalorder %v7496_v52, %v7715_v16  ;;  %v6267_v16 = vsel %vm723_vm10, 1.0, %v12484_v23 }
 0x15a   :  { %788 = vperm.xlu2 %6821, %v148_v27   ;;  %v151_v27 = vld [vmem:[%s12461_s1 + $0x48] sm:$0xff] }
 0x15b   :  { %785 = vperm.xlu1 %6820, %v147_v57   ;;  %782 = vperm.xlu0 %6819, %v146_v41   ;;  %v8101_v57 = vpop.f32.mrf.mxu0 }
 0x15c   :  { %v8080_v54 = vpop.permute.xlu2 %564  ;;  %12489 = vst [vmem:[#allocation16_spill] sm:$0xff] %v8101_v57 }
 0x15d   :  { %v8084_v25 = vpop.permute.xlu1 %534 }
 0x15e   :  { %v8086_v63 = vpop.permute.xlu0 %531 }
 0x160   :  { %6342 = vmatmul.msk.f32.gmra.mxu0 %vm1521_vm0, %v6217_v14 }
 0x161   :  { %6384 = vmatmul.msk.f32.gmra.mxu2 %vm1521_vm0, %v6259_v58  ;;  %v6260_v58 = vsel %vm716_vm11, 1.0, %v12484_v23  ;;  %vm682_vm11 = vcmp.eq.s32.totalorder %v7496_v52, %v7656_v55  ;;  %v178_v55 = vld [vmem:[%s12461_s1 + $0x120] sm:$0xff] }
 0x162   :  { %797 = vperm.xlu2 %6821, %v151_v27   ;;  %v154_v27 = vld [vmem:[%s12461_s1 + $0x60] sm:$0xff] }
 0x163   :  { %794 = vperm.xlu1 %6820, %v150_v32   ;;  %791 = vperm.xlu0 %6819, %v149_v6  }
 0x164   :  { %v8105_v14 = vpop.permute.xlu2 %573 }
 0x165   :  { %v8109_v41 = vpop.permute.xlu1 %543 }
 0x166   :  { %v8111_v5 = vpop.permute.xlu0 %540 }
 0x168   :  { %6343 = vmatmul.msk.f32.gmra.mxu0 %vm1521_vm0, %v6218_v12  ;;  %v8132_v12 = vpop.f32.mrf.mxu0 }
 0x169   :  { %6385 = vmatmul.msk.f32.gmra.mxu2 %vm1521_vm0, %v6260_v58  ;;  %12491 = vst [vmem:[#allocation18_spill] sm:$0xff] %v8132_v12  ;;  %v155_v58 = vld [vmem:[%s12461_s1 + $0x68] sm:$0xff]  ;;  %v6220_v12 = vsel %vm676_vm14, 1.0, %v12484_v23  ;;  %vm683_vm14 = vcmp.eq.s32.totalorder %v7496_v52, %v7736_v29  ;;  %v6269_v29 = vsel %vm725_vm15, 1.0, %v12484_v23  ;;  %vm731_vm15 = vcmp.eq.s32.totalorder %v7496_v52, %v8086_v63  ;;  %v198_v63 = vld [vmem:[%s12461_s1 + $0x1c0] sm:$0xff] }
 0x16a   :  { %806 = vperm.xlu2 %6821, %v154_v27   ;;  %v157_v27 = vld [vmem:[%s12461_s1 + $0x78] sm:$0xff] }
 0x16b   :  { %803 = vperm.xlu1 %6820, %v153_v2   ;;  %800 = vperm.xlu0 %6819, %v152_v56  }
 0x16c   :  { %v8128_v32 = vpop.permute.xlu2 %582 }
 0x16d   :  { %12490 = vst [vmem:[#allocation17_spill] sm:$0xff] %v8128_v32  ;;  %v8134_v6 = vpop.permute.xlu1 %552 }
 0x16e   :  { %v8136_v57 = vpop.permute.xlu0 %549 }
 0x170   :  { %6344 = vmatmul.msk.f32.gmra.mxu0 %vm1521_vm0, %v6219_v26  ;;  %v8162_v32 = vpop.f32.mrf.mxu0 }
 0x171   :  { %6386 = vmatmul.msk.f32.gmra.mxu2 %vm1521_vm0, %v6261_v1  ;;  %12493 = vst [vmem:[#allocation20_spill] sm:$0xff] %v8162_v32  ;;  %v158_v1 = vld [vmem:[%s12461_s1 + $0x80] sm:$0xff]  ;;  %v6221_v32 = vsel %vm677_vm1, 1.0, %v12484_v23  ;;  %vm684_vm1 = vcmp.eq.s32.totalorder %v7496_v52, %v7734_v28 }
 0x172   :  { %815 = vperm.xlu2 %6821, %v157_v27   ;;  %v160_v27 = vld [vmem:[%s12461_s1 + $0x90] sm:$0xff] }
 0x173   :  { %812 = vperm.xlu1 %6820, %v156_v43   ;;  %809 = vperm.xlu0 %6819, %v155_v58  }
 0x174   :  { %v8153_v2 = vpop.permute.xlu2 %591 }
 0x175   :  { %12492 = vst [vmem:[#allocation19_spill] sm:$0xff] %v8153_v2  ;;  %v8157_v26 = vpop.permute.xlu1 %561 }
 0x176   :  { %v8159_v56 = vpop.permute.xlu0 %558 }
 0x178   :  { %6345 = vmatmul.msk.f32.gmra.mxu0 %vm1521_vm0, %v6220_v12 }
 0x179   :  { %6387 = vmatmul.msk.f32.gmra.mxu2 %vm1521_vm0, %v6262_v39  ;;  %v6263_v39 = vsel %vm719_vm2, 1.0, %v12484_v23  ;;  %vm726_vm2 = vcmp.eq.s32.totalorder %v7496_v52, %v8034_v31  ;;  %v182_v31 = vld [vmem:[%s12461_s1 + $0x140] sm:$0xff] }
 0x17a   :  { %824 = vperm.xlu2 %6821, %v160_v27   ;;  %v163_v27 = vld [vmem:[%s12461_s1 + $0xa8] sm:$0xff]  ;;  %v6270_v28 = vsel %vm726_vm2, 1.0, %v12484_v23  ;;  %vm690_vm2 = vcmp.eq.s32.totalorder %v7496_v52, %v7772_v50  ;;  %v202_v50 = vld [vmem:[%s12461_s1 + $0x1e0] sm:$0xff] }
 0x17b   :  { %821 = vperm.xlu1 %6820, %v159_v19   ;;  %818 = vperm.xlu0 %6819, %v158_v1   ;;  %v8198_v19 = vpop.f32.mrf.mxu0  ;;  %v2540_v1 = vld [vmem:[%s12462_s3 + $0x8] sm:$0xff] }
 0x17c   :  { %v8178_v43 = vpop.permute.xlu2 %600  ;;  %12495 = vst [vmem:[#allocation22_spill] sm:$0xff] %v8198_v19  ;;  %2930 = vmatpush.msra.mxu1 %v2540_v1  ;;  %6815 = vmatpush.msra.mxu3 %v2540_v1  ;;  %v164_v1 = vld [vmem:[%s12461_s1 + $0xb0] sm:$0xff] }
 0x17d   :  { %12494 = vst [vmem:[#allocation21_spill] sm:$0xff] %v8178_v43  ;;  %v8182_v12 = vpop.permute.xlu1 %570 }
 0x17e   :  { %v8184_v58 = vpop.permute.xlu0 %567 }
 0x180   :  { %6346 = vmatmul.msk.f32.gmra.mxu0 %vm1521_vm0, %v6221_v32 }
 0x181   :  { %6388 = vmatmul.msk.f32.gmra.mxu2 %vm1521_vm0, %v6263_v39 }
 0x182   :  { %833 = vperm.xlu2 %6821, %v163_v27   ;;  %v6222_v27 = vsel %vm678_vm3, 1.0, %v12484_v23  ;;  %vm685_vm3 = vcmp.eq.s32.totalorder %v7496_v52, %v7675_v0  ;;  %v6271_v0 = vsel %vm727_vm4, 1.0, %v12484_v23 }
 0x183   :  { %830 = vperm.xlu1 %6820, %v162_v10   ;;  %827 = vperm.xlu0 %6819, %v161_v40   ;;  %v2539_v10 = vld [vmem:[%s12462_s3] sm:$0xff]  ;;  %v165_v40 = vld [vmem:[%s12461_s1 + $0xb8] sm:$0xff]  ;;  %v8230_v19 = vpop.f32.mrf.mxu0 }
 0x184   :  { %v8203_v32 = vpop.permute.xlu2 %609  ;;  %2931 = vmatpush.msra.mxu1 %v2539_v10  ;;  %6816 = vmatpush.msra.mxu3 %v2539_v10  ;;  %12497 = vst [vmem:[#allocation24_spill] sm:$0xff] %v8230_v19  ;;  %v6265_v10 = vsel %vm721_vm6, 1.0, %v12484_v23  ;;  %vm728_vm6 = vcmp.eq.s32.totalorder %v7496_v52, %v8061_v59  ;;  %v189_v59 = vld [vmem:[%s12461_s1 + $0x178] sm:$0xff] }
 0x185   :  { %12496 = vst [vmem:[#allocation23_spill] sm:$0xff] %v8203_v32  ;;  %v8210_v43 = vpop.permute.xlu1 %579 }
 0x186   :  { %v8212_v39 = vpop.permute.xlu0 %576 }
 0x188   :  { %6347 = vmatmul.msk.f32.gmra.mxu0 %vm1521_vm0, %v6222_v27 }
 0x189   :  { %6389 = vmatmul.msk.f32.gmra.mxu2 %vm1521_vm0, %v6264_v20  ;;  %v6223_v20 = vsel %vm679_vm5, 1.0, %v12484_v23  ;;  %vm686_vm5 = vcmp.eq.s32.totalorder %v7496_v52, %v7755_v38  ;;  %v6272_v38 = vsel %vm728_vm6, 1.0, %v12484_v23  ;;  %vm733_vm6 = vcmp.eq.s32.totalorder %v7496_v52, %v8005_v49 }
 0x18a   :  { %842 = vperm.xlu2 %6821, %v166_v9   ;;  %v169_v9 = vld [vmem:[%s12461_s1 + $0xd8] sm:$0xff] }
 0x18b   :  { %839 = vperm.xlu1 %6820, %v165_v40   ;;  %836 = vperm.xlu0 %6819, %v164_v1   ;;  %v8261_v1 = vpop.f32.mrf.mxu0 }
 0x18c   :  { %v8234_v27 = vpop.permute.xlu2 %618  ;;  %12500 = vst [vmem:[#allocation27_spill] sm:$0xff] %v8261_v1  ;;  %v6225_v1 = vsel %vm681_vm9, 1.0, %v12484_v23  ;;  %vm729_vm9 = vcmp.eq.s32.totalorder %v7496_v52, %v8059_v7  ;;  %v192_v7 = vld [vmem:[%s12461_s1 + $0x190] sm:$0xff] }
 0x18d   :  { %12498 = vst [vmem:[#allocation25_spill] sm:$0xff] %v8234_v27  ;;  %v8238_v32 = vpop.permute.xlu1 %588  ;;  %v6224_v27 = vsel %vm680_vm7, 1.0, %v12484_v23  ;;  %v6273_v37 = vsel %vm729_vm9, 1.0, %v12484_v23  ;;  %vm734_vm9 = vcmp.eq.s32.totalorder %v7496_v52, %v8111_v5  ;;  %v207_v5 = vld [vmem:[%s12461_s1 + $0x208] sm:$0xff] }
 0x18e   :  { %v8240_v2 = vpop.permute.xlu0 %585 }
 0x190   :  { %6348 = vmatmul.msk.f32.gmra.mxu0 %vm1521_vm0, %v6223_v20 }
 0x191   :  { %6390 = vmatmul.msk.f32.gmra.mxu2 %vm1521_vm0, %v6265_v10  ;;  %v170_v10 = vld [vmem:[%s12461_s1 + $0xe0] sm:$0xff] }
 0x192   :  { %851 = vperm.xlu2 %6821, %v169_v9   ;;  %v172_v9 = vld [vmem:[%s12461_s1 + $0xf0] sm:$0xff] }
 0x193   :  { %848 = vperm.xlu1 %6820, %v168_v46   ;;  %845 = vperm.xlu0 %6819, %v167_v22  }
 0x194   :  { %v8257_v40 = vpop.permute.xlu2 %627 }
 0x195   :  { %12499 = vst [vmem:[#allocation26_spill] sm:$0xff] %v8257_v40  ;;  %v8263_v20 = vpop.permute.xlu1 %597  ;;  %v8291_v40 = vpop.f32.mrf.mxu0 }
 0x196   :  { %v8265_v19 = vpop.permute.xlu0 %594  ;;  %12502 = vst [vmem:[#allocation29_spill] sm:$0xff] %v8291_v40 }
 0x198   :  { %6349 = vmatmul.msk.f32.gmra.mxu0 %vm1521_vm0, %v6224_v27 }
 0x199   :  { %6391 = vmatmul.msk.f32.gmra.mxu2 %vm1521_vm0, %v6266_v17  ;;  %v173_v17 = vld [vmem:[%s12461_s1 + $0xf8] sm:$0xff] }
 0x19a   :  { %860 = vperm.xlu2 %6821, %v172_v9   ;;  %v175_v9 = vld [vmem:[%s12461_s1 + $0x108] sm:$0xff] }
 0x19b   :  { %857 = vperm.xlu1 %6820, %v171_v18   ;;  %854 = vperm.xlu0 %6819, %v170_v10  }
 0x19c   :  { %v8282_v46 = vpop.permute.xlu2 %636 }
 0x19d   :  { %12501 = vst [vmem:[#allocation28_spill] sm:$0xff] %v8282_v46  ;;  %v8286_v27 = vpop.permute.xlu1 %606 }
 0x19e   :  { %v8288_v22 = vpop.permute.xlu0 %603 }
 0x1a0   :  { %6350 = vmatmul.msk.f32.gmra.mxu0 %vm1521_vm0, %v6225_v1 }
 0x1a1   :  { %6392 = vmatmul.msk.f32.gmra.mxu2 %vm1521_vm0, %v6267_v16 }
 0x1a2   :  { %869 = vperm.xlu2 %6821, %v175_v9   ;;  %v6226_v9 = vsel %vm682_vm11, 1.0, %v12484_v23  ;;  %vm688_vm11 = vcmp.eq.s32.totalorder %v7496_v52, %v7694_v8  ;;  %v196_v8 = vld [vmem:[%s12461_s1 + $0x1b0] sm:$0xff] }
 0x1a3   :  { %866 = vperm.xlu1 %6820, %v174_v11   ;;  %863 = vperm.xlu0 %6819, %v173_v17   ;;  %v177_v11 = vld [vmem:[%s12461_s1 + $0x118] sm:$0xff]  ;;  %v176_v17 = vld [vmem:[%s12461_s1 + $0x110] sm:$0xff] }
 0x1a4   :  { %v8307_v18 = vpop.f32.mrf.mxu2  ;;  %v771_v1 = vpop.permute.xlu2 %770 }
 0x1a5   :  { %12503 = vst [vmem:[#allocation30_spill] sm:$0xff] %v8307_v18  ;;  %vm1144_vm13 = vcmp.eq.s32.totalorder %v7496_v52, %v771_v1  ;;  %v8312_v10 = vpop.permute.xlu1 %615  ;;  %v8330_v1 = vpop.f32.mrf.mxu0 }
 0x1a6   :  { %v8314_v46 = vpop.permute.xlu0 %612  ;;  %v6438_v16 = vsel %vm1144_vm13, 1.0, %v12484_v23  ;;  %12504 = vst [vmem:[#allocation31_spill] sm:$0xff] %v8330_v1  ;;  %v6227_v1 = vsel %vm683_vm14, 1.0, %v12484_v23  ;;  %vm689_vm14 = vcmp.eq.s32.totalorder %v7496_v52, %v7774_v51  ;;  %v6275_v51 = vsel %vm731_vm15, 1.0, %v12484_v23 }
 0x1a7   :  { %6563 = vmatmul.msk.f32.vlgmr.msra.gmra.mxu1 %vm1521_vm0, %v6438_v16  ;;  %vm736_vm15 = vcmp.eq.s32.totalorder %v7496_v52, %v8030_v48  ;;  %v213_v48 = vld [vmem:[%s12461_s1 + $0x238] sm:$0xff] }
 0x1a8   :  { %6351 = vmatmul.msk.f32.gmra.mxu0 %vm1521_vm0, %v6226_v9 }
 0x1a9   :  { %6393 = vmatmul.msk.f32.gmra.mxu2 %vm1521_vm0, %v6268_v33  ;;  %v180_v33 = vld [vmem:[%s12461_s1 + $0x130] sm:$0xff] }
 0x1aa   :  { %878 = vperm.xlu2 %6821, %v178_v55   ;;  %v181_v55 = vld [vmem:[%s12461_s1 + $0x138] sm:$0xff] }
 0x1ab   :  { %875 = vperm.xlu1 %6820, %v177_v11   ;;  %872 = vperm.xlu0 %6819, %v176_v17  }
 0x1ac   :  { %v8335_v16 = vpop.f32.mrf.mxu2  ;;  %v8337_v9 = vpop.permute.xlu2 %779 }
 0x1ad   :  { %12505 = vst [vmem:[#allocation32_spill] sm:$0xff] %v8335_v16  ;;  %v8341_v18 = vpop.permute.xlu1 %624  ;;  %v8358_v11 = vpop.f32.mrf.mxu0  ;;  %vm1147_vm13 = vcmp.eq.s32.totalorder %v7496_v52, %v8337_v9  ;;  %v194_v9 = vld [vmem:[%s12461_s1 + $0x1a0] sm:$0xff] }
 0x1ae   :  { %12506 = vst [vmem:[#allocation33_spill] sm:$0xff] %v8341_v18  ;;  %v8343_v40 = vpop.permute.xlu0 %621 }
 0x1af   :  { %12507 = vst [vmem:[#allocation34_spill] sm:$0xff] %v8358_v11 }
 0x1b0   :  { %6352 = vmatmul.msk.f32.gmra.mxu0 %vm1521_vm0, %v6227_v1 }
 0x1b1   :  { %6394 = vmatmul.msk.f32.gmra.mxu2 %vm1521_vm0, %v6269_v29  ;;  %v184_v29 = vld [vmem:[%s12461_s1 + $0x150] sm:$0xff] }
 0x1b2   :  { %887 = vperm.xlu2 %6821, %v181_v55   ;;  %v6228_v55 = vsel %vm684_vm1, 1.0, %v12484_v23 }
 0x1b3   :  { %884 = vperm.xlu1 %6820, %v180_v33   ;;  %881 = vperm.xlu0 %6819, %v179_v4   ;;  %v183_v33 = vld [vmem:[%s12461_s1 + $0x148] sm:$0xff] }
 0x1b4   :  { %v8362_v17 = vpop.f32.mrf.mxu2  ;;  %v8364_v1 = vpop.permute.xlu2 %788 }
 0x1b5   :  { %12508 = vst [vmem:[#allocation35_spill] sm:$0xff] %v8362_v17  ;;  %v8368_v16 = vpop.permute.xlu1 %633  ;;  %v8393_v17 = vpop.f32.mrf.mxu0 }
 0x1b6   :  { %12509 = vst [vmem:[#allocation36_spill] sm:$0xff] %v8368_v16  ;;  %v8370_v18 = vpop.permute.xlu0 %630 }
 0x1b7   :  { %12511 = vst [vmem:[#allocation38_spill] sm:$0xff] %v8393_v17 }
 0x1b8   :  { %6353 = vmatmul.msk.f32.gmra.mxu0 %vm1521_vm0, %v6228_v55 }
 0x1b9   :  { %6395 = vmatmul.msk.f32.gmra.mxu2 %vm1521_vm0, %v6270_v28  ;;  %v187_v28 = vld [vmem:[%s12461_s1 + $0x168] sm:$0xff] }
 0x1ba   :  { %896 = vperm.xlu2 %6821, %v184_v29   ;;  %v6229_v29 = vsel %vm685_vm3, 1.0, %v12484_v23  ;;  %vm732_vm3 = vcmp.eq.s32.totalorder %v7496_v52, %v8084_v25 }
 0x1bb   :  { %893 = vperm.xlu1 %6820, %v183_v33   ;;  %890 = vperm.xlu0 %6819, %v182_v31   ;;  %v185_v33 = vld [vmem:[%s12461_s1 + $0x158] sm:$0xff] }
 0x1bc   :  { %v8387_v4 = vpop.f32.mrf.mxu2  ;;  %v8389_v55 = vpop.permute.xlu2 %797 }
 0x1bd   :  { %12510 = vst [vmem:[#allocation37_spill] sm:$0xff] %v8387_v4  ;;  %v8395_v11 = vpop.permute.xlu1 %642  ;;  %v8421_v17 = vpop.f32.mrf.mxu0 }
 0x1be   :  { %12512 = vst [vmem:[#allocation39_spill] sm:$0xff] %v8395_v11  ;;  %v8397_v16 = vpop.permute.xlu0 %639 }
 0x1bf   :  { %12513 = vst [vmem:[#allocation40_spill] sm:$0xff] %v8397_v16  ;;  %v6230_v16 = vsel %vm686_vm5, 1.0, %v12484_v23  ;;  %vm691_vm5 = vcmp.eq.s32.totalorder %v7496_v52, %v7713_v15  ;;  %v205_v15 = vld [vmem:[%s12461_s1 + $0x1f8] sm:$0xff] }
 0x1c0   :  { %6354 = vmatmul.msk.f32.gmra.mxu0 %vm1521_vm0, %v6229_v29 }
 0x1c1   :  { %6396 = vmatmul.msk.f32.gmra.mxu2 %vm1521_vm0, %v6271_v0 }
 0x1c2   :  { %905 = vperm.xlu2 %6821, %v187_v28   ;;  %v190_v28 = vld [vmem:[%s12461_s1 + $0x180] sm:$0xff] }
 0x1c3   :  { %902 = vperm.xlu1 %6820, %v186_v42   ;;  %899 = vperm.xlu0 %6819, %v185_v33   ;;  %v188_v42 = vld [vmem:[%s12461_s1 + $0x170] sm:$0xff] }
 0x1c4   :  { %v8414_v31 = vpop.f32.mrf.mxu2  ;;  %v8416_v29 = vpop.permute.xlu2 %806 }
 0x1c5   :  { %12514 = vst [vmem:[#allocation41_spill] sm:$0xff] %v8414_v31  ;;  %v777_v4 = vpop.permute.xlu1 %776 }
 0x1c6   :  { %v774_v11 = vpop.permute.xlu0 %773  ;;  %vm1146_vm10 = vcmp.eq.s32.totalorder %v7496_v52, %v777_v4  ;;  %v191_v4 = vld [vmem:[%s12461_s1 + $0x188] sm:$0xff] }
 0x1c7   :  { %vm1145_vm7 = vcmp.eq.s32.totalorder %v7496_v52, %v774_v11 }
 0x1c8   :  { %6355 = vmatmul.msk.f32.gmra.mxu0 %vm1521_vm0, %v6230_v16  ;;  %v6439_v0 = vsel %vm1145_vm7, 1.0, %v12484_v23  ;;  %vm1150_vm7 = vcmp.eq.s32.totalorder %v7496_v52, %v8364_v1  ;;  %v204_v1 = vld [vmem:[%s12461_s1 + $0x1f0] sm:$0xff] }
 0x1c9   :  { %6397 = vmatmul.msk.f32.gmra.mxu2 %vm1521_vm0, %v6272_v38  ;;  %6564 = vmatmul.msk.f32.gmra.mxu1 %vm1521_vm0, %v6439_v0  ;;  %v6231_v0 = vsel %vm687_vm8, 1.0, %v12484_v23  ;;  %v6444_v49 = vsel %vm1150_vm7, 1.0, %v12484_v23  ;;  %vm692_vm8 = vcmp.eq.s32.totalorder %v7496_v52, %v7795_v3  ;;  %v6278_v3 = vsel %vm734_vm9, 1.0, %v12484_v23 }
 0x1ca   :  { %914 = vperm.xlu2 %6821, %v190_v28   ;;  %v193_v28 = vld [vmem:[%s12461_s1 + $0x198] sm:$0xff]  ;;  %vm739_vm9 = vcmp.eq.s32.totalorder %v7496_v52, %v8055_v44  ;;  %v222_v44 = vld [vmem:[%s12461_s1 + $0x280] sm:$0xff] }
 0x1cb   :  { %911 = vperm.xlu1 %6820, %v189_v59   ;;  %908 = vperm.xlu0 %6819, %v188_v42   ;;  %v6440_v59 = vsel %vm1146_vm10, 1.0, %v12484_v23  ;;  %v8462_v42 = vpop.f32.mrf.mxu0 }
 0x1cc   :  { %v8440_v16 = vpop.f32.mrf.mxu2  ;;  %v8442_v11 = vpop.permute.xlu2 %815 }
 0x1cd   :  { %12515 = vst [vmem:[#allocation42_spill] sm:$0xff] %v8440_v16  ;;  %v8447_v33 = vpop.permute.xlu1 %785 }
 0x1ce   :  { %v783_v38 = vpop.permute.xlu0 %782  ;;  %vm1149_vm4 = vcmp.eq.s32.totalorder %v7496_v52, %v8447_v33  ;;  %v201_v33 = vld [vmem:[%s12461_s1 + $0x1d8] sm:$0xff] }
 0x1cf   :  { %vm1148_vm1 = vcmp.eq.s32.totalorder %v7496_v52, %v783_v38  ;;  %v197_v38 = vld [vmem:[%s12461_s1 + $0x1b8] sm:$0xff]  ;;  %v6443_v25 = vsel %vm1149_vm4, 1.0, %v12484_v23 }
 0x1d0   :  { %6356 = vmatmul.msk.f32.gmra.mxu0 %vm1521_vm0, %v6231_v0 }
 0x1d1   :  { %6398 = vmatmul.msk.f32.gmra.mxu2 %vm1521_vm0, %v6273_v37  ;;  %6565 = vmatmul.msk.f32.gmra.mxu1 %vm1521_vm0, %v6440_v59  ;;  %v6274_v59 = vsel %vm730_vm12, 1.0, %v12484_v23  ;;  %vm735_vm12 = vcmp.eq.s32.totalorder %v7496_v52, %v8109_v41  ;;  %v210_v41 = vld [vmem:[%s12461_s1 + $0x220] sm:$0xff] }
 0x1d2   :  { %923 = vperm.xlu2 %6821, %v193_v28   ;;  %v6232_v28 = vsel %vm688_vm11, 1.0, %v12484_v23  ;;  %vm693_vm11 = vcmp.eq.s32.totalorder %v7496_v52, %v7791_v62  ;;  %v6279_v62 = vsel %vm735_vm12, 1.0, %v12484_v23  ;;  %vm740_vm12 = vcmp.eq.s32.totalorder %v7496_v52, %v8159_v56 }
 0x1d3   :  { %920 = vperm.xlu1 %6820, %v192_v7   ;;  %917 = vperm.xlu0 %6819, %v191_v4   ;;  %v6441_v7 = vsel %vm1147_vm13, 1.0, %v12484_v23  ;;  %v8495_v4 = vpop.f32.mrf.mxu0 }
 0x1d4   :  { %v8468_v0 = vpop.f32.mrf.mxu2  ;;  %v8470_v16 = vpop.permute.xlu2 %824  ;;  %12517 = vst [vmem:[#allocation44_spill] sm:$0xff] %v8495_v4 }
 0x1d5   :  { %12516 = vst [vmem:[#allocation43_spill] sm:$0xff] %v8468_v0  ;;  %v8476_v31 = vpop.permute.xlu1 %794 }
 0x1d6   :  { %v8478_v37 = vpop.permute.xlu0 %791  ;;  %vm1152_vm13 = vcmp.eq.s32.totalorder %v7496_v52, %v8476_v31  ;;  %v209_v31 = vld [vmem:[%s12461_s1 + $0x218] sm:$0xff] }
 0x1d7   :  { %vm1151_vm10 = vcmp.eq.s32.totalorder %v7496_v52, %v8478_v37  ;;  %v206_v37 = vld [vmem:[%s12461_s1 + $0x200] sm:$0xff] }
 0x1d8   :  { %6357 = vmatmul.msk.f32.gmra.mxu0 %vm1521_vm0, %v6232_v28 }
 0x1d9   :  { %6399 = vmatmul.msk.f32.gmra.mxu2 %vm1521_vm0, %v6274_v59  ;;  %6566 = vmatmul.msk.f32.gmra.mxu1 %vm1521_vm0, %v6441_v7 }
 0x1da   :  { %932 = vperm.xlu2 %6821, %v196_v8   ;;  %v6233_v8 = vsel %vm689_vm14, 1.0, %v12484_v23  ;;  %vm694_vm14 = vcmp.eq.s32.totalorder %v7496_v52, %v7732_v24  ;;  %v214_v24 = vld [vmem:[%s12461_s1 + $0x240] sm:$0xff] }
 0x1db   :  { %929 = vperm.xlu1 %6820, %v195_v34   ;;  %926 = vperm.xlu0 %6819, %v194_v9   ;;  %v199_v34 = vld [vmem:[%s12461_s1 + $0x1c8] sm:$0xff]  ;;  %v6442_v9 = vsel %vm1148_vm1, 1.0, %v12484_v23  ;;  %vm1153_vm1 = vcmp.eq.s32.totalorder %v7496_v52, %v8389_v55  ;;  %v212_v55 = vld [vmem:[%s12461_s1 + $0x230] sm:$0xff] }
 0x1dc   :  { %v8499_v28 = vpop.f32.mrf.mxu2  ;;  %v8501_v0 = vpop.permute.xlu2 %833 }
 0x1dd   :  { %12518 = vst [vmem:[#allocation45_spill] sm:$0xff] %v8499_v28  ;;  %v8506_v59 = vpop.permute.xlu1 %803  ;;  %v8531_v28 = vpop.f32.mrf.mxu0 }
 0x1de   :  { %v8508_v7 = vpop.permute.xlu0 %800  ;;  %12519 = vst [vmem:[#allocation46_spill] sm:$0xff] %v8531_v28  ;;  %vm1155_vm7 = vcmp.eq.s32.totalorder %v7496_v52, %v8506_v59  ;;  %v219_v59 = vld [vmem:[%s12461_s1 + $0x268] sm:$0xff] }
 0x1df   :  { %vm1154_vm4 = vcmp.eq.s32.totalorder %v7496_v52, %v8508_v7  ;;  %v216_v7 = vld [vmem:[%s12461_s1 + $0x250] sm:$0xff] }
 0x1e0   :  { %6358 = vmatmul.msk.f32.gmra.mxu0 %vm1521_vm0, %v6233_v8 }
 0x1e1   :  { %6400 = vmatmul.msk.f32.gmra.mxu2 %vm1521_vm0, %v6275_v51  ;;  %6567 = vmatmul.msk.f32.gmra.mxu1 %vm1521_vm0, %v6442_v9  ;;  %v6234_v9 = vsel %vm690_vm2, 1.0, %v12484_v23  ;;  %vm695_vm2 = vcmp.eq.s32.totalorder %v7496_v52, %v7816_v53  ;;  %v217_v53 = vld [vmem:[%s12461_s1 + $0x258] sm:$0xff] }
 0x1e2   :  { %941 = vperm.xlu2 %6821, %v199_v34  }
 0x1e3   :  { %938 = vperm.xlu1 %6820, %v198_v63   ;;  %935 = vperm.xlu0 %6819, %v197_v38   ;;  %v6276_v63 = vsel %vm732_vm3, 1.0, %v12484_v23  ;;  %v200_v38 = vld [vmem:[%s12461_s1 + $0x1d0] sm:$0xff]  ;;  %vm737_vm3 = vcmp.eq.s32.totalorder %v7496_v52, %v8136_v57  ;;  %v6448_v57 = vsel %vm1154_vm4, 1.0, %v12484_v23  ;;  %vm1159_vm4 = vcmp.eq.s32.totalorder %v7496_v52, %v8442_v11 }
 0x1e4   :  { %v8527_v8 = vpop.permute.xlu2 %842  ;;  %v8537_v51 = vpop.f32.mrf.mxu2  ;;  %v6453_v11 = vsel %vm1159_vm4, 1.0, %v12484_v23  ;;  %vm747_vm4 = vcmp.eq.s32.totalorder %v7496_v52, %v8210_v43 }
 0x1e5   :  { %v8535_v4 = vpop.permute.xlu1 %812  ;;  %12520 = vst [vmem:[#allocation47_spill] sm:$0xff] %v8537_v51  ;;  %v6291_v43 = vsel %vm747_vm4, 1.0, %v12484_v23 }
 0x1e6   :  { %v8539_v34 = vpop.permute.xlu0 %809 }
 0x1e8   :  { %6359 = vmatmul.msk.f32.gmra.mxu0 %vm1521_vm0, %v6234_v9 }
 0x1e9   :  { %6401 = vmatmul.msk.f32.gmra.mxu2 %vm1521_vm0, %v6276_v63  ;;  %6568 = vmatmul.msk.f32.gmra.mxu1 %vm1521_vm0, %v6443_v25  ;;  %v6235_v63 = vsel %vm691_vm5, 1.0, %v12484_v23  ;;  %v6277_v25 = vsel %vm733_vm6, 1.0, %v12484_v23  ;;  %vm696_vm5 = vcmp.eq.s32.totalorder %v7496_v52, %v7812_v13  ;;  %vm738_vm6 = vcmp.eq.s32.totalorder %v7496_v52, %v8134_v6 }
 0x1ea   :  { %950 = vperm.xlu2 %6821, %v202_v50   ;;  %v8569_v50 = vpop.f32.mrf.mxu0  ;;  %v6282_v13 = vsel %vm738_vm6, 1.0, %v12484_v23  ;;  %v6449_v6 = vsel %vm1155_vm7, 1.0, %v12484_v23  ;;  %vm743_vm6 = vcmp.eq.s32.totalorder %v7496_v52, %v8184_v58 }
 0x1eb   :  { %947 = vperm.xlu1 %6820, %v201_v33   ;;  %944 = vperm.xlu0 %6819, %v200_v38   ;;  %12521 = vst [vmem:[#allocation48_spill] sm:$0xff] %v8569_v50  ;;  %v203_v38 = vld [vmem:[%s12461_s1 + $0x1e8] sm:$0xff] }
 0x1ec   :  { %v8558_v9 = vpop.permute.xlu2 %851  ;;  %v8575_v33 = vpop.f32.mrf.mxu2 }
 0x1ed   :  { %v8564_v51 = vpop.permute.xlu1 %821  ;;  %12522 = vst [vmem:[#allocation49_spill] sm:$0xff] %v8575_v33 }
 0x1ee   :  { %v8566_v28 = vpop.permute.xlu0 %818 }
 0x1ef   :  { %vm1160_vm7 = vcmp.eq.s32.totalorder %v7496_v52, %v8566_v28 }
 0x1f0   :  { %6360 = vmatmul.msk.f32.gmra.mxu0 %vm1521_vm0, %v6235_v63  ;;  %v6454_v28 = vsel %vm1160_vm7, 1.0, %v12484_v23 }
 0x1f1   :  { %6402 = vmatmul.msk.f32.gmra.mxu2 %vm1521_vm0, %v6277_v25  ;;  %6569 = vmatmul.msk.f32.gmra.mxu1 %vm1521_vm0, %v6444_v49  ;;  %v6236_v25 = vsel %vm692_vm8, 1.0, %v12484_v23  ;;  %v6445_v49 = vsel %vm1151_vm10, 1.0, %v12484_v23  ;;  %vm697_vm8 = vcmp.eq.s32.totalorder %v7496_v52, %v7751_v36  ;;  %vm1156_vm10 = vcmp.eq.s32.totalorder %v7496_v52, %v8416_v29  ;;  %v221_v29 = vld [vmem:[%s12461_s1 + $0x278] sm:$0xff] }
 0x1f2   :  { %959 = vperm.xlu2 %6821, %v205_v15   ;;  %v208_v15 = vld [vmem:[%s12461_s1 + $0x210] sm:$0xff]  ;;  %v6283_v36 = vsel %vm739_vm9, 1.0, %v12484_v23  ;;  %vm744_vm9 = vcmp.eq.s32.totalorder %v7496_v52, %v8182_v12 }
 0x1f3   :  { %956 = vperm.xlu1 %6820, %v204_v1   ;;  %953 = vperm.xlu0 %6819, %v203_v38   ;;  %v8612_v1 = vpop.f32.mrf.mxu0 }
 0x1f4   :  { %v8589_v63 = vpop.permute.xlu2 %860  ;;  %12523 = vst [vmem:[#allocation50_spill] sm:$0xff] %v8612_v1  ;;  %v8616_v38 = vpop.f32.mrf.mxu2 }
 0x1f5   :  { %v8595_v33 = vpop.permute.xlu1 %830  ;;  %12524 = vst [vmem:[#allocation51_spill] sm:$0xff] %v8616_v38 }
 0x1f6   :  { %v8597_v50 = vpop.permute.xlu0 %827 }
 0x1f8   :  { %6361 = vmatmul.msk.f32.gmra.mxu0 %vm1521_vm0, %v6236_v25 }
 0x1f9   :  { %6403 = vmatmul.msk.f32.gmra.mxu2 %vm1521_vm0, %v6278_v3  ;;  %6570 = vmatmul.msk.f32.gmra.mxu1 %vm1521_vm0, %v6445_v49  ;;  %v6237_v49 = vsel %vm693_vm11, 1.0, %v12484_v23  ;;  %vm698_vm11 = vcmp.eq.s32.totalorder %v7496_v52, %v7837_v35  ;;  %v6284_v35 = vsel %vm740_vm12, 1.0, %v12484_v23  ;;  %vm745_vm12 = vcmp.eq.s32.totalorder %v7496_v52, %v8105_v14 }
 0x1fa   :  { %968 = vperm.xlu2 %6821, %v208_v15   ;;  %v211_v15 = vld [vmem:[%s12461_s1 + $0x228] sm:$0xff]  ;;  %v6289_v14 = vsel %vm745_vm12, 1.0, %v12484_v23  ;;  %vm750_vm12 = vcmp.eq.s32.totalorder %v7496_v52, %v8238_v32 }
 0x1fb   :  { %965 = vperm.xlu1 %6820, %v207_v5   ;;  %962 = vperm.xlu0 %6819, %v206_v37   ;;  %v6446_v5 = vsel %vm1152_vm13, 1.0, %v12484_v23  ;;  %v8645_v37 = vpop.f32.mrf.mxu0  ;;  %vm1157_vm13 = vcmp.eq.s32.totalorder %v7496_v52, %v8539_v34  ;;  %v225_v34 = vld [vmem:[%s12461_s1 + $0x298] sm:$0xff]  ;;  %v255_v32 = vld [vmem:[%s12461_s1 + $0x388] sm:$0xff] }
 0x1fc   :  { %v8620_v25 = vpop.permute.xlu2 %869  ;;  %12525 = vst [vmem:[#allocation52_spill] sm:$0xff] %v8645_v37  ;;  %v6451_v56 = vsel %vm1157_vm13, 1.0, %v12484_v23  ;;  %vm1162_vm13 = vcmp.eq.s32.totalorder %v7496_v52, %v8470_v16 }
 0x1fd   :  { %v8626_v1 = vpop.permute.xlu1 %839  ;;  %v6456_v16 = vsel %vm1162_vm13, 1.0, %v12484_v23 }
 0x1fe   :  { %v8628_v3 = vpop.permute.xlu0 %836  ;;  %vm1167_vm13 = vcmp.eq.s32.totalorder %v7496_v52, %v8626_v1  ;;  %v254_v1 = vld [vmem:[%s12461_s1 + $0x380] sm:$0xff] }
 0x200   :  { %6362 = vmatmul.msk.f32.gmra.mxu0 %vm1521_vm0, %v6237_v49  ;;  %v8649_v49 = vpop.f32.mrf.mxu2 }
 0x201   :  { %6404 = vmatmul.msk.f32.gmra.mxu2 %vm1521_vm0, %v6279_v62  ;;  %6571 = vmatmul.msk.f32.gmra.mxu1 %vm1521_vm0, %v6446_v5  ;;  %12526 = vst [vmem:[#allocation53_spill] sm:$0xff] %v8649_v49  ;;  %v6238_v5 = vsel %vm694_vm14, 1.0, %v12484_v23  ;;  %vm699_vm14 = vcmp.eq.s32.totalorder %v7496_v52, %v7833_v30  ;;  %v229_v30 = vld [vmem:[%s12461_s1 + $0x2b8] sm:$0xff] }
 0x202   :  { %977 = vperm.xlu2 %6821, %v211_v15  }
 0x203   :  { %974 = vperm.xlu1 %6820, %v210_v41   ;;  %971 = vperm.xlu0 %6819, %v209_v31   ;;  %v6280_v41 = vsel %vm736_vm15, 1.0, %v12484_v23  ;;  %v6447_v31 = vsel %vm1153_vm1, 1.0, %v12484_v23  ;;  %v8682_v49 = vpop.f32.mrf.mxu0  ;;  %vm741_vm15 = vcmp.eq.s32.totalorder %v7496_v52, %v8157_v26  ;;  %vm1158_vm1 = vcmp.eq.s32.totalorder %v7496_v52, %v8535_v4  ;;  %v228_v4 = vld [vmem:[%s12461_s1 + $0x2b0] sm:$0xff] }
 0x204   :  { %v8651_v38 = vpop.permute.xlu2 %878  ;;  %12527 = vst [vmem:[#allocation54_spill] sm:$0xff] %v8682_v49  ;;  %v6452_v26 = vsel %vm1158_vm1, 1.0, %v12484_v23  ;;  %vm746_vm1 = vcmp.eq.s32.totalorder %v7496_v52, %v8212_v39 }
 0x205   :  { %v8657_v62 = vpop.permute.xlu1 %848 }
 0x206   :  { %v8659_v15 = vpop.permute.xlu0 %845 }
 0x207   :  { %vm1169_vm4 = vcmp.eq.s32.totalorder %v7496_v52, %v8659_v15  ;;  %v261_v15 = vld [vmem:[%s12461_s1 + $0x3b8] sm:$0xff] }
 0x208   :  { %6363 = vmatmul.msk.f32.gmra.mxu0 %vm1521_vm0, %v6238_v5 }
 0x209   :  { %6405 = vmatmul.msk.f32.gmra.mxu2 %vm1521_vm0, %v6280_v41  ;;  %6572 = vmatmul.msk.f32.gmra.mxu1 %vm1521_vm0, %v6447_v31  ;;  %v8688_v41 = vpop.f32.mrf.mxu2  ;;  %v6239_v31 = vsel %vm695_vm2, 1.0, %v12484_v23  ;;  %vm700_vm2 = vcmp.eq.s32.totalorder %v7496_v52, %v7770_v45  ;;  %v232_v45 = vld [vmem:[%s12461_s1 + $0x2d0] sm:$0xff] }
 0x20a   :  { %986 = vperm.xlu2 %6821, %v214_v24   ;;  %12528 = vst [vmem:[#allocation55_spill] sm:$0xff] %v8688_v41 }
 0x20b   :  { %983 = vperm.xlu1 %6820, %v213_v48   ;;  %980 = vperm.xlu0 %6819, %v212_v55   ;;  %v6281_v48 = vsel %vm737_vm3, 1.0, %v12484_v23  ;;  %v215_v55 = vld [vmem:[%s12461_s1 + $0x248] sm:$0xff]  ;;  %vm742_vm3 = vcmp.eq.s32.totalorder %v7496_v52, %v8080_v54 }
 0x20c   :  { %v8678_v5 = vpop.permute.xlu2 %887  ;;  %v6286_v54 = vsel %vm742_vm3, 1.0, %v12484_v23 }
 0x20d   :  { %v8686_v37 = vpop.permute.xlu1 %857 }
 0x20e   :  { %v8690_v24 = vpop.permute.xlu0 %854 }
 0x210   :  { %6364 = vmatmul.msk.f32.gmra.mxu0 %vm1521_vm0, %v6239_v31 }
 0x211   :  { %6406 = vmatmul.msk.f32.gmra.mxu2 %vm1521_vm0, %v6281_v48  ;;  %6573 = vmatmul.msk.f32.gmra.mxu1 %vm1521_vm0, %v6448_v57  ;;  %v6240_v48 = vsel %vm696_vm5, 1.0, %v12484_v23  ;;  %v8724_v57 = vpop.f32.mrf.mxu0  ;;  %vm701_vm5 = vcmp.eq.s32.totalorder %v7496_v52, %v7858_v47  ;;  %v235_v47 = vld [vmem:[%s12461_s1 + $0x2e8] sm:$0xff] }
 0x212   :  { %995 = vperm.xlu2 %6821, %v217_v53   ;;  %v220_v53 = vld [vmem:[%s12461_s1 + $0x270] sm:$0xff]  ;;  %12529 = vst [vmem:[#allocation56_spill] sm:$0xff] %v8724_v57 }
 0x213   :  { %992 = vperm.xlu1 %6820, %v216_v7   ;;  %989 = vperm.xlu0 %6819, %v215_v55   ;;  %v8726_v7 = vpop.f32.mrf.mxu2  ;;  %v218_v55 = vld [vmem:[%s12461_s1 + $0x260] sm:$0xff] }
 0x214   :  { %v8709_v31 = vpop.permute.xlu2 %896  ;;  %12530 = vst [vmem:[#allocation57_spill] sm:$0xff] %v8726_v7 }
 0x215   :  { %v8715_v41 = vpop.permute.xlu1 %866 }
 0x216   :  { %v8717_v49 = vpop.permute.xlu0 %863 }
 0x218   :  { %6365 = vmatmul.msk.f32.gmra.mxu0 %vm1521_vm0, %v6240_v48 }
 0x219   :  { %6407 = vmatmul.msk.f32.gmra.mxu2 %vm1521_vm0, %v6282_v13  ;;  %6574 = vmatmul.msk.f32.gmra.mxu1 %vm1521_vm0, %v6449_v6  ;;  %v6241_v13 = vsel %vm697_vm8, 1.0, %v12484_v23  ;;  %v6450_v6 = vsel %vm1156_vm10, 1.0, %v12484_v23  ;;  %vm702_vm8 = vcmp.eq.s32.totalorder %v7496_v52, %v7854_v61  ;;  %vm1161_vm10 = vcmp.eq.s32.totalorder %v7496_v52, %v8564_v51  ;;  %v238_v61 = vld [vmem:[%s12461_s1 + $0x300] sm:$0xff]  ;;  %v237_v51 = vld [vmem:[%s12461_s1 + $0x2f8] sm:$0xff] }
 0x21a   :  { %1004 = vperm.xlu2 %6821, %v220_v53   ;;  %v223_v53 = vld [vmem:[%s12461_s1 + $0x288] sm:$0xff]  ;;  %v6455_v12 = vsel %vm1161_vm10, 1.0, %v12484_v23  ;;  %vm1166_vm10 = vcmp.eq.s32.totalorder %v7496_v52, %v8628_v3 }
 0x21b   :  { %1001 = vperm.xlu1 %6820, %v219_v59   ;;  %998 = vperm.xlu0 %6819, %v218_v55   ;;  %v8765_v59 = vpop.f32.mrf.mxu0  ;;  %v8767_v55 = vpop.f32.mrf.mxu2  ;;  %v251_v3 = vld [vmem:[%s12461_s1 + $0x368] sm:$0xff] }
 0x21c   :  { %v8740_v48 = vpop.permute.xlu2 %905  ;;  %12531 = vst [vmem:[#allocation58_spill] sm:$0xff] %v8765_v59 }
 0x21d   :  { %v8746_v7 = vpop.permute.xlu1 %875  ;;  %12532 = vst [vmem:[#allocation59_spill] sm:$0xff] %v8767_v55  ;;  %v6242_v55 = vsel %vm698_vm11, 1.0, %v12484_v23  ;;  %vm703_vm11 = vcmp.eq.s32.totalorder %v7496_v52, %v7789_v60  ;;  %v241_v60 = vld [vmem:[%s12461_s1 + $0x318] sm:$0xff] }
 0x21e   :  { %v8748_v57 = vpop.permute.xlu0 %872 }
 0x220   :  { %6366 = vmatmul.msk.f32.gmra.mxu0 %vm1521_vm0, %v6241_v13 }
 0x221   :  { %6408 = vmatmul.msk.f32.gmra.mxu2 %vm1521_vm0, %v6283_v36  ;;  %6575 = vmatmul.msk.f32.gmra.mxu1 %vm1521_vm0, %v6450_v6 }
 0x222   :  { %1013 = vperm.xlu2 %6821, %v223_v53   ;;  %v226_v53 = vld [vmem:[%s12461_s1 + $0x2a0] sm:$0xff] }
 0x223   :  { %1010 = vperm.xlu1 %6820, %v222_v44   ;;  %1007 = vperm.xlu0 %6819, %v221_v29   ;;  %v224_v44 = vld [vmem:[%s12461_s1 + $0x290] sm:$0xff]  ;;  %v8798_v29 = vpop.f32.mrf.mxu0 }
 0x224   :  { %v8775_v13 = vpop.permute.xlu2 %914  ;;  %12533 = vst [vmem:[#allocation60_spill] sm:$0xff] %v8798_v29 }
 0x225   :  { %v8777_v36 = vpop.permute.xlu1 %884 }
 0x226   :  { %v8779_v6 = vpop.permute.xlu0 %881 }
 0x228   :  { %6367 = vmatmul.msk.f32.gmra.mxu0 %vm1521_vm0, %v6242_v55  ;;  %v8800_v55 = vpop.f32.mrf.mxu2 }
 0x229   :  { %6409 = vmatmul.msk.f32.gmra.mxu2 %vm1521_vm0, %v6284_v35  ;;  %6576 = vmatmul.msk.f32.gmra.mxu1 %vm1521_vm0, %v6451_v56  ;;  %12534 = vst [vmem:[#allocation61_spill] sm:$0xff] %v8800_v55  ;;  %v6243_v56 = vsel %vm699_vm14, 1.0, %v12484_v23 }
 0x22a   :  { %1022 = vperm.xlu2 %6821, %v226_v53  }
 0x22b   :  { %1019 = vperm.xlu1 %6820, %v225_v34   ;;  %1016 = vperm.xlu0 %6819, %v224_v44   ;;  %v6285_v34 = vsel %vm741_vm15, 1.0, %v12484_v23  ;;  %v227_v44 = vld [vmem:[%s12461_s1 + $0x2a8] sm:$0xff]  ;;  %v8837_v29 = vpop.f32.mrf.mxu0  ;;  %vm704_vm15 = vcmp.eq.s32.totalorder %v7496_v52, %v7879_v21  ;;  %v244_v21 = vld [vmem:[%s12461_s1 + $0x330] sm:$0xff] }
 0x22c   :  { %v8806_v59 = vpop.permute.xlu2 %923  ;;  %12536 = vst [vmem:[#allocation63_spill] sm:$0xff] %v8837_v29  ;;  %v8868_v29 = vpop.f32.mrf.mxu1 }
 0x22d   :  { %v8808_v35 = vpop.permute.xlu1 %893 }
 0x22e   :  { %v8810_v53 = vpop.permute.xlu0 %890 }
 0x230   :  { %6368 = vmatmul.msk.f32.gmra.mxu0 %vm1521_vm0, %v6243_v56 }
 0x231   :  { %6410 = vmatmul.msk.f32.gmra.mxu2 %vm1521_vm0, %v6285_v34  ;;  %6577 = vmatmul.msk.f32.gmra.mxu1 %vm1521_vm0, %v6452_v26  ;;  %v8842_v26 = vpop.f32.mrf.mxu2 }
 0x232   :  { %1031 = vperm.xlu2 %6821, %v229_v30   ;;  %v6244_v30 = vsel %vm700_vm2, 1.0, %v12484_v23  ;;  %12537 = vst [vmem:[#allocation64_spill] sm:$0xff] %v8842_v26  ;;  %vm1163_vm2 = vcmp.eq.s32.totalorder %v7496_v52, %v8597_v50  ;;  %v243_v50 = vld [vmem:[%s12461_s1 + $0x328] sm:$0xff] }
 0x233   :  { %1028 = vperm.xlu1 %6820, %v228_v4   ;;  %1025 = vperm.xlu0 %6819, %v227_v44   ;;  %v231_v4 = vld [vmem:[%s12461_s1 + $0x2c8] sm:$0xff]  ;;  %v230_v44 = vld [vmem:[%s12461_s1 + $0x2c0] sm:$0xff]  ;;  %v8877_v58 = vpop.f32.mrf.mxu0  ;;  %v6457_v39 = vsel %vm1163_vm2, 1.0, %v12484_v23 }
 0x234   :  { %v8833_v56 = vpop.permute.xlu2 %932  ;;  %12540 = vst [vmem:[#allocation67_spill] sm:$0xff] %v8877_v58 }
 0x235   :  { %12535 = vst [vmem:[#allocation62_spill] sm:$0xff] %v8833_v56  ;;  %v8835_v55 = vpop.permute.xlu1 %902 }
 0x236   :  { %v8839_v34 = vpop.permute.xlu0 %899 }
 0x238   :  { %6369 = vmatmul.msk.f32.gmra.mxu0 %vm1521_vm0, %v6244_v30 }
 0x239   :  { %6411 = vmatmul.msk.f32.gmra.mxu2 %vm1521_vm0, %v6286_v54  ;;  %6578 = vmatmul.msk.f32.gmra.mxu1 %vm1521_vm0, %v6453_v11  ;;  %v6287_v11 = vsel %vm743_vm6, 1.0, %v12484_v23 }
 0x23a   :  { %1040 = vperm.xlu2 %6821, %v232_v45   ;;  %v6245_v45 = vsel %vm701_vm5, 1.0, %v12484_v23  ;;  %vm1164_vm5 = vcmp.eq.s32.totalorder %v7496_v52, %v8595_v33 }
 0x23b   :  { %1037 = vperm.xlu1 %6820, %v231_v4   ;;  %1034 = vperm.xlu0 %6819, %v230_v44   ;;  %v234_v4 = vld [vmem:[%s12461_s1 + $0x2e0] sm:$0xff]  ;;  %v233_v44 = vld [vmem:[%s12461_s1 + $0x2d8] sm:$0xff]  ;;  %v6458_v33 = vsel %vm1164_vm5, 1.0, %v12484_v23 }
 0x23c   :  { %v8864_v30 = vpop.permute.xlu2 %941 }
 0x23d   :  { %12538 = vst [vmem:[#allocation65_spill] sm:$0xff] %v8864_v30  ;;  %v8866_v26 = vpop.permute.xlu1 %911 }
 0x23e   :  { %12539 = vst [vmem:[#allocation66_spill] sm:$0xff] %v8866_v26  ;;  %v8870_v54 = vpop.permute.xlu0 %908  ;;  %v8887_v26 = vpop.f32.mrf.mxu2 }
 0x23f   :  { %12541 = vst [vmem:[#allocation68_spill] sm:$0xff] %v8887_v26 }
 0x240   :  { %6370 = vmatmul.msk.f32.gmra.mxu0 %vm1521_vm0, %v6245_v45 }
 0x241   :  { %6412 = vmatmul.msk.f32.gmra.mxu2 %vm1521_vm0, %v6287_v11  ;;  %6579 = vmatmul.msk.f32.gmra.mxu1 %vm1521_vm0, %v6454_v28  ;;  %v6246_v11 = vsel %vm702_vm8, 1.0, %v12484_v23  ;;  %v6288_v28 = vsel %vm744_vm9, 1.0, %v12484_v23  ;;  %vm1165_vm8 = vcmp.eq.s32.totalorder %v7496_v52, %v8501_v0  ;;  %vm749_vm9 = vcmp.eq.s32.totalorder %v7496_v52, %v8240_v2  ;;  %v252_v2 = vld [vmem:[%s12461_s1 + $0x370] sm:$0xff] }
 0x242   :  { %1049 = vperm.xlu2 %6821, %v235_v47   ;;  %v6459_v0 = vsel %vm1165_vm8, 1.0, %v12484_v23 }
 0x243   :  { %1046 = vperm.xlu1 %6820, %v234_v4   ;;  %1043 = vperm.xlu0 %6819, %v233_v44   ;;  %v236_v4 = vld [vmem:[%s12461_s1 + $0x2f0] sm:$0xff]  ;;  %v8920_v44 = vpop.f32.mrf.mxu0 }
 0x244   :  { %v8897_v45 = vpop.permute.xlu2 %950  ;;  %12545 = vst [vmem:[#allocation72_spill] sm:$0xff] %v8920_v44 }
 0x245   :  { %12542 = vst [vmem:[#allocation69_spill] sm:$0xff] %v8897_v45  ;;  %v8899_v58 = vpop.permute.xlu1 %920 }
 0x246   :  { %12543 = vst [vmem:[#allocation70_spill] sm:$0xff] %v8899_v58  ;;  %v8901_v26 = vpop.f32.mrf.mxu1  ;;  %v8904_v47 = vpop.permute.xlu0 %917  ;;  %v12569_v58 = vld [vmem:[#allocation21_spill] sm:$0xff] }
 0x247   :  { %12544 = vst [vmem:[#allocation71_spill] sm:$0xff] %v8904_v47  ;;  %v8922_v47 = vpop.f32.mrf.mxu2 }
 0x248   :  { %6371 = vmatmul.msk.f32.gmra.mxu0 %vm1521_vm0, %v6246_v11  ;;  %12546 = vst [vmem:[#allocation73_spill] sm:$0xff] %v8922_v47  ;;  %v239_v47 = vld [vmem:[%s12461_s1 + $0x308] sm:$0xff] }
 0x249   :  { %6413 = vmatmul.msk.f32.gmra.mxu2 %vm1521_vm0, %v6288_v28  ;;  %6580 = vmatmul.msk.f32.gmra.mxu1 %vm1521_vm0, %v6455_v12 }
 0x24a   :  { %1058 = vperm.xlu2 %6821, %v238_v61   ;;  %v6247_v61 = vsel %vm703_vm11, 1.0, %v12484_v23 }
 0x24b   :  { %1055 = vperm.xlu1 %6820, %v237_v51   ;;  %1052 = vperm.xlu0 %6819, %v236_v4  }
 0x24c   :  { %v960_v11 = vpop.permute.xlu2 %959 }
 0x24d   :  { %v8930_v28 = vpop.permute.xlu1 %929  ;;  %vm1207_vm14 = vcmp.eq.s32.totalorder %v7496_v52, %v960_v11  ;;  %v240_v11 = vld [vmem:[%s12461_s1 + $0x310] sm:$0xff] }
 0x24e   :  { %12547 = vst [vmem:[#allocation74_spill] sm:$0xff] %v8930_v28  ;;  %v8933_v12 = vpop.f32.mrf.mxu1  ;;  %v8936_v51 = vpop.permute.xlu0 %926  ;;  %v6501_v4 = vsel %vm1207_vm14, 1.0, %v12484_v23 }
 0x24f   :  { %12548 = vst [vmem:[#allocation75_spill] sm:$0xff] %v8936_v51  ;;  %6626 = vmatmul.msk.f32.vlgmr.msra.gmra.mxu3 %vm1521_vm0, %v6501_v4  ;;  %v8962_v4 = vpop.f32.mrf.mxu2 }
 0x250   :  { %6372 = vmatmul.msk.f32.gmra.mxu0 %vm1521_vm0, %v6247_v61  ;;  %v8956_v61 = vpop.f32.mrf.mxu0  ;;  %12550 = vst [vmem:[#allocation77_spill] sm:$0xff] %v8962_v4  ;;  %v12553_v4 = vld [vmem:[#allocation7_spill] sm:$0xff] }
 0x251   :  { %6414 = vmatmul.msk.f32.gmra.mxu2 %vm1521_vm0, %v6289_v14  ;;  %6581 = vmatmul.msk.f32.gmra.mxu1 %vm1521_vm0, %v6456_v16  ;;  %12549 = vst [vmem:[#allocation76_spill] sm:$0xff] %v8956_v61  ;;  %v6290_v16 = vsel %vm746_vm1, 1.0, %v12484_v23  ;;  %vm705_vm3 = vcmp.eq.s32.totalorder %v7496_v52, %v12553_v4  ;;  %v247_v4 = vld [vmem:[%s12461_s1 + $0x348] sm:$0xff]  ;;  %vm1168_vm1 = vcmp.eq.s32.totalorder %v7496_v52, %v8527_v8  ;;  %v258_v8 = vld [vmem:[%s12461_s1 + $0x3a0] sm:$0xff] }
 0x252   :  { %1067 = vperm.xlu2 %6821, %v241_v60   ;;  %v6248_v60 = vsel %vm704_vm15, 1.0, %v12484_v23 }
 0x253   :  { %1064 = vperm.xlu1 %6820, %v240_v11   ;;  %1061 = vperm.xlu0 %6819, %v239_v47   ;;  %v242_v11 = vld [vmem:[%s12461_s1 + $0x320] sm:$0xff] }
 0x255   :  { %v8964_v44 = vpop.permute.xlu1 %938 }
 0x256   :  { %12551 = vst [vmem:[#allocation78_spill] sm:$0xff] %v8964_v44  ;;  %v8966_v14 = vpop.f32.mrf.mxu1  ;;  %v8969_v47 = vpop.permute.xlu0 %935 }
 0x257   :  { %12552 = vst [vmem:[#allocation79_spill] sm:$0xff] %v8969_v47 }
 0x258   :  { %6373 = vmatmul.msk.f32.gmra.mxu0 %vm1521_vm0, %v6248_v60  ;;  %v8993_v61 = vpop.f32.mrf.mxu0 }
 0x259   :  { %6415 = vmatmul.msk.f32.gmra.mxu2 %vm1521_vm0, %v6290_v16  ;;  %6582 = vmatmul.msk.f32.gmra.mxu1 %vm1521_vm0, %v6457_v39  ;;  %12555 = vst [vmem:[#allocation80_spill] sm:$0xff] %v8993_v61  ;;  %v6249_v16 = vsel %vm705_vm3, 1.0, %v12484_v23  ;;  %vm752_vm3 = vcmp.eq.s32.totalorder %v7496_v52, %v8265_v19  ;;  %v6463_v19 = vsel %vm1169_vm4, 1.0, %v12484_v23  ;;  %vm1174_vm4 = vcmp.eq.s32.totalorder %v7496_v52, %v8589_v63 }
 0x25a   :  { %1076 = vperm.xlu2 %6821, %v244_v21   ;;  %v8998_v21 = vpop.f32.mrf.mxu2 }
 0x25b   :  { %1073 = vperm.xlu1 %6820, %v243_v50   ;;  %1070 = vperm.xlu0 %6819, %v242_v11   ;;  %12556 = vst [vmem:[#allocation81_spill] sm:$0xff] %v8998_v21  ;;  %v246_v50 = vld [vmem:[%s12461_s1 + $0x340] sm:$0xff]  ;;  %v245_v11 = vld [vmem:[%s12461_s1 + $0x338] sm:$0xff]  ;;  %v12558_v21 = vld [vmem:[#allocation3_spill] sm:$0xff] }
 0x25c   :  { %vm706_vm6 = vcmp.eq.s32.totalorder %v7496_v52, %v12558_v21  ;;  %v250_v21 = vld [vmem:[%s12461_s1 + $0x360] sm:$0xff] }
 0x25d   :  { %v8991_v60 = vpop.permute.xlu1 %947 }
 0x25e   :  { %12554 = vst [vmem:[#allocation7_spill] sm:$0xff] %v8991_v60  ;;  %v8995_v47 = vpop.f32.mrf.mxu1  ;;  %v9000_v39 = vpop.permute.xlu0 %944 }
 0x25f   :  { %12557 = vst [vmem:[#allocation82_spill] sm:$0xff] %v9000_v39  ;;  %v9027_v60 = vpop.permute.xlu2 %968 }
 0x260   :  { %6374 = vmatmul.msk.f32.gmra.mxu0 %vm1521_vm0, %v6249_v16  ;;  %v12559_v16 = vld [vmem:[#allocation17_spill] sm:$0xff]  ;;  %vm1210_vm2 = vcmp.eq.s32.totalorder %v7496_v52, %v9027_v60 }
 0x261   :  { %6416 = vmatmul.msk.f32.gmra.mxu2 %vm1521_vm0, %v6291_v43  ;;  %6583 = vmatmul.msk.f32.gmra.mxu1 %vm1521_vm0, %v6458_v33  ;;  %vm748_vm7 = vcmp.eq.s32.totalorder %v7496_v52, %v12559_v16  ;;  %v6250_v43 = vsel %vm706_vm6, 1.0, %v12484_v23  ;;  %v248_v16 = vld [vmem:[%s12461_s1 + $0x350] sm:$0xff]  ;;  %v257_v60 = vld [vmem:[%s12461_s1 + $0x398] sm:$0xff]  ;;  %vm753_vm6 = vcmp.eq.s32.totalorder %v7496_v52, %v8263_v20 }
 0x262   :  { %1085 = vperm.xlu2 %6821, %v247_v4   ;;  %v6292_v33 = vsel %vm748_vm7, 1.0, %v12484_v23  ;;  %vm1170_vm7 = vcmp.eq.s32.totalorder %v7496_v52, %v8657_v62  ;;  %v264_v20 = vld [vmem:[%s12461_s1 + $0x3d0] sm:$0xff]  ;;  %v263_v62 = vld [vmem:[%s12461_s1 + $0x3c8] sm:$0xff] }
 0x263   :  { %1082 = vperm.xlu1 %6820, %v246_v50   ;;  %1079 = vperm.xlu0 %6819, %v245_v11   ;;  %v9035_v50 = vpop.f32.mrf.mxu0  ;;  %v249_v11 = vld [vmem:[%s12461_s1 + $0x358] sm:$0xff] }
 0x264   :  { %12562 = vst [vmem:[#allocation83_spill] sm:$0xff] %v9035_v50 }
 0x265   :  { %v9022_v61 = vpop.permute.xlu1 %956 }
 0x266   :  { %12560 = vst [vmem:[#allocation3_spill] sm:$0xff] %v9022_v61  ;;  %v9024_v39 = vpop.f32.mrf.mxu1  ;;  %v9029_v4 = vpop.permute.xlu0 %953 }
 0x267   :  { %12561 = vst [vmem:[#allocation17_spill] sm:$0xff] %v9029_v4  ;;  %v9045_v4 = vpop.f32.mrf.mxu2 }
 0x268   :  { %6375 = vmatmul.msk.f32.gmra.mxu0 %vm1521_vm0, %v6250_v43  ;;  %12563 = vst [vmem:[#allocation84_spill] sm:$0xff] %v9045_v4  ;;  %v253_v4 = vld [vmem:[%s12461_s1 + $0x378] sm:$0xff] }
 0x269   :  { %6417 = vmatmul.msk.f32.gmra.mxu2 %vm1521_vm0, %v6292_v33  ;;  %6584 = vmatmul.msk.f32.gmra.mxu1 %vm1521_vm0, %v6459_v0  ;;  %v6293_v33 = vsel %vm749_vm9, 1.0, %v12484_v23  ;;  %v9067_v0 = vpop.permute.xlu2 %977  ;;  %vm754_vm9 = vcmp.eq.s32.totalorder %v7496_v52, %v12569_v58 }
 0x26a   :  { %1094 = vperm.xlu2 %6821, %v250_v21   ;;  %v6460_v21 = vsel %vm1166_vm10, 1.0, %v12484_v23  ;;  %vm1171_vm10 = vcmp.eq.s32.totalorder %v7496_v52, %v8558_v9 }
 0x26b   :  { %1091 = vperm.xlu1 %6820, %v249_v11   ;;  %1088 = vperm.xlu0 %6819, %v248_v16  }
 0x26d   :  { %v966_v43 = vpop.permute.xlu1 %965 }
 0x26e   :  { %v9053_v61 = vpop.f32.mrf.mxu1  ;;  %v963_v50 = vpop.permute.xlu0 %962  ;;  %vm1209_vm14 = vcmp.eq.s32.totalorder %v7496_v52, %v966_v43 }
 0x26f   :  { %vm1208_vm11 = vcmp.eq.s32.totalorder %v7496_v52, %v963_v50  ;;  %v9073_v50 = vpop.f32.mrf.mxu2  ;;  %v6503_v43 = vsel %vm1209_vm14, 1.0, %v12484_v23 }
 0x270   :  { %v6502_v11 = vsel %vm1208_vm11, 1.0, %v12484_v23  ;;  %12564 = vst [vmem:[#allocation85_spill] sm:$0xff] %v9073_v50  ;;  %v12565_v50 = vld [vmem:[#allocation19_spill] sm:$0xff]  ;;  %vm1213_vm11 = vcmp.eq.s32.totalorder %v7496_v52, %v9067_v0 }
 0x271   :  { %6418 = vmatmul.msk.f32.gmra.mxu2 %vm1521_vm0, %v6293_v33  ;;  %6585 = vmatmul.msk.f32.gmra.mxu1 %vm1521_vm0, %v6460_v21  ;;  %vm751_vm15 = vcmp.eq.s32.totalorder %v7496_v52, %v12565_v50  ;;  %v6507_v9 = vsel %vm1213_vm11, 1.0, %v12484_v23 }
 0x272   :  { %6627 = vmatmul.msk.f32.gmra.mxu3 %vm1521_vm0, %v6502_v11  ;;  %1103 = vperm.xlu2 %6821, %v253_v4   ;;  %v256_v4 = vld [vmem:[%s12461_s1 + $0x390] sm:$0xff]  ;;  %v9099_v11 = vpop.permute.xlu2 %986  ;;  %v6295_v50 = vsel %vm751_vm15, 1.0, %v12484_v23  ;;  %vm756_vm15 = vcmp.eq.s32.totalorder %v7496_v52, %v8286_v27 }
 0x273   :  { %1100 = vperm.xlu1 %6820, %v252_v2   ;;  %1097 = vperm.xlu0 %6819, %v251_v3   ;;  %v6294_v2 = vsel %vm750_vm12, 1.0, %v12484_v23  ;;  %v6461_v3 = vsel %vm1167_vm13, 1.0, %v12484_v23  ;;  %vm755_vm12 = vcmp.eq.s32.totalorder %v7496_v52, %v8288_v22  ;;  %vm1172_vm13 = vcmp.eq.s32.totalorder %v7496_v52, %v8690_v24 }
 0x275   :  { %v9079_v16 = vpop.permute.xlu1 %974 }
 0x276   :  { %v9082_v33 = vpop.f32.mrf.mxu1  ;;  %v972_v21 = vpop.permute.xlu0 %971  ;;  %vm1212_vm8 = vcmp.eq.s32.totalorder %v7496_v52, %v9079_v16 }
 0x277   :  { %v9105_v44 = vpop.f32.mrf.mxu2  ;;  %vm1211_vm5 = vcmp.eq.s32.totalorder %v7496_v52, %v972_v21  ;;  %v260_v21 = vld [vmem:[%s12461_s1 + $0x3b0] sm:$0xff] }
 0x278   :  { %12566 = vst [vmem:[#allocation19_spill] sm:$0xff] %v9105_v44 }
 0x279   :  { %6419 = vmatmul.msk.f32.gmra.mxu2 %vm1521_vm0, %v6294_v2  ;;  %6586 = vmatmul.msk.f32.gmra.mxu1 %vm1521_vm0, %v6461_v3 }
 0x27a   :  { %6628 = vmatmul.msk.f32.gmra.mxu3 %vm1521_vm0, %v6503_v43  ;;  %1112 = vperm.xlu2 %6821, %v256_v4   ;;  %v6504_v43 = vsel %vm1210_vm2, 1.0, %v12484_v23  ;;  %v9134_v44 = vpop.permute.xlu2 %995 }
 0x27b   :  { %1109 = vperm.xlu1 %6820, %v255_v32   ;;  %1106 = vperm.xlu0 %6819, %v254_v1   ;;  %v259_v32 = vld [vmem:[%s12461_s1 + $0x3a8] sm:$0xff]  ;;  %v6462_v1 = vsel %vm1168_vm1, 1.0, %v12484_v23  ;;  %vm1173_vm1 = vcmp.eq.s32.totalorder %v7496_v52, %v8686_v37 }
 0x27c   :  { %v12572_v37 = vld [vmem:[#allocation23_spill] sm:$0xff] }
 0x27d   :  { %v9109_v2 = vpop.permute.xlu1 %983 }
 0x27e   :  { %v9111_v3 = vpop.f32.mrf.mxu1  ;;  %v9113_v4 = vpop.permute.xlu0 %980  ;;  %vm1215_vm2 = vcmp.eq.s32.totalorder %v7496_v52, %v9109_v2 }
 0x27f   :  { %vm1214_vm14 = vcmp.eq.s32.totalorder %v7496_v52, %v9113_v4  ;;  %v6509_v27 = vsel %vm1215_vm2, 1.0, %v12484_v23 }
 0x281   :  { %6420 = vmatmul.msk.f32.gmra.mxu2 %vm1521_vm0, %v6295_v50  ;;  %6587 = vmatmul.msk.f32.gmra.mxu1 %vm1521_vm0, %v6462_v1  ;;  %v9139_v1 = vpop.f32.mrf.mxu2 }
 0x282   :  { %6629 = vmatmul.msk.f32.gmra.mxu3 %vm1521_vm0, %v6504_v43  ;;  %1121 = vperm.xlu2 %6821, %v259_v32   ;;  %12567 = vst [vmem:[#allocation86_spill] sm:$0xff] %v9139_v1  ;;  %v262_v32 = vld [vmem:[%s12461_s1 + $0x3c0] sm:$0xff]  ;;  %v6505_v43 = vsel %vm1211_vm5, 1.0, %v12484_v23  ;;  %vm1216_vm5 = vcmp.eq.s32.totalorder %v7496_v52, %v9099_v11 }
 0x283   :  { %1118 = vperm.xlu1 %6820, %v258_v8   ;;  %1115 = vperm.xlu0 %6819, %v257_v60   ;;  %v6296_v8 = vsel %vm752_vm3, 1.0, %v12484_v23  ;;  %vm757_vm3 = vcmp.eq.s32.totalorder %v7496_v52, %v12572_v37  ;;  %v6510_v63 = vsel %vm1216_vm5, 1.0, %v12484_v23 }
 0x285   :  { %v9148_v60 = vpop.permute.xlu1 %992 }
 0x286   :  { %v9137_v50 = vpop.f32.mrf.mxu1  ;;  %v9141_v51 = vpop.permute.xlu0 %989  ;;  %vm1218_vm11 = vcmp.eq.s32.totalorder %v7496_v52, %v9148_v60 }
 0x289   :  { %6421 = vmatmul.msk.f32.gmra.mxu2 %vm1521_vm0, %v6296_v8  ;;  %6588 = vmatmul.msk.f32.gmra.mxu1 %vm1521_vm0, %v6463_v19  ;;  %v9168_v8 = vpop.permute.xlu2 %1004  ;;  %v265_v19 = vld [vmem:[%s12461_s1 + $0x3d8] sm:$0xff]  ;;  %v9183_v16 = vpop.f32.mrf.mxu2 }
 0x28a   :  { %6630 = vmatmul.msk.f32.gmra.mxu3 %vm1521_vm0, %v6505_v43  ;;  %1130 = vperm.xlu2 %6821, %v262_v32   ;;  %v6297_v32 = vsel %vm753_vm6, 1.0, %v12484_v23  ;;  %12568 = vst [vmem:[#allocation87_spill] sm:$0xff] %v9183_v16  ;;  %v6506_v43 = vsel %vm1212_vm8, 1.0, %v12484_v23  ;;  %v6465_v16 = vsel %vm1171_vm10, 1.0, %v12484_v23  ;;  %vm758_vm6 = vcmp.eq.s32.totalorder %v7496_v52, %v8314_v46 }
 0x28b   :  { %1127 = vperm.xlu1 %6820, %v261_v15   ;;  %1124 = vperm.xlu0 %6819, %v260_v21   ;;  %v6464_v15 = vsel %vm1170_vm7, 1.0, %v12484_v23  ;;  %vm1175_vm7 = vcmp.eq.s32.totalorder %v7496_v52, %v8717_v49  ;;  %vm1217_vm8 = vcmp.eq.s32.totalorder %v7496_v52, %v9141_v51  ;;  %vm1176_vm10 = vcmp.eq.s32.totalorder %v7496_v52, %v8715_v41 }
 0x28c   :  { %v6511_v49 = vsel %vm1217_vm8, 1.0, %v12484_v23  ;;  %vm1222_vm8 = vcmp.eq.s32.totalorder %v7496_v52, %v9168_v8 }
 0x28d   :  { %v9188_v28 = vpop.permute.xlu1 %1001 }
 0x28e   :  { %v9166_v1 = vpop.f32.mrf.mxu1  ;;  %v9175_v21 = vpop.permute.xlu0 %998  ;;  %vm1221_vm5 = vcmp.eq.s32.totalorder %v7496_v52, %v9188_v28 }
 0x28f   :  { %vm1220_vm2 = vcmp.eq.s32.totalorder %v7496_v52, %v9175_v21  ;;  %v12588_v21 = vld [vmem:[#allocation13_spill] sm:$0xff]  ;;  %v6515_v28 = vsel %vm1221_vm5, 1.0, %v12484_v23 }
 0x291   :  { %6422 = vmatmul.msk.f32.gmra.mxu2 %vm1521_vm0, %v6297_v32  ;;  %6589 = vmatmul.msk.f32.gmra.mxu1 %vm1521_vm0, %v6464_v15  ;;  %v6298_v15 = vsel %vm754_vm9, 1.0, %v12484_v23  ;;  %v9212_v0 = vpop.f32.mrf.mxu2  ;;  %vm759_vm9 = vcmp.eq.s32.totalorder %v7496_v52, %v8312_v10  ;;  %v6512_v10 = vsel %vm1218_vm11, 1.0, %v12484_v23 }
 0x292   :  { %6631 = vmatmul.msk.f32.gmra.mxu3 %vm1521_vm0, %v6506_v43  ;;  %1139 = vperm.xlu2 %6821, %v265_v19   ;;  %v266_v19 = vld [vmem:[%s12461_s1 + $0x3e0] sm:$0xff]  ;;  %12570 = vst [vmem:[#allocation21_spill] sm:$0xff] %v9212_v0  ;;  %v6299_v43 = vsel %vm755_vm12, 1.0, %v12484_v23 }
 0x293   :  { %1136 = vperm.xlu1 %6820, %v264_v20   ;;  %1133 = vperm.xlu0 %6819, %v263_v62   ;;  %v9204_v20 = vpop.permute.xlu2 %1013 }
 0x295   :  { %v9214_v62 = vpop.permute.xlu1 %1010 }
 0x296   :  { %v9197_v32 = vpop.f32.mrf.mxu1  ;;  %v9209_v58 = vpop.permute.xlu0 %1007 }
 0x297   :  { %vm1223_vm11 = vcmp.eq.s32.totalorder %v7496_v52, %v9209_v58 }
 0x299   :  { %6423 = vmatmul.msk.f32.gmra.mxu2 %vm1521_vm0, %v6298_v15  ;;  %6590 = vmatmul.msk.f32.gmra.mxu1 %vm1521_vm0, %v6465_v16  ;;  %v6466_v15 = vsel %vm1172_vm13, 1.0, %v12484_v23  ;;  %v9238_v4 = vpop.f32.mrf.mxu2  ;;  %vm1177_vm13 = vcmp.eq.s32.totalorder %v7496_v52, %v8620_v25 }
 0x29a   :  { %6632 = vmatmul.msk.f32.gmra.mxu3 %vm1521_vm0, %v6507_v9  ;;  %12571 = vst [vmem:[#allocation88_spill] sm:$0xff] %v9238_v4  ;;  %v6301_v4 = vsel %vm757_vm3, 1.0, %v12484_v23 }
 0x29b   :  { %1142 = vperm.xlu0 %6819, %v266_v19   ;;  %v6508_v19 = vsel %vm1214_vm14, 1.0, %v12484_v23  ;;  %v9230_v22 = vpop.permute.xlu2 %1022  ;;  %vm1219_vm14 = vcmp.eq.s32.totalorder %v7496_v52, %v9134_v44 }
 0x29c   :  { %v6513_v25 = vsel %vm1219_vm14, 1.0, %v12484_v23  ;;  %vm1224_vm14 = vcmp.eq.s32.totalorder %v7496_v52, %v9214_v62 }
 0x29d   :  { %v9242_v9 = vpop.permute.xlu1 %1019 }
 0x29e   :  { %v9222_v16 = vpop.f32.mrf.mxu1  ;;  %v9232_v24 = vpop.permute.xlu0 %1016 }
 0x29f   :  { %vm1226_vm5 = vcmp.eq.s32.totalorder %v7496_v52, %v9232_v24  ;;  %v12618_v24 = vld [vmem:[#allocation39_spill] sm:$0xff] }
 0x2a1   :  { %6424 = vmatmul.msk.f32.gmra.mxu2 %vm1521_vm0, %v6299_v43  ;;  %6591 = vmatmul.msk.f32.gmra.mxu1 %vm1521_vm0, %v6466_v15  ;;  %v6300_v15 = vsel %vm756_vm15, 1.0, %v12484_v23  ;;  %vm761_vm15 = vcmp.eq.s32.totalorder %v7496_v52, %v8343_v40 }
 0x2a2   :  { %6633 = vmatmul.msk.f32.gmra.mxu3 %vm1521_vm0, %v6508_v19  ;;  %v6467_v19 = vsel %vm1173_vm1, 1.0, %v12484_v23  ;;  %vm1178_vm1 = vcmp.eq.s32.totalorder %v7496_v52, %v8748_v57  ;;  %v6514_v57 = vsel %vm1220_vm2, 1.0, %v12484_v23  ;;  %vm1225_vm2 = vcmp.eq.s32.totalorder %v7496_v52, %v9204_v20 }
 0x2a3   :  { %v9256_v2 = vpop.permute.xlu2 %1031 }
 0x2a5   :  { %v9268_v45 = vpop.permute.xlu1 %1028 }
 0x2a6   :  { %v9244_v43 = vpop.f32.mrf.mxu1  ;;  %v9260_v0 = vpop.permute.xlu0 %1025 }
 0x2a9   :  { %6425 = vmatmul.msk.f32.gmra.mxu2 %vm1521_vm0, %v6300_v15  ;;  %6592 = vmatmul.msk.f32.gmra.mxu1 %vm1521_vm0, %v6467_v19  ;;  %v9264_v19 = vpop.f32.mrf.mxu2 }
 0x2aa   :  { %6634 = vmatmul.msk.f32.gmra.mxu3 %vm1521_vm0, %v6509_v27  ;;  %12573 = vst [vmem:[#allocation23_spill] sm:$0xff] %v9264_v19  ;;  %v6468_v27 = vsel %vm1174_vm4, 1.0, %v12484_v23  ;;  %vm1179_vm4 = vcmp.eq.s32.totalorder %v7496_v52, %v8746_v7 }
 0x2ab   :  { %v9282_v37 = vpop.permute.xlu2 %1040 }
 0x2ac   :  { %12574 = vst [vmem:[#allocation89_spill] sm:$0xff] %v9282_v37  ;;  %v12577_v37 = vld [vmem:[#allocation2_spill] sm:$0xff] }
 0x2ad   :  { %v9295_v51 = vpop.permute.xlu1 %1037  ;;  %v3308_v56 = vmul.f32 %v8868_v29, %v12577_v37  ;;  %v12580_v37 = vld [vmem:[#allocation8_spill] sm:$0xff] }
 0x2ae   :  { %v9262_v15 = vpop.f32.mrf.mxu1  ;;  %v9286_v19 = vpop.permute.xlu0 %1034 }
 0x2b1   :  { %6426 = vmatmul.msk.f32.gmra.mxu2 %vm1521_vm0, %v6301_v4  ;;  %6593 = vmatmul.msk.f32.gmra.mxu1 %vm1521_vm0, %v6468_v27  ;;  %v6302_v4 = vsel %vm758_vm6, 1.0, %v12484_v23  ;;  %v6469_v27 = vsel %vm1175_vm7, 1.0, %v12484_v23  ;;  %v9290_v46 = vpop.f32.mrf.mxu2  ;;  %vm1180_vm7 = vcmp.eq.s32.totalorder %v7496_v52, %v8651_v38  ;;  %v6516_v38 = vsel %vm1222_vm8, 1.0, %v12484_v23 }
 0x2b2   :  { %6635 = vmatmul.msk.f32.gmra.mxu3 %vm1521_vm0, %v6510_v63  ;;  %v12575_v63 = vld [vmem:[#allocation4_spill] sm:$0xff]  ;;  %vm1227_vm8 = vcmp.eq.s32.totalorder %v7496_v52, %v9242_v9 }
 0x2b3   :  { %v3309_v30 = vmul.f32 %v8901_v26, %v12575_v63  ;;  %12576 = vst [vmem:[#allocation4_spill] sm:$0xff] %v9290_v46  ;;  %v12578_v63 = vld [vmem:[#allocation6_spill] sm:$0xff] }
 0x2b4   :  { %v3311_v29 = vmul.f32 %v8966_v14, %v12578_v63  ;;  %v12583_v63 = vld [vmem:[#allocation9_spill] sm:$0xff] }
 0x2b5   :  { %v9326_v14 = vpop.permute.xlu1 %1046 }
 0x2b6   :  { %v9280_v11 = vpop.f32.mrf.mxu1  ;;  %v9317_v41 = vpop.permute.xlu0 %1043 }
 0x2b9   :  { %6427 = vmatmul.msk.f32.gmra.mxu2 %vm1521_vm0, %v6302_v4  ;;  %6594 = vmatmul.msk.f32.gmra.mxu1 %vm1521_vm0, %v6469_v27  ;;  %v6303_v4 = vsel %vm759_vm9, 1.0, %v12484_v23  ;;  %v6470_v27 = vsel %vm1176_vm10, 1.0, %v12484_v23  ;;  %v9324_v46 = vpop.f32.mrf.mxu2  ;;  %vm764_vm9 = vcmp.eq.s32.totalorder %v7496_v52, %v8370_v18  ;;  %vm1181_vm10 = vcmp.eq.s32.totalorder %v7496_v52, %v8779_v6 }
 0x2ba   :  { %6636 = vmatmul.msk.f32.gmra.mxu3 %vm1521_vm0, %v6511_v49  ;;  %v3312_v49 = vmul.f32 %v8995_v47, %v12580_v37  ;;  %12581 = vst [vmem:[#allocation2_spill] sm:$0xff] %v9324_v46  ;;  %v6517_v18 = vsel %vm1223_vm11, 1.0, %v12484_v23  ;;  %vm1187_vm11 = vcmp.eq.s32.totalorder %v7496_v52, %v8839_v34 }
 0x2bb   :  { %3435 = vadd.xlane.f32.xlu2 %v3309_v30  ;;  %v9312_v30 = vpop.permute.xlu2 %1049 }
 0x2bd   :  { %3433 = vadd.xlane.f32.xlu1 %v3308_v56  ;;  %v12579_v56 = vld [vmem:[#allocation5_spill] sm:$0xff] }
 0x2be   :  { %v9306_v26 = vpop.f32.mrf.mxu1  ;;  %v3310_v60 = vmul.f32 %v8933_v12, %v12579_v56  ;;  %v12585_v56 = vld [vmem:[#allocation11_spill] sm:$0xff] }
 0x2c1   :  { %6428 = vmatmul.msk.f32.gmra.mxu2 %vm1521_vm0, %v6303_v4  ;;  %6595 = vmatmul.msk.f32.gmra.mxu1 %vm1521_vm0, %v6470_v27  ;;  %v12582_v4 = vld [vmem:[#allocation25_spill] sm:$0xff]  ;;  %v6471_v27 = vsel %vm1177_vm13, 1.0, %v12484_v23  ;;  %vm1182_vm13 = vcmp.eq.s32.totalorder %v7496_v52, %v8777_v36  ;;  %v6518_v36 = vsel %vm1224_vm14, 1.0, %v12484_v23  ;;  %vm1230_vm14 = vcmp.eq.s32.totalorder %v7496_v52, %v9268_v45 }
 0x2c2   :  { %6637 = vmatmul.msk.f32.gmra.mxu3 %vm1521_vm0, %v6512_v10  ;;  %vm760_vm12 = vcmp.eq.s32.totalorder %v7496_v52, %v12582_v4  ;;  %v12584_v10 = vld [vmem:[#allocation10_spill] sm:$0xff]  ;;  %v6305_v4 = vsel %vm761_vm15, 1.0, %v12484_v23 }
 0x2c3   :  { %3439 = vadd.xlane.f32.xlu2 %v3311_v29  ;;  %v6304_v47 = vsel %vm760_vm12, 1.0, %v12484_v23  ;;  %v3313_v29 = vmul.f32 %v9024_v39, %v12583_v63  ;;  %v3314_v44 = vmul.f32 %v9053_v61, %v12584_v10  ;;  %v9348_v37 = vpop.permute.xlu2 %1058  ;;  %v9356_v39 = vpop.f32.mrf.mxu2  ;;  %v3317_v63 = vmul.f32 %v9137_v50, %v12588_v21  ;;  %v12590_v10 = vld [vmem:[#allocation33_spill] sm:$0xff] }
 0x2c4   :  { %12586 = vst [vmem:[#allocation6_spill] sm:$0xff] %v9356_v39  ;;  %v9360_v61 = vpop.permute.xlu1 %1055  ;;  %vm762_vm3 = vcmp.eq.s32.totalorder %v7496_v52, %v12590_v10  ;;  %v12654_v39 = vld [vmem:[#allocation75_spill] sm:$0xff] }
 0x2c5   :  { %3437 = vadd.xlane.f32.xlu0 %v3310_v60  ;;  %3441 = vadd.xlane.f32.xlu1 %v3312_v49  ;;  %v3315_v60 = vmul.f32 %v9082_v33, %v12585_v56  ;;  %v9350_v49 = vpop.permute.xlu0 %1052 }
 0x2c6   :  { %v9334_v12 = vpop.f32.mrf.mxu1 }
 0x2c9   :  { %6429 = vmatmul.msk.f32.gmra.mxu2 %vm1521_vm0, %v6304_v47  ;;  %6596 = vmatmul.msk.f32.gmra.mxu1 %vm1521_vm0, %v6471_v27  ;;  %v6472_v47 = vsel %vm1178_vm1, 1.0, %v12484_v23  ;;  %v12587_v27 = vld [vmem:[#allocation12_spill] sm:$0xff]  ;;  %vm1183_vm1 = vcmp.eq.s32.totalorder %v7496_v52, %v8678_v5  ;;  %v6519_v5 = vsel %vm1225_vm2, 1.0, %v12484_v23  ;;  %vm1190_vm2 = vcmp.eq.s32.totalorder %v7496_v52, %v8870_v54  ;;  %v12645_v54 = vld [vmem:[#allocation62_spill] sm:$0xff] }
 0x2ca   :  { %6638 = vmatmul.msk.f32.gmra.mxu3 %vm1521_vm0, %v6513_v25  ;;  %v3316_v40 = vmul.f32 %v9111_v3, %v12587_v27  ;;  %v12593_v27 = vld [vmem:[#allocation16_spill] sm:$0xff] }
 0x2cb   :  { %3443 = vadd.xlane.f32.xlu2 %v3313_v29  ;;  %v12589_v29 = vld [vmem:[#allocation14_spill] sm:$0xff]  ;;  %v9380_v3 = vpop.permute.xlu2 %1067  ;;  %v9386_v56 = vpop.f32.mrf.mxu2 }
 0x2cc   :  { %v3318_v25 = vmul.f32 %v9166_v1, %v12589_v29  ;;  %12591 = vst [vmem:[#allocation5_spill] sm:$0xff] %v9386_v56  ;;  %v6306_v1 = vsel %vm762_vm3, 1.0, %v12484_v23 }
 0x2cd   :  { %3445 = vadd.xlane.f32.xlu0 %v3314_v44  ;;  %3447 = vadd.xlane.f32.xlu1 %v3315_v60  ;;  %v9384_v44 = vpop.permute.xlu0 %1061  ;;  %v6473_v60 = vsel %vm1179_vm4, 1.0, %v12484_v23  ;;  %vm1184_vm4 = vcmp.eq.s32.totalorder %v7496_v52, %v8810_v53  ;;  %v6520_v53 = vsel %vm1226_vm5, 1.0, %v12484_v23  ;;  %vm1195_vm5 = vcmp.eq.s32.totalorder %v7496_v52, %v8806_v59 }
 0x2ce   :  { %v9362_v33 = vpop.f32.mrf.mxu1 }
 0x2d1   :  { %6430 = vmatmul.msk.f32.gmra.mxu2 %vm1521_vm0, %v6305_v4  ;;  %6597 = vmatmul.msk.f32.gmra.mxu1 %vm1521_vm0, %v6472_v47  ;;  %v9390_v4 = vpop.permute.xlu1 %1064  ;;  %v12592_v47 = vld [vmem:[#allocation15_spill] sm:$0xff] }
 0x2d2   :  { %6639 = vmatmul.msk.f32.gmra.mxu3 %vm1521_vm0, %v6514_v57  ;;  %v3319_v7 = vmul.f32 %v9197_v32, %v12592_v47  ;;  %v12594_v57 = vld [vmem:[#allocation18_spill] sm:$0xff] }
 0x2d3   :  { %3449 = vadd.xlane.f32.xlu2 %v3316_v40  ;;  %v3320_v40 = vmul.f32 %v9222_v16, %v12593_v27  ;;  %v3321_v21 = vmul.f32 %v9244_v43, %v12594_v57  ;;  %v9408_v29 = vpop.permute.xlu2 %1076  ;;  %v9414_v10 = vpop.f32.mrf.mxu2  ;;  %v12598_v47 = vld [vmem:[#allocation22_spill] sm:$0xff] }
 0x2d4   :  { %12596 = vst [vmem:[#allocation8_spill] sm:$0xff] %v9414_v10  ;;  %v12653_v10 = vld [vmem:[#allocation74_spill] sm:$0xff] }
 0x2d5   :  { %3451 = vadd.xlane.f32.xlu0 %v3317_v63  ;;  %3453 = vadd.xlane.f32.xlu1 %v3318_v25  ;;  %v12595_v63 = vld [vmem:[#allocation26_spill] sm:$0xff]  ;;  %v6474_v25 = vsel %vm1180_vm7, 1.0, %v12484_v23  ;;  %v9412_v43 = vpop.permute.xlu0 %1070  ;;  %vm1185_vm7 = vcmp.eq.s32.totalorder %v7496_v52, %v8808_v35  ;;  %v6521_v35 = vsel %vm1227_vm8, 1.0, %v12484_v23 }
 0x2d6   :  { %v2990_v50 = vpop.f32.mrf.mxu1  ;;  %vm763_vm6 = vcmp.eq.s32.totalorder %v7496_v52, %v12595_v63  ;;  %v12602_v63 = vld [vmem:[#allocation29_spill] sm:$0xff] }
 0x2d7   :  { %v6307_v16 = vsel %vm763_vm6, 1.0, %v12484_v23  ;;  %vm768_vm6 = vcmp.eq.s32.totalorder %v7496_v52, %v12618_v24 }
 0x2d9   :  { %6431 = vmatmul.msk.f32.gmra.mxu2 %vm1521_vm0, %v6306_v1  ;;  %6598 = vmatmul.msk.f32.gmra.mxu1 %vm1521_vm0, %v6473_v60  ;;  %v12597_v1 = vld [vmem:[#allocation20_spill] sm:$0xff]  ;;  %v9421_v8 = vpop.permute.xlu1 %1073 }
 0x2da   :  { %6640 = vmatmul.msk.f32.gmra.mxu3 %vm1521_vm0, %v6515_v28  ;;  %v3322_v60 = vmul.f32 %v9262_v15, %v12597_v1  ;;  %v12599_v28 = vld [vmem:[#allocation24_spill] sm:$0xff] }
 0x2db   :  { %3455 = vadd.xlane.f32.xlu2 %v3319_v7  ;;  %v3323_v7 = vmul.f32 %v9280_v11, %v12598_v47  ;;  %v3324_v27 = vmul.f32 %v9306_v26, %v12599_v28  ;;  %v6475_v11 = vsel %vm1181_vm10, 1.0, %v12484_v23  ;;  %v9436_v57 = vpop.permute.xlu2 %1085  ;;  %v12600_v26 = vld [vmem:[#allocation27_spill] sm:$0xff]  ;;  %v9446_v58 = vpop.f32.mrf.mxu2  ;;  %vm1228_vm10 = vcmp.eq.s32.totalorder %v7496_v52, %v9230_v22 }
 0x2dc   :  { %12601 = vst [vmem:[#allocation25_spill] sm:$0xff] %v9446_v58  ;;  %v6522_v24 = vsel %vm1228_vm10, 1.0, %v12484_v23 }
 0x2dd   :  { %3457 = vadd.xlane.f32.xlu0 %v3320_v40  ;;  %3459 = vadd.xlane.f32.xlu1 %v3321_v21  ;;  %v6308_v40 = vsel %vm764_vm9, 1.0, %v12484_v23  ;;  %v3325_v21 = vmul.f32 %v9334_v12, %v12600_v26  ;;  %v9443_v6 = vpop.permute.xlu0 %1079  ;;  %v12604_v12 = vld [vmem:[#allocation36_spill] sm:$0xff]  ;;  %vm1186_vm9 = vcmp.eq.s32.totalorder %v7496_v52, %v8709_v31 }
 0x2de   :  { %v2993_v32 = vpop.f32.mrf.mxu1  ;;  %vm765_vm12 = vcmp.eq.s32.totalorder %v7496_v52, %v12604_v12 }
 0x2e1   :  { %6432 = vmatmul.msk.f32.gmra.mxu2 %vm1521_vm0, %v6307_v16  ;;  %6599 = vmatmul.msk.f32.gmra.mxu1 %vm1521_vm0, %v6474_v25  ;;  %v3326_v16 = vmul.f32 %v9362_v33, %v12602_v63  ;;  %v12603_v25 = vld [vmem:[#allocation31_spill] sm:$0xff]  ;;  %v6309_v33 = vsel %vm765_vm12, 1.0, %v12484_v23  ;;  %vm1229_vm12 = vcmp.eq.s32.totalorder %v7496_v52, %v9260_v0 }
 0x2e2   :  { %6641 = vmatmul.msk.f32.gmra.mxu3 %vm1521_vm0, %v6516_v38  ;;  %v3327_v1 = vmul.f32 %v2990_v50, %v12603_v25  ;;  %v9457_v38 = vpop.f32.mrf.mxu3  ;;  %v6476_v50 = vsel %vm1182_vm13, 1.0, %v12484_v23  ;;  %vm1188_vm13 = vcmp.eq.s32.totalorder %v7496_v52, %v8835_v55 }
 0x2e3   :  { %3461 = vadd.xlane.f32.xlu2 %v3322_v60  ;;  %v9451_v60 = vpop.permute.xlu1 %1082  ;;  %12605 = vst [vmem:[#allocation9_spill] sm:$0xff] %v9457_v38 }
 0x2e5   :  { %3463 = vadd.xlane.f32.xlu0 %v3323_v7  ;;  %3465 = vadd.xlane.f32.xlu1 %v3324_v27  ;;  %v12606_v7 = vld [vmem:[#allocation34_spill] sm:$0xff]  ;;  %v9468_v27 = vpop.permute.xlu2 %1094  ;;  %v9472_v26 = vpop.permute.xlu0 %1088 }
 0x2e6   :  { %v2996_v15 = vpop.f32.mrf.mxu1  ;;  %v3328_v28 = vmul.f32 %v2993_v32, %v12606_v7  ;;  %v9478_v32 = vpop.f32.mrf.mxu2 }
 0x2e7   :  { %12609 = vst [vmem:[#allocation10_spill] sm:$0xff] %v9478_v32 }
 0x2e9   :  { %6433 = vmatmul.msk.f32.gmra.mxu2 %vm1521_vm0, %v6308_v40  ;;  %6600 = vmatmul.msk.f32.gmra.mxu1 %vm1521_vm0, %v6475_v11  ;;  %v12607_v40 = vld [vmem:[#allocation38_spill] sm:$0xff] }
 0x2ea   :  { %6642 = vmatmul.msk.f32.gmra.mxu3 %vm1521_vm0, %v6517_v18  ;;  %v3329_v11 = vmul.f32 %v2996_v15, %v12607_v40  ;;  %v6478_v40 = vsel %vm1184_vm4, 1.0, %v12484_v23  ;;  %vm1192_vm4 = vcmp.eq.s32.totalorder %v7496_v52, %v8775_v13  ;;  %v12649_v13 = vld [vmem:[#allocation70_spill] sm:$0xff] }
 0x2eb   :  { %3467 = vadd.xlane.f32.xlu2 %v3325_v21  ;;  %v12608_v21 = vld [vmem:[#allocation28_spill] sm:$0xff]  ;;  %v9484_v15 = vpop.permute.xlu1 %1091  ;;  %vm1194_vm10 = vcmp.eq.s32.totalorder %v7496_v52, %v12649_v13  ;;  %v9629_v59 = vsel %vm1192_vm4, 1.0, %v12484_v23  ;;  %v12652_v13 = vld [vmem:[#allocation58_spill] sm:$0xff] }
 0x2ec   :  { %vm766_vm15 = vcmp.eq.s32.totalorder %v7496_v52, %v12608_v21 }
 0x2ed   :  { %3469 = vadd.xlane.f32.xlu0 %v3326_v16  ;;  %3471 = vadd.xlane.f32.xlu1 %v3327_v1  ;;  %v6310_v63 = vsel %vm766_vm15, 1.0, %v12484_v23  ;;  %v6477_v16 = vsel %vm1183_vm1, 1.0, %v12484_v23  ;;  %v12611_v1 = vld [vmem:[#allocation40_spill] sm:$0xff]  ;;  %v9495_v20 = vpop.permute.xlu2 %1103  ;;  %vm1189_vm15 = vcmp.eq.s32.totalorder %v7496_v52, %v8740_v48  ;;  %vm1231_vm1 = vcmp.eq.s32.totalorder %v7496_v52, %v9256_v2 }
 0x2ee   :  { %v2999_v47 = vpop.f32.mrf.mxu1  ;;  %vm767_vm3 = vcmp.eq.s32.totalorder %v7496_v52, %v12611_v1  ;;  %12612 = vst [vmem:[#allocation12_spill] sm:$0xff] %v9495_v20 }
 0x2ef   :  { %v3330_v62 = vmul.f32 %v2999_v47, %v8421_v17 }
 0x2f1   :  { %6434 = vmatmul.msk.f32.gmra.mxu2 %vm1521_vm0, %v6309_v33  ;;  %6601 = vmatmul.msk.f32.gmra.mxu1 %vm1521_vm0, %v6476_v50  ;;  %v9505_v33 = vpop.f32.mrf.mxu2  ;;  %v12616_v50 = vld [vmem:[#allocation44_spill] sm:$0xff] }
 0x2f2   :  { %6643 = vmatmul.msk.f32.gmra.mxu3 %vm1521_vm0, %v6518_v36  ;;  %12615 = vst [vmem:[#allocation33_spill] sm:$0xff] %v9505_v33 }
 0x2f3   :  { %3473 = vadd.xlane.f32.xlu2 %v3328_v28  ;;  %v6311_v28 = vsel %vm767_vm3, 1.0, %v12484_v23  ;;  %v9509_v36 = vpop.permute.xlu1 %1100  ;;  %vm1232_vm3 = vcmp.eq.s32.totalorder %v7496_v52, %v9286_v19  ;;  %v12646_v19 = vld [vmem:[#allocation65_spill] sm:$0xff] }
 0x2f4   :  { %12617 = vst [vmem:[#allocation15_spill] sm:$0xff] %v9509_v36 }
 0x2f5   :  { %v9480_v18 = vpop.f32.mrf.mxu3  ;;  %3475 = vadd.xlane.f32.xlu0 %v3329_v11  ;;  %3477 = vadd.xlane.f32.xlu1 %v3330_v62  ;;  %v9524_v21 = vpop.permute.xlu2 %1112 }
 0x2f6   :  { %12610 = vst [vmem:[#allocation11_spill] sm:$0xff] %v9480_v18  ;;  %v3002_v17 = vpop.f32.mrf.mxu1 }
 0x2f7   :  { %v3331_v25 = vmul.f32 %v3002_v17, %v8462_v42  ;;  %v9503_v42 = vpop.permute.xlu0 %1097  ;;  %12620 = vst [vmem:[#allocation18_spill] sm:$0xff] %v9524_v21  ;;  %v12621_v17 = vld [vmem:[#allocation46_spill] sm:$0xff] }
 0x2f8   :  { %12614 = vst [vmem:[#allocation14_spill] sm:$0xff] %v9503_v42 }
 0x2f9   :  { %6435 = vmatmul.msk.f32.gmra.mxu2 %vm1521_vm0, %v6310_v63  ;;  %6602 = vmatmul.msk.f32.gmra.mxu1 %vm1521_vm0, %v6477_v16  ;;  %v6312_v16 = vsel %vm768_vm6, 1.0, %v12484_v23  ;;  %v9531_v1 = vpop.f32.mrf.mxu2  ;;  %vm1198_vm6 = vcmp.eq.s32.totalorder %v7496_v52, %v12645_v54 }
 0x2fa   :  { %6644 = vmatmul.msk.f32.gmra.mxu3 %vm1521_vm0, %v6519_v5  ;;  %v6479_v5 = vsel %vm1185_vm7, 1.0, %v12484_v23  ;;  %12623 = vst [vmem:[#allocation20_spill] sm:$0xff] %v9531_v1  ;;  %vm1201_vm7 = vcmp.eq.s32.totalorder %v7496_v52, %v12646_v19 }
 0x2fb   :  { %3479 = vadd.xlane.f32.xlu2 %v3331_v25 }
 0x2fd   :  { %v9497_v12 = vpop.f32.mrf.mxu3 }
 0x2fe   :  { %12613 = vst [vmem:[#allocation13_spill] sm:$0xff] %v9497_v12  ;;  %v3005_v47 = vpop.f32.mrf.mxu1 }
 0x2ff   :  { %v3332_v7 = vmul.f32 %v3005_v47, %v12616_v50  ;;  %v9528_v25 = vpop.permute.xlu0 %1106  ;;  %v9535_v47 = vpop.permute.xlu1 %1109 }
 0x300   :  { %12622 = vst [vmem:[#allocation26_spill] sm:$0xff] %v9528_v25  ;;  %v9786_v25 = vpop.f32.mrf.mxu0 }
 0x301   :  { %6436 = vmatmul.msk.f32.gmra.mxu2 %vm1521_vm0, %v6311_v28  ;;  %3481 = vadd.xlane.f32.xlu0 %v3332_v7  ;;  %12624 = vst [vmem:[#allocation22_spill] sm:$0xff] %v9535_v47  ;;  %v12626_v7 = vld [vmem:[#allocation48_spill] sm:$0xff] }
 0x302   :  { %6603 = vmatmul.msk.f32.gmra.mxu1 %vm1521_vm0, %v6478_v40  ;;  %6645 = vmatmul.msk.f32.gmra.mxu3 %vm1521_vm0, %v6520_v53  ;;  %v6480_v40 = vsel %vm1186_vm9, 1.0, %v12484_v23  ;;  %v9547_v53 = vpop.permute.xlu2 %1121 }
 0x303   :  { %12627 = vst [vmem:[#allocation27_spill] sm:$0xff] %v9547_v53 }
 0x305   :  { %v9518_v11 = vpop.f32.mrf.mxu3 }
 0x306   :  { %12619 = vst [vmem:[#allocation16_spill] sm:$0xff] %v9518_v11  ;;  %v3008_v62 = vpop.f32.mrf.mxu1 }
 0x307   :  { %v3333_v63 = vmul.f32 %v3008_v62, %v12621_v17  ;;  %v9550_v62 = vpop.permute.xlu0 %1115  ;;  %v9554_v31 = vpop.permute.xlu1 %1118 }
 0x308   :  { %12628 = vst [vmem:[#allocation29_spill] sm:$0xff] %v9550_v62 }
 0x309   :  { %6437 = vmatmul.msk.f32.gmra.mxu2 %vm1521_vm0, %v6312_v16  ;;  %3483 = vadd.xlane.f32.xlu1 %v3333_v63  ;;  %12629 = vst [vmem:[#allocation31_spill] sm:$0xff] %v9554_v31  ;;  %v12631_v63 = vld [vmem:[#allocation50_spill] sm:$0xff] }
 0x30a   :  { %6604 = vmatmul.msk.f32.gmra.mxu1 %vm1521_vm0, %v6479_v5  ;;  %6646 = vmatmul.msk.f32.gmra.mxu3 %vm1521_vm0, %v6521_v35  ;;  %v6481_v5 = vsel %vm1187_vm11, 1.0, %v12484_v23  ;;  %v6523_v35 = vsel %vm1229_vm12, 1.0, %v12484_v23  ;;  %vm1233_vm12 = vcmp.eq.s32.totalorder %v7496_v52, %v9295_v51 }
 0x30d   :  { %v9539_v9 = vpop.f32.mrf.mxu3 }
 0x30e   :  { %12625 = vst [vmem:[#allocation24_spill] sm:$0xff] %v9539_v9  ;;  %v3011_v50 = vpop.f32.mrf.mxu1 }
 0x30f   :  { %v3334_v28 = vmul.f32 %v3011_v50, %v12626_v7  ;;  %v9567_v50 = vpop.permute.xlu2 %1130  ;;  %v9569_v7 = vpop.permute.xlu0 %1124 }
 0x310   :  { %12632 = vst [vmem:[#allocation34_spill] sm:$0xff] %v9567_v50  ;;  %v9577_v0 = vpop.permute.xlu1 %1127 }
 0x311   :  { %3485 = vadd.xlane.f32.xlu2 %v3334_v28  ;;  %12633 = vst [vmem:[#allocation38_spill] sm:$0xff] %v9569_v7 }
 0x312   :  { %6605 = vmatmul.msk.f32.gmra.mxu1 %vm1521_vm0, %v6480_v40  ;;  %6647 = vmatmul.msk.f32.gmra.mxu3 %vm1521_vm0, %v6522_v24  ;;  %12635 = vst [vmem:[#allocation40_spill] sm:$0xff] %v9577_v0  ;;  %v12636_v40 = vld [vmem:[#allocation52_spill] sm:$0xff] }
 0x315   :  { %v9556_v17 = vpop.f32.mrf.mxu3 }
 0x316   :  { %12630 = vst [vmem:[#allocation36_spill] sm:$0xff] %v9556_v17  ;;  %v3014_v22 = vpop.f32.mrf.mxu1 }
 0x317   :  { %v3335_v16 = vmul.f32 %v3014_v22, %v12631_v63  ;;  %v6482_v22 = vsel %vm1188_vm13, 1.0, %v12484_v23  ;;  %v6524_v63 = vsel %vm1230_vm14, 1.0, %v12484_v23  ;;  %v9592_v45 = vpop.permute.xlu0 %1133  ;;  %vm1197_vm13 = vcmp.eq.s32.totalorder %v7496_v52, %v12653_v10 }
 0x318   :  { %12639 = vst [vmem:[#allocation46_spill] sm:$0xff] %v9592_v45  ;;  %vm1196_vm14 = vcmp.eq.s32.totalorder %v7496_v52, %v12654_v39 }
 0x319   :  { %3487 = vadd.xlane.f32.xlu0 %v3335_v16  ;;  %v9584_v16 = vpop.permute.xlu2 %1139 }
 0x31a   :  { %6606 = vmatmul.msk.f32.gmra.mxu1 %vm1521_vm0, %v6481_v5  ;;  %6648 = vmatmul.msk.f32.gmra.mxu3 %vm1521_vm0, %v6523_v35  ;;  %12637 = vst [vmem:[#allocation44_spill] sm:$0xff] %v9584_v16  ;;  %v12640_v35 = vld [vmem:[#allocation54_spill] sm:$0xff]  ;;  %v6527_v16 = vsel %vm1233_vm12, 1.0, %v12484_v23 }
 0x31d   :  { %v9571_v34 = vpop.f32.mrf.mxu3 }
 0x31e   :  { %12634 = vst [vmem:[#allocation28_spill] sm:$0xff] %v9571_v34  ;;  %v3017_v28 = vpop.f32.mrf.mxu1 }
 0x31f   :  { %v3336_v24 = vmul.f32 %v3017_v28, %v12636_v40  ;;  %v9595_v40 = vpop.permute.xlu1 %1136  ;;  %v9608_v32 = vpop.permute.xlu0 %1142 }
 0x320   :  { %12641 = vst [vmem:[#allocation48_spill] sm:$0xff] %v9595_v40 }
 0x321   :  { %3489 = vadd.xlane.f32.xlu1 %v3336_v24  ;;  %v6483_v24 = vsel %vm1189_vm15, 1.0, %v12484_v23  ;;  %12644 = vst [vmem:[#allocation52_spill] sm:$0xff] %v9608_v32 }
 0x322   :  { %6607 = vmatmul.msk.f32.gmra.mxu1 %vm1521_vm0, %v6482_v22  ;;  %6649 = vmatmul.msk.f32.gmra.mxu3 %vm1521_vm0, %v6524_v63  ;;  %v6525_v22 = vsel %vm1231_vm1, 1.0, %v12484_v23 }
 0x325   :  { %v9586_v55 = vpop.f32.mrf.mxu3 }
 0x326   :  { %12638 = vst [vmem:[#allocation39_spill] sm:$0xff] %v9586_v55  ;;  %v3020_v5 = vpop.f32.mrf.mxu1  ;;  %v12657_v55 = vld [vmem:[#allocation7_spill] sm:$0xff] }
 0x327   :  { %v3337_v28 = vmul.f32 %v3020_v5, %v12640_v35  ;;  %v12643_v5 = vld [vmem:[#allocation56_spill] sm:$0xff] }
 0x329   :  { %3491 = vadd.xlane.f32.xlu2 %v3337_v28 }
 0x32a   :  { %6608 = vmatmul.msk.f32.gmra.mxu1 %vm1521_vm0, %v6483_v24  ;;  %6650 = vmatmul.msk.f32.gmra.mxu3 %vm1521_vm0, %v6525_v22  ;;  %v6484_v24 = vsel %vm1190_vm2, 1.0, %v12484_v23  ;;  %v6526_v22 = vsel %vm1232_vm3, 1.0, %v12484_v23  ;;  %vm1203_vm2 = vcmp.eq.s32.totalorder %v7496_v52, %v12657_v55 }
 0x32d   :  { %v9601_v48 = vpop.f32.mrf.mxu3 }
 0x32e   :  { %12642 = vst [vmem:[#allocation50_spill] sm:$0xff] %v9601_v48  ;;  %v3023_v2 = vpop.f32.mrf.mxu1  ;;  %v3436_v63 = vpop.xlane.xlu2 %3435 }
 0x32f   :  { %v3338_v35 = vmul.f32 %v3023_v2, %v12643_v5  ;;  %v6689_v1 = vmul.f32 -1.442695, %v3436_v63  ;;  %v12647_v2 = vld [vmem:[#allocation66_spill] sm:$0xff]  ;;  %v9632_v63 = vsel %vm1195_vm5, 1.0, %v12484_v23  ;;  %v12650_v5 = vld [vmem:[#allocation71_spill] sm:$0xff]  ;;  %vm1237_vm5 = vcmp.eq.s32.totalorder %v7496_v52, %v9312_v30 }
 0x330   :  { %v3434_v28 = vpop.xlane.xlu1 %3433  ;;  %vm1191_vm8 = vcmp.eq.s32.totalorder %v7496_v52, %v12647_v2  ;;  %vm1193_vm11 = vcmp.eq.s32.totalorder %v7496_v52, %v12650_v5 }
 0x331   :  { %6822 = vpow2.f32 %v6689_v1  ;;  %v6688_v33 = vmul.f32 -1.442695, %v3434_v28  ;;  %3493 = vadd.xlane.f32.xlu0 %v3338_v35  ;;  %v12648_v1 = vld [vmem:[#allocation69_spill] sm:$0xff]  ;;  %v9639_v28 = vsel %vm1198_vm6, 1.0, %v12484_v23  ;;  %v9655_v56 = vsel %vm1193_vm11, 1.0, %v12484_v23 }
 0x332   :  { %6609 = vmatmul.msk.f32.gmra.mxu1 %vm1521_vm0, %v6484_v24  ;;  %6651 = vmatmul.msk.f32.gmra.mxu3 %vm1521_vm0, %v6526_v22  ;;  %vm1204_vm9 = vcmp.eq.s32.totalorder %v7496_v52, %v12648_v1  ;;  %v6485_v24 = vsel %vm1191_vm8, 1.0, %v12484_v23  ;;  %v9651_v1 = vsel %vm1194_vm10, 1.0, %v12484_v23  ;;  %vm1236_vm6 = vcmp.eq.s32.totalorder %v7496_v52, %v9326_v14 }
 0x333   :  { %6824 = vpow2.f32 %v6688_v33  ;;  %v9642_v33 = vsel %vm1201_vm7, 1.0, %v12484_v23  ;;  %v9648_v2 = vsel %vm1204_vm9, 1.0, %v12484_v23  ;;  %vm1235_vm7 = vcmp.eq.s32.totalorder %v7496_v52, %v9317_v41 }
 0x334   :  { %v9713_v14 = vsel %vm1203_vm2, 1.0, %v12484_v23  ;;  %vm6058_vm8 = vcmask 7168  }
 0x335   :  { %v9636_v35 = vpop.f32.mrf.mxu3 }
 0x336   :  { %12651 = vst [vmem:[#allocation54_spill] sm:$0xff] %v9636_v35  ;;  %v3026_v22 = vpop.f32.mrf.mxu1  ;;  %v3440_v54 = vpop.xlane.xlu2 %3439 }
 0x337   :  { %v6823_v19 = vpop.eup %6822  ;;  %v3339_v5 = vmul.f32 %v3026_v22, %v12652_v13  ;;  %v6691_v58 = vmul.f32 -1.442695, %v3440_v54  ;;  %v12655_v54 = vld [vmem:[#allocation78_spill] sm:$0xff]  ;;  %v12656_v13 = vld [vmem:[#allocation79_spill] sm:$0xff] }
 0x338   :  { %v9661_v51 = vadd.f32 1.0, %v6823_v19  ;;  %v3442_v46 = vpop.xlane.xlu1 %3441  ;;  %v3438_v32 = vpop.xlane.xlu0 %3437  ;;  %vm1200_vm15 = vcmp.eq.s32.totalorder %v7496_v52, %v12655_v54  ;;  %vm1199_vm1 = vcmp.eq.s32.totalorder %v7496_v52, %v12656_v13  ;;  %v12658_v19 = vld [vmem:[#allocation82_spill] sm:$0xff]  ;;  %v9723_v54 = vsel %vm1236_vm6, 1.0, %v12484_v23  ;;  %v12661_v13 = vld [vmem:[#allocation60_spill] sm:$0xff] }
 0x339   :  { %v6825_v48 = vpop.eup %6824  ;;  %6826 = vpow2.f32 %v6691_v58  ;;  %v6692_v35 = vmul.f32 -1.442695, %v3442_v46  ;;  %3495 = vadd.xlane.f32.xlu1 %v3339_v5  ;;  %v6690_v22 = vmul.f32 -1.442695, %v3438_v32  ;;  %vm1202_vm3 = vcmp.eq.s32.totalorder %v7496_v52, %v12658_v19  ;;  %v12659_v46 = vld [vmem:[#allocation89_spill] sm:$0xff] }
 0x33a   :  { %6828 = vrcp.f32 %v9661_v51  ;;  %6610 = vmatmul.msk.f32.gmra.mxu1 %vm1521_vm0, %v6485_v24  ;;  %6652 = vmatmul.msk.f32.gmra.mxu3 %vm1521_vm0, %v6527_v16  ;;  %vm1234_vm4 = vcmp.eq.s32.totalorder %v7496_v52, %v12659_v46  ;;  %v9677_v58 = vadd.f32 1.0, %v6825_v48  ;;  %v9683_v32 = vsel %vm1197_vm13, 1.0, %v12484_v23 }
 0x33b   :  { %6830 = vpow2.f32 %v6692_v35  ;;  %v9693_v16 = vsel %vm1196_vm14, 1.0, %v12484_v23  ;;  %v9696_v48 = vsel %vm1200_vm15, 1.0, %v12484_v23  ;;  %v9707_v30 = vsel %vm1199_vm1, 1.0, %v12484_v23 }
 0x33c   :  { %6832 = vpow2.f32 %v6690_v22  ;;  %v9716_v39 = vsel %vm1202_vm3, 1.0, %v12484_v23  ;;  %v6528_v41 = vsel %vm1234_vm4, 1.0, %v12484_v23  ;;  %v9720_v22 = vsel %vm1237_vm5, 1.0, %v12484_v23 }
 0x33d   :  { %6834 = vrcp.f32 %v9677_v58  ;;  %v9701_v10 = vpop.f32.mrf.mxu3  ;;  %v4207_v17 = vand.u32 2147483647, %v9661_v51  ;;  %v4209_v40 = vand.u32 2147483648, %v9661_v51  ;;  %vm4203_vm9 = vweird.f32 %v9661_v51 }
 0x33e   :  { %12660 = vst [vmem:[#allocation56_spill] sm:$0xff] %v9701_v10  ;;  %v3029_v35 = vpop.f32.mrf.mxu1  ;;  %v3444_v24 = vpop.xlane.xlu2 %3443  ;;  %v9727_v10 = vsel %vm1235_vm7, 1.0, %v12484_v23  ;;  %vm4188_vm12 = vweird.f32 %v9677_v58 }
 0x33f   :  { %v6827_v5 = vpop.eup %6826  ;;  %v3340_v19 = vmul.f32 %v3029_v35, %v12661_v13  ;;  %v6693_v46 = vmul.f32 -1.442695, %v3444_v24  ;;  %v4192_v24 = vand.u32 2147483647, %v9677_v58  ;;  %v4194_v13 = vand.u32 2147483648, %v9677_v58 }
 0x340   :  { %v6829_v55 = vpop.eup %6828  ;;  %v9731_v34 = vadd.f32 1.0, %v6827_v5  ;;  %v3448_v9 = vpop.xlane.xlu1 %3447  ;;  %vm9747_vm11 = vcmp.eq.f32.partialorder %v4207_v17, 8.507059e+37  ;;  %v4210_v0 = vor.u32 1.1754944e-38, %v4209_v40 }
 0x341   :  { %v6831_v12 = vpop.eup %6830  ;;  %v4199_v45 = vmul.f32 %v6829_v55, %v9661_v51  ;;  %6836 = vpow2.f32 %v6693_v46  ;;  %v6695_v11 = vmul.f32 -1.442695, %v3448_v9  ;;  %3497 = vadd.xlane.f32.xlu2 %v3340_v19  ;;  %v3446_v5 = vpop.xlane.xlu0 %3445  ;;  %vm4204_vm10 = vweird.f32 %v6829_v55 }
 0x342   :  { %v6833_v35 = vpop.eup %6832  ;;  %6838 = vrcp.f32 %v9731_v34  ;;  %6611 = vmatmul.msk.f32.gmra.mxu1 %vm1521_vm0, %v9629_v59  ;;  %6653 = vmatmul.msk.f32.gmra.mxu3 %vm1521_vm0, %v6528_v41  ;;  %v9743_v9 = vadd.f32 1.0, %v6831_v12  ;;  %v4237_v41 = vand.u32 2147483647, %v9731_v34  ;;  %v4239_v7 = vand.u32 2147483648, %v9731_v34  ;;  %vm4205_vm15 = vmor %vm4203_vm9, %vm4204_vm10 }
 0x343   :  { %v9741_v18 = vpop.eup %6834  ;;  %v4200_v46 = vsub.f32 1.0, %v4199_v45  ;;  %v9745_v19 = vadd.f32 1.0, %v6833_v35  ;;  %6840 = vpow2.f32 %v6695_v11  ;;  %vm9759_vm13 = vcmp.eq.f32.partialorder %v4192_v24, 8.507059e+37 }
 0x344   :  { %v4184_v59 = vmul.f32 %v9741_v18, %v9677_v58  ;;  %6842 = vrcp.f32 %v9743_v9  ;;  %vm4233_vm14 = vweird.f32 %v9731_v34  ;;  %v4254_v53 = vand.u32 2147483648, %v9743_v9 }
 0x345   :  { %v4201_v50 = vmul.f32 %v6829_v55, %v4200_v46  ;;  %v9756_v12 = vpop.f32.mrf.mxu3  ;;  %6844 = vrcp.f32 %v9745_v19  ;;  %v4195_v46 = vor.u32 1.1754944e-38, %v4194_v13  ;;  %vm4189_vm1 = vweird.f32 %v9741_v18 }
 0x346   :  { %12664 = vst [vmem:[#allocation62_spill] sm:$0xff] %v9756_v12  ;;  %v4185_v45 = vsub.f32 1.0, %v4184_v59  ;;  %v9764_v17 = vpop.f32.mrf.mxu1  ;;  %v4252_v59 = vand.u32 2147483647, %v9743_v9  ;;  %vm9782_vm2 = vcmp.eq.f32.partialorder %v4237_v41, 8.507059e+37  ;;  %v4240_v51 = vor.u32 1.1754944e-38, %v4239_v7  ;;  %vm4190_vm4 = vmor %vm4188_vm12, %vm4189_vm1 }
 0x347   :  { %v6837_v40 = vpop.eup %6836  ;;  %v4202_v35 = vadd.f32 %v6829_v55, %v4201_v50  ;;  %v9778_v50 = vpop.xlane.xlu2 %3449  ;;  %vm4248_vm3 = vweird.f32 %v9743_v9  ;;  %v4222_v20 = vand.u32 2147483647, %v9745_v19  ;;  %vm4218_vm5 = vweird.f32 %v9745_v19 }
 0x348   :  { %v9768_v31 = vpop.eup %6838  ;;  %v4186_v24 = vmul.f32 %v9741_v18, %v4185_v45  ;;  %v9776_v12 = vadd.f32 1.0, %v6837_v40  ;;  %vm9816_vm7 = vcmp.eq.f32.partialorder %v4252_v59, 8.507059e+37  ;;  %vm1243_vm1 = vcmp.eq.s32.totalorder %v7496_v52, %v9380_v3 }
 0x349   :  { %v6841_v13 = vpop.eup %6840  ;;  %v4206_v62 = vsel %vm4205_vm15, %v6829_v55, %v4202_v35  ;;  %v4229_v21 = vmul.f32 %v9768_v31, %v9731_v34  ;;  %vm4234_vm6 = vweird.f32 %v9768_v31  ;;  %vm9834_vm9 = vcmp.eq.f32.partialorder %v4222_v20, 8.507059e+37 }
 0x34a   :  { %v4211_v45 = vsel %vm9747_vm11, %v4210_v0, %v4206_v62  ;;  %v4187_v40 = vadd.f32 %v9741_v18, %v4186_v24  ;;  %6846 = vrcp.f32 %v9776_v12  ;;  %6612 = vmatmul.msk.f32.gmra.mxu1 %vm1521_vm0, %v9655_v56  ;;  %6654 = vmatmul.msk.f32.gmra.mxu3 %vm1521_vm0, %v9727_v10  ;;  %v9798_v7 = vpop.eup %6842  ;;  %v4255_v62 = vor.u32 1.1754944e-38, %v4254_v53  ;;  %v3454_v10 = vpop.xlane.xlu1 %3453  ;;  %vm4235_vm11 = vmor %vm4233_vm14, %vm4234_vm6 }
 0x34b   :  { %6060 = vst.msk [vmem:[%s12463_s4 + $0x8] sm:$0xff] %vm6058_vm8, %v4211_v45  ;;  %v4230_v38 = vsub.f32 1.0, %v4229_v21  ;;  %v4224_v56 = vand.u32 2147483648, %v9745_v19  ;;  %v6694_v0 = vmul.f32 -1.442695, %v3446_v5  ;;  %v9810_v55 = vpop.eup %6844  ;;  %v4244_v35 = vmul.f32 %v9798_v7, %v9743_v9  ;;  %v3452_v53 = vpop.xlane.xlu0 %3451 }
 0x34c   :  { %v4191_v41 = vsel %vm4190_vm4, %v9741_v18, %v4187_v40  ;;  %v9820_v21 = vadd.f32 1.0, %v6841_v13  ;;  %v4214_v18 = vmul.f32 %v9810_v55, %v9745_v19  ;;  %v4267_v45 = vand.u32 2147483647, %v9776_v12 }
 0x34d   :  { %v4196_v5 = vsel %vm9759_vm13, %v4195_v46, %v4191_v41  ;;  %v4231_v24 = vmul.f32 %v9768_v31, %v4230_v38  ;;  %v9828_v40 = vpop.f32.mrf.mxu3  ;;  %v4245_v59 = vsub.f32 1.0, %v4244_v35  ;;  %v4269_v11 = vand.u32 2147483648, %v9776_v12 }
 0x34e   :  { %12671 = vst [vmem:[#allocation65_spill] sm:$0xff] %v9828_v40  ;;  %6848 = vrcp.f32 %v9820_v21  ;;  %v3035_v46 = vpop.f32.mrf.mxu1  ;;  %v4215_v41 = vsub.f32 1.0, %v4214_v18  ;;  %v4225_v36 = vor.u32 1.1754944e-38, %v4224_v56  ;;  %vm4263_vm10 = vweird.f32 %v9776_v12 }
 0x34f   :  { %6059 = vst.msk [vmem:[%s12463_s4] sm:$0xff] %vm6058_vm8, %v4196_v5  ;;  %v4232_v38 = vadd.f32 %v9768_v31, %v4231_v24  ;;  %v4246_v20 = vmul.f32 %v9798_v7, %v4245_v59  ;;  %vm4249_vm12 = vweird.f32 %v9798_v7  ;;  %vm4219_vm13 = vweird.f32 %v9810_v55 }
 0x350   :  { %v9842_v40 = vpop.eup %6846  ;;  %6850 = vpow2.f32 %v6694_v0  ;;  %v4216_v56 = vmul.f32 %v9810_v55, %v4215_v41  ;;  %vm9855_vm15 = vcmp.eq.f32.partialorder %v4267_v45, 8.507059e+37  ;;  %v4270_v59 = vor.u32 1.1754944e-38, %v4269_v11  ;;  %v3456_v0 = vpop.xlane.xlu2 %3455 }
 0x351   :  { %v4236_v35 = vsel %vm4235_vm11, %v9768_v31, %v4232_v38  ;;  %v4259_v5 = vmul.f32 %v9842_v40, %v9776_v12  ;;  %v4247_v18 = vadd.f32 %v9798_v7, %v4246_v20  ;;  %v4297_v42 = vand.u32 2147483647, %v9820_v21  ;;  %v9885_v11 = vpop.f32.mrf.mxu0 }
 0x352   :  { %v4241_v34 = vsel %vm9782_vm2, %v4240_v51, %v4236_v35  ;;  %6613 = vmatmul.msk.f32.gmra.mxu1 %vm1521_vm0, %v9651_v1  ;;  %6655 = vmatmul.msk.f32.gmra.mxu3 %vm1521_vm0, %v9723_v54  ;;  %vm1240_vm14 = vcmp.eq.s32.totalorder %v7496_v52, %v9348_v37  ;;  %vm4250_vm2 = vmor %vm4248_vm3, %vm4249_vm12  ;;  %v4217_v47 = vadd.f32 %v9810_v55, %v4216_v56  ;;  %v12676_v1 = vld [vmem:[#allocation63_spill] sm:$0xff]  ;;  %v6696_v51 = vmul.f32 -1.442695, %v9778_v50 }
 0x353   :  { %6062 = vst.msk [vmem:[%s12463_s4 + $0x18] sm:$0xff] %vm6058_vm8, %v4241_v34  ;;  %v4260_v31 = vsub.f32 1.0, %v4259_v5  ;;  %v3341_v54 = vmul.f32 %v9764_v17, %v12676_v1  ;;  %vm1246_vm4 = vcmp.eq.s32.totalorder %v7496_v52, %v9408_v29  ;;  %v4251_v38 = vsel %vm4250_vm2, %v9798_v7, %v4247_v18  ;;  %vm4220_vm3 = vmor %vm4218_vm5, %vm4219_vm13  ;;  %v3460_v7 = vpop.xlane.xlu1 %3459 }
 0x354   :  { %v9883_v45 = vpop.eup %6848  ;;  %vm4264_vm6 = vweird.f32 %v9842_v40  ;;  %v6698_v9 = vmul.f32 -1.442695, %v3454_v10  ;;  %v6697_v17 = vmul.f32 -1.442695, %v3452_v53  ;;  %v4256_v50 = vsel %vm9816_vm7, %v4255_v62, %v4251_v38  ;;  %v3458_v53 = vpop.xlane.xlu0 %3457 }
 0x355   :  { %v4221_v41 = vsel %vm4220_vm3, %v9810_v55, %v4217_v47  ;;  %v4261_v20 = vmul.f32 %v9842_v40, %v4260_v31  ;;  %v4289_v35 = vmul.f32 %v9883_v45, %v9820_v21  ;;  %3499 = vadd.xlane.f32.xlu0 %v3341_v54  ;;  %v9901_v56 = vpop.f32.mrf.mxu3  ;;  %6063 = vst.msk [vmem:[%s12463_s4 + $0x20] sm:$0xff] %vm6058_vm8, %v4256_v50  ;;  %v4299_v10 = vand.u32 2147483648, %v9820_v21  ;;  %v12677_v55 = vld [vmem:[#allocation67_spill] sm:$0xff]  ;;  %vm4265_vm5 = vmor %vm4263_vm10, %vm4264_vm6 }
 0x356   :  { %v6851_v19 = vpop.eup %6850  ;;  %v4226_v62 = vsel %vm9834_vm9, %v4225_v36, %v4221_v41  ;;  %6852 = vpow2.f32 %v6696_v51  ;;  %v3342_v58 = vmul.f32 %v3035_v46, %v12677_v55  ;;  %v3038_v5 = vpop.f32.mrf.mxu1  ;;  %vm4294_vm7 = vweird.f32 %v9883_v45 }
 0x357   :  { %6061 = vst.msk [vmem:[%s12463_s4 + $0x10] sm:$0xff] %vm6058_vm8, %v4226_v62  ;;  %v4262_v34 = vadd.f32 %v9842_v40, %v4261_v20  ;;  %v4290_v18 = vsub.f32 1.0, %v4289_v35  ;;  %v9916_v47 = vadd.f32 1.0, %v6851_v19  ;;  %6854 = vpow2.f32 %v6698_v9 }
 0x358   :  { %6856 = vpow2.f32 %v6697_v17  ;;  %v6699_v36 = vmul.f32 -1.442695, %v3456_v0  ;;  %v6701_v13 = vmul.f32 -1.442695, %v3460_v7  ;;  %3501 = vadd.xlane.f32.xlu1 %v3342_v58  ;;  %v6700_v1 = vmul.f32 -1.442695, %v3458_v53  ;;  %v3462_v51 = vpop.xlane.xlu2 %3461 }
 0x359   :  { %v4266_v46 = vsel %vm4265_vm5, %v9842_v40, %v4262_v34  ;;  %v4291_v31 = vmul.f32 %v9883_v45, %v4290_v18  ;;  %6858 = vrcp.f32 %v9916_v47  ;;  %vm1239_vm9 = vcmp.eq.s32.totalorder %v7496_v52, %v9360_v61  ;;  %v12678_v0 = vld [vmem:[#allocation72_spill] sm:$0xff] }
 0x35a   :  { %vm1238_vm11 = vcmp.eq.s32.totalorder %v7496_v52, %v9350_v49  ;;  %v4271_v12 = vsel %vm9855_vm15, %v4270_v59, %v4266_v46  ;;  %6860 = vpow2.f32 %v6699_v36  ;;  %6614 = vmatmul.msk.f32.gmra.mxu1 %vm1521_vm0, %v9632_v63  ;;  %6656 = vmatmul.msk.f32.gmra.mxu3 %vm1521_vm0, %v9720_v22  ;;  %vm4293_vm10 = vweird.f32 %v9820_v21  ;;  %v9962_v21 = vpop.f32.mrf.mxu0 }
 0x35b   :  { %6064 = vst.msk [vmem:[%s12463_s4 + $0x28] sm:$0xff] %vm6058_vm8, %v4271_v12  ;;  %v4292_v40 = vadd.f32 %v9883_v45, %v4291_v31  ;;  %6862 = vpow2.f32 %v6701_v13  ;;  %v3343_v24 = vmul.f32 %v3038_v5, %v12678_v0  ;;  %vm1242_vm12 = vcmp.eq.s32.totalorder %v7496_v52, %v9390_v4  ;;  %vm9947_vm13 = vmor %vm4293_vm10, %vm4294_vm7  ;;  %v3466_v53 = vpop.xlane.xlu1 %3465 }
 0x35c   :  { %v6853_v59 = vpop.eup %6852  ;;  %vm4298_vm15 = vcmp.eq.f32.partialorder %v4297_v42, 8.507059e+37  ;;  %v4300_v22 = vor.u32 1.1754944e-38, %v4299_v10  ;;  %v4282_v54 = vand.u32 2147483647, %v9916_v47  ;;  %v4284_v17 = vand.u32 2147483648, %v9916_v47  ;;  %v3464_v31 = vpop.xlane.xlu0 %3463 }
 0x35d   :  { %v6855_v38 = vpop.eup %6854  ;;  %v4296_v9 = vsel %vm9947_vm13, %v9883_v45, %v4292_v40  ;;  %v9958_v50 = vadd.f32 1.0, %v6853_v59  ;;  %6864 = vpow2.f32 %v6700_v1  ;;  %3503 = vadd.xlane.f32.xlu2 %v3343_v24  ;;  %v9960_v41 = vpop.f32.mrf.mxu3  ;;  %v9968_v42 = vsel %vm1240_vm14, 1.0, %v12484_v23 }
 0x35e   :  { %v6857_v20 = vpop.eup %6856  ;;  %v9974_v45 = vsel %vm1243_vm1, 1.0, %v12484_v23  ;;  %v4301_v35 = vsel %vm4298_vm15, %v4300_v22, %v4296_v9  ;;  %v9976_v7 = vadd.f32 1.0, %v6855_v38  ;;  %v9978_v19 = vpop.f32.mrf.mxu1  ;;  %v9984_v10 = vsel %vm1246_vm4, 1.0, %v12484_v23 }
 0x35f   :  { %v6859_v62 = vpop.eup %6858  ;;  %v9990_v37 = vsel %vm1239_vm9, 1.0, %v12484_v23  ;;  %6066 = vst.msk [vmem:[%s12463_s4 + $0x38] sm:$0xff] %vm6058_vm8, %v4301_v35  ;;  %6866 = vrcp.f32 %v9958_v50  ;;  %v6702_v3 = vmul.f32 -1.442695, %v3462_v51  ;;  %v6532_v29 = vsel %vm1238_vm11, 1.0, %v12484_v23 }
 0x360   :  { %v6861_v55 = vpop.eup %6860  ;;  %v10005_v61 = vsel %vm1242_vm12, 1.0, %v12484_v23  ;;  %v4274_v58 = vmul.f32 %v6859_v62, %v9916_v47  ;;  %6868 = vrcp.f32 %v9976_v7  ;;  %vm4278_vm14 = vweird.f32 %v9916_v47 }
 0x361   :  { %v6863_v5 = vpop.eup %6862  ;;  %vm10010_vm1 = vcmp.eq.f32.partialorder %v4282_v54, 8.507059e+37  ;;  %v4285_v49 = vor.u32 1.1754944e-38, %v4284_v17  ;;  %v4312_v18 = vand.u32 2147483647, %v9958_v50  ;;  %v4314_v4 = vand.u32 2147483648, %v9958_v50 }
 0x362   :  { %v4275_v36 = vsub.f32 1.0, %v4274_v58  ;;  %v10016_v13 = vadd.f32 1.0, %v6857_v20  ;;  %v10018_v46 = vadd.f32 1.0, %v6861_v55  ;;  %6615 = vmatmul.msk.f32.gmra.mxu1 %vm1521_vm0, %v9693_v16  ;;  %6657 = vmatmul.msk.f32.gmra.mxu3 %vm1521_vm0, %v6532_v29  ;;  %v4342_v12 = vand.u32 2147483647, %v9976_v7 }
 0x363   :  { %v6865_v1 = vpop.eup %6864  ;;  %v4344_v40 = vand.u32 2147483648, %v9976_v7  ;;  %6870 = vpow2.f32 %v6702_v3  ;;  %v6704_v0 = vmul.f32 -1.442695, %v3466_v53  ;;  %vm4279_vm2 = vweird.f32 %v6859_v62 }
 0x364   :  { %v4276_v24 = vmul.f32 %v6859_v62, %v4275_v36  ;;  %6872 = vrcp.f32 %v10016_v13  ;;  %v10026_v59 = vadd.f32 1.0, %v6863_v5  ;;  %vm4308_vm4 = vweird.f32 %v9958_v50  ;;  %vm4280_vm5 = vmor %vm4278_vm14, %vm4279_vm2  ;;  %v10057_v5 = vpop.f32.mrf.mxu0 }
 0x365   :  { %v6867_v63 = vpop.eup %6866  ;;  %vm4338_vm3 = vweird.f32 %v9976_v7  ;;  %6874 = vrcp.f32 %v10018_v46  ;;  %v10031_v16 = vmul.f32 -1.442695, %v3464_v31  ;;  %v10033_v22 = vpop.f32.mrf.mxu3  ;;  %vm10038_vm6 = vcmp.eq.f32.partialorder %v4312_v18, 8.507059e+37 }
 0x366   :  { %v10035_v54 = vpop.eup %6868  ;;  %v4277_v51 = vadd.f32 %v6859_v62, %v4276_v24  ;;  %v4304_v38 = vmul.f32 %v6867_v63, %v9958_v50  ;;  %v4315_v17 = vor.u32 1.1754944e-38, %v4314_v4  ;;  %v10042_v20 = vadd.f32 1.0, %v6865_v1  ;;  %v10044_v35 = vpop.f32.mrf.mxu1 }
 0x367   :  { %v4334_v3 = vmul.f32 %v10035_v54, %v9976_v7  ;;  %vm10051_vm7 = vcmp.eq.f32.partialorder %v4342_v12, 8.507059e+37  ;;  %v4345_v29 = vor.u32 1.1754944e-38, %v4344_v40  ;;  %v4327_v58 = vand.u32 2147483647, %v10016_v13 }
 0x368   :  { %v4329_v53 = vand.u32 2147483648, %v10016_v13  ;;  %v4281_v18 = vsel %vm4280_vm5, %v6859_v62, %v4277_v51  ;;  %v4305_v36 = vsub.f32 1.0, %v4304_v38  ;;  %v4357_v4 = vand.u32 2147483647, %v10018_v46 }
 0x369   :  { %6876 = vrcp.f32 %v10026_v59  ;;  %v6871_v47 = vpop.eup %6870  ;;  %v4286_v31 = vsel %vm10010_vm1, %v4285_v49, %v4281_v18  ;;  %v4335_v1 = vsub.f32 1.0, %v4334_v3  ;;  %vm4323_vm9 = vweird.f32 %v10016_v13 }
 0x36a   :  { %6878 = vpow2.f32 %v6704_v0  ;;  %v10064_v12 = vpop.eup %6872  ;;  %6065 = vst.msk [vmem:[%s12463_s4 + $0x30] sm:$0xff] %vm6058_vm8, %v4286_v31  ;;  %v4306_v62 = vmul.f32 %v6867_v63, %v4305_v36  ;;  %vm4309_vm11 = vweird.f32 %v6867_v63  ;;  %vm4353_vm10 = vweird.f32 %v10018_v46  ;;  %6616 = vmatmul.msk.f32.gmra.mxu1 %vm1521_vm0, %v9683_v32  ;;  %6658 = vmatmul.msk.f32.gmra.mxu3 %vm1521_vm0, %v9990_v37  ;;  %v10089_v37 = vpop.xlane.xlu2 %3467 }
 0x36b   :  { %6880 = vrcp.f32 %v10042_v20  ;;  %v6875_v34 = vpop.eup %6874  ;;  %v4336_v49 = vmul.f32 %v10035_v54, %v4335_v1  ;;  %vm4339_vm12 = vweird.f32 %v10035_v54  ;;  %v4319_v40 = vmul.f32 %v10064_v12, %v10016_v13  ;;  %vm4310_vm14 = vmor %vm4308_vm4, %vm4309_vm11 }
 0x36c   :  { %vm10080_vm13 = vcmp.eq.f32.partialorder %v4327_v58, 8.507059e+37  ;;  %v4307_v24 = vadd.f32 %v6867_v63, %v4306_v62  ;;  %v4330_v51 = vor.u32 1.1754944e-38, %v4329_v53  ;;  %v4349_v38 = vmul.f32 %v6875_v34, %v10018_v46  ;;  %vm4340_vm2 = vmor %vm4338_vm3, %vm4339_vm12 }
 0x36d   :  { %vm10085_vm15 = vcmp.eq.f32.partialorder %v4357_v4, 8.507059e+37  ;;  %v4337_v3 = vadd.f32 %v10035_v54, %v4336_v49  ;;  %v4320_v58 = vsub.f32 1.0, %v4319_v40  ;;  %v4359_v18 = vand.u32 2147483648, %v10018_v46  ;;  %v10097_v53 = vpop.f32.mrf.mxu3 }
 0x36e   :  { %vm4383_vm1 = vweird.f32 %v10026_v59  ;;  %12691 = vst [vmem:[#allocation66_spill] sm:$0xff] %v10097_v53  ;;  %v4311_v4 = vsel %vm4310_vm14, %v6867_v63, %v4307_v24  ;;  %vm4324_vm5 = vweird.f32 %v10064_v12  ;;  %v4350_v50 = vsub.f32 1.0, %v4349_v38  ;;  %v10111_v24 = vpop.f32.mrf.mxu1 }
 0x36f   :  { %v6877_v36 = vpop.eup %6876  ;;  %v10104_v31 = vadd.f32 1.0, %v6871_v47  ;;  %v4316_v62 = vsel %vm10038_vm6, %v4315_v17, %v4311_v4  ;;  %v4341_v49 = vsel %vm4340_vm2, %v10035_v54, %v4337_v3  ;;  %v4321_v40 = vmul.f32 %v10064_v12, %v4320_v58  ;;  %v3472_v58 = vpop.xlane.xlu1 %3471  ;;  %vm4325_vm3 = vmor %vm4323_vm9, %vm4324_vm5 }
 0x370   :  { %v6879_v1 = vpop.eup %6878  ;;  %v4379_v63 = vmul.f32 %v6877_v36, %v10026_v59  ;;  %6067 = vst.msk [vmem:[%s12463_s4 + $0x40] sm:$0xff] %vm6058_vm8, %v4316_v62  ;;  %v4346_v7 = vsel %vm10051_vm7, %v4345_v29, %v4341_v49  ;;  %v4351_v47 = vmul.f32 %v6875_v34, %v4350_v50  ;;  %vm4354_vm4 = vweird.f32 %v6875_v34  ;;  %v10126_v4 = vpop.f32.mrf.mxu0 }
 0x371   :  { %v6881_v53 = vpop.eup %6880  ;;  %v4387_v9 = vand.u32 2147483647, %v10026_v59  ;;  %6069 = vst.msk [vmem:[%s12463_s4 + $0x50] sm:$0xff] %vm6058_vm8, %v4346_v7  ;;  %v4322_v54 = vadd.f32 %v10064_v12, %v4321_v40  ;;  %v4360_v17 = vor.u32 1.1754944e-38, %v4359_v18  ;;  %v4389_v29 = vand.u32 2147483648, %v10026_v59  ;;  %vm4355_vm6 = vmor %vm4353_vm10, %vm4354_vm4  ;;  %v3470_v49 = vpop.xlane.xlu0 %3469 }
 0x372   :  { %v4380_v38 = vsub.f32 1.0, %v4379_v63  ;;  %v4364_v3 = vmul.f32 %v6881_v53, %v10042_v20  ;;  %v4352_v55 = vadd.f32 %v6875_v34, %v4351_v47  ;;  %v4372_v50 = vand.u32 2147483647, %v10042_v20  ;;  %6617 = vmatmul.msk.f32.gmra.mxu1 %vm1521_vm0, %v9639_v28  ;;  %6659 = vmatmul.msk.f32.gmra.mxu3 %vm1521_vm0, %v9968_v42  ;;  %v3474_v0 = vpop.xlane.xlu2 %3473 }
 0x373   :  { %6882 = vrcp.f32 %v10104_v31  ;;  %v4326_v18 = vsel %vm4325_vm3, %v10064_v12, %v4322_v54  ;;  %vm4384_vm7 = vweird.f32 %v6877_v36  ;;  %v4374_v7 = vand.u32 2147483648, %v10042_v20 }
 0x374   :  { %v4381_v13 = vmul.f32 %v6877_v36, %v4380_v38  ;;  %v4365_v62 = vsub.f32 1.0, %v4364_v3  ;;  %v4331_v40 = vsel %vm10080_vm13, %v4330_v51, %v4326_v18  ;;  %v4356_v63 = vsel %vm4355_vm6, %v6875_v34, %v4352_v55  ;;  %vm4385_vm10 = vmor %vm4383_vm1, %vm4384_vm7 }
 0x375   :  { %v10146_v28 = vadd.f32 1.0, %v6879_v1  ;;  %6068 = vst.msk [vmem:[%s12463_s4 + $0x48] sm:$0xff] %vm6058_vm8, %v4331_v40  ;;  %v4361_v42 = vsel %vm10085_vm15, %v4360_v17, %v4356_v63  ;;  %vm4369_vm9 = vweird.f32 %v6881_v53  ;;  %vm1241_vm11 = vcmp.eq.s32.totalorder %v7496_v52, %v9384_v44  ;;  %v10163_v51 = vpop.f32.mrf.mxu3  ;;  %v12692_v17 = vld [vmem:[#allocation76_spill] sm:$0xff] }
 0x376   :  { %v4382_v46 = vadd.f32 %v6877_v36, %v4381_v13  ;;  %v4366_v12 = vmul.f32 %v6881_v53, %v4365_v62  ;;  %6070 = vst.msk [vmem:[%s12463_s4 + $0x58] sm:$0xff] %vm6058_vm8, %v4361_v42  ;;  %vm4388_vm12 = vcmp.eq.f32.partialorder %v4387_v9, 8.507059e+37  ;;  %v4390_v34 = vor.u32 1.1754944e-38, %v4389_v29  ;;  %v10183_v3 = vpop.f32.mrf.mxu1 }
 0x377   :  { %6884 = vrcp.f32 %v10146_v28  ;;  %vm4368_vm13 = vweird.f32 %v10042_v20  ;;  %v4375_v59 = vor.u32 1.1754944e-38, %v4374_v7  ;;  %v3344_v9 = vmul.f32 %v9978_v19, %v12692_v17 }
 0x378   :  { %v4386_v32 = vsel %vm4385_vm10, %v6877_v36, %v4382_v46  ;;  %v4367_v1 = vadd.f32 %v6881_v53, %v4366_v12  ;;  %6886 = vpow2.f32 %v10031_v16  ;;  %vm4370_vm15 = vmor %vm4368_vm13, %vm4369_vm9  ;;  %v6705_v38 = vmul.f32 -1.442695, %v10089_v37  ;;  %v10200_v18 = vpop.f32.mrf.mxu0  ;;  %v12694_v12 = vld [vmem:[#allocation83_spill] sm:$0xff] }
 0x379   :  { %v10167_v47 = vpop.eup %6882  ;;  %v4391_v54 = vsel %vm4388_vm12, %v4390_v34, %v4386_v32  ;;  %v6535_v36 = vsel %vm1241_vm11, 1.0, %v12484_v23  ;;  %vm4373_vm14 = vcmp.eq.f32.partialorder %v4372_v50, 8.507059e+37  ;;  %v6707_v37 = vmul.f32 -1.442695, %v3472_v58  ;;  %3505 = vadd.xlane.f32.xlu0 %v3344_v9  ;;  %v3478_v50 = vpop.xlane.xlu1 %3477 }
 0x37a   :  { %6072 = vst.msk [vmem:[%s12463_s4 + $0x68] sm:$0xff] %vm6058_vm8, %v4391_v54  ;;  %v4371_v16 = vsel %vm4370_vm15, %v6881_v53, %v4367_v1  ;;  %v4394_v20 = vmul.f32 %v10167_v47, %v10104_v31  ;;  %6888 = vpow2.f32 %v6705_v38  ;;  %v6706_v55 = vmul.f32 -1.442695, %v3470_v49  ;;  %6618 = vmatmul.msk.f32.gmra.mxu1 %vm1521_vm0, %v9707_v30  ;;  %v12693_v53 = vld [vmem:[#allocation80_spill] sm:$0xff]  ;;  %6660 = vmatmul.msk.f32.gmra.mxu3 %vm1521_vm0, %v6535_v36  ;;  %v3476_v7 = vpop.xlane.xlu0 %3475  ;;  %v3480_v9 = vpop.xlane.xlu2 %3479 }
 0x37b   :  { %v4376_v19 = vsel %vm4373_vm14, %v4375_v59, %v4371_v16  ;;  %vm1245_vm1 = vcmp.eq.s32.totalorder %v7496_v52, %v9421_v8  ;;  %vm1244_vm2 = vcmp.eq.s32.totalorder %v7496_v52, %v9412_v43  ;;  %v3345_v58 = vmul.f32 %v10044_v35, %v12693_v53 }
 0x37c   :  { %6071 = vst.msk [vmem:[%s12463_s4 + $0x60] sm:$0xff] %vm6058_vm8, %v4376_v19  ;;  %v4395_v44 = vsub.f32 1.0, %v4394_v20  ;;  %v6708_v29 = vmul.f32 -1.442695, %v3474_v0  ;;  %v4402_v13 = vand.u32 2147483647, %v10104_v31  ;;  %6890 = vpow2.f32 %v6707_v37 }
 0x37d   :  { %v10198_v30 = vpop.eup %6884  ;;  %v4404_v62 = vand.u32 2147483648, %v10104_v31  ;;  %v4432_v49 = vand.u32 2147483647, %v10146_v28  ;;  %vm4399_vm5 = vweird.f32 %v10167_v47  ;;  %6892 = vpow2.f32 %v6706_v55  ;;  %3507 = vadd.xlane.f32.xlu1 %v3345_v58  ;;  %v10217_v38 = vpop.f32.mrf.mxu3 }
 0x37e   :  { %v6887_v40 = vpop.eup %6886  ;;  %v4396_v63 = vmul.f32 %v10167_v47, %v4395_v44  ;;  %v4424_v35 = vmul.f32 %v10198_v30, %v10146_v28  ;;  %6894 = vpow2.f32 %v6708_v29  ;;  %v6710_v46 = vmul.f32 -1.442695, %v3478_v50 }
 0x37f   :  { %v10209_v42 = vadd.f32 1.0, %v6887_v40  ;;  %v3346_v34 = vmul.f32 %v10111_v24, %v12694_v12  ;;  %vm4398_vm4 = vweird.f32 %v10104_v31  ;;  %v4434_v1 = vand.u32 2147483648, %v10146_v28  ;;  %v10224_v16 = vpop.f32.mrf.mxu1 }
 0x380   :  { %v4397_v0 = vadd.f32 %v10167_v47, %v4396_v63  ;;  %v4425_v32 = vsub.f32 1.0, %v4424_v35  ;;  %v6889_v54 = vpop.eup %6888  ;;  %vm4400_vm3 = vmor %vm4398_vm4, %vm4399_vm5  ;;  %vm4403_vm6 = vcmp.eq.f32.partialorder %v4402_v13, 8.507059e+37  ;;  %v4405_v59 = vor.u32 1.1754944e-38, %v4404_v62  ;;  %v10256_v40 = vpop.f32.mrf.mxu0 }
 0x381   :  { %6896 = vrcp.f32 %v10209_v42  ;;  %v6709_v17 = vmul.f32 -1.442695, %v3476_v7  ;;  %3509 = vadd.xlane.f32.xlu2 %v3346_v34  ;;  %vm4429_vm7 = vweird.f32 %v10198_v30  ;;  %v10222_v31 = vadd.f32 1.0, %v6889_v54 }
 0x382   :  { %v4401_v24 = vsel %vm4400_vm3, %v10167_v47, %v4397_v0  ;;  %v4426_v36 = vmul.f32 %v10198_v30, %v4425_v32  ;;  %v6891_v20 = vpop.eup %6890  ;;  %vm4428_vm9 = vweird.f32 %v10146_v28  ;;  %vm10227_vm11 = vcmp.eq.f32.partialorder %v4432_v49, 8.507059e+37  ;;  %6619 = vmatmul.msk.f32.gmra.mxu1 %vm1521_vm0, %v9696_v48  ;;  %6661 = vmatmul.msk.f32.gmra.mxu3 %vm1521_vm0, %v10005_v61  ;;  %v3482_v43 = vpop.xlane.xlu0 %3481 }
 0x383   :  { %v4406_v19 = vsel %vm4403_vm6, %v4405_v59, %v4401_v24  ;;  %6898 = vpow2.f32 %v6710_v46  ;;  %v6893_v47 = vpop.eup %6892  ;;  %v4435_v44 = vor.u32 1.1754944e-38, %v4434_v1  ;;  %v6711_v28 = vmul.f32 -1.442695, %v3480_v9  ;;  %vm4430_vm10 = vmor %vm4428_vm9, %vm4429_vm7 }
 0x384   :  { %6073 = vst.msk [vmem:[%s12463_s4 + $0x70] sm:$0xff] %vm6058_vm8, %v4406_v19  ;;  %v4427_v55 = vadd.f32 %v10198_v30, %v4426_v36  ;;  %6900 = vrcp.f32 %v10222_v31  ;;  %v6895_v53 = vpop.eup %6894  ;;  %v4417_v48 = vand.u32 2147483647, %v10209_v42  ;;  %v4419_v58 = vand.u32 2147483648, %v10209_v42 }
 0x385   :  { %v10245_v29 = vadd.f32 1.0, %v6891_v20  ;;  %v10247_v50 = vadd.f32 1.0, %v6893_v47  ;;  %v10250_v62 = vadd.f32 1.0, %v6895_v53  ;;  %6902 = vpow2.f32 %v6709_v17  ;;  %v10287_v34 = vpop.f32.mrf.mxu3 }
 0x386   :  { %v4431_v13 = vsel %vm4430_vm10, %v10198_v30, %v4427_v55  ;;  %v3347_v61 = vmul.f32 %v10183_v3, %v9786_v25  ;;  %v10262_v63 = vsel %vm1245_vm1, 1.0, %v12484_v23  ;;  %v10268_v30 = vsel %vm1244_vm2, 1.0, %v12484_v23 }
 0x387   :  { %v10254_v49 = vpop.eup %6896  ;;  %v4436_v35 = vsel %vm10227_vm11, %v4435_v44, %v4431_v13  ;;  %6904 = vrcp.f32 %v10245_v29  ;;  %vm4413_vm12 = vweird.f32 %v10209_v42  ;;  %v4447_v25 = vand.u32 2147483647, %v10222_v31  ;;  %v10292_v59 = vpop.f32.mrf.mxu1 }
 0x388   :  { %6075 = vst.msk [vmem:[%s12463_s4 + $0x80] sm:$0xff] %vm6058_vm8, %v4436_v35  ;;  %v4409_v8 = vmul.f32 %v10254_v49, %v10209_v42  ;;  %6906 = vpow2.f32 %v6711_v28  ;;  %3511 = vadd.xlane.f32.xlu0 %v3347_v61  ;;  %vm10281_vm13 = vcmp.eq.f32.partialorder %v4417_v48, 8.507059e+37  ;;  %v4420_v46 = vor.u32 1.1754944e-38, %v4419_v58  ;;  %v10334_v42 = vpop.f32.mrf.mxu0 }
 0x389   :  { %v6899_v3 = vpop.eup %6898  ;;  %v4449_v12 = vand.u32 2147483648, %v10222_v31  ;;  %6908 = vrcp.f32 %v10247_v50  ;;  %v4477_v1 = vand.u32 2147483647, %v10245_v29  ;;  %v4479_v54 = vand.u32 2147483648, %v10245_v29 }
 0x38a   :  { %v6901_v0 = vpop.eup %6900  ;;  %v4410_v32 = vsub.f32 1.0, %v4409_v8  ;;  %6910 = vrcp.f32 %v10250_v62  ;;  %vm4443_vm15 = vweird.f32 %v10222_v31  ;;  %v4464_v9 = vand.u32 2147483648, %v10247_v50  ;;  %6620 = vmatmul.msk.f32.gmra.mxu1 %vm1521_vm0, %v9642_v33  ;;  %6662 = vmatmul.msk.f32.gmra.mxu3 %vm1521_vm0, %v9974_v45 }
 0x38b   :  { %v4439_v17 = vmul.f32 %v6901_v0, %v10222_v31  ;;  %v10297_v24 = vmul.f32 -1.442695, %v3482_v43  ;;  %v6903_v36 = vpop.eup %6902  ;;  %vm4414_vm14 = vweird.f32 %v10254_v49  ;;  %vm10303_vm1 = vcmp.eq.f32.partialorder %v4447_v25, 8.507059e+37 }
 0x38c   :  { %v4411_v20 = vmul.f32 %v10254_v49, %v4410_v32  ;;  %v4462_v37 = vand.u32 2147483647, %v10247_v50  ;;  %v4450_v44 = vor.u32 1.1754944e-38, %v4449_v12  ;;  %vm4473_vm2 = vweird.f32 %v10245_v29  ;;  %vm4415_vm6 = vmor %vm4413_vm12, %vm4414_vm14 }
 0x38d   :  { %v6905_v47 = vpop.eup %6904  ;;  %v4440_v55 = vsub.f32 1.0, %v4439_v17  ;;  %v10311_v33 = vadd.f32 1.0, %v6899_v3  ;;  %vm4444_vm5 = vweird.f32 %v6901_v0  ;;  %vm10315_vm4 = vcmp.eq.f32.partialorder %v4477_v1, 8.507059e+37 }
 0x38e   :  { %v6907_v28 = vpop.eup %6906  ;;  %v4412_v53 = vadd.f32 %v10254_v49, %v4411_v20  ;;  %v4469_v48 = vmul.f32 %v6905_v47, %v10245_v29  ;;  %v4480_v13 = vor.u32 1.1754944e-38, %v4479_v54  ;;  %vm4458_vm3 = vweird.f32 %v10247_v50  ;;  %vm4445_vm9 = vmor %vm4443_vm15, %vm4444_vm5 }
 0x38f   :  { %v6909_v45 = vpop.eup %6908  ;;  %v4441_v61 = vmul.f32 %v6901_v0, %v4440_v55  ;;  %v4465_v35 = vor.u32 1.1754944e-38, %v4464_v9  ;;  %6912 = vrcp.f32 %v10311_v33  ;;  %v10325_v8 = vadd.f32 1.0, %v6903_v36 }
 0x390   :  { %v6911_v25 = vpop.eup %6910  ;;  %v4416_v43 = vsel %vm4415_vm6, %v10254_v49, %v4412_v53  ;;  %v4470_v3 = vsub.f32 1.0, %v4469_v48  ;;  %v4454_v12 = vmul.f32 %v6909_v45, %v10247_v50  ;;  %vm10329_vm7 = vcmp.eq.f32.partialorder %v4462_v37, 8.507059e+37  ;;  %v10340_v49 = vpop.f32.mrf.mxu3 }
 0x391   :  { %v4492_v1 = vand.u32 2147483647, %v10250_v62  ;;  %v4421_v54 = vsel %vm10281_vm13, %v4420_v46, %v4416_v43  ;;  %v4442_v17 = vadd.f32 %v6901_v0, %v4441_v61  ;;  %v4484_v9 = vmul.f32 %v6911_v25, %v10250_v62  ;;  %v10350_v46 = vpop.f32.mrf.mxu1  ;;  %v10411_v32 = vpop.f32.mrf.mxu0 }
 0x392   :  { %v4494_v36 = vand.u32 2147483648, %v10250_v62  ;;  %6074 = vst.msk [vmem:[%s12463_s4 + $0x78] sm:$0xff] %vm6058_vm8, %v4421_v54  ;;  %v4471_v20 = vmul.f32 %v6905_v47, %v4470_v3  ;;  %vm4474_vm11 = vweird.f32 %v6905_v47  ;;  %v4455_v7 = vsub.f32 1.0, %v4454_v12  ;;  %6621 = vmatmul.msk.f32.gmra.mxu1 %vm1521_vm0, %v9716_v39  ;;  %6663 = vmatmul.msk.f32.gmra.mxu3 %vm1521_vm0, %v10268_v30  ;;  %v3486_v12 = vpop.xlane.xlu2 %3485 }
 0x393   :  { %vm4488_vm10 = vweird.f32 %v10250_v62  ;;  %v4446_v37 = vsel %vm4445_vm9, %v6901_v0, %v4442_v17  ;;  %v4485_v55 = vsub.f32 1.0, %v4484_v9  ;;  %6914 = vrcp.f32 %v10325_v8  ;;  %vm4475_vm13 = vmor %vm4473_vm2, %vm4474_vm11 }
 0x394   :  { %v10353_v53 = vadd.f32 1.0, %v6907_v28  ;;  %v4451_v31 = vsel %vm10303_vm1, %v4450_v44, %v4446_v37  ;;  %v4472_v48 = vadd.f32 %v6905_v47, %v4471_v20  ;;  %v4456_v61 = vmul.f32 %v6909_v45, %v4455_v7  ;;  %v3484_v44 = vpop.xlane.xlu1 %3483 }
 0x395   :  { %vm4459_vm12 = vweird.f32 %v6909_v45  ;;  %v10361_v43 = vpop.eup %6912  ;;  %6076 = vst.msk [vmem:[%s12463_s4 + $0x88] sm:$0xff] %vm6058_vm8, %v4451_v31  ;;  %v4486_v39 = vmul.f32 %v6911_v25, %v4485_v55  ;;  %vm4489_vm15 = vweird.f32 %v6911_v25  ;;  %vm10370_vm14 = vcmp.eq.f32.partialorder %v4492_v1, 8.507059e+37 }
 0x396   :  { %v4495_v19 = vor.u32 1.1754944e-38, %v4494_v36  ;;  %v4476_v30 = vsel %vm4475_vm13, %v6905_v47, %v4472_v48  ;;  %v4457_v28 = vadd.f32 %v6909_v45, %v4456_v61  ;;  %v4514_v3 = vmul.f32 %v10361_v43, %v10311_v33  ;;  %vm4460_vm2 = vmor %vm4458_vm3, %vm4459_vm12  ;;  %v3488_v48 = vpop.xlane.xlu0 %3487 }
 0x397   :  { %vm4518_vm1 = vweird.f32 %v10311_v33  ;;  %v4481_v29 = vsel %vm10315_vm4, %v4480_v13, %v4476_v30  ;;  %v4487_v1 = vadd.f32 %v6911_v25, %v4486_v39  ;;  %v4522_v54 = vand.u32 2147483647, %v10311_v33  ;;  %vm4490_vm5 = vmor %vm4488_vm10, %vm4489_vm15 }
 0x398   :  { %v4524_v17 = vand.u32 2147483648, %v10311_v33  ;;  %6078 = vst.msk [vmem:[%s12463_s4 + $0x98] sm:$0xff] %vm6058_vm8, %v4481_v29  ;;  %v4461_v47 = vsel %vm4460_vm2, %v6909_v45, %v4457_v28  ;;  %v4515_v58 = vsub.f32 1.0, %v4514_v3  ;;  %v4507_v13 = vand.u32 2147483647, %v10325_v8  ;;  %v10399_v45 = vpop.f32.mrf.mxu3 }
 0x399   :  { %6916 = vrcp.f32 %v10353_v53  ;;  %v10393_v50 = vpop.eup %6914  ;;  %v4466_v9 = vsel %vm10329_vm7, %v4465_v35, %v4461_v47  ;;  %v4491_v36 = vsel %vm4490_vm5, %v6911_v25, %v4487_v1  ;;  %vm4503_vm4 = vweird.f32 %v10325_v8  ;;  %v3062_v25 = vpop.f32.mrf.mxu1 }
 0x39a   :  { %v4509_v20 = vand.u32 2147483648, %v10325_v8  ;;  %6077 = vst.msk [vmem:[%s12463_s4 + $0x90] sm:$0xff] %vm6058_vm8, %v4466_v9  ;;  %v4496_v62 = vsel %vm10370_vm14, %v4495_v19, %v4491_v36  ;;  %v4516_v7 = vmul.f32 %v10361_v43, %v4515_v58  ;;  %vm4519_vm3 = vweird.f32 %v10361_v43  ;;  %6622 = vmatmul.msk.f32.gmra.mxu1 %vm1521_vm0, %v9713_v14  ;;  %6664 = vmatmul.msk.f32.gmra.mxu3 %vm1521_vm0, %v10262_v63 }
 0x39b   :  { %v4499_v35 = vmul.f32 %v10393_v50, %v10325_v8  ;;  %6079 = vst.msk [vmem:[%s12463_s4 + $0xa0] sm:$0xff] %vm6058_vm8, %v4496_v62  ;;  %vm10417_vm6 = vcmp.eq.f32.partialorder %v4522_v54, 8.507059e+37  ;;  %v4525_v55 = vor.u32 1.1754944e-38, %v4524_v17  ;;  %6918 = vpow2.f32 %v10297_v24  ;;  %vm4520_vm9 = vmor %vm4518_vm1, %vm4519_vm3 }
 0x39c   :  { %v6713_v31 = vmul.f32 -1.442695, %v3484_v44  ;;  %v4517_v61 = vadd.f32 %v10361_v43, %v4516_v7  ;;  %vm10425_vm7 = vcmp.eq.f32.partialorder %v4507_v13, 8.507059e+37  ;;  %v3348_v19 = vmul.f32 %v10224_v16, %v9885_v11  ;;  %v3490_v30 = vpop.xlane.xlu1 %3489  ;;  %v3492_v63 = vpop.xlane.xlu2 %3491  ;;  %v12712_v7 = vld [vmem:[#allocation17_spill] sm:$0xff] }
 0x39d   :  { %v4500_v39 = vsub.f32 1.0, %v4499_v35  ;;  %v4510_v24 = vor.u32 1.1754944e-38, %v4509_v20  ;;  %v6714_v14 = vmul.f32 -1.442695, %v3486_v12  ;;  %v3349_v44 = vmul.f32 %v10292_v59, %v9962_v21 }
 0x39e   :  { %6920 = vpow2.f32 %v6713_v31  ;;  %v4521_v3 = vsel %vm4520_vm9, %v10361_v43, %v4517_v61  ;;  %vm4504_vm11 = vweird.f32 %v10393_v50  ;;  %3513 = vadd.xlane.f32.xlu1 %v3348_v19  ;;  %v6715_v16 = vmul.f32 -1.442695, %v3488_v48 }
 0x39f   :  { %v10439_v28 = vpop.eup %6916  ;;  %v4501_v11 = vmul.f32 %v10393_v50, %v4500_v39  ;;  %v4526_v33 = vsel %vm10417_vm6, %v4525_v55, %v4521_v3  ;;  %v4537_v21 = vand.u32 2147483647, %v10353_v53  ;;  %6922 = vpow2.f32 %v6714_v14  ;;  %3515 = vadd.xlane.f32.xlu2 %v3349_v44  ;;  %vm4505_vm10 = vmor %vm4503_vm4, %vm4504_vm11 }
 0x3a0   :  { %v4529_v12 = vmul.f32 %v10439_v28, %v10353_v53  ;;  %6081 = vst.msk [vmem:[%s12463_s4 + $0xb0] sm:$0xff] %vm6058_vm8, %v4526_v33  ;;  %6924 = vpow2.f32 %v6715_v16  ;;  %v3350_v43 = vmul.f32 %v10350_v46, %v10057_v5  ;;  %v6716_v29 = vmul.f32 -1.442695, %v3490_v30  ;;  %v10462_v58 = vpop.f32.mrf.mxu3 }
 0x3a1   :  { %v4502_v59 = vadd.f32 %v10393_v50, %v4501_v11  ;;  %v6919_v1 = vpop.eup %6918  ;;  %vm4534_vm12 = vweird.f32 %v10439_v28  ;;  %v4539_v17 = vand.u32 2147483648, %v10353_v53  ;;  %v6717_v47 = vmul.f32 -1.442695, %v3492_v63  ;;  %v3065_v46 = vpop.f32.mrf.mxu1 }
 0x3a2   :  { %v4530_v54 = vsub.f32 1.0, %v4529_v12  ;;  %v10465_v9 = vadd.f32 1.0, %v6919_v1  ;;  %3517 = vadd.xlane.f32.xlu0 %v3350_v43  ;;  %6926 = vpow2.f32 %v6716_v29  ;;  %v3351_v5 = vmul.f32 %v3062_v25, %v10126_v4  ;;  %6623 = vmatmul.msk.f32.gmra.mxu1 %vm1521_vm0, %v9648_v2  ;;  %v10487_v4 = vpop.f32.mrf.mxu0 }
 0x3a3   :  { %v4506_v13 = vsel %vm4505_vm10, %v10393_v50, %v4502_v59  ;;  %6928 = vpow2.f32 %v6717_v47  ;;  %v3352_v62 = vmul.f32 %v3065_v46, %v10200_v18  ;;  %v12711_v50 = vld [vmem:[#allocation3_spill] sm:$0xff]  ;;  %vm1205_vm15 = vcmp.eq.s32.totalorder %v7496_v52, %v12712_v7  ;;  %6665 = vmatmul.msk.f32.gmra.mxu3 %vm1521_vm0, %v9984_v10 }
 0x3a4   :  { %v6921_v36 = vpop.eup %6920  ;;  %v4511_v8 = vsel %vm10425_vm7, %v4510_v24, %v4506_v13  ;;  %v4531_v20 = vmul.f32 %v10439_v28, %v4530_v54  ;;  %vm1206_vm13 = vcmp.eq.s32.totalorder %v7496_v52, %v12711_v50  ;;  %vm1249_vm14 = vcmp.eq.s32.totalorder %v7496_v52, %v9436_v57 }
 0x3a5   :  { %6080 = vst.msk [vmem:[%s12463_s4 + $0xa8] sm:$0xff] %vm6058_vm8, %v4511_v8  ;;  %6930 = vrcp.f32 %v10465_v9  ;;  %v6923_v2 = vpop.eup %6922  ;;  %vm1248_vm1 = vcmp.eq.s32.totalorder %v7496_v52, %v9451_v60  ;;  %vm4533_vm2 = vweird.f32 %v10353_v53  ;;  %v10493_v35 = vadd.f32 1.0, %v6921_v36 }
 0x3a6   :  { %v4532_v18 = vadd.f32 %v10439_v28, %v4531_v20  ;;  %v6925_v25 = vpop.eup %6924  ;;  %vm1247_vm5 = vcmp.eq.s32.totalorder %v7496_v52, %v9443_v6  ;;  %vm4535_vm4 = vmor %vm4533_vm2, %vm4534_vm12  ;;  %vm4538_vm3 = vcmp.eq.f32.partialorder %v4537_v21, 8.507059e+37  ;;  %v4540_v10 = vor.u32 1.1754944e-38, %v4539_v17  ;;  %3519 = vadd.xlane.f32.xlu1 %v3351_v5 }
 0x3a7   :  { %v10499_v37 = vadd.f32 1.0, %v6923_v2  ;;  %v4552_v31 = vand.u32 2147483647, %v10465_v9  ;;  %v4554_v53 = vand.u32 2147483648, %v10465_v9  ;;  %6932 = vrcp.f32 %v10493_v35  ;;  %3521 = vadd.xlane.f32.xlu2 %v3352_v62 }
 0x3a8   :  { %v4536_v55 = vsel %vm4535_vm4, %v10439_v28, %v4532_v18  ;;  %v6927_v48 = vpop.eup %6926  ;;  %v10509_v61 = vsel %vm1206_vm13, 1.0, %v12484_v23  ;;  %v6499_v39 = vsel %vm1205_vm15, 1.0, %v12484_v23  ;;  %v10520_v24 = vsel %vm1249_vm14, 1.0, %v12484_v23  ;;  %v10538_v57 = vpop.f32.mrf.mxu3 }
 0x3a9   :  { %v4541_v0 = vsel %vm4538_vm3, %v4540_v10, %v4536_v55  ;;  %6934 = vrcp.f32 %v10499_v37  ;;  %v6929_v19 = vpop.eup %6928  ;;  %v10526_v14 = vsel %vm1248_vm1, 1.0, %v12484_v23  ;;  %v6541_v44 = vsel %vm1247_vm5, 1.0, %v12484_v23  ;;  %v3494_v28 = vpop.xlane.xlu0 %3493 }
 0x3aa   :  { %6082 = vst.msk [vmem:[%s12463_s4 + $0xb8] sm:$0xff] %vm6058_vm8, %v4541_v0  ;;  %v10536_v30 = vadd.f32 1.0, %v6925_v25  ;;  %vm4548_vm6 = vweird.f32 %v10465_v9  ;;  %v4567_v60 = vand.u32 2147483647, %v10493_v35  ;;  %v4569_v11 = vand.u32 2147483648, %v10493_v35  ;;  %v3068_v6 = vpop.f32.mrf.mxu1  ;;  %6624 = vmatmul.msk.f32.gmra.mxu1 %vm1521_vm0, %v6499_v39  ;;  %v10565_v46 = vpop.f32.mrf.mxu0 }
 0x3ab   :  { %v6931_v3 = vpop.eup %6930  ;;  %v10543_v16 = vadd.f32 1.0, %v6927_v48  ;;  %vm10546_vm7 = vcmp.eq.f32.partialorder %v4552_v31, 8.507059e+37  ;;  %v4555_v12 = vor.u32 1.1754944e-38, %v4554_v53  ;;  %v4582_v21 = vand.u32 2147483647, %v10499_v37  ;;  %6666 = vmatmul.msk.f32.gmra.mxu3 %vm1521_vm0, %v6541_v44 }
 0x3ac   :  { %v4544_v63 = vmul.f32 %v6931_v3, %v10465_v9  ;;  %v4584_v59 = vand.u32 2147483648, %v10499_v37  ;;  %6936 = vrcp.f32 %v10536_v30  ;;  %v10554_v43 = vadd.f32 1.0, %v6929_v19 }
 0x3ad   :  { %v6718_v29 = vmul.f32 -1.442695, %v3494_v28  ;;  %v6933_v1 = vpop.eup %6932  ;;  %vm4563_vm9 = vweird.f32 %v10493_v35  ;;  %vm4578_vm11 = vweird.f32 %v10499_v37  ;;  %6938 = vrcp.f32 %v10543_v16 }
 0x3ae   :  { %v4545_v54 = vsub.f32 1.0, %v4544_v63  ;;  %vm4549_vm10 = vweird.f32 %v6931_v3  ;;  %v4559_v47 = vmul.f32 %v6933_v1, %v10493_v35  ;;  %vm10561_vm12 = vcmp.eq.f32.partialorder %v4567_v60, 8.507059e+37 }
 0x3af   :  { %v6935_v17 = vpop.eup %6934  ;;  %v4570_v5 = vor.u32 1.1754944e-38, %v4569_v11  ;;  %vm10568_vm13 = vcmp.eq.f32.partialorder %v4582_v21, 8.507059e+37  ;;  %v4597_v62 = vand.u32 2147483647, %v10536_v30  ;;  %v4585_v7 = vor.u32 1.1754944e-38, %v4584_v59  ;;  %vm10584_vm14 = vmor %vm4548_vm6, %vm4549_vm10  ;;  %v3496_v11 = vpop.xlane.xlu1 %3495 }
 0x3b0   :  { %v4546_v36 = vmul.f32 %v6931_v3, %v4545_v54  ;;  %v4574_v8 = vmul.f32 %v6935_v17, %v10499_v37  ;;  %v4560_v50 = vsub.f32 1.0, %v4559_v47  ;;  %v4599_v2 = vand.u32 2147483648, %v10536_v30  ;;  %v10577_v55 = vpop.f32.mrf.mxu3 }
 0x3b1   :  { %6940 = vrcp.f32 %v10554_v43  ;;  %vm4593_vm15 = vweird.f32 %v10536_v30  ;;  %v4612_v10 = vand.u32 2147483647, %v10543_v16  ;;  %vm4564_vm1 = vweird.f32 %v6933_v1 }
 0x3b2   :  { %v4547_v18 = vadd.f32 %v6931_v3, %v4546_v36  ;;  %v4575_v25 = vsub.f32 1.0, %v4574_v8  ;;  %v10579_v31 = vpop.eup %6936  ;;  %v4561_v48 = vmul.f32 %v6933_v1, %v4560_v50  ;;  %vm4608_vm2 = vweird.f32 %v10543_v16  ;;  %v3071_v0 = vpop.f32.mrf.mxu1  ;;  %6625 = vmatmul.msk.f32.gmra.mxu1 %vm1521_vm0, %v10509_v61  ;;  %vm4565_vm3 = vmor %vm4563_vm9, %vm4564_vm1 }
 0x3b3   :  { %6942 = vpow2.f32 %v6718_v29  ;;  %v3353_v39 = vmul.f32 %v3068_v6, %v10256_v40  ;;  %v10590_v19 = vpop.eup %6938  ;;  %vm4579_vm5 = vweird.f32 %v6935_v17  ;;  %v4589_v9 = vmul.f32 %v10579_v31, %v10536_v30  ;;  %6667 = vmatmul.msk.f32.gmra.mxu3 %vm1521_vm0, %v10526_v14 }
 0x3b4   :  { %v4551_v44 = vsel %vm10584_vm14, %v6931_v3, %v4547_v18  ;;  %v4576_v28 = vmul.f32 %v6935_v17, %v4575_v25  ;;  %vm10596_vm4 = vcmp.eq.f32.partialorder %v4597_v62, 8.507059e+37  ;;  %v4562_v6 = vadd.f32 %v6933_v1, %v4561_v48  ;;  %vm4580_vm6 = vmor %vm4578_vm11, %vm4579_vm5  ;;  %v3498_v62 = vpop.xlane.xlu2 %3497 }
 0x3b5   :  { %v4556_v40 = vsel %vm10546_vm7, %v4555_v12, %v4551_v44  ;;  %v4600_v63 = vor.u32 1.1754944e-38, %v4599_v2  ;;  %v4604_v3 = vmul.f32 %v10590_v19, %v10543_v16  ;;  %3523 = vadd.xlane.f32.xlu0 %v3353_v39  ;;  %v4590_v33 = vsub.f32 1.0, %v4589_v9 }
 0x3b6   :  { %6083 = vst.msk [vmem:[%s12463_s4 + $0xc0] sm:$0xff] %vm6058_vm8, %v4556_v40  ;;  %v4577_v61 = vadd.f32 %v6935_v17, %v4576_v28  ;;  %v4614_v12 = vand.u32 2147483648, %v10543_v16  ;;  %v4627_v21 = vand.u32 2147483647, %v10554_v43  ;;  %v4566_v29 = vsel %vm4565_vm3, %v6933_v1, %v4562_v6 }
 0x3b7   :  { %v6941_v59 = vpop.eup %6940  ;;  %vm4594_vm7 = vweird.f32 %v10579_v31  ;;  %v4605_v14 = vsub.f32 1.0, %v4604_v3  ;;  %v6719_v54 = vmul.f32 -1.442695, %v3496_v11  ;;  %v4571_v35 = vsel %vm10561_vm12, %v4570_v5, %v4566_v29 }
 0x3b8   :  { %v4581_v47 = vsel %vm4580_vm6, %v6935_v17, %v4577_v61  ;;  %v4591_v36 = vmul.f32 %v10579_v31, %v4590_v33  ;;  %v4619_v8 = vmul.f32 %v6941_v59, %v10554_v43  ;;  %6084 = vst.msk [vmem:[%s12463_s4 + $0xc8] sm:$0xff] %vm6058_vm8, %v4571_v35  ;;  %vm4609_vm9 = vweird.f32 %v10590_v19  ;;  %v10633_v17 = vpop.f32.mrf.mxu0  ;;  %vm4595_vm11 = vmor %vm4593_vm15, %vm4594_vm7 }
 0x3b9   :  { %v6943_v50 = vpop.eup %6942  ;;  %v4586_v37 = vsel %vm10568_vm13, %v4585_v7, %v4581_v47  ;;  %v4606_v1 = vmul.f32 %v10590_v19, %v4605_v14  ;;  %6944 = vpow2.f32 %v6719_v54  ;;  %v3354_v20 = vmul.f32 %v3071_v0, %v10334_v42  ;;  %v10643_v7 = vpop.f32.mrf.mxu3  ;;  %vm4610_vm10 = vmor %vm4608_vm2, %vm4609_vm9 }
 0x3ba   :  { %6085 = vst.msk [vmem:[%s12463_s4 + $0xd0] sm:$0xff] %vm6058_vm8, %v4586_v37  ;;  %v4592_v13 = vadd.f32 %v10579_v31, %v4591_v36  ;;  %v4620_v5 = vsub.f32 1.0, %v4619_v8  ;;  %v10640_v2 = vadd.f32 1.0, %v6943_v50  ;;  %v4615_v25 = vor.u32 1.1754944e-38, %v4614_v12  ;;  %v3074_v39 = vpop.f32.mrf.mxu1 }
 0x3bb   :  { %v4607_v18 = vadd.f32 %v10590_v19, %v4606_v1  ;;  %v4629_v53 = vand.u32 2147483648, %v10554_v43  ;;  %v6720_v48 = vmul.f32 -1.442695, %v3498_v62  ;;  %vm4624_vm12 = vweird.f32 %v6941_v59  ;;  %3525 = vadd.xlane.f32.xlu1 %v3354_v20  ;;  %6668 = vmatmul.msk.f32.gmra.mxu3 %vm1521_vm0, %v10520_v24 }
 0x3bc   :  { %v4596_v44 = vsel %vm4595_vm11, %v10579_v31, %v4592_v13  ;;  %v4621_v42 = vmul.f32 %v6941_v59, %v4620_v5  ;;  %6946 = vrcp.f32 %v10640_v2  ;;  %vm4613_vm13 = vcmp.eq.f32.partialorder %v4612_v10, 8.507059e+37 }
 0x3bd   :  { %v4601_v30 = vsel %vm10596_vm4, %v4600_v63, %v4596_v44  ;;  %v4611_v0 = vsel %vm4610_vm10, %v10590_v19, %v4607_v18  ;;  %vm4623_vm15 = vweird.f32 %v10554_v43  ;;  %6948 = vpow2.f32 %v6720_v48 }
 0x3be   :  { %6086 = vst.msk [vmem:[%s12463_s4 + $0xd8] sm:$0xff] %vm6058_vm8, %v4601_v30  ;;  %v4616_v31 = vsel %vm4613_vm13, %v4615_v25, %v4611_v0  ;;  %v4622_v28 = vadd.f32 %v6941_v59, %v4621_v42  ;;  %v3355_v9 = vmul.f32 %v3074_v39, %v10411_v32  ;;  %vm4625_vm14 = vmor %vm4623_vm15, %vm4624_vm12  ;;  %v4630_v16 = vor.u32 1.1754944e-38, %v4629_v53 }
 0x3bf   :  { %v6945_v60 = vpop.eup %6944  ;;  %6087 = vst.msk [vmem:[%s12463_s4 + $0xe0] sm:$0xff] %vm6058_vm8, %v4616_v31  ;;  %vm4628_vm1 = vcmp.eq.f32.partialorder %v4627_v21, 8.507059e+37  ;;  %vm1250_vm2 = vcmp.eq.s32.totalorder %v7496_v52, %v9472_v26  ;;  %v4644_v12 = vand.u32 2147483648, %v10640_v2  ;;  %vm1251_vm4 = vcmp.eq.s32.totalorder %v7496_v52, %v9484_v15 }
 0x3c0   :  { %v4626_v24 = vsel %vm4625_vm14, %v6941_v59, %v4622_v28  ;;  %v4089_v43 = vadd.f32 1.0, %v6945_v60  ;;  %3527 = vadd.xlane.f32.xlu2 %v3355_v9  ;;  %v10684_v63 = vpop.f32.mrf.mxu0  ;;  %v6544_v3 = vsel %vm1250_vm2, 1.0, %v12484_v23  ;;  %v4642_v59 = vand.u32 2147483647, %v10640_v2 }
 0x3c1   :  { %v4631_v10 = vsel %vm4628_vm1, %v4630_v16, %v4626_v24  ;;  %v10681_v32 = vpop.f32.mrf.mxu3  ;;  %vm4638_vm3 = vweird.f32 %v10640_v2  ;;  %v4645_v54 = vor.u32 1.1754944e-38, %v4644_v12  ;;  %v6545_v37 = vsel %vm1251_vm4, 1.0, %v12484_v23 }
 0x3c2   :  { %v6947_v19 = vpop.eup %6946  ;;  %6088 = vst.msk [vmem:[%s12463_s4 + $0xe8] sm:$0xff] %vm6058_vm8, %v4631_v10  ;;  %6950 = vrcp.f32 %v4089_v43  ;;  %v3077_v40 = vpop.f32.mrf.mxu1  ;;  %vm4643_vm7 = vcmp.eq.f32.partialorder %v4642_v59, 8.507059e+37  ;;  %v4659_v13 = vand.u32 2147483648, %v4089_v43  ;;  %v4657_v20 = vand.u32 2147483647, %v4089_v43 }
 0x3c3   :  { %v4634_v11 = vmul.f32 %v6947_v19, %v10640_v2  ;;  %v6949_v6 = vpop.eup %6948  ;;  %v3356_v26 = vmul.f32 %v3077_v40, %v10487_v4  ;;  %6669 = vmatmul.msk.f32.gmra.mxu3 %vm1521_vm0, %v6544_v3  ;;  %vm4639_vm5 = vweird.f32 %v6947_v19  ;;  %vm4653_vm11 = vweird.f32 %v4089_v43 }
 0x3c4   :  { %v10688_v33 = vadd.f32 1.0, %v6949_v6  ;;  %vm4640_vm6 = vmor %vm4638_vm3, %vm4639_vm5  ;;  %vm1252_vm10 = vcmp.eq.s32.totalorder %v7496_v52, %v9468_v27  ;;  %v4660_v39 = vor.u32 1.1754944e-38, %v4659_v13  ;;  %vm4658_vm13 = vcmp.eq.f32.partialorder %v4657_v20, 8.507059e+37 }
 0x3c5   :  { %v4635_v61 = vsub.f32 1.0, %v4634_v11  ;;  %3529 = vadd.xlane.f32.xlu0 %v3356_v26  ;;  %v6546_v24 = vsel %vm1252_vm10, 1.0, %v12484_v23 }
 0x3c6   :  { %6952 = vrcp.f32 %v10688_v33  ;;  %v4674_v30 = vand.u32 2147483648, %v10688_v33  ;;  %v4672_v28 = vand.u32 2147483647, %v10688_v33  ;;  %vm4668_vm14 = vweird.f32 %v10688_v33 }
 0x3c7   :  { %v4636_v21 = vmul.f32 %v6947_v19, %v4635_v61 }
 0x3c8   :  { %v6951_v29 = vpop.eup %6950  ;;  %v3500_v35 = vpop.xlane.xlu0 %3499  ;;  %v4675_v40 = vor.u32 1.1754944e-38, %v4674_v30  ;;  %vm4673_vm2 = vcmp.eq.f32.partialorder %v4672_v28, 8.507059e+37 }
 0x3c9   :  { %v4637_v14 = vadd.f32 %v6947_v19, %v4636_v21  ;;  %v4649_v4 = vmul.f32 %v6951_v29, %v4089_v43  ;;  %v10697_v47 = vpop.f32.mrf.mxu3  ;;  %v6721_v62 = vmul.f32 -1.442695, %v3500_v35  ;;  %vm4654_vm9 = vweird.f32 %v6951_v29  ;;  %v10706_v25 = vpop.f32.mrf.mxu0 }
 0x3ca   :  { %v3080_v50 = vpop.f32.mrf.mxu1  ;;  %vm4655_vm12 = vmor %vm4653_vm11, %vm4654_vm9 }
 0x3cb   :  { %v4641_v36 = vsel %vm4640_vm6, %v6947_v19, %v4637_v14  ;;  %v4650_v8 = vsub.f32 1.0, %v4649_v4  ;;  %v3357_v15 = vmul.f32 %v3080_v50, %v10565_v46  ;;  %6954 = vpow2.f32 %v6721_v62  ;;  %v3502_v18 = vpop.xlane.xlu1 %3501  ;;  %6670 = vmatmul.msk.f32.gmra.mxu3 %vm1521_vm0, %v6545_v37 }
 0x3cc   :  { %v4646_v1 = vsel %vm4643_vm7, %v4645_v54, %v4641_v36  ;;  %v6953_v5 = vpop.eup %6952  ;;  %v6722_v48 = vmul.f32 -1.442695, %v3502_v18 }
 0x3cd   :  { %6089 = vst.msk [vmem:[%s12463_s4 + $0xf0] sm:$0xff] %vm6058_vm8, %v4646_v1  ;;  %v4651_v2 = vmul.f32 %v6951_v29, %v4650_v8  ;;  %v4664_v53 = vmul.f32 %v6953_v5, %v10688_v33  ;;  %3531 = vadd.xlane.f32.xlu1 %v3357_v15  ;;  %vm4669_vm15 = vweird.f32 %v6953_v5  ;;  %v12724_v8 = vld [vmem:[#allocation15_spill] sm:$0xff] }
 0x3ce   :  { %6956 = vpow2.f32 %v6722_v48  ;;  %vm4670_vm1 = vmor %vm4668_vm14, %vm4669_vm15  ;;  %vm1254_vm4 = vcmp.eq.s32.totalorder %v7496_v52, %v12724_v8 }
 0x3cf   :  { %v4652_v46 = vadd.f32 %v6951_v29, %v4651_v2  ;;  %v4665_v44 = vsub.f32 1.0, %v4664_v53 }
 0x3d0   :  { %v3504_v9 = vpop.xlane.xlu2 %3503 }
 0x3d1   :  { %v4656_v42 = vsel %vm4655_vm12, %v6951_v29, %v4652_v46  ;;  %v4666_v31 = vmul.f32 %v6953_v5, %v4665_v44  ;;  %v10713_v60 = vpop.f32.mrf.mxu3  ;;  %v6955_v16 = vpop.eup %6954  ;;  %v6723_v27 = vmul.f32 -1.442695, %v3504_v9 }
 0x3d2   :  { %v4661_v0 = vsel %vm4658_vm13, %v4660_v39, %v4656_v42  ;;  %v3083_v43 = vpop.f32.mrf.mxu1  ;;  %v4091_v19 = vadd.f32 1.0, %v6955_v16  ;;  %v10723_v12 = vpop.f32.mrf.mxu0 }
 0x3d3   :  { %6090 = vst.msk [vmem:[%s12463_s4 + $0xf8] sm:$0xff] %vm6058_vm8, %v4661_v0  ;;  %v4667_v10 = vadd.f32 %v6953_v5, %v4666_v31  ;;  %v3358_v11 = vmul.f32 %v3083_v43, %v10633_v17  ;;  %6958 = vpow2.f32 %v6723_v27  ;;  %6671 = vmatmul.msk.f32.gmra.mxu3 %vm1521_vm0, %v6546_v24  ;;  %v12723_v17 = vld [vmem:[#allocation14_spill] sm:$0xff]  ;;  %v12725_v24 = vld [vmem:[#allocation12_spill] sm:$0xff] }
 0x3d4   :  { %v6957_v6 = vpop.eup %6956  ;;  %6960 = vrcp.f32 %v4091_v19  ;;  %vm1253_vm5 = vcmp.eq.s32.totalorder %v7496_v52, %v12723_v17  ;;  %v4689_v50 = vand.u32 2147483648, %v4091_v19  ;;  %v4687_v13 = vand.u32 2147483647, %v4091_v19 }
 0x3d5   :  { %v4671_v3 = vsel %vm4670_vm1, %v6953_v5, %v4667_v10  ;;  %3533 = vadd.xlane.f32.xlu2 %v3358_v11  ;;  %v4092_v61 = vadd.f32 1.0, %v6957_v6  ;;  %v6547_v14 = vsel %vm1253_vm5, 1.0, %v12484_v23  ;;  %v6548_v5 = vsel %vm1254_vm4, 1.0, %v12484_v23 }
 0x3d6   :  { %v4676_v26 = vsel %vm4673_vm2, %v4675_v40, %v4671_v3  ;;  %vm4683_vm6 = vweird.f32 %v4091_v19  ;;  %v4690_v18 = vor.u32 1.1754944e-38, %v4689_v50  ;;  %vm4688_vm11 = vcmp.eq.f32.partialorder %v4687_v13, 8.507059e+37 }
 0x3d7   :  { %6091 = vst.msk [vmem:[%s12463_s4 + $0x100] sm:$0xff] %vm6058_vm8, %v4676_v26  ;;  %6962 = vrcp.f32 %v4092_v61  ;;  %v4704_v53 = vand.u32 2147483648, %v4092_v61  ;;  %v4702_v44 = vand.u32 2147483647, %v4092_v61  ;;  %vm4698_vm10 = vweird.f32 %v4092_v61 }
 0x3d8   :  { %vm1255_vm13 = vcmp.eq.s32.totalorder %v7496_v52, %v12725_v24 }
 0x3d9   :  { %v10731_v33 = vpop.f32.mrf.mxu3  ;;  %v6959_v21 = vpop.eup %6958  ;;  %v4705_v9 = vor.u32 1.1754944e-38, %v4704_v53  ;;  %vm4703_vm15 = vcmp.eq.f32.partialorder %v4702_v44, 8.507059e+37  ;;  %v6549_v26 = vsel %vm1255_vm13, 1.0, %v12484_v23 }
 0x3da   :  { %v3086_v59 = vpop.f32.mrf.mxu1  ;;  %v6961_v29 = vpop.eup %6960  ;;  %v4093_v4 = vadd.f32 1.0, %v6959_v21 }
 0x3db   :  { %v3359_v54 = vmul.f32 %v3086_v59, %v10684_v63  ;;  %v4679_v35 = vmul.f32 %v6961_v29, %v4091_v19  ;;  %6672 = vmatmul.msk.f32.gmra.mxu3 %vm1521_vm0, %v6547_v14  ;;  %vm4684_vm3 = vweird.f32 %v6961_v29  ;;  %v2076_v15 = vpop.f32.mrf.mxu0  ;;  %v10775_v44 = vpop.f32.mrf.mxu2 }
 0x3dc   :  { %6964 = vrcp.f32 %v4093_v4  ;;  %vm4685_vm7 = vmor %vm4683_vm6, %vm4684_vm3  ;;  %v4719_v27 = vand.u32 2147483648, %v4093_v4  ;;  %v4717_v19 = vand.u32 2147483647, %v4093_v4  ;;  %vm4713_vm1 = vweird.f32 %v4093_v4 }
 0x3dd   :  { %3535 = vadd.xlane.f32.xlu0 %v3359_v54  ;;  %v6963_v36 = vpop.eup %6962  ;;  %v4680_v62 = vsub.f32 1.0, %v4679_v35 }
 0x3de   :  { %v4694_v37 = vmul.f32 %v6963_v36, %v4092_v61  ;;  %vm4699_vm9 = vweird.f32 %v6963_v36  ;;  %v4720_v61 = vor.u32 1.1754944e-38, %v4719_v27  ;;  %vm4718_vm5 = vcmp.eq.f32.partialorder %v4717_v19, 8.507059e+37 }
 0x3df   :  { %v4681_v1 = vmul.f32 %v6961_v29, %v4680_v62  ;;  %vm4700_vm12 = vmor %vm4698_vm10, %vm4699_vm9 }
 0x3e0   :  { %v4695_v2 = vsub.f32 1.0, %v4694_v37 }
 0x3e1   :  { %v10739_v63 = vpop.f32.mrf.mxu3  ;;  %v4682_v20 = vadd.f32 %v6961_v29, %v4681_v1 }
 0x3e2   :  { %v3089_v48 = vpop.f32.mrf.mxu1  ;;  %v6965_v46 = vpop.eup %6964  ;;  %v4696_v39 = vmul.f32 %v6963_v36, %v4695_v2 }
 0x3e3   :  { %v3360_v42 = vmul.f32 %v3089_v48, %v10706_v25  ;;  %v4686_v30 = vsel %vm4685_vm7, %v6961_v29, %v4682_v20  ;;  %v4709_v0 = vmul.f32 %v6965_v46, %v4093_v4  ;;  %6673 = vmatmul.msk.f32.gmra.mxu3 %vm1521_vm0, %v6548_v5  ;;  %vm4714_vm14 = vweird.f32 %v6965_v46  ;;  %v2079_v3 = vpop.f32.mrf.mxu0  ;;  %v12726_v4 = vld [vmem:[#allocation26_spill] sm:$0xff] }
 0x3e4   :  { %v4691_v31 = vsel %vm4688_vm11, %v4690_v18, %v4686_v30  ;;  %v4697_v28 = vadd.f32 %v6963_v36, %v4696_v39  ;;  %vm4715_vm2 = vmor %vm4713_vm1, %vm4714_vm14  ;;  %vm1256_vm4 = vcmp.eq.s32.totalorder %v7496_v52, %v12726_v4  ;;  %v12727_v5 = vld [vmem:[#allocation22_spill] sm:$0xff] }
 0x3e5   :  { %3537 = vadd.xlane.f32.xlu1 %v3360_v42  ;;  %6092 = vst.msk [vmem:[%s12463_s4 + $0x108] sm:$0xff] %vm6058_vm8, %v4691_v31  ;;  %v4710_v16 = vsub.f32 1.0, %v4709_v0  ;;  %v6550_v8 = vsel %vm1256_vm4, 1.0, %v12484_v23  ;;  %vm1257_vm3 = vcmp.eq.s32.totalorder %v7496_v52, %v12727_v5 }
 0x3e6   :  { %v4701_v25 = vsel %vm4700_vm12, %v6963_v36, %v4697_v28 }
 0x3e7   :  { %v4706_v43 = vsel %vm4703_vm15, %v4705_v9, %v4701_v25  ;;  %v4711_v10 = vmul.f32 %v6965_v46, %v4710_v16  ;;  %v12728_v9 = vld [vmem:[#allocation18_spill] sm:$0xff] }
 0x3e8   :  { %6093 = vst.msk [vmem:[%s12463_s4 + $0x110] sm:$0xff] %vm6058_vm8, %v4706_v43  ;;  %vm1258_vm6 = vcmp.eq.s32.totalorder %v7496_v52, %v12728_v9 }
 0x3e9   :  { %v10753_v11 = vpop.f32.mrf.mxu3  ;;  %v4712_v40 = vadd.f32 %v6965_v46, %v4711_v10  ;;  %v6552_v43 = vsel %vm1258_vm6, 1.0, %v12484_v23  ;;  %v12729_v10 = vld [vmem:[#allocation29_spill] sm:$0xff] }
 0x3ea   :  { %v3092_v6 = vpop.f32.mrf.mxu1  ;;  %vm1259_vm7 = vcmp.eq.s32.totalorder %v7496_v52, %v12729_v10  ;;  %v12730_v10 = vld [vmem:[#allocation31_spill] sm:$0xff] }
 0x3eb   :  { %v3361_v17 = vmul.f32 %v3092_v6, %v10723_v12  ;;  %v4716_v21 = vsel %vm4715_vm2, %v6965_v46, %v4712_v40  ;;  %6674 = vmatmul.msk.f32.gmra.mxu3 %vm1521_vm0, %v6549_v26  ;;  %v2082_v37 = vpop.f32.mrf.mxu0  ;;  %vm1260_vm6 = vcmp.eq.s32.totalorder %v7496_v52, %v12730_v10 }
 0x3ec   :  { %v4721_v59 = vsel %vm4718_vm5, %v4720_v61, %v4716_v21  ;;  %v3506_v29 = vpop.xlane.xlu0 %3505 }
 0x3ed   :  { %3539 = vadd.xlane.f32.xlu2 %v3361_v17  ;;  %6094 = vst.msk [vmem:[%s12463_s4 + $0x118] sm:$0xff] %vm6058_vm8, %v4721_v59  ;;  %v6724_v14 = vmul.f32 -1.442695, %v3506_v29  ;;  %v10793_v29 = vpop.f32.mrf.mxu2 }
 0x3ef   :  { %6966 = vpow2.f32 %v6724_v14  ;;  %v6553_v14 = vsel %vm1259_vm7, 1.0, %v12484_v23 }
 0x3f0   :  { %v3508_v54 = vpop.xlane.xlu1 %3507 }
 0x3f1   :  { %v10764_v35 = vpop.f32.mrf.mxu3  ;;  %v6725_v12 = vmul.f32 -1.442695, %v3508_v54 }
 0x3f2   :  { %v3095_v36 = vpop.f32.mrf.mxu1 }
 0x3f3   :  { %v3362_v62 = vmul.f32 %v3095_v36, %v2076_v15  ;;  %6968 = vpow2.f32 %v6725_v12  ;;  %6675 = vmatmul.msk.f32.gmra.mxu3 %vm1521_vm0, %v6550_v8  ;;  %v6551_v15 = vsel %vm1257_vm3, 1.0, %v12484_v23  ;;  %v2085_v31 = vpop.f32.mrf.mxu0 }
 0x3f4   :  { %v3510_v50 = vpop.xlane.xlu2 %3509 }
 0x3f5   :  { %v6726_v1 = vmul.f32 -1.442695, %v3510_v50  ;;  %3541 = vadd.xlane.f32.xlu0 %v3362_v62  ;;  %v6967_v13 = vpop.eup %6966 }
 0x3f6   :  { %v4094_v2 = vadd.f32 1.0, %v6967_v13 }
 0x3f7   :  { %6970 = vpow2.f32 %v6726_v1 }
 0x3f8   :  { %6972 = vrcp.f32 %v4094_v2  ;;  %v4732_v17 = vand.u32 2147483647, %v4094_v2  ;;  %vm4728_vm11 = vweird.f32 %v4094_v2 }
 0x3f9   :  { %v10770_v20 = vpop.f32.mrf.mxu3  ;;  %v6969_v18 = vpop.eup %6968 }
 0x3fa   :  { %v3098_v53 = vpop.f32.mrf.mxu1  ;;  %v10773_v48 = vadd.f32 1.0, %v6969_v18  ;;  %vm4733_vm13 = vcmp.eq.f32.partialorder %v4732_v17, 8.507059e+37 }
 0x3fb   :  { %v3512_v46 = vpop.xlane.xlu0 %3511  ;;  %v3363_v39 = vmul.f32 %v3098_v53, %v2079_v3  ;;  %6676 = vmatmul.msk.f32.gmra.mxu3 %vm1521_vm0, %v6551_v15  ;;  %v4734_v3 = vand.u32 2147483648, %v4094_v2 }
 0x3fc   :  { %v6727_v42 = vmul.f32 -1.442695, %v3512_v46  ;;  %6974 = vrcp.f32 %v10773_v48  ;;  %v4749_v54 = vand.u32 2147483648, %v10773_v48  ;;  %v4747_v50 = vand.u32 2147483647, %v10773_v48 }
 0x3fd   :  { %v6971_v30 = vpop.eup %6970  ;;  %3543 = vadd.xlane.f32.xlu1 %v3363_v39  ;;  %v4735_v8 = vor.u32 1.1754944e-38, %v4734_v3  ;;  %vm4743_vm15 = vweird.f32 %v10773_v48 }
 0x3fe   :  { %v10779_v0 = vadd.f32 1.0, %v6971_v30  ;;  %6976 = vpow2.f32 %v6727_v42  ;;  %v6973_v28 = vpop.eup %6972  ;;  %v4750_v53 = vor.u32 1.1754944e-38, %v4749_v54  ;;  %vm4748_vm2 = vcmp.eq.f32.partialorder %v4747_v50, 8.507059e+37 }
 0x3ff   :  { %v4724_v16 = vmul.f32 %v6973_v28, %v4094_v2  ;;  %vm4729_vm9 = vweird.f32 %v6973_v28  ;;  %v6554_v54 = vsel %vm1260_vm6, 1.0, %v12484_v23 }
 0x400   :  { %6978 = vrcp.f32 %v10779_v0  ;;  %vm4730_vm10 = vmor %vm4728_vm11, %vm4729_vm9  ;;  %v4764_v15 = vand.u32 2147483648, %v10779_v0  ;;  %v4762_v42 = vand.u32 2147483647, %v10779_v0  ;;  %vm4758_vm5 = vweird.f32 %v10779_v0 }
 0x401   :  { %v10784_v24 = vpop.f32.mrf.mxu3  ;;  %v4725_v19 = vsub.f32 1.0, %v4724_v16 }
 0x402   :  { %v3101_v25 = vpop.f32.mrf.mxu1  ;;  %v6975_v27 = vpop.eup %6974  ;;  %vm4763_vm3 = vcmp.eq.f32.partialorder %v4762_v42, 8.507059e+37 }
 0x403   :  { %v3364_v40 = vmul.f32 %v3101_v25, %v2082_v37  ;;  %v4739_v26 = vmul.f32 %v6975_v27, %v10773_v48  ;;  %6677 = vmatmul.msk.f32.gmra.mxu3 %vm1521_vm0, %v6552_v43  ;;  %v4726_v61 = vmul.f32 %v6973_v28, %v4725_v19  ;;  %vm4744_vm12 = vweird.f32 %v6975_v27  ;;  %v2088_v37 = vpop.f32.mrf.mxu0 }
 0x404   :  { %v6977_v6 = vpop.eup %6976  ;;  %vm4745_vm14 = vmor %vm4743_vm15, %vm4744_vm12  ;;  %v4765_v25 = vor.u32 1.1754944e-38, %v4764_v15 }
 0x405   :  { %v10791_v21 = vadd.f32 1.0, %v6977_v6  ;;  %3545 = vadd.xlane.f32.xlu2 %v3364_v40  ;;  %v4740_v4 = vsub.f32 1.0, %v4739_v26  ;;  %v4727_v12 = vadd.f32 %v6973_v28, %v4726_v61 }
 0x406   :  { %v6979_v59 = vpop.eup %6978 }
 0x407   :  { %v4754_v36 = vmul.f32 %v6979_v59, %v10779_v0  ;;  %6980 = vrcp.f32 %v10791_v21  ;;  %v4741_v62 = vmul.f32 %v6975_v27, %v4740_v4  ;;  %v4731_v1 = vsel %vm4730_vm10, %v6973_v28, %v4727_v12 }
 0x408   :  { %v4736_v18 = vsel %vm4733_vm13, %v4735_v8, %v4731_v1  ;;  %vm4759_vm1 = vweird.f32 %v6979_v59  ;;  %v4779_v0 = vand.u32 2147483648, %v10791_v21  ;;  %v4777_v61 = vand.u32 2147483647, %v10791_v21 }
 0x409   :  { %v4755_v13 = vsub.f32 1.0, %v4754_v36  ;;  %v10801_v5 = vpop.f32.mrf.mxu3  ;;  %v4742_v2 = vadd.f32 %v6975_v27, %v4741_v62  ;;  %6095 = vst.msk [vmem:[%s12463_s4 + $0x120] sm:$0xff] %vm6058_vm8, %v4736_v18  ;;  %vm4760_vm4 = vmor %vm4758_vm5, %vm4759_vm1  ;;  %vm4773_vm9 = vweird.f32 %v10791_v21 }
 0x40a   :  { %v3104_v46 = vpop.f32.mrf.mxu1  ;;  %v4780_v62 = vor.u32 1.1754944e-38, %v4779_v0  ;;  %vm4778_vm10 = vcmp.eq.f32.partialorder %v4777_v61, 8.507059e+37 }
 0x40b   :  { %v4756_v39 = vmul.f32 %v6979_v59, %v4755_v13  ;;  %v3365_v48 = vmul.f32 %v3104_v46, %v2085_v31  ;;  %v4746_v30 = vsel %vm4745_vm14, %v6975_v27, %v4742_v2  ;;  %6678 = vmatmul.msk.f32.gmra.mxu3 %vm1521_vm0, %v6553_v14  ;;  %v10816_v27 = vpop.f32.mrf.mxu2  ;;  %v2091_v4 = vpop.f32.mrf.mxu0  ;;  %v12731_v2 = vld [vmem:[#allocation27_spill] sm:$0xff] }
 0x40c   :  { %v4751_v9 = vsel %vm4748_vm2, %v4750_v53, %v4746_v30  ;;  %vm1261_vm12 = vcmp.eq.s32.totalorder %v7496_v52, %v12731_v2 }
 0x40d   :  { %v6981_v28 = vpop.eup %6980  ;;  %v4757_v16 = vadd.f32 %v6979_v59, %v4756_v39  ;;  %3547 = vadd.xlane.f32.xlu0 %v3365_v48  ;;  %6096 = vst.msk [vmem:[%s12463_s4 + $0x128] sm:$0xff] %vm6058_vm8, %v4751_v9  ;;  %v6555_v48 = vsel %vm1261_vm12, 1.0, %v12484_v23 }
 0x40e   :  { %v4769_v43 = vmul.f32 %v6981_v28, %v10791_v21  ;;  %vm4774_vm7 = vweird.f32 %v6981_v28 }
 0x40f   :  { %v4761_v31 = vsel %vm4760_vm4, %v6979_v59, %v4757_v16  ;;  %vm4775_vm11 = vmor %vm4773_vm9, %vm4774_vm7 }
 0x410   :  { %v4766_v19 = vsel %vm4763_vm3, %v4765_v25, %v4761_v31  ;;  %v4770_v40 = vsub.f32 1.0, %v4769_v43 }
 0x411   :  { %6097 = vst.msk [vmem:[%s12463_s4 + $0x130] sm:$0xff] %vm6058_vm8, %v4766_v19  ;;  %v3514_v6 = vpop.xlane.xlu1 %3513  ;;  %v10825_v3 = vpop.f32.mrf.mxu3  ;;  %v12732_v19 = vld [vmem:[#allocation38_spill] sm:$0xff] }
 0x412   :  { %v4771_v26 = vmul.f32 %v6981_v28, %v4770_v40  ;;  %v6728_v17 = vmul.f32 -1.442695, %v3514_v6  ;;  %v3516_v59 = vpop.xlane.xlu2 %3515  ;;  %v3107_v14 = vpop.f32.mrf.mxu1  ;;  %vm1262_vm13 = vcmp.eq.s32.totalorder %v7496_v52, %v12732_v19  ;;  %v12733_v6 = vld [vmem:[#allocation34_spill] sm:$0xff] }
 0x413   :  { %v6729_v12 = vmul.f32 -1.442695, %v3516_v59  ;;  %v3366_v36 = vmul.f32 %v3107_v14, %v2088_v37  ;;  %6679 = vmatmul.msk.f32.gmra.mxu3 %vm1521_vm0, %v6554_v54  ;;  %v10840_v30 = vpop.f32.mrf.mxu2  ;;  %v2094_v43 = vpop.f32.mrf.mxu0  ;;  %vm1264_vm15 = vcmp.eq.s32.totalorder %v7496_v52, %v12733_v6  ;;  %v6556_v59 = vsel %vm1262_vm13, 1.0, %v12484_v23 }
 0x414   :  { %v4772_v8 = vadd.f32 %v6981_v28, %v4771_v26  ;;  %6982 = vpow2.f32 %v6728_v17  ;;  %v12734_v26 = vld [vmem:[#allocation40_spill] sm:$0xff] }
 0x415   :  { %6984 = vpow2.f32 %v6729_v12  ;;  %v3518_v50 = vpop.xlane.xlu0 %3517  ;;  %3549 = vadd.xlane.f32.xlu1 %v3366_v36  ;;  %vm1263_vm14 = vcmp.eq.s32.totalorder %v7496_v52, %v12734_v26  ;;  %v12735_v36 = vld [vmem:[#allocation30_spill] sm:$0xff] }
 0x416   :  { %v4776_v1 = vsel %vm4775_vm11, %v6981_v28, %v4772_v8  ;;  %v6730_v13 = vmul.f32 -1.442695, %v3518_v50  ;;  %v12736_v8 = vld [vmem:[#allocation9_spill] sm:$0xff] }
 0x417   :  { %v4781_v18 = vsel %vm4778_vm10, %v4780_v62, %v4776_v1  ;;  %v3371_v62 = vmul.f32 %v12736_v8, %v12735_v36 }
 0x418   :  { %6098 = vst.msk [vmem:[%s12463_s4 + $0x138] sm:$0xff] %vm6058_vm8, %v4781_v18  ;;  %6986 = vpow2.f32 %v6730_v13  ;;  %v10870_v18 = vsel %vm1264_vm15, 1.0, %v12484_v23 }
 0x419   :  { %v3520_v21 = vpop.xlane.xlu1 %3519  ;;  %v10837_v37 = vpop.f32.mrf.mxu3 }
 0x41a   :  { %v6983_v53 = vpop.eup %6982  ;;  %v6731_v15 = vmul.f32 -1.442695, %v3520_v21  ;;  %v3522_v46 = vpop.xlane.xlu2 %3521 }
 0x41b   :  { %v3110_v39 = vpop.f32.mrf.mxu1  ;;  %v6985_v42 = vpop.eup %6984  ;;  %v10842_v28 = vadd.f32 1.0, %v6983_v53  ;;  %v6732_v9 = vmul.f32 -1.442695, %v3522_v46  ;;  %6680 = vmatmul.msk.f32.gmra.mxu3 %vm1521_vm0, %v6555_v48 }
 0x41c   :  { %v3367_v16 = vmul.f32 %v3110_v39, %v2091_v4  ;;  %v10844_v25 = vadd.f32 1.0, %v6985_v42  ;;  %6988 = vpow2.f32 %v6731_v15  ;;  %v10872_v2 = vpop.f32.mrf.mxu2  ;;  %v6557_v15 = vsel %vm1263_vm14, 1.0, %v12484_v23 }
 0x41d   :  { %6990 = vrcp.f32 %v10842_v28  ;;  %v4792_v14 = vand.u32 2147483647, %v10842_v28  ;;  %v4794_v1 = vand.u32 2147483648, %v10842_v28  ;;  %vm4788_vm1 = vweird.f32 %v10842_v28 }
 0x41e   :  { %3551 = vadd.xlane.f32.xlu2 %v3367_v16  ;;  %v6987_v31 = vpop.eup %6986  ;;  %6992 = vrcp.f32 %v10844_v25  ;;  %v4807_v53 = vand.u32 2147483647, %v10844_v25  ;;  %v4809_v39 = vand.u32 2147483648, %v10844_v25  ;;  %vm4803_vm5 = vweird.f32 %v10844_v25 }
 0x41f   :  { %v10849_v10 = vadd.f32 1.0, %v6987_v31  ;;  %6994 = vpow2.f32 %v6732_v9  ;;  %v2097_v9 = vpop.f32.mrf.mxu0  ;;  %vm10885_vm2 = vcmp.eq.f32.partialorder %v4792_v14, 8.507059e+37  ;;  %v4795_v19 = vor.u32 1.1754944e-38, %v4794_v1 }
 0x420   :  { %vm10891_vm6 = vcmp.eq.f32.partialorder %v4807_v53, 8.507059e+37 }
 0x421   :  { %6996 = vrcp.f32 %v10849_v10  ;;  %v10854_v40 = vpop.f32.mrf.mxu3  ;;  %v4822_v8 = vand.u32 2147483647, %v10849_v10  ;;  %vm4818_vm10 = vweird.f32 %v10849_v10 }
 0x422   :  { %v6989_v0 = vpop.eup %6988 }
 0x423   :  { %v3113_v61 = vpop.f32.mrf.mxu1  ;;  %v6991_v17 = vpop.eup %6990  ;;  %v10862_v4 = vadd.f32 1.0, %v6989_v0  ;;  %6681 = vmatmul.msk.f32.gmra.mxu3 %vm1521_vm0, %v6556_v59  ;;  %vm4823_vm13 = vcmp.eq.f32.partialorder %v4822_v8, 8.507059e+37 }
 0x424   :  { %v3368_v54 = vmul.f32 %v3113_v61, %v2094_v43  ;;  %v6993_v12 = vpop.eup %6992  ;;  %v4784_v50 = vmul.f32 %v6991_v17, %v10842_v28  ;;  %vm4789_vm4 = vweird.f32 %v6991_v17 }
 0x425   :  { %v6995_v13 = vpop.eup %6994  ;;  %v4799_v21 = vmul.f32 %v6993_v12, %v10844_v25  ;;  %6998 = vrcp.f32 %v10862_v4  ;;  %vm4804_vm3 = vweird.f32 %v6993_v12  ;;  %vm4790_vm7 = vmor %vm4788_vm1, %vm4789_vm4  ;;  %vm4833_vm14 = vweird.f32 %v10862_v4 }
 0x426   :  { %3553 = vadd.xlane.f32.xlu0 %v3368_v54  ;;  %v4785_v46 = vsub.f32 1.0, %v4784_v50  ;;  %v10882_v42 = vadd.f32 1.0, %v6995_v13  ;;  %v4810_v54 = vor.u32 1.1754944e-38, %v4809_v39  ;;  %vm4805_vm9 = vmor %vm4803_vm5, %vm4804_vm3 }
 0x427   :  { %v6997_v48 = vpop.eup %6996  ;;  %v4800_v43 = vsub.f32 1.0, %v4799_v21  ;;  %v4824_v21 = vand.u32 2147483648, %v10849_v10 }
 0x428   :  { %v4786_v31 = vmul.f32 %v6991_v17, %v4785_v46  ;;  %v4814_v0 = vmul.f32 %v6997_v48, %v10849_v10  ;;  %v3524_v6 = vpop.xlane.xlu0 %3523  ;;  %7000 = vrcp.f32 %v10882_v42  ;;  %vm4819_vm11 = vweird.f32 %v6997_v48 }
 0x429   :  { %v4801_v26 = vmul.f32 %v6993_v12, %v4800_v43  ;;  %v10896_v59 = vpop.f32.mrf.mxu3  ;;  %v6733_v53 = vmul.f32 -1.442695, %v3524_v6  ;;  %v4837_v6 = vand.u32 2147483647, %v10862_v4  ;;  %vm4820_vm12 = vmor %vm4818_vm10, %vm4819_vm11  ;;  %v4825_v10 = vor.u32 1.1754944e-38, %v4824_v21 }
 0x42a   :  { %v4787_v14 = vadd.f32 %v6991_v17, %v4786_v31  ;;  %v4815_v36 = vsub.f32 1.0, %v4814_v0  ;;  %vm4848_vm4 = vweird.f32 %v10882_v42 }
 0x42b   :  { %v3116_v50 = vpop.f32.mrf.mxu1  ;;  %v6999_v1 = vpop.eup %6998  ;;  %v4802_v13 = vadd.f32 %v6993_v12, %v4801_v26  ;;  %6682 = vmatmul.msk.f32.gmra.mxu3 %vm1521_vm0, %v6557_v15  ;;  %7002 = vpow2.f32 %v6733_v53  ;;  %v12743_v53 = vld [vmem:[#allocation37_spill] sm:$0xff]  ;;  %vm4838_vm1 = vcmp.eq.f32.partialorder %v4837_v6, 8.507059e+37 }
 0x42c   :  { %v3369_v46 = vmul.f32 %v3116_v50, %v2097_v9  ;;  %v4791_v43 = vsel %vm4790_vm7, %v6991_v17, %v4787_v14  ;;  %v4816_v39 = vmul.f32 %v6997_v48, %v4815_v36  ;;  %v4829_v31 = vmul.f32 %v6999_v1, %v10862_v4  ;;  %v12741_v36 = vld [vmem:[#allocation32_spill] sm:$0xff]  ;;  %v12742_v50 = vld [vmem:[#allocation11_spill] sm:$0xff] }
 0x42d   :  { %v4796_v28 = vsel %vm10885_vm2, %v4795_v19, %v4791_v43  ;;  %v4806_v0 = vsel %vm4805_vm9, %v6993_v12, %v4802_v13  ;;  %v10918_v12 = vpop.f32.mrf.mxu2  ;;  %vm4834_vm15 = vweird.f32 %v6999_v1  ;;  %v3372_v13 = vmul.f32 %v12742_v50, %v12741_v36 }
 0x42e   :  { %3559 = vadd.xlane.f32.xlu0 %v3371_v62  ;;  %3555 = vadd.xlane.f32.xlu1 %v3369_v46  ;;  %6099 = vst.msk [vmem:[%s12463_s4 + $0x140] sm:$0xff] %vm6058_vm8, %v4796_v28  ;;  %v4811_v25 = vsel %vm10891_vm6, %v4810_v54, %v4806_v0  ;;  %v4817_v17 = vadd.f32 %v6997_v48, %v4816_v39  ;;  %v4830_v15 = vsub.f32 1.0, %v4829_v31  ;;  %v3526_v9 = vpop.xlane.xlu1 %3525  ;;  %v7001_v16 = vpop.eup %7000  ;;  %v4839_v62 = vand.u32 2147483648, %v10862_v4  ;;  %v12744_v46 = vld [vmem:[#allocation16_spill] sm:$0xff]  ;;  %vm4835_vm2 = vmor %vm4833_vm14, %vm4834_vm15 }
 0x42f   :  { %6100 = vst.msk [vmem:[%s12463_s4 + $0x148] sm:$0xff] %vm6058_vm8, %v4811_v25  ;;  %v6734_v19 = vmul.f32 -1.442695, %v3526_v9  ;;  %v4844_v14 = vmul.f32 %v7001_v16, %v10882_v42  ;;  %v2100_v54 = vpop.f32.mrf.mxu0  ;;  %v3374_v43 = vmul.f32 %v12744_v46, %v12743_v53  ;;  %v4854_v25 = vand.u32 2147483648, %v10882_v42 }
 0x430   :  { %v4821_v26 = vsel %vm4820_vm12, %v6997_v48, %v4817_v17  ;;  %v4831_v61 = vmul.f32 %v6999_v1, %v4830_v15  ;;  %v4840_v0 = vor.u32 1.1754944e-38, %v4839_v62  ;;  %vm4849_vm5 = vweird.f32 %v7001_v16 }
 0x431   :  { %v4826_v39 = vsel %vm4823_vm13, %v4825_v10, %v4821_v26  ;;  %7004 = vpow2.f32 %v6734_v19  ;;  %v10931_v31 = vpop.f32.mrf.mxu3  ;;  %v4845_v8 = vsub.f32 1.0, %v4844_v14  ;;  %v7003_v9 = vpop.eup %7002  ;;  %v4852_v26 = vand.u32 2147483647, %v10882_v42  ;;  %vm4850_vm3 = vmor %vm4848_vm4, %vm4849_vm5 }
 0x432   :  { %6101 = vst.msk [vmem:[%s12463_s4 + $0x150] sm:$0xff] %vm6058_vm8, %v4826_v39  ;;  %v4832_v48 = vadd.f32 %v6999_v1, %v4831_v61  ;;  %v10943_v6 = vadd.f32 1.0, %v7003_v9  ;;  %v4855_v61 = vor.u32 1.1754944e-38, %v4854_v25  ;;  %v12752_v25 = vld [vmem:[#allocation28_spill] sm:$0xff] }
 0x433   :  { %v3528_v21 = vpop.xlane.xlu2 %3527  ;;  %v3119_v28 = vpop.f32.mrf.mxu1  ;;  %v4846_v19 = vmul.f32 %v7001_v16, %v4845_v8  ;;  %6683 = vmatmul.msk.f32.gmra.mxu3 %vm1521_vm0, %v10870_v18  ;;  %v12745_v18 = vld [vmem:[#allocation46_spill] sm:$0xff]  ;;  %vm4853_vm7 = vcmp.eq.f32.partialorder %v4852_v26, 8.507059e+37  ;;  %v12749_v8 = vld [vmem:[#allocation41_spill] sm:$0xff] }
 0x434   :  { %v6735_v17 = vmul.f32 -1.442695, %v3528_v21  ;;  %v3370_v15 = vmul.f32 %v3119_v28, %v2100_v54  ;;  %v4836_v10 = vsel %vm4835_vm2, %v6999_v1, %v4832_v48  ;;  %vm1265_vm6 = vcmp.eq.s32.totalorder %v7496_v52, %v12745_v18  ;;  %v12750_v21 = vld [vmem:[#allocation24_spill] sm:$0xff]  ;;  %v12754_v18 = vld [vmem:[#allocation42_spill] sm:$0xff] }
 0x435   :  { %v4841_v4 = vsel %vm4838_vm1, %v4840_v0, %v4836_v10  ;;  %v4847_v62 = vadd.f32 %v7001_v16, %v4846_v19  ;;  %v10955_v50 = vpop.f32.mrf.mxu2  ;;  %v6559_v48 = vsel %vm1265_vm6, 1.0, %v12484_v23  ;;  %v3375_v28 = vmul.f32 %v12750_v21, %v12749_v8  ;;  %v12751_v0 = vld [vmem:[#allocation43_spill] sm:$0xff]  ;;  %v12753_v10 = vld [vmem:[#allocation48_spill] sm:$0xff]  ;;  %v12756_v21 = vld [vmem:[#allocation45_spill] sm:$0xff] }
 0x436   :  { %7006 = vpow2.f32 %v6735_v17  ;;  %3557 = vadd.xlane.f32.xlu2 %v3370_v15  ;;  %3561 = vadd.xlane.f32.xlu1 %v3372_v13  ;;  %6102 = vst.msk [vmem:[%s12463_s4 + $0x158] sm:$0xff] %vm6058_vm8, %v4841_v4  ;;  %v3377_v17 = vmul.f32 %v12752_v25, %v12751_v0  ;;  %vm1266_vm9 = vcmp.eq.s32.totalorder %v7496_v52, %v12753_v10  ;;  %v12758_v25 = vld [vmem:[#allocation49_spill] sm:$0xff]  ;;  %vm4863_vm10 = vweird.f32 %v10943_v6 }
 0x437   :  { %3565 = vadd.xlane.f32.xlu0 %v3374_v43  ;;  %v7005_v1 = vpop.eup %7004  ;;  %7008 = vrcp.f32 %v10943_v6  ;;  %v4851_v14 = vsel %vm4850_vm3, %v7001_v16, %v4847_v62  ;;  %12746 = vst [vmem:[#allocation69_spill] sm:$0xff] %v10955_v50  ;;  %v12747_v43 = vld [vmem:[#allocation35_spill] sm:$0xff]  ;;  %v12748_v16 = vld [vmem:[#allocation13_spill] sm:$0xff]  ;;  %v6560_v4 = vsel %vm1266_vm9, 1.0, %v12484_v23 }
 0x438   :  { %v10953_v54 = vadd.f32 1.0, %v7005_v1  ;;  %v3530_v36 = vpop.xlane.xlu0 %3529  ;;  %v4856_v13 = vsel %vm4853_vm7, %v4855_v61, %v4851_v14  ;;  %v3373_v39 = vmul.f32 %v12748_v16, %v12747_v43  ;;  %v12755_v14 = vld [vmem:[#allocation36_spill] sm:$0xff] }
 0x439   :  { %v10957_v53 = vpop.f32.mrf.mxu3  ;;  %v6736_v42 = vmul.f32 -1.442695, %v3530_v36  ;;  %6103 = vst.msk [vmem:[%s12463_s4 + $0x160] sm:$0xff] %vm6058_vm8, %v4856_v13  ;;  %v3376_v36 = vmul.f32 %v12755_v14, %v12754_v18  ;;  %v4867_v13 = vand.u32 2147483647, %v10943_v6 }
 0x43a   :  { %7010 = vrcp.f32 %v10953_v54  ;;  %v4882_v50 = vand.u32 2147483647, %v10953_v54  ;;  %vm4878_vm1 = vweird.f32 %v10953_v54 }
 0x43b   :  { %7012 = vpow2.f32 %v6736_v42  ;;  %6684 = vmatmul.msk.f32.gmra.mxu3 %vm1521_vm0, %v6559_v48  ;;  %v4869_v42 = vand.u32 2147483648, %v10943_v6  ;;  %vm4868_vm14 = vcmp.eq.f32.partialorder %v4867_v13, 8.507059e+37 }
 0x43c   :  { %v7007_v46 = vpop.eup %7006  ;;  %vm4883_vm5 = vcmp.eq.f32.partialorder %v4882_v50, 8.507059e+37 }
 0x43d   :  { %v10971_v15 = vadd.f32 1.0, %v7007_v46  ;;  %v7009_v9 = vpop.eup %7008  ;;  %v10988_v8 = vpop.f32.mrf.mxu2 }
 0x43e   :  { %3563 = vadd.xlane.f32.xlu2 %v3373_v39  ;;  %3567 = vadd.xlane.f32.xlu1 %v3375_v28  ;;  %v4859_v19 = vmul.f32 %v7009_v9, %v10943_v6  ;;  %vm4864_vm11 = vweird.f32 %v7009_v9  ;;  %v12757_v28 = vld [vmem:[#allocation39_spill] sm:$0xff]  ;;  %v12760_v6 = vld [vmem:[#allocation44_spill] sm:$0xff] }
 0x43f   :  { %7014 = vrcp.f32 %v10971_v15  ;;  %3571 = vadd.xlane.f32.xlu0 %v3377_v17  ;;  %v3378_v0 = vmul.f32 %v12757_v28, %v12756_v21  ;;  %v12759_v17 = vld [vmem:[#allocation54_spill] sm:$0xff]  ;;  %vm4865_vm12 = vmor %vm4863_vm10, %vm4864_vm11  ;;  %vm1267_vm15 = vcmp.eq.s32.totalorder %v7496_v52, %v12760_v6  ;;  %v4899_v13 = vand.u32 2147483648, %v10971_v15 }
 0x440   :  { %v7011_v26 = vpop.eup %7010  ;;  %v4860_v62 = vsub.f32 1.0, %v4859_v19  ;;  %v3532_v1 = vpop.xlane.xlu1 %3531  ;;  %v3380_v10 = vmul.f32 %v12759_v17, %v12758_v25  ;;  %v6561_v50 = vsel %vm1267_vm15, 1.0, %v12484_v23  ;;  %vm4893_vm3 = vweird.f32 %v10971_v15 }
 0x441   :  { %v7013_v61 = vpop.eup %7012  ;;  %v4874_v46 = vmul.f32 %v7011_v26, %v10953_v54  ;;  %v10984_v43 = vpop.f32.mrf.mxu3  ;;  %v6737_v48 = vmul.f32 -1.442695, %v3532_v1  ;;  %v4870_v1 = vor.u32 1.1754944e-38, %v4869_v42  ;;  %vm4879_vm13 = vweird.f32 %v7011_v26 }
 0x442   :  { %v4861_v16 = vmul.f32 %v7009_v9, %v4860_v62  ;;  %v10986_v39 = vadd.f32 1.0, %v7013_v61  ;;  %v4884_v62 = vand.u32 2147483648, %v10953_v54  ;;  %vm11007_vm2 = vmor %vm4878_vm1, %vm4879_vm13 }
 0x443   :  { %v4875_v19 = vsub.f32 1.0, %v4874_v46  ;;  %6685 = vmatmul.msk.f32.gmra.mxu3 %vm1521_vm0, %v6560_v4 }
 0x444   :  { %v4862_v14 = vadd.f32 %v7009_v9, %v4861_v16  ;;  %7016 = vrcp.f32 %v10986_v39  ;;  %v4885_v42 = vor.u32 1.1754944e-38, %v4884_v62  ;;  %vm4908_vm10 = vweird.f32 %v10986_v39 }
 0x445   :  { %v7015_v18 = vpop.eup %7014  ;;  %v4876_v61 = vmul.f32 %v7011_v26, %v4875_v19  ;;  %7018 = vpow2.f32 %v6737_v48  ;;  %v12763_v19 = vld [vmem:[#allocation47_spill] sm:$0xff] }
 0x446   :  { %v4889_v21 = vmul.f32 %v7015_v18, %v10971_v15  ;;  %3569 = vadd.xlane.f32.xlu2 %v3376_v36  ;;  %3573 = vadd.xlane.f32.xlu1 %v3378_v0  ;;  %v4866_v46 = vsel %vm4865_vm12, %v7009_v9, %v4862_v14  ;;  %v4897_v9 = vand.u32 2147483647, %v10971_v15  ;;  %vm4894_vm4 = vweird.f32 %v7015_v18  ;;  %v12764_v14 = vld [vmem:[#allocation50_spill] sm:$0xff]  ;;  %v12769_v15 = vld [vmem:[#allocation52_spill] sm:$0xff] }
 0x447   :  { %3577 = vadd.xlane.f32.xlu0 %v3380_v10  ;;  %v4871_v16 = vsel %vm4868_vm14, %v4870_v1, %v4866_v46  ;;  %v4877_v28 = vadd.f32 %v7011_v26, %v4876_v61  ;;  %v3379_v62 = vmul.f32 %v12764_v14, %v12763_v19  ;;  %v12765_v1 = vld [vmem:[#allocation51_spill] sm:$0xff]  ;;  %v12766_v61 = vld [vmem:[#allocation56_spill] sm:$0xff]  ;;  %vm4895_vm6 = vmor %vm4893_vm3, %vm4894_vm4  ;;  %vm1268_vm9 = vcmp.eq.s32.totalorder %v7496_v52, %v12769_v15 }
 0x448   :  { %v4890_v4 = vsub.f32 1.0, %v4889_v21  ;;  %6104 = vst.msk [vmem:[%s12463_s4 + $0x168] sm:$0xff] %vm6058_vm8, %v4871_v16  ;;  %v3534_v48 = vpop.xlane.xlu2 %3533  ;;  %v3381_v21 = vmul.f32 %v12766_v61, %v12765_v1  ;;  %vm4898_vm7 = vcmp.eq.f32.partialorder %v4897_v9, 8.507059e+37  ;;  %v4914_v14 = vand.u32 2147483648, %v10986_v39 }
 0x449   :  { %v4881_v54 = vsel %vm11007_vm2, %v7011_v26, %v4877_v28  ;;  %v6738_v25 = vmul.f32 -1.442695, %v3534_v48  ;;  %v11015_v17 = vpop.f32.mrf.mxu3  ;;  %v12767_v28 = vld [vmem:[#allocation55_spill] sm:$0xff]  ;;  %v4900_v48 = vor.u32 1.1754944e-38, %v4899_v13  ;;  %v6562_v61 = vsel %vm1268_vm9, 1.0, %v12484_v23 }
 0x44a   :  { %v4891_v0 = vmul.f32 %v7015_v18, %v4890_v4  ;;  %v7017_v10 = vpop.eup %7016  ;;  %v4886_v46 = vsel %vm4883_vm5, %v4885_v42, %v4881_v54  ;;  %v12768_v4 = vld [vmem:[#allocation65_spill] sm:$0xff]  ;;  %v11035_v42 = vpop.f32.mrf.mxu2 }
 0x44b   :  { %6105 = vst.msk [vmem:[%s12463_s4 + $0x170] sm:$0xff] %vm6058_vm8, %v4886_v46  ;;  %v4904_v16 = vmul.f32 %v7017_v10, %v10986_v39  ;;  %7020 = vpow2.f32 %v6738_v25  ;;  %v7019_v6 = vpop.eup %7018  ;;  %v3383_v36 = vmul.f32 %v12768_v4, %v12767_v28  ;;  %6686 = vmatmul.msk.f32.gmra.mxu3 %vm1521_vm0, %v6561_v50  ;;  %vm4909_vm11 = vweird.f32 %v7017_v10  ;;  %v12771_v46 = vld [vmem:[#allocation62_spill] sm:$0xff]  ;;  %v12772_v28 = vld [vmem:[#allocation57_spill] sm:$0xff] }
 0x44c   :  { %v4892_v26 = vadd.f32 %v7015_v18, %v4891_v0  ;;  %v11037_v0 = vadd.f32 1.0, %v7019_v6  ;;  %vm4910_vm12 = vmor %vm4908_vm10, %vm4909_vm11  ;;  %v3384_v4 = vmul.f32 %v9901_v56, %v12772_v28 }
 0x44d   :  { %v4905_v19 = vsub.f32 1.0, %v4904_v16  ;;  %v4915_v16 = vor.u32 1.1754944e-38, %v4914_v14 }
 0x44e   :  { %v4896_v54 = vsel %vm4895_vm6, %v7015_v18, %v4892_v26  ;;  %3575 = vadd.xlane.f32.xlu2 %v3379_v62  ;;  %3579 = vadd.xlane.f32.xlu1 %v3381_v21  ;;  %v4912_v18 = vand.u32 2147483647, %v10986_v39  ;;  %7022 = vrcp.f32 %v11037_v0  ;;  %v12770_v21 = vld [vmem:[#allocation53_spill] sm:$0xff]  ;;  %v4929_v14 = vand.u32 2147483648, %v11037_v0 }
 0x44f   :  { %v4901_v25 = vsel %vm4898_vm7, %v4900_v48, %v4896_v54  ;;  %3583 = vadd.xlane.f32.xlu0 %v3383_v36  ;;  %v4906_v13 = vmul.f32 %v7017_v10, %v4905_v19  ;;  %v3382_v26 = vmul.f32 %v12771_v46, %v12770_v21  ;;  %v12773_v48 = vld [vmem:[#allocation61_spill] sm:$0xff]  ;;  %v12775_v46 = vld [vmem:[#allocation64_spill] sm:$0xff]  ;;  %vm4923_vm15 = vweird.f32 %v11037_v0 }
 0x450   :  { %6106 = vst.msk [vmem:[%s12463_s4 + $0x178] sm:$0xff] %vm6058_vm8, %v4901_v25  ;;  %v3536_v9 = vpop.xlane.xlu0 %3535  ;;  %vm4913_vm13 = vcmp.eq.f32.partialorder %v4912_v18, 8.507059e+37  ;;  %v3386_v39 = vmul.f32 %v10033_v22, %v12773_v48  ;;  %v4927_v25 = vand.u32 2147483647, %v11037_v0 }
 0x451   :  { %v7021_v50 = vpop.eup %7020  ;;  %v4907_v62 = vadd.f32 %v7017_v10, %v4906_v13  ;;  %v11049_v52 = vpop.f32.mrf.mxu3  ;;  %v6739_v1 = vmul.f32 -1.442695, %v3536_v9 }
 0x452   :  { %v11054_v6 = vadd.f32 1.0, %v7021_v50  ;;  %vm4928_vm1 = vcmp.eq.f32.partialorder %v4927_v25, 8.507059e+37 }
 0x453   :  { %v4911_v36 = vsel %vm4910_vm12, %v7017_v10, %v4907_v62  ;;  %7024 = vpow2.f32 %v6739_v1  ;;  %6687 = vmatmul.msk.f32.gmra.mxu3 %vm1521_vm0, %v6562_v61  ;;  %v11067_v10 = vpop.f32.mrf.mxu2  ;;  %v12774_v61 = vld [vmem:[#allocation59_spill] sm:$0xff] }
 0x454   :  { %v4916_v54 = vsel %vm4913_vm13, %v4915_v16, %v4911_v36  ;;  %7026 = vrcp.f32 %v11054_v6  ;;  %v7023_v23 = vpop.eup %7022  ;;  %v3385_v21 = vmul.f32 %v9960_v41, %v12774_v61  ;;  %vm4938_vm5 = vweird.f32 %v11054_v6  ;;  %v12779_v61 = vld [vmem:[#allocation77_spill] sm:$0xff] }
 0x455   :  { %6107 = vst.msk [vmem:[%s12463_s4 + $0x180] sm:$0xff] %vm6058_vm8, %v4916_v54  ;;  %v4919_v56 = vmul.f32 %v7023_v23, %v11037_v0  ;;  %vm4924_vm0 = vweird.f32 %v7023_v23  ;;  %v4944_v54 = vand.u32 2147483648, %v11054_v6 }
 0x456   :  { %3581 = vadd.xlane.f32.xlu2 %v3382_v26  ;;  %3585 = vadd.xlane.f32.xlu1 %v3384_v4  ;;  %v12776_v26 = vld [vmem:[#allocation66_spill] sm:$0xff]  ;;  %v12777_v4 = vld [vmem:[#allocation73_spill] sm:$0xff]  ;;  %vm4925_vm14 = vmor %vm4923_vm15, %vm4924_vm0 }
 0x457   :  { %3589 = vadd.xlane.f32.xlu0 %v3386_v39  ;;  %v4920_v19 = vsub.f32 1.0, %v4919_v56  ;;  %v3387_v16 = vmul.f32 %v12776_v26, %v12775_v46  ;;  %v3389_v36 = vmul.f32 %v10217_v38, %v12777_v4  ;;  %v4942_v38 = vand.u32 2147483647, %v11054_v6 }
 0x458   :  { %v3538_v22 = vpop.xlane.xlu1 %3537  ;;  %v4945_v46 = vor.u32 1.1754944e-38, %v4944_v54 }
 0x459   :  { %v7025_v15 = vpop.eup %7024  ;;  %v6740_v13 = vmul.f32 -1.442695, %v3538_v22  ;;  %v3257_v18 = vpop.f32.mrf.mxu3  ;;  %v4921_v50 = vmul.f32 %v7023_v23, %v4920_v19  ;;  %vm4943_vm3 = vcmp.eq.f32.partialorder %v4942_v38, 8.507059e+37 }
 0x45a   :  { %v7027_v9 = vpop.eup %7026  ;;  %v11071_v62 = vadd.f32 1.0, %v7025_v15  ;;  %v11074_v1 = vmul.f32 %v3257_v18, %v10988_v8  ;;  %v4930_v8 = vor.u32 1.1754944e-38, %v4929_v14  ;;  %v12778_v14 = vld [vmem:[#allocation68_spill] sm:$0xff] }
 0x45b   :  { %v4934_v28 = vmul.f32 %v7027_v9, %v11054_v6  ;;  %7028 = vpow2.f32 %v6740_v13  ;;  %v4922_v48 = vadd.f32 %v7023_v23, %v4921_v50  ;;  %vm4939_vm2 = vweird.f32 %v7027_v9  ;;  %v11091_v15 = vpop.f32.mrf.mxu2 }
 0x45c   :  { %7030 = vrcp.f32 %v11071_v62  ;;  %vm4940_vm4 = vmor %vm4938_vm5, %vm4939_vm2  ;;  %vm4953_vm7 = vweird.f32 %v11071_v62 }
 0x45d   :  { %v4935_v39 = vsub.f32 1.0, %v4934_v28  ;;  %v4926_v41 = vsel %vm4925_vm14, %v7023_v23, %v4922_v48  ;;  %v3388_v23 = vmul.f32 %v10163_v51, %v12778_v14  ;;  %v12780_v51 = vld [vmem:[#allocation84_spill] sm:$0xff]  ;;  %v4957_v48 = vand.u32 2147483647, %v11071_v62 }
 0x45e   :  { %3587 = vadd.xlane.f32.xlu2 %v3385_v21  ;;  %3591 = vadd.xlane.f32.xlu1 %v3387_v16  ;;  %v4931_v56 = vsel %vm4928_vm1, %v4930_v8, %v4926_v41  ;;  %v3390_v21 = vmul.f32 %v10287_v34, %v12779_v61  ;;  %v3392_v6 = vmul.f32 %v10399_v45, %v12780_v51  ;;  %v12781_v45 = vld [vmem:[#allocation81_spill] sm:$0xff]  ;;  %v12783_v61 = vld [vmem:[#allocation86_spill] sm:$0xff] }
 0x45f   :  { %3595 = vadd.xlane.f32.xlu0 %v3389_v36  ;;  %v4936_v19 = vmul.f32 %v7027_v9, %v4935_v39  ;;  %6108 = vst.msk [vmem:[%s12463_s4 + $0x188] sm:$0xff] %vm6058_vm8, %v4931_v56  ;;  %v3391_v41 = vmul.f32 %v10340_v49, %v12781_v45  ;;  %vm4958_vm11 = vcmp.eq.f32.partialorder %v4957_v48, 8.507059e+37 }
 0x460   :  { %v3540_v0 = vpop.xlane.xlu2 %3539 }
 0x461   :  { %v7029_v22 = vpop.eup %7028  ;;  %v4937_v25 = vadd.f32 %v7027_v9, %v4936_v19  ;;  %v6741_v13 = vmul.f32 -1.442695, %v3540_v0  ;;  %v3260_v18 = vpop.f32.mrf.mxu3  ;;  %v12782_v0 = vld [vmem:[#allocation85_spill] sm:$0xff] }
 0x462   :  { %v7031_v50 = vpop.eup %7030  ;;  %v4110_v26 = vadd.f32 1.0, %v7029_v22  ;;  %v11099_v16 = vmul.f32 %v3260_v18, %v11035_v42  ;;  %v4959_v42 = vand.u32 2147483648, %v11071_v62  ;;  %v3393_v22 = vmul.f32 %v10462_v58, %v12782_v0 }
 0x463   :  { %v4941_v28 = vsel %vm4940_vm4, %v7027_v9, %v4937_v25  ;;  %v4949_v4 = vmul.f32 %v7031_v50, %v11071_v62  ;;  %7032 = vpow2.f32 %v6741_v13  ;;  %vm4954_vm6 = vweird.f32 %v7031_v50  ;;  %v11118_v13 = vpop.f32.mrf.mxu2 }
 0x464   :  { %v4946_v36 = vsel %vm4943_vm3, %v4945_v46, %v4941_v28  ;;  %7034 = vrcp.f32 %v4110_v26  ;;  %vm4955_vm9 = vmor %vm4953_vm7, %vm4954_vm6  ;;  %v4960_v14 = vor.u32 1.1754944e-38, %v4959_v42  ;;  %v3395_v62 = vmul.f32 %v10577_v55, %v12783_v61 }
 0x465   :  { %6109 = vst.msk [vmem:[%s12463_s4 + $0x190] sm:$0xff] %vm6058_vm8, %v4946_v36  ;;  %v4950_v34 = vsub.f32 1.0, %v4949_v4  ;;  %vm4968_vm12 = vweird.f32 %v4110_v26 }
 0x466   :  { %3593 = vadd.xlane.f32.xlu2 %v3388_v23  ;;  %3597 = vadd.xlane.f32.xlu1 %v3390_v21 }
 0x467   :  { %3601 = vadd.xlane.f32.xlu0 %v3392_v6  ;;  %v4951_v9 = vmul.f32 %v7031_v50, %v4950_v34  ;;  %v12784_v34 = vld [vmem:[#allocation19_spill] sm:$0xff] }
 0x468   :  { %v3542_v8 = vpop.xlane.xlu0 %3541  ;;  %v3394_v42 = vmul.f32 %v10538_v57, %v12784_v34 }
 0x469   :  { %v7033_v39 = vpop.eup %7032  ;;  %v4952_v54 = vadd.f32 %v7031_v50, %v4951_v9  ;;  %v3263_v56 = vpop.f32.mrf.mxu3  ;;  %v6742_v19 = vmul.f32 -1.442695, %v3542_v8  ;;  %v12785_v9 = vld [vmem:[#allocation87_spill] sm:$0xff] }
 0x46a   :  { %v7035_v38 = vpop.eup %7034  ;;  %v4111_v23 = vadd.f32 1.0, %v7033_v39  ;;  %v11116_v25 = vmul.f32 %v3263_v56, %v11067_v10  ;;  %v4974_v10 = vand.u32 2147483648, %v4110_v26  ;;  %v3396_v48 = vmul.f32 %v10643_v7, %v12785_v9 }
 0x46b   :  { %v4956_v18 = vsel %vm4955_vm9, %v7031_v50, %v4952_v54  ;;  %v4964_v49 = vmul.f32 %v7035_v38, %v4110_v26  ;;  %7036 = vpow2.f32 %v6742_v19  ;;  %vm4969_vm10 = vweird.f32 %v7035_v38  ;;  %v12786_v54 = vld [vmem:[#allocation88_spill] sm:$0xff]  ;;  %v11134_v19 = vpop.f32.mrf.mxu2 }
 0x46c   :  { %v4961_v21 = vsel %vm4958_vm11, %v4960_v14, %v4956_v18  ;;  %7038 = vrcp.f32 %v4111_v23  ;;  %v4972_v50 = vand.u32 2147483647, %v4110_v26  ;;  %vm4970_vm13 = vmor %vm4968_vm12, %vm4969_vm10  ;;  %v4975_v8 = vor.u32 1.1754944e-38, %v4974_v10 }
 0x46d   :  { %6110 = vst.msk [vmem:[%s12463_s4 + $0x198] sm:$0xff] %vm6058_vm8, %v4961_v21  ;;  %v4965_v58 = vsub.f32 1.0, %v4964_v49  ;;  %v3398_v26 = vmul.f32 %v10697_v47, %v12786_v54  ;;  %v4989_v7 = vand.u32 2147483648, %v4111_v23  ;;  %v4987_v0 = vand.u32 2147483647, %v4111_v23  ;;  %v12790_v54 = vld [vmem:[#allocation4_spill] sm:$0xff] }
 0x46e   :  { %3599 = vadd.xlane.f32.xlu2 %v3391_v41  ;;  %3603 = vadd.xlane.f32.xlu1 %v3393_v22  ;;  %vm4973_vm0 = vcmp.eq.f32.partialorder %v4972_v50, 8.507059e+37  ;;  %vm4983_vm14 = vweird.f32 %v4111_v23 }
 0x46f   :  { %3607 = vadd.xlane.f32.xlu0 %v3395_v62  ;;  %v4966_v46 = vmul.f32 %v7035_v38, %v4965_v58  ;;  %v12787_v62 = vld [vmem:[#allocation21_spill] sm:$0xff]  ;;  %v12788_v58 = vld [vmem:[#allocation23_spill] sm:$0xff]  ;;  %vm4988_vm2 = vcmp.eq.f32.partialorder %v4987_v0, 8.507059e+37 }
 0x470   :  { %v3544_v28 = vpop.xlane.xlu1 %3543  ;;  %v3397_v21 = vmul.f32 %v10681_v32, %v12787_v62  ;;  %v3399_v10 = vmul.f32 %v10713_v60, %v12788_v58 }
 0x471   :  { %v7037_v4 = vpop.eup %7036  ;;  %v4967_v51 = vadd.f32 %v7035_v38, %v4966_v46  ;;  %v6743_v55 = vmul.f32 -1.442695, %v3544_v28  ;;  %v11126_v6 = vpop.f32.mrf.mxu3  ;;  %v4990_v46 = vor.u32 1.1754944e-38, %v4989_v7 }
 0x472   :  { %v7039_v36 = vpop.eup %7038  ;;  %v4112_v39 = vadd.f32 1.0, %v7037_v4 }
 0x473   :  { %v4971_v45 = vsel %vm4970_vm13, %v7035_v38, %v4967_v51  ;;  %v4979_v41 = vmul.f32 %v7039_v36, %v4111_v23  ;;  %7040 = vpow2.f32 %v6743_v55  ;;  %vm4984_vm15 = vweird.f32 %v7039_v36  ;;  %v12789_v51 = vld [vmem:[#allocation2_spill] sm:$0xff]  ;;  %v11152_v34 = vpop.f32.mrf.mxu2 }
 0x474   :  { %v4976_v56 = vsel %vm4973_vm0, %v4975_v8, %v4971_v45  ;;  %7042 = vrcp.f32 %v4112_v39  ;;  %vm4985_vm1 = vmor %vm4983_vm14, %vm4984_vm15  ;;  %v3401_v23 = vmul.f32 %v10739_v63, %v12789_v51  ;;  %v5004_v60 = vand.u32 2147483648, %v4112_v39 }
 0x475   :  { %6111 = vst.msk [vmem:[%s12463_s4 + $0x1a0] sm:$0xff] %vm6058_vm8, %v4976_v56  ;;  %v4980_v57 = vsub.f32 1.0, %v4979_v41  ;;  %vm4998_vm4 = vweird.f32 %v4112_v39  ;;  %v12791_v56 = vld [vmem:[#allocation6_spill] sm:$0xff] }
 0x476   :  { %3605 = vadd.xlane.f32.xlu2 %v3394_v42  ;;  %3609 = vadd.xlane.f32.xlu1 %v3396_v48  ;;  %v5002_v42 = vand.u32 2147483647, %v4112_v39  ;;  %v5005_v7 = vor.u32 1.1754944e-38, %v5004_v60 }
 0x477   :  { %3613 = vadd.xlane.f32.xlu0 %v3398_v26  ;;  %v4981_v38 = vmul.f32 %v7039_v36, %v4980_v57  ;;  %v3400_v26 = vmul.f32 %v10731_v33, %v12790_v54  ;;  %v3402_v57 = vmul.f32 %v10753_v11, %v12791_v56 }
 0x478   :  { %v3546_v22 = vpop.xlane.xlu2 %3545  ;;  %vm5003_vm6 = vcmp.eq.f32.partialorder %v5002_v42, 8.507059e+37 }
 0x479   :  { %v7041_v14 = vpop.eup %7040  ;;  %v4982_v47 = vadd.f32 %v7039_v36, %v4981_v38  ;;  %v6744_v18 = vmul.f32 -1.442695, %v3546_v22  ;;  %v11140_v49 = vpop.f32.mrf.mxu3 }
 0x47a   :  { %v7043_v61 = vpop.eup %7042  ;;  %v4113_v50 = vadd.f32 1.0, %v7041_v14  ;;  %v12792_v14 = vld [vmem:[#allocation8_spill] sm:$0xff] }
 0x47b   :  { %v4986_v28 = vsel %vm4985_vm1, %v7039_v36, %v4982_v47  ;;  %v4994_v4 = vmul.f32 %v7043_v61, %v4112_v39  ;;  %7044 = vpow2.f32 %v6744_v18  ;;  %vm4999_vm5 = vweird.f32 %v7043_v61  ;;  %v11166_v58 = vpop.f32.mrf.mxu2 }
 0x47c   :  { %v4991_v55 = vsel %vm4988_vm2, %v4990_v46, %v4986_v28  ;;  %7046 = vrcp.f32 %v4113_v50  ;;  %vm5000_vm3 = vmor %vm4998_vm4, %vm4999_vm5  ;;  %v3404_v39 = vmul.f32 %v10770_v20, %v12792_v14  ;;  %v5019_v11 = vand.u32 2147483648, %v4113_v50 }
 0x47d   :  { %6112 = vst.msk [vmem:[%s12463_s4 + $0x1a8] sm:$0xff] %vm6058_vm8, %v4991_v55  ;;  %v4995_v32 = vsub.f32 1.0, %v4994_v4  ;;  %vm5013_vm9 = vweird.f32 %v4113_v50  ;;  %v12793_v4 = vld [vmem:[#allocation5_spill] sm:$0xff] }
 0x47e   :  { %3611 = vadd.xlane.f32.xlu2 %v3397_v21  ;;  %3615 = vadd.xlane.f32.xlu1 %v3399_v10  ;;  %v3403_v51 = vmul.f32 %v10764_v35, %v12793_v4 }
 0x47f   :  { %3619 = vadd.xlane.f32.xlu0 %v3401_v23  ;;  %v4996_v36 = vmul.f32 %v7043_v61, %v4995_v32  ;;  %v12794_v23 = vld [vmem:[#allocation25_spill] sm:$0xff]  ;;  %v5020_v32 = vor.u32 1.1754944e-38, %v5019_v11 }
 0x480   :  { %v3548_v9 = vpop.xlane.xlu0 %3547  ;;  %v3405_v55 = vmul.f32 %v10784_v24, %v12794_v23  ;;  %v3411_v23 = vmul.f32 %v10931_v31, %v10816_v27 }
 0x481   :  { %v7045_v48 = vpop.eup %7044  ;;  %v4997_v63 = vadd.f32 %v7043_v61, %v4996_v36  ;;  %v11154_v8 = vpop.f32.mrf.mxu3  ;;  %v6745_v45 = vmul.f32 -1.442695, %v3548_v9  ;;  %v12795_v9 = vld [vmem:[#allocation33_spill] sm:$0xff] }
 0x482   :  { %v7047_v41 = vpop.eup %7046  ;;  %v4114_v38 = vadd.f32 1.0, %v7045_v48 }
 0x483   :  { %v5001_v0 = vsel %vm5000_vm3, %v7043_v61, %v4997_v63  ;;  %v5009_v22 = vmul.f32 %v7047_v41, %v4113_v50  ;;  %7048 = vpow2.f32 %v6745_v45  ;;  %vm5014_vm7 = vweird.f32 %v7047_v41 }
 0x484   :  { %v5006_v47 = vsel %vm5003_vm6, %v5005_v7, %v5001_v0  ;;  %7050 = vrcp.f32 %v4114_v38  ;;  %v5017_v61 = vand.u32 2147483647, %v4113_v50  ;;  %vm5015_vm11 = vmor %vm5013_vm9, %vm5014_vm7  ;;  %v3407_v50 = vmul.f32 %v10825_v3, %v12795_v9  ;;  %v12796_v7 = vld [vmem:[#allocation10_spill] sm:$0xff] }
 0x485   :  { %6113 = vst.msk [vmem:[%s12463_s4 + $0x1b0] sm:$0xff] %vm6058_vm8, %v5006_v47  ;;  %v5010_v33 = vsub.f32 1.0, %v5009_v22  ;;  %v5034_v24 = vand.u32 2147483648, %v4114_v38  ;;  %v5032_v45 = vand.u32 2147483647, %v4114_v38  ;;  %vm5028_vm13 = vweird.f32 %v4114_v38  ;;  %v12797_v22 = vld [vmem:[#allocation20_spill] sm:$0xff] }
 0x486   :  { %3617 = vadd.xlane.f32.xlu2 %v3400_v26  ;;  %3621 = vadd.xlane.f32.xlu1 %v3402_v57  ;;  %vm5018_vm10 = vcmp.eq.f32.partialorder %v5017_v61, 8.507059e+37  ;;  %v3406_v0 = vmul.f32 %v10801_v5, %v12796_v7  ;;  %v3408_v14 = vmul.f32 %v10837_v37, %v12797_v22 }
 0x487   :  { %3625 = vadd.xlane.f32.xlu0 %v3404_v39  ;;  %v5011_v18 = vmul.f32 %v7047_v41, %v5010_v33  ;;  %v5035_v39 = vor.u32 1.1754944e-38, %v5034_v24  ;;  %v11188_v33 = vpop.f32.mrf.mxu2  ;;  %vm5033_vm15 = vcmp.eq.f32.partialorder %v5032_v45, 8.507059e+37 }
 0x488   :  { %v3550_v62 = vpop.xlane.xlu1 %3549 }
 0x489   :  { %v7049_v21 = vpop.eup %7048  ;;  %v5012_v20 = vadd.f32 %v7047_v41, %v5011_v18  ;;  %v6746_v10 = vmul.f32 -1.442695, %v3550_v62  ;;  %v11168_v46 = vpop.f32.mrf.mxu3 }
 0x48a   :  { %v7051_v28 = vpop.eup %7050  ;;  %v4115_v60 = vadd.f32 1.0, %v7049_v21 }
 0x48b   :  { %v5016_v36 = vsel %vm5015_vm11, %v7047_v41, %v5012_v20  ;;  %v5024_v42 = vmul.f32 %v7051_v28, %v4114_v38  ;;  %7052 = vpow2.f32 %v6746_v10  ;;  %vm5029_vm12 = vweird.f32 %v7051_v28 }
 0x48c   :  { %v5021_v48 = vsel %vm5018_vm10, %v5020_v32, %v5016_v36  ;;  %7054 = vrcp.f32 %v4115_v60  ;;  %vm5030_vm0 = vmor %vm5028_vm13, %vm5029_vm12  ;;  %v3410_v38 = vmul.f32 %v10896_v59, %v10793_v29  ;;  %v5049_v37 = vand.u32 2147483648, %v4115_v60 }
 0x48d   :  { %6114 = vst.msk [vmem:[%s12463_s4 + $0x1b8] sm:$0xff] %vm6058_vm8, %v5021_v48  ;;  %v5025_v35 = vsub.f32 1.0, %v5024_v42  ;;  %v5047_v21 = vand.u32 2147483647, %v4115_v60  ;;  %vm5043_vm1 = vweird.f32 %v4115_v60 }
 0x48e   :  { %3623 = vadd.xlane.f32.xlu2 %v3403_v51  ;;  %3627 = vadd.xlane.f32.xlu1 %v3405_v55  ;;  %v3409_v51 = vmul.f32 %v10854_v40, %v10775_v44  ;;  %v5050_v55 = vor.u32 1.1754944e-38, %v5049_v37 }
 0x48f   :  { %3631 = vadd.xlane.f32.xlu0 %v3407_v50  ;;  %v5026_v63 = vmul.f32 %v7051_v28, %v5025_v35  ;;  %vm5048_vm5 = vcmp.eq.f32.partialorder %v5047_v21, 8.507059e+37  ;;  %v11209_v50 = vpop.f32.mrf.mxu2 }
 0x491   :  { %v3552_v41 = vpop.xlane.xlu2 %3551  ;;  %v7053_v54 = vpop.eup %7052  ;;  %v5027_v26 = vadd.f32 %v7051_v28, %v5026_v63 }
 0x492   :  { %v6747_v3 = vmul.f32 -1.442695, %v3552_v41  ;;  %v11180_v56 = vpop.f32.mrf.mxu3  ;;  %v7055_v57 = vpop.eup %7054  ;;  %v11186_v47 = vadd.f32 1.0, %v7053_v54  ;;  %v3412_v54 = vmul.f32 %v10957_v53, %v10840_v30 }
 0x493   :  { %v5031_v11 = vsel %vm5030_vm0, %v7051_v28, %v5027_v26  ;;  %v5039_v18 = vmul.f32 %v7055_v57, %v4115_v60  ;;  %vm5044_vm14 = vweird.f32 %v7055_v57  ;;  %v3413_v60 = vmul.f32 %v10984_v43, %v10872_v2 }
 0x494   :  { %7056 = vpow2.f32 %v6747_v3  ;;  %v5036_v61 = vsel %vm5033_vm15, %v5035_v39, %v5031_v11  ;;  %vm5045_vm2 = vmor %vm5043_vm1, %vm5044_vm14  ;;  %v5064_v27 = vand.u32 2147483648, %v11186_v47  ;;  %v5062_v2 = vand.u32 2147483647, %v11186_v47  ;;  %v12798_v39 = vld [vmem:[#allocation69_spill] sm:$0xff] }
 0x495   :  { %7058 = vrcp.f32 %v11186_v47  ;;  %6115 = vst.msk [vmem:[%s12463_s4 + $0x1c0] sm:$0xff] %vm6058_vm8, %v5036_v61  ;;  %v5040_v5 = vsub.f32 1.0, %v5039_v18  ;;  %vm5058_vm3 = vweird.f32 %v11186_v47  ;;  %v3414_v26 = vmul.f32 %v11015_v17, %v10918_v12 }
 0x496   :  { %3629 = vadd.xlane.f32.xlu2 %v3406_v0  ;;  %3633 = vadd.xlane.f32.xlu1 %v3408_v14  ;;  %v5065_v3 = vor.u32 1.1754944e-38, %v5064_v27  ;;  %vm5063_vm7 = vcmp.eq.f32.partialorder %v5062_v2, 8.507059e+37 }
 0x497   :  { %3637 = vadd.xlane.f32.xlu0 %v3410_v38  ;;  %v5041_v62 = vmul.f32 %v7055_v57, %v5040_v5  ;;  %v2268_v53 = vpop.f32.mrf.mxu2 }
 0x499   :  { %v3554_v20 = vpop.xlane.xlu0 %3553  ;;  %v5042_v28 = vadd.f32 %v7055_v57, %v5041_v62 }
 0x49a   :  { %v7057_v10 = vpop.eup %7056  ;;  %v11197_v29 = vpop.f32.mrf.mxu3  ;;  %v6748_v59 = vmul.f32 -1.442695, %v3554_v20 }
 0x49b   :  { %v7059_v4 = vpop.eup %7058  ;;  %v11203_v32 = vadd.f32 1.0, %v7057_v10  ;;  %v5046_v36 = vsel %vm5045_vm2, %v7055_v57, %v5042_v28 }
 0x49c   :  { %v5054_v42 = vmul.f32 %v7059_v4, %v11186_v47  ;;  %7060 = vpow2.f32 %v6748_v59  ;;  %v5051_v9 = vsel %vm5048_vm5, %v5050_v55, %v5046_v36  ;;  %vm5059_vm4 = vweird.f32 %v7059_v4 }
 0x49d   :  { %7062 = vrcp.f32 %v11203_v32  ;;  %6116 = vst.msk [vmem:[%s12463_s4 + $0x1c8] sm:$0xff] %vm6058_vm8, %v5051_v9  ;;  %vm5060_vm6 = vmor %vm5058_vm3, %vm5059_vm4  ;;  %v5079_v12 = vand.u32 2147483648, %v11203_v32  ;;  %v5077_v14 = vand.u32 2147483647, %v11203_v32  ;;  %v3415_v47 = vmul.f32 %v11049_v52, %v12798_v39 }
 0x49e   :  { %v5055_v44 = vsub.f32 1.0, %v5054_v42  ;;  %3635 = vadd.xlane.f32.xlu2 %v3409_v51  ;;  %3639 = vadd.xlane.f32.xlu1 %v3411_v23  ;;  %vm5073_vm11 = vweird.f32 %v11203_v32  ;;  %v3420_v23 = vmul.f32 %v11140_v49, %v11118_v13  ;;  %v11257_v13 = vmul.f32 %v11154_v8, %v11134_v19 }
 0x49f   :  { %3643 = vadd.xlane.f32.xlu0 %v3413_v60  ;;  %v5080_v10 = vor.u32 1.1754944e-38, %v5079_v12  ;;  %vm5078_vm12 = vcmp.eq.f32.partialorder %v5077_v14, 8.507059e+37  ;;  %v3422_v49 = vmul.f32 %v11168_v46, %v11152_v34  ;;  %v11263_v42 = vmul.f32 %v11180_v56, %v11166_v58 }
 0x4a0   :  { %v5056_v40 = vmul.f32 %v7059_v4, %v5055_v44 }
 0x4a1   :  { %v3556_v31 = vpop.xlane.xlu1 %3555  ;;  %v3560_v43 = vpop.xlane.xlu0 %3559 }
 0x4a2   :  { %v7061_v48 = vpop.eup %7060  ;;  %v5057_v35 = vadd.f32 %v7059_v4, %v5056_v40  ;;  %v6749_v24 = vmul.f32 -1.442695, %v3556_v31  ;;  %v11218_v63 = vpop.f32.mrf.mxu3  ;;  %v6751_v45 = vmul.f32 -1.442695, %v3560_v43 }
 0x4a3   :  { %v7063_v41 = vpop.eup %7062  ;;  %v11224_v57 = vadd.f32 1.0, %v7061_v48  ;;  %v11278_v34 = vmul.f32 %v11218_v63, %v11209_v50 }
 0x4a4   :  { %v5061_v7 = vsel %vm5060_vm6, %v7059_v4, %v5057_v35  ;;  %v5069_v0 = vmul.f32 %v7063_v41, %v11203_v32  ;;  %7064 = vpow2.f32 %v6749_v24  ;;  %vm5074_vm9 = vweird.f32 %v7063_v41  ;;  %v2271_v35 = vpop.f32.mrf.mxu2 }
 0x4a5   :  { %v5066_v22 = vsel %vm5063_vm7, %v5065_v3, %v5061_v7  ;;  %7066 = vrcp.f32 %v11224_v57  ;;  %vm5075_vm10 = vmor %vm5073_vm11, %vm5074_vm9  ;;  %v5092_v32 = vand.u32 2147483647, %v11224_v57  ;;  %vm5088_vm0 = vweird.f32 %v11224_v57 }
 0x4a6   :  { %6117 = vst.msk [vmem:[%s12463_s4 + $0x1d0] sm:$0xff] %vm6058_vm8, %v5066_v22  ;;  %v5070_v30 = vsub.f32 1.0, %v5069_v0  ;;  %7068 = vpow2.f32 %v6751_v45  ;;  %3641 = vadd.xlane.f32.xlu2 %v3412_v54  ;;  %3645 = vadd.xlane.f32.xlu1 %v3414_v26 }
 0x4a7   :  { %3649 = vadd.xlane.f32.xlu0 %v11074_v1  ;;  %v3419_v1 = vmul.f32 %v11126_v6, %v11091_v15  ;;  %v5094_v6 = vand.u32 2147483648, %v11224_v57  ;;  %vm11272_vm15 = vcmp.eq.f32.partialorder %v5092_v32, 8.507059e+37 }
 0x4a8   :  { %v5071_v17 = vmul.f32 %v7063_v41, %v5070_v30 }
 0x4a9   :  { %v3558_v11 = vpop.xlane.xlu2 %3557  ;;  %v3562_v18 = vpop.xlane.xlu1 %3561  ;;  %v5095_v44 = vor.u32 1.1754944e-38, %v5094_v6 }
 0x4aa   :  { %v7065_v38 = vpop.eup %7064  ;;  %v5072_v61 = vadd.f32 %v7063_v41, %v5071_v17  ;;  %v6750_v5 = vmul.f32 -1.442695, %v3558_v11  ;;  %v6752_v37 = vmul.f32 -1.442695, %v3562_v18  ;;  %v3287_v62 = vpop.f32.mrf.mxu3 }
 0x4ab   :  { %v3566_v21 = vpop.xlane.xlu0 %3565  ;;  %v7067_v20 = vpop.eup %7066  ;;  %v11240_v28 = vadd.f32 1.0, %v7065_v38  ;;  %v11285_v31 = vmul.f32 %v3287_v62, %v2268_v53 }
 0x4ac   :  { %v6754_v59 = vmul.f32 -1.442695, %v3566_v21  ;;  %v7069_v52 = vpop.eup %7068  ;;  %v5076_v4 = vsel %vm5075_vm10, %v7063_v41, %v5072_v61  ;;  %v5084_v51 = vmul.f32 %v7067_v20, %v11224_v57  ;;  %7070 = vpow2.f32 %v6750_v5 }
 0x4ad   :  { %v5081_v55 = vsel %vm5078_vm12, %v5080_v10, %v5076_v4  ;;  %7072 = vrcp.f32 %v11240_v28  ;;  %v11252_v36 = vadd.f32 1.0, %v7069_v52  ;;  %vm5089_vm13 = vweird.f32 %v7067_v20 }
 0x4ae   :  { %6118 = vst.msk [vmem:[%s12463_s4 + $0x1d8] sm:$0xff] %vm6058_vm8, %v5081_v55  ;;  %v5085_v15 = vsub.f32 1.0, %v5084_v51  ;;  %7074 = vpow2.f32 %v6752_v37  ;;  %3647 = vadd.xlane.f32.xlu2 %v3415_v47  ;;  %3651 = vadd.xlane.f32.xlu1 %v11099_v16  ;;  %v5107_v9 = vand.u32 2147483647, %v11240_v28  ;;  %v11269_v16 = vmul.f32 %v11197_v29, %v11188_v33  ;;  %vm5090_vm14 = vmor %vm5088_vm0, %vm5089_vm13 }
 0x4af   :  { %7076 = vpow2.f32 %v6754_v59  ;;  %3655 = vadd.xlane.f32.xlu0 %v3419_v1  ;;  %v5109_v27 = vand.u32 2147483648, %v11240_v28  ;;  %vm5103_vm1 = vweird.f32 %v11240_v28  ;;  %v5137_v26 = vand.u32 2147483647, %v11252_v36 }
 0x4b0   :  { %v5086_v60 = vmul.f32 %v7067_v20, %v5085_v15  ;;  %7078 = vrcp.f32 %v11252_v36  ;;  %vm11290_vm2 = vcmp.eq.f32.partialorder %v5107_v9, 8.507059e+37  ;;  %v5139_v3 = vand.u32 2147483648, %v11252_v36 }
 0x4b1   :  { %v3564_v8 = vpop.xlane.xlu2 %3563  ;;  %v3568_v58 = vpop.xlane.xlu1 %3567  ;;  %v5110_v0 = vor.u32 1.1754944e-38, %v5109_v27  ;;  %vm5133_vm4 = vweird.f32 %v11252_v36  ;;  %vm11316_vm3 = vcmp.eq.f32.partialorder %v5137_v26, 8.507059e+37 }
 0x4b2   :  { %v7071_v46 = vpop.eup %7070  ;;  %v5087_v56 = vadd.f32 %v7067_v20, %v5086_v60  ;;  %v6753_v40 = vmul.f32 -1.442695, %v3564_v8  ;;  %v3290_v33 = vpop.f32.mrf.mxu3  ;;  %v6755_v50 = vmul.f32 -1.442695, %v3568_v58 }
 0x4b3   :  { %v7073_v29 = vpop.eup %7072  ;;  %v11283_v2 = vadd.f32 1.0, %v7071_v46  ;;  %v11287_v43 = vpop.xlane.xlu0 %3571  ;;  %v11323_v5 = vmul.f32 %v3290_v33, %v2271_v35 }
 0x4b4   :  { %v7075_v48 = vpop.eup %7074  ;;  %v5091_v24 = vsel %vm5090_vm14, %v7067_v20, %v5087_v56  ;;  %v5099_v63 = vmul.f32 %v7073_v29, %v11240_v28  ;;  %7080 = vpow2.f32 %v6753_v40  ;;  %vm5104_vm5 = vweird.f32 %v7073_v29  ;;  %v2274_v60 = vpop.f32.mrf.mxu2 }
 0x4b5   :  { %v7077_v41 = vpop.eup %7076  ;;  %v5096_v54 = vsel %vm11272_vm15, %v5095_v44, %v5091_v24  ;;  %7082 = vrcp.f32 %v11283_v2  ;;  %v11305_v22 = vadd.f32 1.0, %v7075_v48  ;;  %v5122_v17 = vand.u32 2147483647, %v11283_v2  ;;  %vm5105_vm7 = vmor %vm5103_vm1, %vm5104_vm5 }
 0x4b6   :  { %v11299_v57 = vpop.eup %7078  ;;  %6119 = vst.msk [vmem:[%s12463_s4 + $0x1e0] sm:$0xff] %vm6058_vm8, %v5096_v54  ;;  %v5100_v7 = vsub.f32 1.0, %v5099_v63  ;;  %v11307_v30 = vadd.f32 1.0, %v7077_v41  ;;  %3653 = vadd.xlane.f32.xlu2 %v11116_v25  ;;  %3657 = vadd.xlane.f32.xlu1 %v3420_v23  ;;  %7084 = vpow2.f32 %v6755_v50  ;;  %v5124_v14 = vand.u32 2147483648, %v11283_v2 }
 0x4b7   :  { %v5129_v12 = vmul.f32 %v11299_v57, %v11252_v36  ;;  %3661 = vadd.xlane.f32.xlu0 %v3422_v49  ;;  %7086 = vrcp.f32 %v11305_v22  ;;  %v5140_v25 = vor.u32 1.1754944e-38, %v5139_v3  ;;  %vm5118_vm6 = vweird.f32 %v11283_v2 }
 0x4b8   :  { %v5101_v53 = vmul.f32 %v7073_v29, %v5100_v7  ;;  %7088 = vrcp.f32 %v11307_v30  ;;  %v5154_v61 = vand.u32 2147483648, %v11305_v22  ;;  %vm5134_vm9 = vweird.f32 %v11299_v57 }
 0x4b9   :  { %v5130_v39 = vsub.f32 1.0, %v5129_v12  ;;  %v3570_v11 = vpop.xlane.xlu2 %3569  ;;  %v5152_v21 = vand.u32 2147483647, %v11305_v22  ;;  %vm11334_vm11 = vcmp.eq.f32.partialorder %v5122_v17, 8.507059e+37  ;;  %v5125_v52 = vor.u32 1.1754944e-38, %v5124_v14  ;;  %v3574_v28 = vpop.xlane.xlu1 %3573  ;;  %vm5135_vm10 = vmor %vm5133_vm4, %vm5134_vm9 }
 0x4ba   :  { %v7081_v18 = vpop.eup %7080  ;;  %v5102_v38 = vadd.f32 %v7073_v29, %v5101_v53  ;;  %v5182_v4 = vand.u32 2147483647, %v11307_v30  ;;  %v11339_v51 = vpop.f32.mrf.mxu3  ;;  %v5184_v15 = vand.u32 2147483648, %v11307_v30  ;;  %vm5148_vm12 = vweird.f32 %v11305_v22 }
 0x4bb   :  { %v7083_v37 = vpop.eup %7082  ;;  %v5131_v62 = vmul.f32 %v11299_v57, %v5130_v39  ;;  %v11331_v20 = vadd.f32 1.0, %v7081_v18  ;;  %v3578_v6 = vpop.xlane.xlu0 %3577  ;;  %v5155_v19 = vor.u32 1.1754944e-38, %v5154_v61  ;;  %vm5178_vm13 = vweird.f32 %v11307_v30 }
 0x4bc   :  { %v5106_v1 = vsel %vm5105_vm7, %v7073_v29, %v5102_v38  ;;  %v5114_v10 = vmul.f32 %v7083_v37, %v11283_v2  ;;  %v7085_v23 = vpop.eup %7084  ;;  %vm5119_vm0 = vweird.f32 %v7083_v37  ;;  %vm11363_vm15 = vcmp.eq.f32.partialorder %v5152_v21, 8.507059e+37  ;;  %v2277_v18 = vpop.f32.mrf.mxu2 }
 0x4bd   :  { %v5111_v55 = vsel %vm11290_vm2, %v5110_v0, %v5106_v1  ;;  %v5132_v32 = vadd.f32 %v11299_v57, %v5131_v62  ;;  %7090 = vrcp.f32 %v11331_v20  ;;  %v11346_v49 = vpop.eup %7086  ;;  %v11367_v56 = vadd.f32 1.0, %v7085_v23  ;;  %vm5120_vm2 = vmor %vm5118_vm6, %vm5119_vm0 }
 0x4be   :  { %6120 = vst.msk [vmem:[%s12463_s4 + $0x1e8] sm:$0xff] %vm6058_vm8, %v5111_v55  ;;  %v5115_v9 = vsub.f32 1.0, %v5114_v10  ;;  %3659 = vadd.xlane.f32.xlu2 %v11257_v13  ;;  %3663 = vadd.xlane.f32.xlu1 %v11263_v42  ;;  %v7089_v8 = vpop.eup %7088  ;;  %v5144_v46 = vmul.f32 %v11346_v49, %v11305_v22  ;;  %vm11373_vm14 = vcmp.eq.f32.partialorder %v5182_v4, 8.507059e+37  ;;  %v5185_v33 = vor.u32 1.1754944e-38, %v5184_v15 }
 0x4bf   :  { %v5136_v58 = vsel %vm5135_vm10, %v11299_v57, %v5132_v32  ;;  %3667 = vadd.xlane.f32.xlu0 %v11278_v34  ;;  %v5174_v42 = vmul.f32 %v7089_v8, %v11307_v30  ;;  %v5167_v29 = vand.u32 2147483647, %v11331_v20  ;;  %7092 = vrcp.f32 %v11367_v56 }
 0x4c0   :  { %v5141_v13 = vsel %vm11316_vm3, %v5140_v25, %v5136_v58  ;;  %v5116_v44 = vmul.f32 %v7083_v37, %v5115_v9  ;;  %v5145_v40 = vsub.f32 1.0, %v5144_v46  ;;  %vm5163_vm1 = vweird.f32 %v11331_v20 }
 0x4c1   :  { %6122 = vst.msk [vmem:[%s12463_s4 + $0x1f8] sm:$0xff] %vm6058_vm8, %v5141_v13  ;;  %v5175_v50 = vsub.f32 1.0, %v5174_v42  ;;  %v5169_v48 = vand.u32 2147483648, %v11331_v20  ;;  %v3576_v35 = vpop.xlane.xlu2 %3575  ;;  %vm5149_vm5 = vweird.f32 %v11346_v49  ;;  %v6757_v45 = vmul.f32 -1.442695, %v11287_v43  ;;  %v3580_v17 = vpop.xlane.xlu1 %3579 }
 0x4c2   :  { %v5117_v34 = vadd.f32 %v7083_v37, %v5116_v44  ;;  %v5146_v63 = vmul.f32 %v11346_v49, %v5145_v40  ;;  %v6756_v41 = vmul.f32 -1.442695, %v3570_v11  ;;  %vm5179_vm4 = vweird.f32 %v7089_v8  ;;  %vm11405_vm6 = vmor %vm5148_vm12, %vm5149_vm5  ;;  %v3296_v14 = vpop.f32.mrf.mxu3 }
 0x4c3   :  { %v7091_v24 = vpop.eup %7090  ;;  %v5176_v26 = vmul.f32 %v7089_v8, %v5175_v50  ;;  %vm11395_vm7 = vcmp.eq.f32.partialorder %v5167_v29, 8.507059e+37  ;;  %7094 = vpow2.f32 %v6757_v45  ;;  %v6758_v53 = vmul.f32 -1.442695, %v3574_v28  ;;  %vm5180_vm9 = vmor %vm5178_vm13, %vm5179_vm4  ;;  %v3584_v11 = vpop.xlane.xlu0 %3583 }
 0x4c4   :  { %v5121_v54 = vsel %vm5120_vm2, %v7083_v37, %v5117_v34  ;;  %v5159_v3 = vmul.f32 %v7091_v24, %v11331_v20  ;;  %v5147_v7 = vadd.f32 %v11346_v49, %v5146_v63  ;;  %vm5164_vm3 = vweird.f32 %v7091_v24  ;;  %v2280_v27 = vpop.f32.mrf.mxu2 }
 0x4c5   :  { %v5126_v57 = vsel %vm11334_vm11, %v5125_v52, %v5121_v54  ;;  %v5177_v0 = vadd.f32 %v7089_v8, %v5176_v26  ;;  %v7093_v39 = vpop.eup %7092  ;;  %7096 = vpow2.f32 %v6756_v41  ;;  %v3428_v22 = vmul.f32 %v11339_v51, %v2274_v60  ;;  %vm5165_vm11 = vmor %vm5163_vm1, %vm5164_vm3 }
 0x4c6   :  { %6121 = vst.msk [vmem:[%s12463_s4 + $0x1f0] sm:$0xff] %vm6058_vm8, %v5126_v57  ;;  %v5160_v12 = vsub.f32 1.0, %v5159_v3  ;;  %3665 = vadd.xlane.f32.xlu2 %v11269_v16  ;;  %3669 = vadd.xlane.f32.xlu1 %v11285_v31  ;;  %v5151_v47 = vsel %vm11405_vm6, %v11346_v49, %v5147_v7  ;;  %v6760_v25 = vmul.f32 -1.442695, %v3578_v6  ;;  %v5189_v61 = vmul.f32 %v7093_v39, %v11367_v56 }
 0x4c7   :  { %v5156_v16 = vsel %vm11363_vm15, %v5155_v19, %v5151_v47  ;;  %v5181_v38 = vsel %vm5180_vm9, %v7089_v8, %v5177_v0  ;;  %v5170_v37 = vor.u32 1.1754944e-38, %v5169_v48  ;;  %7098 = vpow2.f32 %v6758_v53  ;;  %3673 = vadd.xlane.f32.xlu0 %v3428_v22 }
 0x4c8   :  { %v5161_v31 = vmul.f32 %v7091_v24, %v5160_v12  ;;  %6123 = vst.msk [vmem:[%s12463_s4 + $0x200] sm:$0xff] %vm6058_vm8, %v5156_v16  ;;  %v5186_v30 = vsel %vm11373_vm14, %v5185_v33, %v5181_v38  ;;  %v6759_v62 = vmul.f32 -1.442695, %v3576_v35  ;;  %v5190_v1 = vsub.f32 1.0, %v5189_v61 }
 0x4c9   :  { %6125 = vst.msk [vmem:[%s12463_s4 + $0x210] sm:$0xff] %vm6058_vm8, %v5186_v30  ;;  %7100 = vpow2.f32 %v6760_v25  ;;  %v6761_v10 = vmul.f32 -1.442695, %v3580_v17  ;;  %vm5194_vm10 = vweird.f32 %v7093_v39  ;;  %v5197_v59 = vand.u32 2147483647, %v11367_v56  ;;  %v7095_v4 = vpop.eup %7094  ;;  %v3582_v55 = vpop.xlane.xlu2 %3581 }
 0x4ca   :  { %v5162_v21 = vadd.f32 %v7091_v24, %v5161_v31  ;;  %v5199_v52 = vand.u32 2147483648, %v11367_v56  ;;  %7102 = vpow2.f32 %v6759_v62  ;;  %v5191_v51 = vmul.f32 %v7093_v39, %v5190_v1  ;;  %v3586_v36 = vpop.xlane.xlu1 %3585  ;;  %v3299_v13 = vpop.f32.mrf.mxu3 }
 0x4cb   :  { %7104 = vpow2.f32 %v6761_v10  ;;  %v3429_v23 = vmul.f32 %v3296_v14, %v2277_v18  ;;  %v7097_v32 = vpop.eup %7096  ;;  %v11438_v6 = vadd.f32 1.0, %v7095_v4  ;;  %v6763_v20 = vmul.f32 -1.442695, %v3584_v11  ;;  %v3590_v42 = vpop.xlane.xlu0 %3589 }
 0x4cc   :  { %v5166_v28 = vsel %vm5165_vm11, %v7091_v24, %v5162_v21  ;;  %v5192_v49 = vadd.f32 %v7093_v39, %v5191_v51  ;;  %vm5193_vm12 = vweird.f32 %v11367_v56  ;;  %v11445_v60 = vadd.f32 1.0, %v7097_v32 }
 0x4cd   :  { %v5171_v15 = vsel %vm11395_vm7, %v5170_v37, %v5166_v28  ;;  %v7099_v9 = vpop.eup %7098  ;;  %vm5195_vm13 = vmor %vm5193_vm12, %vm5194_vm10  ;;  %v5200_v19 = vor.u32 1.1754944e-38, %v5199_v52  ;;  %7106 = vrcp.f32 %v11438_v6  ;;  %v6762_v8 = vmul.f32 -1.442695, %v3582_v55 }
 0x4ce   :  { %6124 = vst.msk [vmem:[%s12463_s4 + $0x208] sm:$0xff] %vm6058_vm8, %v5171_v15  ;;  %3671 = vadd.xlane.f32.xlu2 %v11323_v5  ;;  %3675 = vadd.xlane.f32.xlu1 %v3429_v23  ;;  %v5196_v46 = vsel %vm5195_vm13, %v7093_v39, %v5192_v49  ;;  %vm5198_vm0 = vcmp.eq.f32.partialorder %v5197_v59, 8.507059e+37  ;;  %7108 = vrcp.f32 %v11445_v60  ;;  %v5227_v40 = vand.u32 2147483647, %v11438_v6 }
 0x4cf   :  { %v7101_v58 = vpop.eup %7100  ;;  %v5201_v44 = vsel %vm5198_vm0, %v5200_v19, %v5196_v46  ;;  %7110 = vpow2.f32 %v6763_v20  ;;  %v5229_v33 = vand.u32 2147483648, %v11438_v6  ;;  %v11457_v29 = vadd.f32 1.0, %v7099_v9 }
 0x4d0   :  { %v7103_v56 = vpop.eup %7102  ;;  %6126 = vst.msk [vmem:[%s12463_s4 + $0x218] sm:$0xff] %vm6058_vm8, %v5201_v44  ;;  %v11459_v34 = vadd.f32 1.0, %v7101_v58  ;;  %v5212_v50 = vand.u32 2147483647, %v11445_v60  ;;  %7112 = vpow2.f32 %v6762_v8  ;;  %v6764_v48 = vmul.f32 -1.442695, %v3586_v36 }
 0x4d1   :  { %v7105_v5 = vpop.eup %7104  ;;  %v3430_v35 = vmul.f32 %v3299_v13, %v2280_v27  ;;  %v5214_v24 = vand.u32 2147483648, %v11445_v60  ;;  %7114 = vrcp.f32 %v11457_v29  ;;  %v11464_v63 = vadd.f32 1.0, %v7103_v56  ;;  %v3588_v43 = vpop.xlane.xlu2 %3587 }
 0x4d2   :  { %v11466_v45 = vmul.f32 -1.442695, %v3590_v42  ;;  %vm5223_vm15 = vweird.f32 %v11438_v6  ;;  %vm5208_vm14 = vweird.f32 %v11445_v60  ;;  %7116 = vrcp.f32 %v11459_v34  ;;  %v11512_v15 = vpop.xlane.xlu1 %3591  ;;  %v3302_v27 = vpop.f32.mrf.mxu3 }
 0x4d3   :  { %v7107_v41 = vpop.eup %7106  ;;  %v11471_v54 = vadd.f32 1.0, %v7105_v5  ;;  %vm11474_vm1 = vcmp.eq.f32.partialorder %v5227_v40, 8.507059e+37  ;;  %v5230_v7 = vor.u32 1.1754944e-38, %v5229_v33  ;;  %v5244_v2 = vand.u32 2147483648, %v11457_v29  ;;  %v3596_v40 = vpop.xlane.xlu0 %3595 }
 0x4d4   :  { %v7109_v26 = vpop.eup %7108  ;;  %v5219_v3 = vmul.f32 %v7107_v41, %v11438_v6  ;;  %vm11480_vm2 = vcmp.eq.f32.partialorder %v5212_v50, 8.507059e+37  ;;  %v5242_v17 = vand.u32 2147483647, %v11457_v29  ;;  %v5274_v14 = vand.u32 2147483648, %v11459_v34 }
 0x4d5   :  { %v7111_v0 = vpop.eup %7110  ;;  %v5204_v12 = vmul.f32 %v7109_v26, %v11445_v60  ;;  %7118 = vpow2.f32 %v6764_v48  ;;  %v5215_v47 = vor.u32 1.1754944e-38, %v5214_v24  ;;  %v5272_v22 = vand.u32 2147483647, %v11459_v34  ;;  %v2283_v24 = vpop.f32.mrf.mxu2 }
 0x4d6   :  { %3677 = vadd.xlane.f32.xlu2 %v3430_v35  ;;  %v5220_v39 = vsub.f32 1.0, %v5219_v3  ;;  %7120 = vrcp.f32 %v11464_v63  ;;  %v7113_v25 = vpop.eup %7112  ;;  %vm5238_vm5 = vweird.f32 %v11457_v29  ;;  %v11490_v18 = vmul.f32 -1.442695, %v3588_v43 }
 0x4d7   :  { %v5205_v11 = vsub.f32 1.0, %v5204_v12  ;;  %7122 = vrcp.f32 %v11471_v54  ;;  %v7115_v16 = vpop.eup %7114  ;;  %vm5224_vm4 = vweird.f32 %v7107_v41  ;;  %v5245_v31 = vor.u32 1.1754944e-38, %v5244_v2 }
 0x4d8   :  { %v5221_v38 = vmul.f32 %v7107_v41, %v5220_v39  ;;  %vm5268_vm3 = vweird.f32 %v11459_v34  ;;  %v7117_v61 = vpop.eup %7116  ;;  %vm5209_vm7 = vweird.f32 %v7109_v26  ;;  %v5234_v37 = vmul.f32 %v7115_v16, %v11457_v29  ;;  %vm5225_vm11 = vmor %vm5223_vm15, %vm5224_vm4 }
 0x4d9   :  { %v5206_v30 = vmul.f32 %v7109_v26, %v5205_v11  ;;  %vm11494_vm6 = vcmp.eq.f32.partialorder %v5242_v17, 8.507059e+37  ;;  %v5275_v21 = vor.u32 1.1754944e-38, %v5274_v14  ;;  %v5264_v10 = vmul.f32 %v7117_v61, %v11459_v34  ;;  %vm5210_vm12 = vmor %vm5208_vm14, %vm5209_vm7  ;;  %v3594_v35 = vpop.xlane.xlu2 %3593 }
 0x4da   :  { %v5222_v1 = vadd.f32 %v7107_v41, %v5221_v38  ;;  %vm11499_vm9 = vcmp.eq.f32.partialorder %v5272_v22, 8.507059e+37  ;;  %v5257_v52 = vand.u32 2147483647, %v11464_v63  ;;  %v5259_v4 = vand.u32 2147483648, %v11464_v63  ;;  %v3598_v14 = vpop.xlane.xlu1 %3597 }
 0x4db   :  { %v7119_v28 = vpop.eup %7118  ;;  %v5207_v51 = vadd.f32 %v7109_v26, %v5206_v30  ;;  %v5235_v23 = vsub.f32 1.0, %v5234_v37  ;;  %vm5253_vm10 = vweird.f32 %v11464_v63  ;;  %v5287_v55 = vand.u32 2147483647, %v11471_v54 }
 0x4dc   :  { %v11510_v32 = vadd.f32 1.0, %v7111_v0  ;;  %v7121_v20 = vpop.eup %7120  ;;  %v5226_v49 = vsel %vm5225_vm11, %v7107_v41, %v5222_v1  ;;  %vm5239_vm13 = vweird.f32 %v7115_v16  ;;  %v5265_v9 = vsub.f32 1.0, %v5264_v10  ;;  %v3305_v1 = vpop.f32.mrf.mxu3 }
 0x4dd   :  { %v11517_v6 = vadd.f32 1.0, %v7113_v25  ;;  %v7123_v19 = vpop.eup %7122  ;;  %v5231_v8 = vsel %vm11474_vm1, %v5230_v7, %v5226_v49  ;;  %v5211_v58 = vsel %vm5210_vm12, %v7109_v26, %v5207_v51  ;;  %v5236_v46 = vmul.f32 %v7115_v16, %v5235_v23  ;;  %vm5240_vm15 = vmor %vm5238_vm5, %vm5239_vm13  ;;  %v3602_v10 = vpop.xlane.xlu0 %3601 }
 0x4de   :  { %v5249_v36 = vmul.f32 %v7121_v20, %v11464_v63  ;;  %6128 = vst.msk [vmem:[%s12463_s4 + $0x228] sm:$0xff] %vm6058_vm8, %v5231_v8  ;;  %v5216_v60 = vsel %vm11480_vm2, %v5215_v47, %v5211_v58  ;;  %v5266_v13 = vmul.f32 %v7117_v61, %v5265_v9  ;;  %vm5269_vm0 = vweird.f32 %v7117_v61  ;;  %v2286_v23 = vpop.f32.mrf.mxu2 }
 0x4df   :  { %v5279_v56 = vmul.f32 %v7123_v19, %v11471_v54  ;;  %6127 = vst.msk [vmem:[%s12463_s4 + $0x220] sm:$0xff] %vm6058_vm8, %v5216_v60  ;;  %v5237_v44 = vadd.f32 %v7115_v16, %v5236_v46  ;;  %v5289_v5 = vand.u32 2147483648, %v11471_v54  ;;  %7124 = vrcp.f32 %v11510_v32  ;;  %vm5270_vm1 = vmor %vm5268_vm3, %vm5269_vm0 }
 0x4e0   :  { %v5250_v42 = vsub.f32 1.0, %v5249_v36  ;;  %v5267_v33 = vadd.f32 %v7117_v61, %v5266_v13  ;;  %vm5254_vm14 = vweird.f32 %v7121_v20  ;;  %v11538_v48 = vadd.f32 1.0, %v7119_v28 }
 0x4e1   :  { %v5280_v50 = vsub.f32 1.0, %v5279_v56  ;;  %v5241_v41 = vsel %vm5240_vm15, %v7115_v16, %v5237_v44  ;;  %vm5284_vm2 = vweird.f32 %v7123_v19  ;;  %7126 = vrcp.f32 %v11517_v6  ;;  %vm5255_vm4 = vmor %vm5253_vm10, %vm5254_vm14  ;;  %v3600_v51 = vpop.xlane.xlu2 %3599 }
 0x4e2   :  { %v5251_v26 = vmul.f32 %v7121_v20, %v5250_v42  ;;  %v5246_v29 = vsel %vm11494_vm6, %v5245_v31, %v5241_v41  ;;  %v5271_v3 = vsel %vm5270_vm1, %v7117_v61, %v5267_v33  ;;  %v5317_v7 = vand.u32 2147483647, %v11510_v32  ;;  %v3604_v56 = vpop.xlane.xlu1 %3603 }
 0x4e3   :  { %v5281_v57 = vmul.f32 %v7123_v19, %v5280_v50  ;;  %6129 = vst.msk [vmem:[%s12463_s4 + $0x230] sm:$0xff] %vm6058_vm8, %v5246_v29  ;;  %v5276_v34 = vsel %vm11499_vm9, %v5275_v21, %v5271_v3  ;;  %vm5283_vm5 = vweird.f32 %v11471_v54  ;;  %v5319_v43 = vand.u32 2147483648, %v11510_v32 }
 0x4e4   :  { %v5252_v2 = vadd.f32 %v7121_v20, %v5251_v26  ;;  %6131 = vst.msk [vmem:[%s12463_s4 + $0x240] sm:$0xff] %vm6058_vm8, %v5276_v34  ;;  %vm5258_vm3 = vcmp.eq.f32.partialorder %v5257_v52, 8.507059e+37  ;;  %v5260_v0 = vor.u32 1.1754944e-38, %v5259_v4  ;;  %7128 = vrcp.f32 %v11538_v48  ;;  %vm5285_vm7 = vmor %vm5283_vm5, %vm5284_vm2 }
 0x4e5   :  { %v5282_v12 = vadd.f32 %v7123_v19, %v5281_v57  ;;  %v7125_v53 = vpop.eup %7124  ;;  %vm5288_vm6 = vcmp.eq.f32.partialorder %v5287_v55, 8.507059e+37  ;;  %v5290_v54 = vor.u32 1.1754944e-38, %v5289_v5  ;;  %vm5313_vm9 = vweird.f32 %v11510_v32  ;;  %v3608_v29 = vpop.xlane.xlu0 %3607 }
 0x4e6   :  { %v5256_v17 = vsel %vm5255_vm4, %v7121_v20, %v5252_v2  ;;  %v5309_v22 = vmul.f32 %v7125_v53, %v11510_v32  ;;  %vm11566_vm11 = vcmp.eq.f32.partialorder %v5317_v7, 8.507059e+37  ;;  %v5320_v16 = vor.u32 1.1754944e-38, %v5319_v43 }
 0x4e7   :  { %v5261_v39 = vsel %vm5258_vm3, %v5260_v0, %v5256_v17  ;;  %v5286_v47 = vsel %vm5285_vm7, %v7123_v19, %v5282_v12  ;;  %v7127_v25 = vpop.eup %7126  ;;  %vm5298_vm10 = vweird.f32 %v11517_v6  ;;  %v5302_v38 = vand.u32 2147483647, %v11517_v6 }
 0x4e8   :  { %6130 = vst.msk [vmem:[%s12463_s4 + $0x238] sm:$0xff] %vm6058_vm8, %v5261_v39  ;;  %v5291_v11 = vsel %vm5288_vm6, %v5290_v54, %v5286_v47  ;;  %v5310_v31 = vsub.f32 1.0, %v5309_v22  ;;  %vm5314_vm12 = vweird.f32 %v7125_v53  ;;  %v5294_v61 = vmul.f32 %v7127_v25, %v11517_v6 }
 0x4e9   :  { %6132 = vst.msk [vmem:[%s12463_s4 + $0x248] sm:$0xff] %vm6058_vm8, %v5291_v11  ;;  %v5304_v30 = vand.u32 2147483648, %v11517_v6  ;;  %vm5328_vm13 = vweird.f32 %v11538_v48  ;;  %7130 = vpow2.f32 %v11466_v45  ;;  %v6767_v37 = vmul.f32 -1.442695, %v11512_v15  ;;  %vm5315_vm15 = vmor %vm5313_vm9, %vm5314_vm12  ;;  %v3606_v7 = vpop.xlane.xlu2 %3605 }
 0x4ea   :  { %v3431_v62 = vmul.f32 %v3302_v27, %v2283_v24  ;;  %v6769_v21 = vmul.f32 -1.442695, %v3596_v40  ;;  %v7129_v59 = vpop.eup %7128  ;;  %v5311_v52 = vmul.f32 %v7125_v53, %v5310_v31  ;;  %v5295_v4 = vsub.f32 1.0, %v5294_v61 }
 0x4eb   :  { %7132 = vpow2.f32 %v11490_v18  ;;  %v6768_v28 = vmul.f32 -1.442695, %v3594_v35  ;;  %vm5299_vm0 = vweird.f32 %v7127_v25  ;;  %v5324_v55 = vmul.f32 %v7129_v59, %v11538_v48 }
 0x4ec   :  { %7134 = vpow2.f32 %v6767_v37  ;;  %3679 = vadd.xlane.f32.xlu0 %v3431_v62  ;;  %v6770_v45 = vmul.f32 -1.442695, %v3598_v14  ;;  %v5312_v20 = vadd.f32 %v7125_v53, %v5311_v52  ;;  %v5296_v15 = vmul.f32 %v7127_v25, %v5295_v4  ;;  %vm5300_vm14 = vmor %vm5298_vm10, %vm5299_vm0 }
 0x4ed   :  { %7136 = vpow2.f32 %v6769_v21  ;;  %v3432_v49 = vmul.f32 %v3305_v1, %v2286_v23  ;;  %v5325_v9 = vsub.f32 1.0, %v5324_v55  ;;  %v5332_v18 = vand.u32 2147483647, %v11538_v48 }
 0x4ee   :  { %v5334_v19 = vand.u32 2147483648, %v11538_v48  ;;  %v6772_v8 = vmul.f32 -1.442695, %v3602_v10  ;;  %v5316_v58 = vsel %vm5315_vm15, %v7125_v53, %v5312_v20  ;;  %v5297_v46 = vadd.f32 %v7127_v25, %v5296_v15 }
 0x4ef   :  { %v5305_v36 = vor.u32 1.1754944e-38, %v5304_v30  ;;  %7138 = vpow2.f32 %v6768_v28  ;;  %3681 = vadd.xlane.f32.xlu1 %v3432_v49  ;;  %v7131_v60 = vpop.eup %7130  ;;  %v5321_v13 = vsel %vm11566_vm11, %v5320_v16, %v5316_v58  ;;  %v5326_v32 = vmul.f32 %v7129_v59, %v5325_v9 }
 0x4f0   :  { %vm5329_vm1 = vweird.f32 %v7129_v59  ;;  %7140 = vpow2.f32 %v6770_v45  ;;  %6134 = vst.msk [vmem:[%s12463_s4 + $0x258] sm:$0xff] %vm6058_vm8, %v5321_v13  ;;  %v5301_v42 = vsel %vm5300_vm14, %v7127_v25, %v5297_v46  ;;  %vm5303_vm2 = vcmp.eq.f32.partialorder %v5302_v38, 8.507059e+37 }
 0x4f1   :  { %v7133_v44 = vpop.eup %7132  ;;  %v11601_v5 = vadd.f32 1.0, %v7131_v60  ;;  %v6771_v27 = vmul.f32 -1.442695, %v3600_v51  ;;  %v5306_v33 = vsel %vm5303_vm2, %v5305_v36, %v5301_v42  ;;  %v5327_v50 = vadd.f32 %v7129_v59, %v5326_v32  ;;  %vm5330_vm5 = vmor %vm5328_vm13, %vm5329_vm1 }
 0x4f2   :  { %v7135_v40 = vpop.eup %7134  ;;  %v11603_v6 = vadd.f32 1.0, %v7133_v44  ;;  %7142 = vpow2.f32 %v6772_v8  ;;  %6133 = vst.msk [vmem:[%s12463_s4 + $0x250] sm:$0xff] %vm6058_vm8, %v5306_v33  ;;  %v5335_v24 = vor.u32 1.1754944e-38, %v5334_v19  ;;  %v6773_v41 = vmul.f32 -1.442695, %v3604_v56 }
 0x4f3   :  { %v7137_v35 = vpop.eup %7136  ;;  %7144 = vrcp.f32 %v11601_v5  ;;  %v5331_v26 = vsel %vm5330_vm5, %v7129_v59, %v5327_v50  ;;  %vm5333_vm4 = vcmp.eq.f32.partialorder %v5332_v18, 8.507059e+37  ;;  %v5362_v48 = vand.u32 2147483647, %v11601_v5 }
 0x4f4   :  { %7146 = vrcp.f32 %v11603_v6  ;;  %v5336_v57 = vsel %vm5333_vm4, %v5335_v24, %v5331_v26  ;;  %v5364_v2 = vand.u32 2147483648, %v11601_v5  ;;  %v11620_v43 = vadd.f32 1.0, %v7135_v40 }
 0x4f5   :  { %v7139_v3 = vpop.eup %7138  ;;  %7148 = vpow2.f32 %v6771_v27  ;;  %6135 = vst.msk [vmem:[%s12463_s4 + $0x260] sm:$0xff] %vm6058_vm8, %v5336_v57  ;;  %v11622_v0 = vadd.f32 1.0, %v7137_v35  ;;  %v5347_v12 = vand.u32 2147483647, %v11603_v6  ;;  %v5349_v53 = vand.u32 2147483648, %v11603_v6 }
 0x4f6   :  { %v7141_v34 = vpop.eup %7140  ;;  %7150 = vpow2.f32 %v6773_v41  ;;  %v6775_v17 = vmul.f32 -1.442695, %v3608_v29  ;;  %v11627_v14 = vadd.f32 1.0, %v7139_v3  ;;  %v11629_v39 = vmul.f32 -1.442695, %v3606_v7 }
 0x4f7   :  { %7152 = vrcp.f32 %v11620_v43  ;;  %vm5358_vm3 = vweird.f32 %v11601_v5  ;;  %vm5343_vm7 = vweird.f32 %v11603_v6  ;;  %v11634_v22 = vadd.f32 1.0, %v7141_v34 }
 0x4f8   :  { %v7143_v54 = vpop.eup %7142  ;;  %7154 = vrcp.f32 %v11622_v0  ;;  %vm11637_vm6 = vcmp.eq.f32.partialorder %v5362_v48, 8.507059e+37  ;;  %v5365_v16 = vor.u32 1.1754944e-38, %v5364_v2  ;;  %v5379_v38 = vand.u32 2147483648, %v11620_v43  ;;  %v3610_v48 = vpop.xlane.xlu1 %3609 }
 0x4f9   :  { %v7145_v47 = vpop.eup %7144  ;;  %vm11645_vm9 = vcmp.eq.f32.partialorder %v5347_v12, 8.507059e+37  ;;  %v5350_v37 = vor.u32 1.1754944e-38, %v5349_v53  ;;  %v5377_v62 = vand.u32 2147483647, %v11620_v43  ;;  %7156 = vpow2.f32 %v6775_v17 }
 0x4fa   :  { %v7147_v63 = vpop.eup %7146  ;;  %v5354_v25 = vmul.f32 %v7145_v47, %v11601_v5  ;;  %v5407_v1 = vand.u32 2147483647, %v11622_v0  ;;  %v5409_v10 = vand.u32 2147483648, %v11622_v0  ;;  %7158 = vrcp.f32 %v11627_v14 }
 0x4fb   :  { %v11642_v31 = vpop.eup %7148  ;;  %v5339_v61 = vmul.f32 %v7147_v63, %v11603_v6  ;;  %vm5373_vm11 = vweird.f32 %v11620_v43  ;;  %7160 = vrcp.f32 %v11634_v22  ;;  %v11655_v4 = vadd.f32 1.0, %v7143_v54  ;;  %v3614_v54 = vpop.xlane.xlu0 %3613 }
 0x4fc   :  { %v5355_v21 = vsub.f32 1.0, %v5354_v25  ;;  %v7151_v59 = vpop.eup %7150  ;;  %vm5359_vm10 = vweird.f32 %v7145_v47  ;;  %v5380_v23 = vor.u32 1.1754944e-38, %v5379_v38  ;;  %vm5403_vm12 = vweird.f32 %v11622_v0 }
 0x4fd   :  { %v5340_v52 = vsub.f32 1.0, %v5339_v61  ;;  %v7153_v28 = vpop.eup %7152  ;;  %vm5344_vm13 = vweird.f32 %v7147_v63  ;;  %vm11659_vm0 = vcmp.eq.f32.partialorder %v5377_v62, 8.507059e+37  ;;  %v5392_v49 = vand.u32 2147483647, %v11627_v14  ;;  %vm5360_vm14 = vmor %vm5358_vm3, %vm5359_vm10 }
 0x4fe   :  { %v5356_v51 = vmul.f32 %v7145_v47, %v5355_v21  ;;  %v7155_v55 = vpop.eup %7154  ;;  %v5369_v20 = vmul.f32 %v7153_v28, %v11620_v43  ;;  %vm11665_vm15 = vcmp.eq.f32.partialorder %v5407_v1, 8.507059e+37  ;;  %v5410_v8 = vor.u32 1.1754944e-38, %v5409_v10  ;;  %vm5345_vm2 = vmor %vm5343_vm7, %vm5344_vm13 }
 0x4ff   :  { %v5341_v45 = vmul.f32 %v7147_v63, %v5340_v52  ;;  %v5399_v18 = vmul.f32 %v7155_v55, %v11622_v0  ;;  %v7157_v58 = vpop.eup %7156  ;;  %vm5388_vm1 = vweird.f32 %v11627_v14  ;;  %v5394_v60 = vand.u32 2147483648, %v11627_v14 }
 0x500   :  { %v5357_v9 = vadd.f32 %v7145_v47, %v5356_v51  ;;  %v5370_v36 = vsub.f32 1.0, %v5369_v20  ;;  %7162 = vrcp.f32 %v11655_v4  ;;  %v7159_v13 = vpop.eup %7158  ;;  %vm5374_vm5 = vweird.f32 %v7153_v28 }
 0x501   :  { %v5342_v46 = vadd.f32 %v7147_v63, %v5341_v45  ;;  %v5400_v56 = vsub.f32 1.0, %v5399_v18  ;;  %vm5418_vm4 = vweird.f32 %v11634_v22  ;;  %v5422_v44 = vand.u32 2147483647, %v11634_v22  ;;  %v7161_v42 = vpop.eup %7160 }
 0x502   :  { %v5361_v32 = vsel %vm5360_vm14, %v7145_v47, %v5357_v9  ;;  %v5371_v40 = vmul.f32 %v7153_v28, %v5370_v36  ;;  %v5384_v33 = vmul.f32 %v7159_v13, %v11627_v14  ;;  %vm11682_vm3 = vcmp.eq.f32.partialorder %v5392_v49, 8.507059e+37  ;;  %v3612_v49 = vpop.xlane.xlu2 %3611  ;;  %v3616_v9 = vpop.xlane.xlu1 %3615 }
 0x503   :  { %v5366_v5 = vsel %vm11637_vm6, %v5365_v16, %v5361_v32  ;;  %v5346_v27 = vsel %vm5345_vm2, %v7147_v63, %v5342_v46  ;;  %v5401_v35 = vmul.f32 %v7155_v55, %v5400_v56  ;;  %vm5404_vm7 = vweird.f32 %v7155_v55  ;;  %vm5375_vm6 = vmor %vm5373_vm11, %vm5374_vm5 }
 0x504   :  { %6137 = vst.msk [vmem:[%s12463_s4 + $0x270] sm:$0xff] %vm6058_vm8, %v5366_v5  ;;  %v5351_v6 = vsel %vm11645_vm9, %v5350_v37, %v5346_v27  ;;  %v5414_v24 = vmul.f32 %v7161_v42, %v11634_v22  ;;  %v5372_v41 = vadd.f32 %v7153_v28, %v5371_v40  ;;  %v5385_v26 = vsub.f32 1.0, %v5384_v33  ;;  %vm5405_vm10 = vmor %vm5403_vm12, %vm5404_vm7 }
 0x505   :  { %6136 = vst.msk [vmem:[%s12463_s4 + $0x268] sm:$0xff] %vm6058_vm8, %v5351_v6  ;;  %v5395_v29 = vor.u32 1.1754944e-38, %v5394_v60  ;;  %v5424_v3 = vand.u32 2147483648, %v11634_v22  ;;  %v5402_v57 = vadd.f32 %v7155_v55, %v5401_v35  ;;  %vm5389_vm9 = vweird.f32 %v7159_v13 }
 0x506   :  { %v5415_v7 = vsub.f32 1.0, %v5414_v24  ;;  %v11702_v34 = vadd.f32 1.0, %v11642_v31  ;;  %v7163_v2 = vpop.eup %7162  ;;  %v5376_v12 = vsel %vm5375_vm6, %v7153_v28, %v5372_v41  ;;  %v5386_v53 = vmul.f32 %v7159_v13, %v5385_v26  ;;  %vm5390_vm12 = vmor %vm5388_vm1, %vm5389_vm9 }
 0x507   :  { %vm5419_vm13 = vweird.f32 %v7161_v42  ;;  %v11707_v17 = vadd.f32 1.0, %v7151_v59  ;;  %v5381_v43 = vsel %vm11659_vm0, %v5380_v23, %v5376_v12  ;;  %v5406_v47 = vsel %vm5405_vm10, %v7155_v55, %v5402_v57 }
 0x508   :  { %v5416_v63 = vmul.f32 %v7161_v42, %v5415_v7  ;;  %v5444_v25 = vmul.f32 %v7163_v2, %v11655_v4  ;;  %6138 = vst.msk [vmem:[%s12463_s4 + $0x278] sm:$0xff] %vm6058_vm8, %v5381_v43  ;;  %v5411_v0 = vsel %vm11665_vm15, %v5410_v8, %v5406_v47  ;;  %v5387_v11 = vadd.f32 %v7159_v13, %v5386_v53  ;;  %vm5420_vm0 = vmor %vm5418_vm4, %vm5419_vm13 }
 0x509   :  { %vm11718_vm11 = vcmp.eq.f32.partialorder %v5422_v44, 8.507059e+37  ;;  %v5425_v38 = vor.u32 1.1754944e-38, %v5424_v3  ;;  %6140 = vst.msk [vmem:[%s12463_s4 + $0x288] sm:$0xff] %vm6058_vm8, %v5411_v0  ;;  %7164 = vrcp.f32 %v11702_v34  ;;  %v11730_v30 = vadd.f32 1.0, %v7157_v58  ;;  %v3620_v58 = vpop.xlane.xlu0 %3619 }
 0x50a   :  { %v5417_v31 = vadd.f32 %v7161_v42, %v5416_v63  ;;  %v5445_v61 = vsub.f32 1.0, %v5444_v25  ;;  %v5391_v37 = vsel %vm5390_vm12, %v7159_v13, %v5387_v11  ;;  %v5452_v62 = vand.u32 2147483647, %v11655_v4  ;;  %v3618_v47 = vpop.xlane.xlu2 %3617  ;;  %v3622_v11 = vpop.xlane.xlu1 %3621 }
 0x50b   :  { %v5454_v21 = vand.u32 2147483648, %v11655_v4  ;;  %7166 = vrcp.f32 %v11707_v17  ;;  %v5396_v14 = vsel %vm11682_vm3, %v5395_v29, %v5391_v37  ;;  %vm5449_vm15 = vweird.f32 %v7163_v2 }
 0x50c   :  { %v5421_v1 = vsel %vm5420_vm0, %v7161_v42, %v5417_v31  ;;  %v5446_v10 = vmul.f32 %v7163_v2, %v5445_v61  ;;  %6139 = vst.msk [vmem:[%s12463_s4 + $0x280] sm:$0xff] %vm6058_vm8, %v5396_v14  ;;  %v5437_v59 = vand.u32 2147483647, %v11702_v34  ;;  %vm5448_vm14 = vweird.f32 %v11655_v4 }
 0x50d   :  { %v5426_v22 = vsel %vm11718_vm11, %v5425_v38, %v5421_v1  ;;  %v5439_v28 = vand.u32 2147483648, %v11702_v34  ;;  %7168 = vrcp.f32 %v11730_v30  ;;  %vm5450_vm1 = vmor %vm5448_vm14, %vm5449_vm15  ;;  %vm5453_vm2 = vcmp.eq.f32.partialorder %v5452_v62, 8.507059e+37 }
 0x50e   :  { %6141 = vst.msk [vmem:[%s12463_s4 + $0x290] sm:$0xff] %vm6058_vm8, %v5426_v22  ;;  %v5447_v52 = vadd.f32 %v7163_v2, %v5446_v10  ;;  %v5455_v51 = vor.u32 1.1754944e-38, %v5454_v21  ;;  %vm5433_vm5 = vweird.f32 %v11702_v34  ;;  %7170 = vpow2.f32 %v11629_v39 }
 0x50f   :  { %v7165_v23 = vpop.eup %7164  ;;  %v5467_v45 = vand.u32 2147483647, %v11707_v17  ;;  %v6776_v20 = vmul.f32 -1.442695, %v3610_v48  ;;  %v6778_v15 = vmul.f32 -1.442695, %v3614_v54  ;;  %vm5463_vm3 = vweird.f32 %v11707_v17 }
 0x510   :  { %v5451_v55 = vsel %vm5450_vm1, %v7163_v2, %v5447_v52  ;;  %v5429_v19 = vmul.f32 %v7165_v23, %v11702_v34  ;;  %vm11758_vm4 = vcmp.eq.f32.partialorder %v5437_v59, 8.507059e+37  ;;  %v5440_v39 = vor.u32 1.1754944e-38, %v5439_v28 }
 0x511   :  { %v7167_v4 = vpop.eup %7166  ;;  %v5456_v18 = vsel %vm5453_vm2, %v5455_v51, %v5451_v55  ;;  %v5469_v36 = vand.u32 2147483648, %v11707_v17  ;;  %7172 = vpow2.f32 %v6776_v20  ;;  %v6777_v13 = vmul.f32 -1.442695, %v3612_v49  ;;  %v3626_v16 = vpop.xlane.xlu0 %3625 }
 0x512   :  { %6143 = vst.msk [vmem:[%s12463_s4 + $0x2a0] sm:$0xff] %vm6058_vm8, %v5456_v18  ;;  %v5459_v46 = vmul.f32 %v7167_v4, %v11707_v17  ;;  %v5430_v60 = vsub.f32 1.0, %v5429_v19  ;;  %7174 = vpow2.f32 %v6778_v15  ;;  %v6779_v32 = vmul.f32 -1.442695, %v3616_v9 }
 0x513   :  { %v7169_v56 = vpop.eup %7168  ;;  %vm11769_vm7 = vcmp.eq.f32.partialorder %v5467_v45, 8.507059e+37  ;;  %vm5493_vm6 = vweird.f32 %v11730_v30  ;;  %v6781_v5 = vmul.f32 -1.442695, %v3620_v58  ;;  %vm5434_vm9 = vweird.f32 %v7165_v23 }
 0x514   :  { %v5460_v44 = vsub.f32 1.0, %v5459_v46  ;;  %v7171_v27 = vpop.eup %7170  ;;  %v5431_v40 = vmul.f32 %v7165_v23, %v5430_v60  ;;  %v5489_v33 = vmul.f32 %v7169_v56, %v11730_v30  ;;  %7176 = vpow2.f32 %v6777_v13  ;;  %vm5435_vm13 = vmor %vm5433_vm5, %vm5434_vm9 }
 0x515   :  { %vm5464_vm10 = vweird.f32 %v7167_v4  ;;  %v11775_v6 = vadd.f32 1.0, %v7171_v27  ;;  %7178 = vpow2.f32 %v6779_v32  ;;  %v5497_v41 = vand.u32 2147483647, %v11730_v30 }
 0x516   :  { %v5461_v50 = vmul.f32 %v7167_v4, %v5460_v44  ;;  %v5432_v35 = vadd.f32 %v7165_v23, %v5431_v40  ;;  %v5490_v24 = vsub.f32 1.0, %v5489_v33  ;;  %7180 = vpow2.f32 %v6781_v5  ;;  %vm5465_vm11 = vmor %vm5463_vm3, %vm5464_vm10 }
 0x517   :  { %v7173_v26 = vpop.eup %7172  ;;  %v5470_v3 = vor.u32 1.1754944e-38, %v5469_v36  ;;  %v5499_v57 = vand.u32 2147483648, %v11730_v30  ;;  %7182 = vrcp.f32 %v11775_v6  ;;  %vm5494_vm12 = vweird.f32 %v7169_v56 }
 0x518   :  { %v5462_v29 = vadd.f32 %v7167_v4, %v5461_v50  ;;  %v7175_v7 = vpop.eup %7174  ;;  %v5436_v48 = vsel %vm5435_vm13, %v7165_v23, %v5432_v35  ;;  %v5491_v2 = vmul.f32 %v7169_v56, %v5490_v24  ;;  %v11785_v12 = vadd.f32 1.0, %v7173_v26  ;;  %vm5495_vm0 = vmor %vm5493_vm6, %vm5494_vm12 }
 0x519   :  { %v5441_v34 = vsel %vm11758_vm4, %v5440_v39, %v5436_v48  ;;  %v5482_v54 = vand.u32 2147483647, %v11775_v6  ;;  %v11790_v43 = vadd.f32 1.0, %v7175_v7  ;;  %v5484_v0 = vand.u32 2147483648, %v11775_v6  ;;  %v3628_v7 = vpop.xlane.xlu1 %3627 }
 0x51a   :  { %v5466_v53 = vsel %vm5465_vm11, %v7167_v4, %v5462_v29  ;;  %v7177_v63 = vpop.eup %7176  ;;  %6142 = vst.msk [vmem:[%s12463_s4 + $0x298] sm:$0xff] %vm6058_vm8, %v5441_v34  ;;  %v5492_v25 = vadd.f32 %v7169_v56, %v5491_v2  ;;  %7184 = vrcp.f32 %v11785_v12  ;;  %v5500_v31 = vor.u32 1.1754944e-38, %v5499_v57 }
 0x51b   :  { %v5471_v17 = vsel %vm11769_vm7, %v5470_v3, %v5466_v53  ;;  %v7179_v38 = vpop.eup %7178  ;;  %7186 = vrcp.f32 %v11790_v43  ;;  %vm5498_vm15 = vcmp.eq.f32.partialorder %v5497_v41, 8.507059e+37  ;;  %v6780_v62 = vmul.f32 -1.442695, %v3618_v47 }
 0x51c   :  { %6144 = vst.msk [vmem:[%s12463_s4 + $0x2a8] sm:$0xff] %vm6058_vm8, %v5471_v17  ;;  %v7181_v61 = vpop.eup %7180  ;;  %v5496_v37 = vsel %vm5495_vm0, %v7169_v56, %v5492_v25  ;;  %v11808_v1 = vadd.f32 1.0, %v7177_v63  ;;  %v6782_v10 = vmul.f32 -1.442695, %v3622_v11  ;;  %v11810_v22 = vmul.f32 -1.442695, %v3626_v16  ;;  %v3624_v56 = vpop.xlane.xlu2 %3623 }
 0x51d   :  { %v7183_v21 = vpop.eup %7182  ;;  %v5501_v14 = vsel %vm5498_vm15, %v5500_v31, %v5496_v37  ;;  %vm5478_vm14 = vweird.f32 %v11775_v6  ;;  %vm11818_vm1 = vcmp.eq.f32.partialorder %v5482_v54, 8.507059e+37  ;;  %v5485_v52 = vor.u32 1.1754944e-38, %v5484_v0 }
 0x51e   :  { %6146 = vst.msk [vmem:[%s12463_s4 + $0x2b8] sm:$0xff] %vm6058_vm8, %v5501_v14  ;;  %v5474_v30 = vmul.f32 %v7183_v21, %v11775_v6  ;;  %vm5508_vm2 = vweird.f32 %v11785_v12  ;;  %v5512_v28 = vand.u32 2147483647, %v11785_v12  ;;  %v5514_v51 = vand.u32 2147483648, %v11785_v12 }
 0x51f   :  { %v5542_v23 = vand.u32 2147483647, %v11790_v43  ;;  %7188 = vrcp.f32 %v11808_v1  ;;  %v11827_v20 = vadd.f32 1.0, %v7179_v38  ;;  %v11829_v15 = vadd.f32 1.0, %v7181_v61  ;;  %v3632_v61 = vpop.xlane.xlu0 %3631 }
 0x520   :  { %v7185_v55 = vpop.eup %7184  ;;  %v5475_v45 = vsub.f32 1.0, %v5474_v30  ;;  %7190 = vpow2.f32 %v6780_v62  ;;  %vm5479_vm5 = vweird.f32 %v7183_v21  ;;  %vm5538_vm4 = vweird.f32 %v11790_v43 }
 0x521   :  { %v7187_v49 = vpop.eup %7186  ;;  %v5504_v9 = vmul.f32 %v7185_v55, %v11785_v12  ;;  %v5544_v4 = vand.u32 2147483648, %v11790_v43  ;;  %v5527_v8 = vand.u32 2147483647, %v11808_v1  ;;  %7192 = vrcp.f32 %v11827_v20  ;;  %vm5480_vm6 = vmor %vm5478_vm14, %vm5479_vm5 }
 0x522   :  { %v5476_v18 = vmul.f32 %v7183_v21, %v5475_v45  ;;  %v5534_v19 = vmul.f32 %v7187_v49, %v11790_v43  ;;  %vm11837_vm3 = vcmp.eq.f32.partialorder %v5512_v28, 8.507059e+37  ;;  %v5515_v46 = vor.u32 1.1754944e-38, %v5514_v51 }
 0x523   :  { %v5505_v58 = vsub.f32 1.0, %v5504_v9  ;;  %v5529_v36 = vand.u32 2147483648, %v11808_v1  ;;  %vm11842_vm7 = vcmp.eq.f32.partialorder %v5542_v23, 8.507059e+37  ;;  %7194 = vrcp.f32 %v11829_v15 }
 0x524   :  { %v5477_v60 = vadd.f32 %v7183_v21, %v5476_v18  ;;  %v5535_v13 = vsub.f32 1.0, %v5534_v19  ;;  %vm5509_vm9 = vweird.f32 %v7185_v55  ;;  %v5545_v5 = vor.u32 1.1754944e-38, %v5544_v4 }
 0x525   :  { %v7189_v44 = vpop.eup %7188  ;;  %v5506_v42 = vmul.f32 %v7185_v55, %v5505_v58  ;;  %vm5523_vm10 = vweird.f32 %v11808_v1  ;;  %vm5539_vm13 = vweird.f32 %v7187_v49  ;;  %vm11852_vm11 = vcmp.eq.f32.partialorder %v5527_v8, 8.507059e+37  ;;  %vm5510_vm0 = vmor %vm5508_vm2, %vm5509_vm9 }
 0x526   :  { %v7191_v27 = vpop.eup %7190  ;;  %v5481_v40 = vsel %vm5480_vm6, %v7183_v21, %v5477_v60  ;;  %v5536_v33 = vmul.f32 %v7187_v49, %v5535_v13  ;;  %v5519_v50 = vmul.f32 %v7189_v44, %v11808_v1  ;;  %v5530_v41 = vor.u32 1.1754944e-38, %v5529_v36  ;;  %vm5540_vm15 = vmor %vm5538_vm4, %vm5539_vm13 }
 0x527   :  { %v5486_v24 = vsel %vm11818_vm1, %v5485_v52, %v5481_v40  ;;  %v5507_v6 = vadd.f32 %v7185_v55, %v5506_v42  ;;  %vm5553_vm12 = vweird.f32 %v11827_v20  ;;  %v7193_v26 = vpop.eup %7192  ;;  %v11866_v57 = vadd.f32 1.0, %v7191_v27  ;;  %v3638_v40 = vpop.xlane.xlu0 %3637 }
 0x528   :  { %6145 = vst.msk [vmem:[%s12463_s4 + $0x2b0] sm:$0xff] %vm6058_vm8, %v5486_v24  ;;  %v5537_v29 = vadd.f32 %v7187_v49, %v5536_v33  ;;  %v5520_v3 = vsub.f32 1.0, %v5519_v50  ;;  %7196 = vpow2.f32 %v6782_v10  ;;  %vm5524_vm14 = vweird.f32 %v7189_v44  ;;  %v3630_v10 = vpop.xlane.xlu2 %3629 }
 0x529   :  { %v5511_v48 = vsel %vm5510_vm0, %v7185_v55, %v5507_v6  ;;  %v5549_v2 = vmul.f32 %v7193_v26, %v11827_v20  ;;  %v5557_v34 = vand.u32 2147483647, %v11827_v20  ;;  %v7195_v53 = vpop.eup %7194  ;;  %7198 = vrcp.f32 %v11866_v57  ;;  %vm5525_vm5 = vmor %vm5523_vm10, %vm5524_vm14 }
 0x52a   :  { %v5516_v12 = vsel %vm11837_vm3, %v5515_v46, %v5511_v48  ;;  %v5541_v54 = vsel %vm5540_vm15, %v7187_v49, %v5537_v29  ;;  %v5521_v47 = vmul.f32 %v7189_v44, %v5520_v3  ;;  %v5559_v17 = vand.u32 2147483648, %v11827_v20  ;;  %v3634_v20 = vpop.xlane.xlu1 %3633 }
 0x52b   :  { %6147 = vst.msk [vmem:[%s12463_s4 + $0x2c0] sm:$0xff] %vm6058_vm8, %v5516_v12  ;;  %v5546_v43 = vsel %vm11842_vm7, %v5545_v5, %v5541_v54  ;;  %v5550_v63 = vsub.f32 1.0, %v5549_v2  ;;  %v5579_v25 = vmul.f32 %v7195_v53, %v11829_v15  ;;  %vm5554_vm1 = vweird.f32 %v7193_v26 }
 0x52c   :  { %6149 = vst.msk [vmem:[%s12463_s4 + $0x2d0] sm:$0xff] %vm6058_vm8, %v5546_v43  ;;  %v5522_v0 = vadd.f32 %v7189_v44, %v5521_v47  ;;  %vm5583_vm2 = vweird.f32 %v11829_v15  ;;  %v5587_v11 = vand.u32 2147483647, %v11829_v15  ;;  %7200 = vpow2.f32 %v11810_v22  ;;  %vm5555_vm3 = vmor %vm5553_vm12, %vm5554_vm1 }
 0x52d   :  { %v5551_v16 = vmul.f32 %v7193_v26, %v5550_v63  ;;  %v5580_v38 = vsub.f32 1.0, %v5579_v25  ;;  %v6783_v31 = vmul.f32 -1.442695, %v3624_v56  ;;  %vm5584_vm4 = vweird.f32 %v7195_v53 }
 0x52e   :  { %v7197_v37 = vpop.eup %7196  ;;  %v5526_v62 = vsel %vm5525_vm5, %v7189_v44, %v5522_v0  ;;  %v5589_v21 = vand.u32 2147483648, %v11829_v15  ;;  %v6785_v14 = vmul.f32 -1.442695, %v3628_v7  ;;  %vm5558_vm7 = vcmp.eq.f32.partialorder %v5557_v34, 8.507059e+37  ;;  %vm5585_vm6 = vmor %vm5583_vm2, %vm5584_vm4 }
 0x52f   :  { %v5531_v30 = vsel %vm11852_vm11, %v5530_v41, %v5526_v62  ;;  %v5552_v59 = vadd.f32 %v7193_v26, %v5551_v16  ;;  %v5581_v52 = vmul.f32 %v7195_v53, %v5580_v38  ;;  %v11897_v1 = vadd.f32 1.0, %v7197_v37  ;;  %v7199_v28 = vpop.eup %7198 }
 0x530   :  { %6148 = vst.msk [vmem:[%s12463_s4 + $0x2c8] sm:$0xff] %vm6058_vm8, %v5531_v30  ;;  %v5560_v22 = vor.u32 1.1754944e-38, %v5559_v17  ;;  %7202 = vpow2.f32 %v6783_v31  ;;  %v6787_v51 = vmul.f32 -1.442695, %v3632_v61  ;;  %v5564_v45 = vmul.f32 %v7199_v28, %v11866_v57  ;;  %v3636_v6 = vpop.xlane.xlu2 %3635 }
 0x531   :  { %v5556_v23 = vsel %vm5555_vm3, %v7193_v26, %v5552_v59  ;;  %v5582_v55 = vadd.f32 %v7195_v53, %v5581_v52  ;;  %v6786_v49 = vmul.f32 -1.442695, %v3630_v10  ;;  %vm5588_vm9 = vcmp.eq.f32.partialorder %v5587_v11, 8.507059e+37 }
 0x532   :  { %v5561_v9 = vsel %vm5558_vm7, %v5560_v22, %v5556_v23  ;;  %v5590_v4 = vor.u32 1.1754944e-38, %v5589_v21  ;;  %7204 = vrcp.f32 %v11897_v1  ;;  %v7201_v18 = vpop.eup %7200  ;;  %v5565_v8 = vsub.f32 1.0, %v5564_v45  ;;  %v3640_v43 = vpop.xlane.xlu1 %3639 }
 0x533   :  { %6150 = vst.msk [vmem:[%s12463_s4 + $0x2d8] sm:$0xff] %vm6058_vm8, %v5561_v9  ;;  %v5586_v19 = vsel %vm5585_vm6, %v7195_v53, %v5582_v55  ;;  %v5572_v58 = vand.u32 2147483647, %v11866_v57  ;;  %7206 = vpow2.f32 %v6785_v14  ;;  %v5574_v15 = vand.u32 2147483648, %v11866_v57 }
 0x534   :  { %v5591_v39 = vsel %vm5588_vm9, %v5590_v4, %v5586_v19  ;;  %v11917_v46 = vadd.f32 1.0, %v7201_v18  ;;  %7208 = vpow2.f32 %v6787_v51  ;;  %v5566_v36 = vmul.f32 %v7199_v28, %v5565_v8 }
 0x535   :  { %6152 = vst.msk [vmem:[%s12463_s4 + $0x2e8] sm:$0xff] %vm6058_vm8, %v5591_v39  ;;  %vm5569_vm10 = vweird.f32 %v7199_v28  ;;  %7210 = vpow2.f32 %v6786_v49  ;;  %v5602_v13 = vand.u32 2147483647, %v11897_v1  ;;  %v6788_v32 = vmul.f32 -1.442695, %v3634_v20  ;;  %v3644_v20 = vpop.xlane.xlu0 %3643 }
 0x536   :  { %v7203_v60 = vpop.eup %7202  ;;  %7212 = vrcp.f32 %v11917_v46  ;;  %v5567_v56 = vadd.f32 %v7199_v28, %v5566_v36  ;;  %vm5568_vm13 = vweird.f32 %v11866_v57  ;;  %vm5573_vm12 = vcmp.eq.f32.partialorder %v5572_v58, 8.507059e+37 }
 0x537   :  { %v11926_v44 = vadd.f32 1.0, %v7203_v60  ;;  %vm5570_vm11 = vmor %vm5568_vm13, %vm5569_vm10  ;;  %v5575_v5 = vor.u32 1.1754944e-38, %v5574_v15  ;;  %vm5598_vm0 = vweird.f32 %v11897_v1  ;;  %v5604_v27 = vand.u32 2147483648, %v11897_v1 }
 0x538   :  { %v7205_v42 = vpop.eup %7204  ;;  %v5571_v50 = vsel %vm5570_vm11, %v7199_v28, %v5567_v56  ;;  %v5632_v24 = vand.u32 2147483647, %v11917_v46  ;;  %vm11933_vm15 = vcmp.eq.f32.partialorder %v5602_v13, 8.507059e+37  ;;  %v5634_v3 = vand.u32 2147483648, %v11917_v46 }
 0x539   :  { %v7207_v33 = vpop.eup %7206  ;;  %v5594_v35 = vmul.f32 %v7205_v42, %v11897_v1  ;;  %7214 = vrcp.f32 %v11926_v44  ;;  %v5576_v26 = vsel %vm5573_vm12, %v5575_v5, %v5571_v50  ;;  %v6790_v34 = vmul.f32 -1.442695, %v3638_v40 }
 0x53a   :  { %v7209_v41 = vpop.eup %7208  ;;  %7216 = vpow2.f32 %v6788_v32  ;;  %6151 = vst.msk [vmem:[%s12463_s4 + $0x2e0] sm:$0xff] %vm6058_vm8, %v5576_v26  ;;  %v11942_v48 = vadd.f32 1.0, %v7207_v33  ;;  %v5605_v12 = vor.u32 1.1754944e-38, %v5604_v27  ;;  %vm5628_vm14 = vweird.f32 %v11917_v46 }
 0x53b   :  { %v7211_v57 = vpop.eup %7210  ;;  %v5595_v7 = vsub.f32 1.0, %v5594_v35  ;;  %v11944_v2 = vadd.f32 1.0, %v7209_v41  ;;  %v5617_v54 = vand.u32 2147483647, %v11926_v44  ;;  %v6789_v47 = vmul.f32 -1.442695, %v3636_v6  ;;  %v3642_v35 = vpop.xlane.xlu2 %3641 }
 0x53c   :  { %v7213_v53 = vpop.eup %7212  ;;  %vm5599_vm1 = vweird.f32 %v7205_v42  ;;  %vm11949_vm2 = vcmp.eq.f32.partialorder %v5632_v24, 8.507059e+37  ;;  %7218 = vrcp.f32 %v11942_v48  ;;  %v5635_v0 = vor.u32 1.1754944e-38, %v5634_v3 }
 0x53d   :  { %v5596_v63 = vmul.f32 %v7205_v42, %v5595_v7  ;;  %v5624_v17 = vmul.f32 %v7213_v53, %v11917_v46  ;;  %v5619_v11 = vand.u32 2147483648, %v11926_v44  ;;  %7220 = vrcp.f32 %v11944_v2  ;;  %vm5600_vm5 = vmor %vm5598_vm0, %vm5599_vm1  ;;  %v3650_v25 = vpop.xlane.xlu0 %3649 }
 0x53e   :  { %v11956_v16 = vadd.f32 1.0, %v7211_v57  ;;  %7222 = vpow2.f32 %v6790_v34  ;;  %v11958_v37 = vmul.f32 -1.442695, %v3640_v43  ;;  %vm5613_vm4 = vweird.f32 %v11926_v44 }
 0x53f   :  { %v7215_v38 = vpop.eup %7214  ;;  %v5597_v31 = vadd.f32 %v7205_v42, %v5596_v63  ;;  %v5625_v61 = vsub.f32 1.0, %v5624_v17  ;;  %vm11964_vm3 = vcmp.eq.f32.partialorder %v5617_v54, 8.507059e+37  ;;  %7224 = vpow2.f32 %v6789_v47 }
 0x540   :  { %v7217_v62 = vpop.eup %7216  ;;  %v5609_v21 = vmul.f32 %v7215_v38, %v11926_v44  ;;  %vm5629_vm7 = vweird.f32 %v7213_v53  ;;  %v5647_v59 = vand.u32 2147483647, %v11942_v48  ;;  %v5620_v1 = vor.u32 1.1754944e-38, %v5619_v11 }
 0x541   :  { %v5601_v10 = vsel %vm5600_vm5, %v7205_v42, %v5597_v31  ;;  %v5626_v30 = vmul.f32 %v7213_v53, %v5625_v61  ;;  %7226 = vrcp.f32 %v11956_v16  ;;  %vm5643_vm6 = vweird.f32 %v11942_v48  ;;  %vm5630_vm9 = vmor %vm5628_vm14, %vm5629_vm7 }
 0x542   :  { %v5606_v52 = vsel %vm11933_vm15, %v5605_v12, %v5601_v10  ;;  %v5610_v28 = vsub.f32 1.0, %v5609_v21  ;;  %v7219_v22 = vpop.eup %7218  ;;  %v5649_v23 = vand.u32 2147483648, %v11942_v48  ;;  %v5677_v55 = vand.u32 2147483647, %v11944_v2  ;;  %v3646_v12 = vpop.xlane.xlu1 %3645 }
 0x543   :  { %6153 = vst.msk [vmem:[%s12463_s4 + $0x2f0] sm:$0xff] %vm6058_vm8, %v5606_v52  ;;  %v5627_v51 = vadd.f32 %v7213_v53, %v5626_v30  ;;  %v7221_v45 = vpop.eup %7220  ;;  %vm5614_vm10 = vweird.f32 %v7215_v38  ;;  %v5639_v9 = vmul.f32 %v7219_v22, %v11942_v48  ;;  %v11982_v4 = vadd.f32 1.0, %v7217_v62 }
 0x544   :  { %v5611_v49 = vmul.f32 %v7215_v38, %v5610_v28  ;;  %v7223_v18 = vpop.eup %7222  ;;  %vm11984_vm13 = vcmp.eq.f32.partialorder %v5647_v59, 8.507059e+37  ;;  %v5669_v58 = vmul.f32 %v7221_v45, %v11944_v2  ;;  %vm5673_vm11 = vweird.f32 %v11944_v2  ;;  %vm5615_vm12 = vmor %vm5613_vm4, %vm5614_vm10 }
 0x545   :  { %v5631_v19 = vsel %vm5630_vm9, %v7213_v53, %v5627_v51  ;;  %v7225_v39 = vpop.eup %7224  ;;  %v5640_v36 = vsub.f32 1.0, %v5639_v9  ;;  %v5679_v60 = vand.u32 2147483648, %v11944_v2  ;;  %v5650_v13 = vor.u32 1.1754944e-38, %v5649_v23  ;;  %v3648_v51 = vpop.xlane.xlu2 %3647 }
 0x546   :  { %v5636_v15 = vsel %vm11949_vm2, %v5635_v0, %v5631_v19  ;;  %v5612_v46 = vadd.f32 %v7215_v38, %v5611_v49  ;;  %v5670_v32 = vsub.f32 1.0, %v5669_v58  ;;  %vm12000_vm0 = vcmp.eq.f32.partialorder %v5677_v55, 8.507059e+37 }
 0x547   :  { %6155 = vst.msk [vmem:[%s12463_s4 + $0x300] sm:$0xff] %vm6058_vm8, %v5636_v15  ;;  %7228 = vrcp.f32 %v11982_v4  ;;  %v7227_v42 = vpop.eup %7226  ;;  %v5641_v27 = vmul.f32 %v7219_v22, %v5640_v36  ;;  %vm5644_vm15 = vweird.f32 %v7219_v22  ;;  %v12005_v40 = vadd.f32 1.0, %v7223_v18 }
 0x548   :  { %v5616_v5 = vsel %vm5615_vm12, %v7215_v38, %v5612_v46  ;;  %v5671_v50 = vmul.f32 %v7221_v45, %v5670_v32  ;;  %vm5674_vm14 = vweird.f32 %v7221_v45  ;;  %v5654_v44 = vmul.f32 %v7227_v42, %v11956_v16  ;;  %vm5645_vm1 = vmor %vm5643_vm6, %vm5644_vm15  ;;  %v3656_v32 = vpop.xlane.xlu0 %3655 }
 0x549   :  { %v5621_v33 = vsel %vm11964_vm3, %v5620_v1, %v5616_v5  ;;  %v5642_v24 = vadd.f32 %v7219_v22, %v5641_v27  ;;  %v5680_v6 = vor.u32 1.1754944e-38, %v5679_v60  ;;  %v5662_v41 = vand.u32 2147483647, %v11956_v16  ;;  %vm5675_vm2 = vmor %vm5673_vm11, %vm5674_vm14 }
 0x54a   :  { %6154 = vst.msk [vmem:[%s12463_s4 + $0x2f8] sm:$0xff] %vm6058_vm8, %v5621_v33  ;;  %7230 = vrcp.f32 %v12005_v40  ;;  %v5672_v26 = vadd.f32 %v7221_v45, %v5671_v50  ;;  %v5655_v29 = vsub.f32 1.0, %v5654_v44  ;;  %v5664_v3 = vand.u32 2147483648, %v11956_v16 }
 0x54b   :  { %v5692_v57 = vand.u32 2147483647, %v11982_v4  ;;  %v5646_v7 = vsel %vm5645_vm1, %v7219_v22, %v5642_v24  ;;  %v5694_v34 = vand.u32 2147483648, %v11982_v4  ;;  %v12023_v53 = vadd.f32 1.0, %v7225_v39  ;;  %v3652_v39 = vpop.xlane.xlu1 %3651 }
 0x54c   :  { %7232 = vpow2.f32 %v11958_v37  ;;  %v5651_v48 = vsel %vm11984_vm13, %v5650_v13, %v5646_v7  ;;  %v5676_v47 = vsel %vm5675_vm2, %v7221_v45, %v5672_v26  ;;  %v5656_v43 = vmul.f32 %v7227_v42, %v5655_v29 }
 0x54d   :  { %v7229_v54 = vpop.eup %7228  ;;  %vm5659_vm5 = vweird.f32 %v7227_v42  ;;  %6156 = vst.msk [vmem:[%s12463_s4 + $0x308] sm:$0xff] %vm6058_vm8, %v5651_v48  ;;  %v5681_v2 = vsel %vm12000_vm0, %v5680_v6, %v5676_v47  ;;  %vm5658_vm4 = vweird.f32 %v11956_v16  ;;  %vm12035_vm3 = vcmp.eq.f32.partialorder %v5662_v41, 8.507059e+37 }
 0x54e   :  { %v5684_v17 = vmul.f32 %v7229_v54, %v11982_v4  ;;  %6158 = vst.msk [vmem:[%s12463_s4 + $0x318] sm:$0xff] %vm6058_vm8, %v5681_v2  ;;  %v5657_v0 = vadd.f32 %v7227_v42, %v5656_v43  ;;  %v5665_v11 = vor.u32 1.1754944e-38, %v5664_v3  ;;  %vm5688_vm7 = vweird.f32 %v11982_v4  ;;  %vm5660_vm6 = vmor %vm5658_vm4, %vm5659_vm5  ;;  %v3654_v43 = vpop.xlane.xlu2 %3653 }
 0x54f   :  { %7234 = vrcp.f32 %v12023_v53  ;;  %vm12046_vm9 = vcmp.eq.f32.partialorder %v5692_v57, 8.507059e+37  ;;  %v6793_v61 = vmul.f32 -1.442695, %v3644_v20  ;;  %v6792_v37 = vmul.f32 -1.442695, %v3642_v35 }
 0x550   :  { %v7231_v38 = vpop.eup %7230  ;;  %v5685_v16 = vsub.f32 1.0, %v5684_v17  ;;  %v5661_v62 = vsel %vm5660_vm6, %v7227_v42, %v5657_v0  ;;  %v5695_v21 = vor.u32 1.1754944e-38, %v5694_v34  ;;  %v5722_v10 = vand.u32 2147483647, %v12005_v40  ;;  %v12148_v20 = vpop.xlane.xlu0 %3661 }
 0x551   :  { %v5714_v14 = vmul.f32 %v7231_v38, %v12005_v40  ;;  %v5666_v59 = vsel %vm12035_vm3, %v5665_v11, %v5661_v62  ;;  %vm5689_vm10 = vweird.f32 %v7229_v54  ;;  %7236 = vpow2.f32 %v6793_v61 }
 0x552   :  { %v7233_v30 = vpop.eup %7232  ;;  %v5686_v52 = vmul.f32 %v7229_v54, %v5685_v16  ;;  %6157 = vst.msk [vmem:[%s12463_s4 + $0x310] sm:$0xff] %vm6058_vm8, %v5666_v59  ;;  %7238 = vpow2.f32 %v6792_v37  ;;  %v6794_v22 = vmul.f32 -1.442695, %v3646_v12  ;;  %vm5718_vm13 = vweird.f32 %v12005_v40  ;;  %vm5690_vm11 = vmor %vm5688_vm7, %vm5689_vm10 }
 0x553   :  { %v5715_v28 = vsub.f32 1.0, %v5714_v14  ;;  %v12058_v1 = vadd.f32 1.0, %v7233_v30  ;;  %v5724_v55 = vand.u32 2147483648, %v12005_v40  ;;  %v6796_v45 = vmul.f32 -1.442695, %v3650_v25  ;;  %v12130_v14 = vpop.xlane.xlu1 %3657 }
 0x554   :  { %v5687_v23 = vadd.f32 %v7229_v54, %v5686_v52  ;;  %vm5719_vm12 = vweird.f32 %v7231_v38  ;;  %vm12064_vm0 = vcmp.eq.f32.partialorder %v5722_v10, 8.507059e+37  ;;  %v5707_v8 = vand.u32 2147483647, %v12023_v53 }
 0x555   :  { %v7235_v49 = vpop.eup %7234  ;;  %v5716_v9 = vmul.f32 %v7231_v38, %v5715_v28  ;;  %7240 = vrcp.f32 %v12058_v1  ;;  %v6795_v58 = vmul.f32 -1.442695, %v3648_v51  ;;  %v5709_v46 = vand.u32 2147483648, %v12023_v53  ;;  %vm5720_vm15 = vmor %vm5718_vm13, %vm5719_vm12 }
 0x556   :  { %v5691_v18 = vsel %vm5690_vm11, %v7229_v54, %v5687_v23  ;;  %v5699_v19 = vmul.f32 %v7235_v49, %v12023_v53  ;;  %7242 = vpow2.f32 %v6794_v22  ;;  %v5725_v60 = vor.u32 1.1754944e-38, %v5724_v55 }
 0x557   :  { %v5696_v15 = vsel %vm12046_vm9, %v5695_v21, %v5691_v18  ;;  %v5717_v4 = vadd.f32 %v7231_v38, %v5716_v9  ;;  %v7237_v36 = vpop.eup %7236  ;;  %vm5703_vm14 = vweird.f32 %v12023_v53  ;;  %7244 = vpow2.f32 %v6796_v45 }
 0x558   :  { %6159 = vst.msk [vmem:[%s12463_s4 + $0x320] sm:$0xff] %vm6058_vm8, %v5696_v15  ;;  %v5700_v13 = vsub.f32 1.0, %v5699_v19  ;;  %v7239_v56 = vpop.eup %7238  ;;  %vm5704_vm1 = vweird.f32 %v7235_v49  ;;  %v12081_v5 = vadd.f32 1.0, %v7237_v36  ;;  %v6797_v27 = vmul.f32 -1.442695, %v3652_v39 }
 0x559   :  { %v5721_v42 = vsel %vm5720_vm15, %v7231_v38, %v5717_v4  ;;  %v12085_v44 = vadd.f32 1.0, %v7239_v56  ;;  %7246 = vpow2.f32 %v6795_v58  ;;  %vm12091_vm2 = vcmp.eq.f32.partialorder %v5707_v8, 8.507059e+37  ;;  %vm5705_vm4 = vmor %vm5703_vm14, %vm5704_vm1 }
 0x55a   :  { %v5726_v33 = vsel %vm12064_vm0, %v5725_v60, %v5721_v42  ;;  %v5701_v50 = vmul.f32 %v7235_v49, %v5700_v13  ;;  %v5710_v24 = vor.u32 1.1754944e-38, %v5709_v46  ;;  %7248 = vrcp.f32 %v12081_v5 }
 0x55b   :  { %v7241_v40 = vpop.eup %7240  ;;  %6161 = vst.msk [vmem:[%s12463_s4 + $0x330] sm:$0xff] %vm6058_vm8, %v5726_v33  ;;  %v6799_v6 = vmul.f32 -1.442695, %v3656_v32  ;;  %vm5733_vm5 = vweird.f32 %v12058_v1  ;;  %7250 = vrcp.f32 %v12085_v44  ;;  %v5737_v3 = vand.u32 2147483647, %v12058_v1 }
 0x55c   :  { %v5702_v41 = vadd.f32 %v7235_v49, %v5701_v50  ;;  %v5729_v26 = vmul.f32 %v7241_v40, %v12058_v1  ;;  %v7243_v29 = vpop.eup %7242  ;;  %v5739_v57 = vand.u32 2147483648, %v12058_v1  ;;  %v5767_v7 = vand.u32 2147483647, %v12081_v5 }
 0x55d   :  { %7252 = vpow2.f32 %v6797_v27  ;;  %v7245_v34 = vpop.eup %7244  ;;  %v5769_v48 = vand.u32 2147483648, %v12081_v5  ;;  %v12106_v47 = vadd.f32 1.0, %v7243_v29  ;;  %v5752_v53 = vand.u32 2147483647, %v12085_v44  ;;  %v3664_v29 = vpop.xlane.xlu1 %3663 }
 0x55e   :  { %v5706_v12 = vsel %vm5705_vm4, %v7235_v49, %v5702_v41  ;;  %v5730_v54 = vsub.f32 1.0, %v5729_v26  ;;  %v12111_v63 = vadd.f32 1.0, %v7245_v34  ;;  %7254 = vpow2.f32 %v6799_v6 }
 0x55f   :  { %v5711_v2 = vsel %vm12091_vm2, %v5710_v24, %v5706_v12  ;;  %v7247_v17 = vpop.eup %7246  ;;  %vm5734_vm3 = vweird.f32 %v7241_v40  ;;  %v5754_v0 = vand.u32 2147483648, %v12085_v44  ;;  %7256 = vrcp.f32 %v12106_v47  ;;  %v3660_v24 = vpop.xlane.xlu2 %3659 }
 0x560   :  { %6160 = vst.msk [vmem:[%s12463_s4 + $0x328] sm:$0xff] %vm6058_vm8, %v5711_v2  ;;  %v5731_v25 = vmul.f32 %v7241_v40, %v5730_v54  ;;  %v7249_v11 = vpop.eup %7248  ;;  %vm12119_vm7 = vcmp.eq.f32.partialorder %v5737_v3, 8.507059e+37  ;;  %v5740_v16 = vor.u32 1.1754944e-38, %v5739_v57  ;;  %7258 = vrcp.f32 %v12111_v63  ;;  %vm5735_vm10 = vmor %vm5733_vm5, %vm5734_vm3 }
 0x561   :  { %v6798_v31 = vmul.f32 -1.442695, %v3654_v43  ;;  %v7251_v61 = vpop.eup %7250  ;;  %v5759_v62 = vmul.f32 %v7249_v11, %v12081_v5  ;;  %vm5763_vm6 = vweird.f32 %v12081_v5  ;;  %vm12126_vm9 = vcmp.eq.f32.partialorder %v5767_v7, 8.507059e+37 }
 0x562   :  { %v5732_v37 = vadd.f32 %v7241_v40, %v5731_v25  ;;  %v5770_v30 = vor.u32 1.1754944e-38, %v5769_v48  ;;  %v5744_v59 = vmul.f32 %v7251_v61, %v12085_v44  ;;  %vm5748_vm13 = vweird.f32 %v12085_v44 }
 0x563   :  { %v7253_v10 = vpop.eup %7252  ;;  %vm12137_vm11 = vcmp.eq.f32.partialorder %v5752_v53, 8.507059e+37  ;;  %v5760_v22 = vsub.f32 1.0, %v5759_v62  ;;  %v5755_v51 = vor.u32 1.1754944e-38, %v5754_v0  ;;  %v5782_v23 = vand.u32 2147483647, %v12106_v47 }
 0x564   :  { %v5736_v28 = vsel %vm5735_vm10, %v7241_v40, %v5732_v37  ;;  %v7255_v55 = vpop.eup %7254  ;;  %v5745_v1 = vsub.f32 1.0, %v5744_v59  ;;  %vm5778_vm12 = vweird.f32 %v12106_v47  ;;  %v5784_v49 = vand.u32 2147483648, %v12106_v47 }
 0x565   :  { %v5741_v45 = vsel %vm12119_vm7, %v5740_v16, %v5736_v28  ;;  %v12146_v9 = vadd.f32 1.0, %v7247_v17  ;;  %v7257_v18 = vpop.eup %7256  ;;  %v5761_v19 = vmul.f32 %v7249_v11, %v5760_v22  ;;  %vm5764_vm0 = vweird.f32 %v7249_v11  ;;  %v3668_v17 = vpop.xlane.xlu0 %3667 }
 0x566   :  { %6162 = vst.msk [vmem:[%s12463_s4 + $0x338] sm:$0xff] %vm6058_vm8, %v5741_v45  ;;  %vm5808_vm15 = vweird.f32 %v12111_v63  ;;  %v12155_v8 = vadd.f32 1.0, %v7253_v10  ;;  %7260 = vpow2.f32 %v6798_v31  ;;  %v7259_v58 = vpop.eup %7258  ;;  %v5746_v39 = vmul.f32 %v7251_v61, %v5745_v1  ;;  %vm5765_vm2 = vmor %vm5763_vm6, %vm5764_vm0 }
 0x567   :  { %vm5749_vm14 = vweird.f32 %v7251_v61  ;;  %v5774_v15 = vmul.f32 %v7257_v18, %v12106_v47  ;;  %7262 = vrcp.f32 %v12146_v9  ;;  %v5762_v4 = vadd.f32 %v7249_v11, %v5761_v19  ;;  %v3666_v1 = vpop.xlane.xlu2 %3665  ;;  %v3670_v19 = vpop.xlane.xlu1 %3669 }
 0x568   :  { %vm12159_vm1 = vcmp.eq.f32.partialorder %v5782_v23, 8.507059e+37  ;;  %v5804_v36 = vmul.f32 %v7259_v58, %v12111_v63  ;;  %v5812_v60 = vand.u32 2147483647, %v12111_v63  ;;  %v5747_v13 = vadd.f32 %v7251_v61, %v5746_v39  ;;  %vm5750_vm5 = vmor %vm5748_vm13, %vm5749_vm14 }
 0x569   :  { %v5775_v32 = vsub.f32 1.0, %v5774_v15  ;;  %v5814_v56 = vand.u32 2147483648, %v12111_v63  ;;  %v12168_v42 = vadd.f32 1.0, %v7255_v55  ;;  %v5766_v27 = vsel %vm5765_vm2, %v7249_v11, %v5762_v4 }
 0x56a   :  { %vm5779_vm4 = vweird.f32 %v7257_v18  ;;  %v5805_v33 = vsub.f32 1.0, %v5804_v36  ;;  %7264 = vrcp.f32 %v12155_v8  ;;  %v5771_v50 = vsel %vm12126_vm9, %v5770_v30, %v5766_v27 }
 0x56b   :  { %v5751_v40 = vsel %vm5750_vm5, %v7251_v61, %v5747_v13  ;;  %v5776_v5 = vmul.f32 %v7257_v18, %v5775_v32  ;;  %v5797_v35 = vand.u32 2147483647, %v12146_v9  ;;  %6164 = vst.msk [vmem:[%s12463_s4 + $0x348] sm:$0xff] %vm6058_vm8, %v5771_v50  ;;  %v5785_v41 = vor.u32 1.1754944e-38, %v5784_v49  ;;  %vm5780_vm6 = vmor %vm5778_vm12, %vm5779_vm4 }
 0x56c   :  { %v7261_v6 = vpop.eup %7260  ;;  %v5756_v44 = vsel %vm12137_vm11, %v5755_v51, %v5751_v40  ;;  %v5806_v26 = vmul.f32 %v7259_v58, %v5805_v33  ;;  %vm5809_vm3 = vweird.f32 %v7259_v58  ;;  %vm12186_vm7 = vcmp.eq.f32.partialorder %v5812_v60, 8.507059e+37 }
 0x56d   :  { %v7263_v3 = vpop.eup %7262  ;;  %6163 = vst.msk [vmem:[%s12463_s4 + $0x340] sm:$0xff] %vm6058_vm8, %v5756_v44  ;;  %v5777_v57 = vadd.f32 %v7257_v18, %v5776_v5  ;;  %v5799_v34 = vand.u32 2147483648, %v12146_v9  ;;  %7266 = vrcp.f32 %v12168_v42  ;;  %v5815_v54 = vor.u32 1.1754944e-38, %v5814_v56  ;;  %vm5810_vm10 = vmor %vm5808_vm15, %vm5809_vm3  ;;  %v3674_v32 = vpop.xlane.xlu0 %3673 }
 0x56e   :  { %v5807_v12 = vadd.f32 %v7259_v58, %v5806_v26  ;;  %v5789_v48 = vmul.f32 %v7263_v3, %v12146_v9  ;;  %vm5793_vm9 = vweird.f32 %v12146_v9  ;;  %vm12199_vm13 = vcmp.eq.f32.partialorder %v5797_v35, 8.507059e+37 }
 0x56f   :  { %v5781_v43 = vsel %vm5780_vm6, %v7257_v18, %v5777_v57  ;;  %vm5823_vm11 = vweird.f32 %v12155_v8  ;;  %v5827_v53 = vand.u32 2147483647, %v12155_v8  ;;  %v5829_v47 = vand.u32 2147483648, %v12155_v8 }
 0x570   :  { %v7265_v25 = vpop.eup %7264  ;;  %v5786_v0 = vsel %vm12159_vm1, %v5785_v41, %v5781_v43  ;;  %v5811_v11 = vsel %vm5810_vm10, %v7259_v58, %v5807_v12  ;;  %v5790_v38 = vsub.f32 1.0, %v5789_v48  ;;  %v12208_v16 = vadd.f32 1.0, %v7261_v6  ;;  %v3672_v43 = vpop.xlane.xlu2 %3671 }
 0x571   :  { %6165 = vst.msk [vmem:[%s12463_s4 + $0x350] sm:$0xff] %vm6058_vm8, %v5786_v0  ;;  %v5816_v63 = vsel %vm12186_vm7, %v5815_v54, %v5811_v11  ;;  %v5800_v31 = vor.u32 1.1754944e-38, %v5799_v34  ;;  %v5819_v61 = vmul.f32 %v7265_v25, %v12155_v8  ;;  %v5857_v37 = vand.u32 2147483647, %v12168_v42 }
 0x572   :  { %6167 = vst.msk [vmem:[%s12463_s4 + $0x360] sm:$0xff] %vm6058_vm8, %v5816_v63  ;;  %v5791_v62 = vmul.f32 %v7263_v3, %v5790_v38  ;;  %vm5794_vm12 = vweird.f32 %v7263_v3  ;;  %vm5853_vm0 = vweird.f32 %v12168_v42  ;;  %7268 = vrcp.f32 %v12208_v16 }
 0x573   :  { %v7267_v21 = vpop.eup %7266  ;;  %v5820_v10 = vsub.f32 1.0, %v5819_v61  ;;  %vm12224_vm15 = vcmp.eq.f32.partialorder %v5827_v53, 8.507059e+37  ;;  %v5830_v59 = vor.u32 1.1754944e-38, %v5829_v47  ;;  %v6800_v52 = vmul.f32 -1.442695, %v12130_v14  ;;  %vm5795_vm14 = vmor %vm5793_vm9, %vm5794_vm12 }
 0x574   :  { %v5792_v28 = vadd.f32 %v7263_v3, %v5791_v62  ;;  %v5849_v22 = vmul.f32 %v7267_v21, %v12168_v42  ;;  %v5859_v51 = vand.u32 2147483648, %v12168_v42  ;;  %v6802_v23 = vmul.f32 -1.442695, %v12148_v20 }
 0x575   :  { %v5821_v55 = vmul.f32 %v7265_v25, %v5820_v10  ;;  %vm5824_vm1 = vweird.f32 %v7265_v25  ;;  %vm12234_vm2 = vcmp.eq.f32.partialorder %v5857_v37, 8.507059e+37  ;;  %7270 = vpow2.f32 %v6800_v52  ;;  %v3680_v0 = vpop.xlane.xlu0 %3679 }
 0x576   :  { %v5796_v49 = vsel %vm5795_vm14, %v7263_v3, %v5792_v28  ;;  %v5850_v14 = vsub.f32 1.0, %v5849_v22  ;;  %7272 = vpow2.f32 %v6802_v23  ;;  %v6801_v18 = vmul.f32 -1.442695, %v3660_v24  ;;  %vm5825_vm5 = vmor %vm5823_vm11, %vm5824_vm1 }
 0x577   :  { %v5801_v58 = vsel %vm12199_vm13, %v5800_v31, %v5796_v49  ;;  %v5822_v20 = vadd.f32 %v7265_v25, %v5821_v55  ;;  %v6803_v39 = vmul.f32 -1.442695, %v3664_v29  ;;  %v6805_v9 = vmul.f32 -1.442695, %v3668_v17 }
 0x578   :  { %v7269_v15 = vpop.eup %7268  ;;  %6166 = vst.msk [vmem:[%s12463_s4 + $0x358] sm:$0xff] %vm6058_vm8, %v5801_v58  ;;  %v5851_v4 = vmul.f32 %v7267_v21, %v5850_v14  ;;  %vm5854_vm4 = vweird.f32 %v7267_v21  ;;  %7274 = vpow2.f32 %v6801_v18  ;;  %v6804_v46 = vmul.f32 -1.442695, %v3666_v1 }
 0x579   :  { %v5826_v36 = vsel %vm5825_vm5, %v7265_v25, %v5822_v20  ;;  %v5834_v60 = vmul.f32 %v7269_v15, %v12208_v16  ;;  %7276 = vpow2.f32 %v6803_v39  ;;  %v6806_v13 = vmul.f32 -1.442695, %v3670_v19  ;;  %vm5855_vm3 = vmor %vm5853_vm0, %vm5854_vm4  ;;  %v3676_v25 = vpop.xlane.xlu1 %3675 }
 0x57a   :  { %v5831_v56 = vsel %vm12224_vm15, %v5830_v59, %v5826_v36  ;;  %v5852_v27 = vadd.f32 %v7267_v21, %v5851_v4  ;;  %v5860_v33 = vor.u32 1.1754944e-38, %v5859_v51  ;;  %7278 = vpow2.f32 %v6805_v9 }
 0x57b   :  { %v7271_v50 = vpop.eup %7270  ;;  %6168 = vst.msk [vmem:[%s12463_s4 + $0x368] sm:$0xff] %vm6058_vm8, %v5831_v56  ;;  %v5835_v8 = vsub.f32 1.0, %v5834_v60  ;;  %vm5839_vm7 = vweird.f32 %v7269_v15  ;;  %v5842_v40 = vand.u32 2147483647, %v12208_v16  ;;  %v5844_v5 = vand.u32 2147483648, %v12208_v16 }
 0x57c   :  { %v7273_v35 = vpop.eup %7272  ;;  %v5856_v24 = vsel %vm5855_vm3, %v7267_v21, %v5852_v27  ;;  %v12258_v6 = vadd.f32 1.0, %v7271_v50  ;;  %7280 = vpow2.f32 %v6804_v46  ;;  %v6808_v44 = vmul.f32 -1.442695, %v3674_v32 }
 0x57d   :  { %v5861_v41 = vsel %vm12234_vm2, %v5860_v33, %v5856_v24  ;;  %v5836_v26 = vmul.f32 %v7269_v15, %v5835_v8  ;;  %v12262_v29 = vadd.f32 1.0, %v7273_v35  ;;  %7282 = vpow2.f32 %v6806_v13 }
 0x57e   :  { %v7275_v42 = vpop.eup %7274  ;;  %6170 = vst.msk [vmem:[%s12463_s4 + $0x378] sm:$0xff] %vm6058_vm8, %v5861_v41  ;;  %7284 = vrcp.f32 %v12258_v6  ;;  %vm5838_vm6 = vweird.f32 %v12208_v16  ;;  %vm12270_vm9 = vcmp.eq.f32.partialorder %v5842_v40, 8.507059e+37  ;;  %v5845_v12 = vor.u32 1.1754944e-38, %v5844_v5 }
 0x57f   :  { %v7277_v3 = vpop.eup %7276  ;;  %v5837_v57 = vadd.f32 %v7269_v15, %v5836_v26  ;;  %7286 = vrcp.f32 %v12262_v29  ;;  %vm5840_vm10 = vmor %vm5838_vm6, %vm5839_vm7  ;;  %v5872_v54 = vand.u32 2147483647, %v12258_v6  ;;  %v12277_v48 = vadd.f32 1.0, %v7275_v42 }
 0x580   :  { %v7279_v34 = vpop.eup %7278  ;;  %7288 = vpow2.f32 %v6808_v44  ;;  %v5874_v53 = vand.u32 2147483648, %v12258_v6  ;;  %v12280_v47 = vadd.f32 1.0, %v7277_v3  ;;  %v5902_v16 = vand.u32 2147483647, %v12262_v29 }
 0x581   :  { %v5841_v2 = vsel %vm5840_vm10, %v7269_v15, %v5837_v57  ;;  %v12282_v17 = vadd.f32 1.0, %v7279_v34  ;;  %v5904_v63 = vand.u32 2147483648, %v12262_v29  ;;  %7290 = vrcp.f32 %v12277_v48 }
 0x582   :  { %v7281_v11 = vpop.eup %7280  ;;  %v5846_v38 = vsel %vm12270_vm9, %v5845_v12, %v5841_v2  ;;  %7292 = vrcp.f32 %v12280_v47  ;;  %v6807_v37 = vmul.f32 -1.442695, %v3672_v43  ;;  %v12295_v62 = vmul.f32 -1.442695, %v3676_v25 }
 0x583   :  { %v7283_v31 = vpop.eup %7282  ;;  %6169 = vst.msk [vmem:[%s12463_s4 + $0x370] sm:$0xff] %vm6058_vm8, %v5846_v38  ;;  %7294 = vrcp.f32 %v12282_v17  ;;  %v12297_v21 = vmul.f32 -1.442695, %v3680_v0  ;;  %vm5868_vm13 = vweird.f32 %v12258_v6  ;;  %vm12301_vm11 = vcmp.eq.f32.partialorder %v5872_v54, 8.507059e+37  ;;  %v3678_v0 = vpop.xlane.xlu2 %3677 }
 0x584   :  { %v7285_v61 = vpop.eup %7284  ;;  %vm5898_vm12 = vweird.f32 %v12262_v29  ;;  %v5875_v28 = vor.u32 1.1754944e-38, %v5874_v53  ;;  %vm12307_vm0 = vcmp.eq.f32.partialorder %v5902_v16, 8.507059e+37  ;;  %v5905_v23 = vor.u32 1.1754944e-38, %v5904_v63  ;;  %v3682_v16 = vpop.xlane.xlu1 %3681 }
 0x585   :  { %v7287_v10 = vpop.eup %7286  ;;  %v5864_v30 = vmul.f32 %v7285_v61, %v12258_v6  ;;  %vm5883_vm15 = vweird.f32 %v12277_v48  ;;  %v5887_v45 = vand.u32 2147483647, %v12277_v48  ;;  %v5889_v1 = vand.u32 2147483648, %v12277_v48 }
 0x586   :  { %v7289_v52 = vpop.eup %7288  ;;  %v5894_v22 = vmul.f32 %v7287_v10, %v12262_v29  ;;  %v5917_v49 = vand.u32 2147483647, %v12280_v47  ;;  %vm5869_vm14 = vweird.f32 %v7285_v61  ;;  %vm5913_vm1 = vweird.f32 %v12280_v47 }
 0x587   :  { %v5865_v55 = vsub.f32 1.0, %v5864_v30  ;;  %v7291_v14 = vpop.eup %7290  ;;  %v5919_v19 = vand.u32 2147483648, %v12280_v47  ;;  %v12317_v58 = vadd.f32 1.0, %v7281_v11  ;;  %vm5899_vm2 = vweird.f32 %v7287_v10  ;;  %vm5870_vm4 = vmor %vm5868_vm13, %vm5869_vm14 }
 0x588   :  { %v5895_v18 = vsub.f32 1.0, %v5894_v22  ;;  %v7293_v20 = vpop.eup %7292  ;;  %v5879_v9 = vmul.f32 %v7291_v14, %v12277_v48  ;;  %vm5943_vm5 = vweird.f32 %v12282_v17  ;;  %v5947_v15 = vand.u32 2147483647, %v12282_v17  ;;  %vm5900_vm3 = vmor %vm5898_vm12, %vm5899_vm2 }
 0x589   :  { %v5866_v39 = vmul.f32 %v7285_v61, %v5865_v55  ;;  %v7295_v4 = vpop.eup %7294  ;;  %v5909_v36 = vmul.f32 %v7293_v20, %v12280_v47  ;;  %v5949_v60 = vand.u32 2147483648, %v12282_v17  ;;  %v12324_v13 = vadd.f32 1.0, %v7283_v31 }
 0x58a   :  { %v5896_v46 = vmul.f32 %v7287_v10, %v5895_v18  ;;  %v5880_v56 = vsub.f32 1.0, %v5879_v9  ;;  %v5939_v27 = vmul.f32 %v7295_v4, %v12282_v17  ;;  %7296 = vpow2.f32 %v6807_v37 }
 0x58b   :  { %v5867_v32 = vadd.f32 %v7285_v61, %v5866_v39  ;;  %v5910_v50 = vsub.f32 1.0, %v5909_v36  ;;  %7298 = vrcp.f32 %v12317_v58  ;;  %v12331_v8 = vadd.f32 1.0, %v7289_v52 }
 0x58c   :  { %v5897_v33 = vadd.f32 %v7287_v10, %v5896_v46  ;;  %v5881_v5 = vmul.f32 %v7291_v14, %v5880_v56  ;;  %vm5884_vm7 = vweird.f32 %v7291_v14  ;;  %v5940_v35 = vsub.f32 1.0, %v5939_v27 }
 0x58d   :  { %v5871_v40 = vsel %vm5870_vm4, %v7285_v61, %v5867_v32  ;;  %v5911_v6 = vmul.f32 %v7293_v20, %v5910_v50  ;;  %vm5914_vm6 = vweird.f32 %v7293_v20  ;;  %vm5944_vm9 = vweird.f32 %v7295_v4  ;;  %vm5885_vm10 = vmor %vm5883_vm15, %vm5884_vm7 }
 0x58e   :  { %v5876_v24 = vsel %vm12301_vm11, %v5875_v28, %v5871_v40  ;;  %v5901_v44 = vsel %vm5900_vm3, %v7287_v10, %v5897_v33  ;;  %v5882_v26 = vadd.f32 %v7291_v14, %v5881_v5  ;;  %v5941_v29 = vmul.f32 %v7295_v4, %v5940_v35  ;;  %vm5915_vm11 = vmor %vm5913_vm1, %vm5914_vm6 }
 0x58f   :  { %6171 = vst.msk [vmem:[%s12463_s4 + $0x380] sm:$0xff] %vm6058_vm8, %v5876_v24  ;;  %v5906_v41 = vsel %vm12307_vm0, %v5905_v23, %v5901_v44  ;;  %vm5888_vm13 = vcmp.eq.f32.partialorder %v5887_v45, 8.507059e+37  ;;  %v5890_v42 = vor.u32 1.1754944e-38, %v5889_v1  ;;  %v5912_v3 = vadd.f32 %v7293_v20, %v5911_v6  ;;  %vm5945_vm0 = vmor %vm5943_vm5, %vm5944_vm9 }
 0x590   :  { %6173 = vst.msk [vmem:[%s12463_s4 + $0x390] sm:$0xff] %vm6058_vm8, %v5906_v41  ;;  %7300 = vrcp.f32 %v12324_v13  ;;  %v7297_v57 = vpop.eup %7296  ;;  %v5886_v7 = vsel %vm5885_vm10, %v7291_v14, %v5882_v26  ;;  %vm5918_vm12 = vcmp.eq.f32.partialorder %v5917_v49, 8.507059e+37  ;;  %v5920_v34 = vor.u32 1.1754944e-38, %v5919_v19 }
 0x591   :  { %v5942_v12 = vadd.f32 %v7295_v4, %v5941_v29  ;;  %v7299_v54 = vpop.eup %7298  ;;  %v5891_v43 = vsel %vm5888_vm13, %v5890_v42, %v5886_v7  ;;  %v5916_v2 = vsel %vm5915_vm11, %v7293_v20, %v5912_v3  ;;  %v5950_v48 = vor.u32 1.1754944e-38, %v5949_v60 }
 0x592   :  { %7302 = vrcp.f32 %v12331_v8  ;;  %6172 = vst.msk [vmem:[%s12463_s4 + $0x388] sm:$0xff] %vm6058_vm8, %v5891_v43  ;;  %v5921_v53 = vsel %vm5918_vm12, %v5920_v34, %v5916_v2  ;;  %vm5948_vm15 = vcmp.eq.f32.partialorder %v5947_v15, 8.507059e+37  ;;  %v5924_v25 = vmul.f32 %v7299_v54, %v12317_v58 }
 0x593   :  { %v5946_v47 = vsel %vm5945_vm0, %v7295_v4, %v5942_v12  ;;  %6174 = vst.msk [vmem:[%s12463_s4 + $0x398] sm:$0xff] %vm6058_vm8, %v5921_v53  ;;  %v5932_v11 = vand.u32 2147483647, %v12317_v58  ;;  %v5934_v38 = vand.u32 2147483648, %v12317_v58  ;;  %v12372_v31 = vadd.f32 1.0, %v7297_v57 }
 0x594   :  { %v5951_v17 = vsel %vm5948_vm15, %v5950_v48, %v5946_v47  ;;  %v5925_v63 = vsub.f32 1.0, %v5924_v25  ;;  %7304 = vpow2.f32 %v12295_v62  ;;  %v6810_v37 = vmul.f32 -1.442695, %v3678_v0 }
 0x595   :  { %6176 = vst.msk [vmem:[%s12463_s4 + $0x3a8] sm:$0xff] %vm6058_vm8, %v5951_v17  ;;  %7306 = vpow2.f32 %v12297_v21  ;;  %vm5929_vm14 = vweird.f32 %v7299_v54  ;;  %v6812_v59 = vmul.f32 -1.442695, %v3682_v16  ;;  %vm5928_vm1 = vweird.f32 %v12317_v58 }
 0x596   :  { %v7301_v61 = vpop.eup %7300  ;;  %v5926_v10 = vmul.f32 %v7299_v54, %v5925_v63  ;;  %vm12378_vm2 = vcmp.eq.f32.partialorder %v5932_v11, 8.507059e+37  ;;  %v5935_v22 = vor.u32 1.1754944e-38, %v5934_v38  ;;  %7308 = vrcp.f32 %v12372_v31  ;;  %vm5930_vm4 = vmor %vm5928_vm1, %vm5929_vm14 }
 0x597   :  { %v5954_v30 = vmul.f32 %v7301_v61, %v12324_v13  ;;  %vm5958_vm5 = vweird.f32 %v12324_v13  ;;  %vm5959_vm3 = vweird.f32 %v7301_v61  ;;  %v5962_v23 = vand.u32 2147483647, %v12324_v13 }
 0x598   :  { %v7303_v52 = vpop.eup %7302  ;;  %v5927_v62 = vadd.f32 %v7299_v54, %v5926_v10  ;;  %v5964_v55 = vand.u32 2147483648, %v12324_v13  ;;  %7310 = vpow2.f32 %v6810_v37  ;;  %v5992_v58 = vand.u32 2147483647, %v12331_v8  ;;  %vm5960_vm6 = vmor %vm5958_vm5, %vm5959_vm3 }
 0x599   :  { %v5955_v51 = vsub.f32 1.0, %v5954_v30  ;;  %v5984_v21 = vmul.f32 %v7303_v52, %v12331_v8  ;;  %7312 = vpow2.f32 %v6812_v59  ;;  %v5994_v20 = vand.u32 2147483648, %v12331_v8 }
 0x59a   :  { %v7305_v45 = vpop.eup %7304  ;;  %v5931_v1 = vsel %vm5930_vm4, %v7299_v54, %v5927_v62  ;;  %vm5989_vm7 = vweird.f32 %v7303_v52  ;;  %v5965_v36 = vor.u32 1.1754944e-38, %v5964_v55  ;;  %vm5988_vm9 = vweird.f32 %v12331_v8 }
 0x59b   :  { %v5956_v49 = vmul.f32 %v7301_v61, %v5955_v51  ;;  %v5985_v14 = vsub.f32 1.0, %v5984_v21  ;;  %v7307_v18 = vpop.eup %7306  ;;  %v5936_v19 = vsel %vm12378_vm2, %v5935_v22, %v5931_v1  ;;  %v12391_v39 = vadd.f32 1.0, %v7305_v45  ;;  %vm5990_vm13 = vmor %vm5988_vm9, %vm5989_vm7 }
 0x59c   :  { %6175 = vst.msk [vmem:[%s12463_s4 + $0x3a0] sm:$0xff] %vm6058_vm8, %v5936_v19  ;;  %v12397_v4 = vadd.f32 1.0, %v7307_v18  ;;  %v7309_v46 = vpop.eup %7308  ;;  %vm5963_vm10 = vcmp.eq.f32.partialorder %v5962_v23, 8.507059e+37  ;;  %v5995_v50 = vor.u32 1.1754944e-38, %v5994_v20  ;;  %vm5993_vm11 = vcmp.eq.f32.partialorder %v5992_v58, 8.507059e+37 }
 0x59d   :  { %v5957_v9 = vadd.f32 %v7301_v61, %v5956_v49  ;;  %v5986_v15 = vmul.f32 %v7303_v52, %v5985_v14  ;;  %7314 = vrcp.f32 %v12391_v39  ;;  %v5969_v56 = vmul.f32 %v7309_v46, %v12372_v31 }
 0x59e   :  { %v7311_v27 = vpop.eup %7310  ;;  %7316 = vrcp.f32 %v12397_v4  ;;  %v5979_v35 = vand.u32 2147483648, %v12372_v31  ;;  %vm5974_vm12 = vweird.f32 %v7309_v46  ;;  %v5977_v41 = vand.u32 2147483647, %v12372_v31 }
 0x59f   :  { %v5961_v60 = vsel %vm5960_vm6, %v7301_v61, %v5957_v9  ;;  %v5987_v32 = vadd.f32 %v7303_v52, %v5986_v15  ;;  %v7313_v40 = vpop.eup %7312  ;;  %v5970_v8 = vsub.f32 1.0, %v5969_v56  ;;  %v12411_v24 = vadd.f32 1.0, %v7311_v27 }
 0x5a0   :  { %v5966_v33 = vsel %vm5963_vm10, %v5965_v36, %v5961_v60  ;;  %v12413_v44 = vadd.f32 1.0, %v7313_v40  ;;  %vm5973_vm0 = vweird.f32 %v12372_v31  ;;  %v5980_v57 = vor.u32 1.1754944e-38, %v5979_v35 }
 0x5a1   :  { %6177 = vst.msk [vmem:[%s12463_s4 + $0x3b0] sm:$0xff] %vm6058_vm8, %v5966_v33  ;;  %v5991_v13 = vsel %vm5990_vm13, %v7303_v52, %v5987_v32  ;;  %v5971_v6 = vmul.f32 %v7309_v46, %v5970_v8  ;;  %7318 = vrcp.f32 %v12411_v24  ;;  %vm5975_vm15 = vmor %vm5973_vm0, %vm5974_vm12  ;;  %vm5978_vm14 = vcmp.eq.f32.partialorder %v5977_v41, 8.507059e+37 }
 0x5a2   :  { %v5996_v5 = vsel %vm5993_vm11, %v5995_v50, %v5991_v13  ;;  %7320 = vrcp.f32 %v12413_v44  ;;  %v6007_v43 = vand.u32 2147483647, %v12391_v39  ;;  %v6009_v2 = vand.u32 2147483648, %v12391_v39 }
 0x5a3   :  { %6179 = vst.msk [vmem:[%s12463_s4 + $0x3c0] sm:$0xff] %vm6058_vm8, %v5996_v5  ;;  %v7315_v26 = vpop.eup %7314  ;;  %v5972_v29 = vadd.f32 %v7309_v46, %v5971_v6  ;;  %v6037_v48 = vand.u32 2147483647, %v12397_v4  ;;  %vm6003_vm2 = vweird.f32 %v12391_v39  ;;  %v6039_v0 = vand.u32 2147483648, %v12397_v4 }
 0x5a4   :  { %v5999_v42 = vmul.f32 %v7315_v26, %v12391_v39  ;;  %v7317_v3 = vpop.eup %7316  ;;  %vm6004_vm1 = vweird.f32 %v7315_v26  ;;  %vm6008_vm3 = vcmp.eq.f32.partialorder %v6007_v43, 8.507059e+37  ;;  %v6010_v63 = vor.u32 1.1754944e-38, %v6009_v2 }
 0x5a5   :  { %v5976_v7 = vsel %vm5975_vm15, %v7309_v46, %v5972_v29  ;;  %v6029_v12 = vmul.f32 %v7317_v3, %v12397_v4  ;;  %vm6034_vm5 = vweird.f32 %v7317_v3  ;;  %vm6005_vm4 = vmor %vm6003_vm2, %vm6004_vm1  ;;  %vm6033_vm7 = vweird.f32 %v12397_v4 }
 0x5a6   :  { %v6000_v34 = vsub.f32 1.0, %v5999_v42  ;;  %v5981_v54 = vsel %vm5978_vm14, %v5980_v57, %v5976_v7  ;;  %vm6038_vm6 = vcmp.eq.f32.partialorder %v6037_v48, 8.507059e+37  ;;  %vm6035_vm9 = vmor %vm6033_vm7, %vm6034_vm5  ;;  %v6040_v59 = vor.u32 1.1754944e-38, %v6039_v0 }
 0x5a7   :  { %6178 = vst.msk [vmem:[%s12463_s4 + $0x3b8] sm:$0xff] %vm6058_vm8, %v5981_v54  ;;  %v6030_v47 = vsub.f32 1.0, %v6029_v12  ;;  %v7319_v25 = vpop.eup %7318  ;;  %v6022_v52 = vand.u32 2147483647, %v12411_v24  ;;  %v6024_v28 = vand.u32 2147483648, %v12411_v24  ;;  %vm6018_vm13 = vweird.f32 %v12411_v24 }
 0x5a8   :  { %v6001_v53 = vmul.f32 %v7315_v26, %v6000_v34  ;;  %v6014_v38 = vmul.f32 %v7319_v25, %v12411_v24  ;;  %v7321_v16 = vpop.eup %7320  ;;  %vm6019_vm10 = vweird.f32 %v7319_v25  ;;  %v6054_v23 = vand.u32 2147483648, %v12413_v44 }
 0x5a9   :  { %v6031_v11 = vmul.f32 %v7317_v3, %v6030_v47  ;;  %v6044_v10 = vmul.f32 %v7321_v16, %v12413_v44  ;;  %vm6049_vm11 = vweird.f32 %v7321_v16  ;;  %v6052_v1 = vand.u32 2147483647, %v12413_v44  ;;  %vm6020_vm12 = vmor %vm6018_vm13, %vm6019_vm10 }
 0x5aa   :  { %v6002_v17 = vadd.f32 %v7315_v26, %v6001_v53  ;;  %v6015_v37 = vsub.f32 1.0, %v6014_v38  ;;  %v6025_v49 = vor.u32 1.1754944e-38, %v6024_v28  ;;  %vm6023_vm0 = vcmp.eq.f32.partialorder %v6022_v52, 8.507059e+37 }
 0x5ab   :  { %v6032_v61 = vadd.f32 %v7317_v3, %v6031_v11  ;;  %v6045_v51 = vsub.f32 1.0, %v6044_v10  ;;  %vm6048_vm15 = vweird.f32 %v12413_v44  ;;  %v6055_v58 = vor.u32 1.1754944e-38, %v6054_v23 }
 0x5ac   :  { %v6006_v31 = vsel %vm6005_vm4, %v7315_v26, %v6002_v17  ;;  %v6016_v62 = vmul.f32 %v7319_v25, %v6015_v37  ;;  %vm6050_vm14 = vmor %vm6048_vm15, %vm6049_vm11  ;;  %vm6053_vm1 = vcmp.eq.f32.partialorder %v6052_v1, 8.507059e+37 }
 0x5ad   :  { %v6011_v30 = vsel %vm6008_vm3, %v6010_v63, %v6006_v31  ;;  %v6036_v22 = vsel %vm6035_vm9, %v7317_v3, %v6032_v61  ;;  %v6046_v45 = vmul.f32 %v7321_v16, %v6045_v51 }
 0x5ae   :  { %6180 = vst.msk [vmem:[%s12463_s4 + $0x3c8] sm:$0xff] %vm6058_vm8, %v6011_v30  ;;  %v6041_v21 = vsel %vm6038_vm6, %v6040_v59, %v6036_v22  ;;  %v6017_v55 = vadd.f32 %v7319_v25, %v6016_v62 }
 0x5af   :  { %6182 = vst.msk [vmem:[%s12463_s4 + $0x3d8] sm:$0xff] %vm6058_vm8, %v6041_v21  ;;  %v6047_v18 = vadd.f32 %v7321_v16, %v6046_v45 }
 0x5b0   :  { %v6021_v14 = vsel %vm6020_vm12, %v7319_v25, %v6017_v55 }
 0x5b1   :  { %v6026_v19 = vsel %vm6023_vm0, %v6025_v49, %v6021_v14  ;;  %v6051_v20 = vsel %vm6050_vm14, %v7321_v16, %v6047_v18 }
 0x5b2   :  { %6181 = vst.msk [vmem:[%s12463_s4 + $0x3d0] sm:$0xff] %vm6058_vm8, %v6026_v19  ;;  %v6056_v39 = vsel %vm6053_vm1, %v6055_v58, %v6051_v20 }
 0x5b3   :  { %6183 = vst.msk [vmem:[%s12463_s4 + $0x3e0] sm:$0xff] %vm6058_vm8, %v6056_v39 }

</bundles_post_ra>
